<compile_context>
chip_gen: v7x
topology: tpu7x:2x2x1
jax: 0.10.0
libtpu: 0.0.40
codegen_flags: <defaults>
</compile_context>

<pallas_src>
import math
from functools import partial

import jax
import jax.numpy as jnp
import numpy as np
from jax import lax
from jax.experimental import pallas as pl
from jax.experimental.pallas import tpu as pltpu


def _round_up(x, m):
    return ((x + m - 1) // m) * m


def _make_encoder_kernel(TB, H, W, K1, C1, C2, C3, compute_dtype):
    """Fused 3-conv kernel for one batch tile of TB images (static shapes)."""
    HW = H * W
    M = TB * HW

    def zero_border(pad_ref, cin):
        # Zero only the 1-pixel halo; the interior is fully overwritten below.
        zrow = jnp.zeros((TB, 1, W + 2, cin), jnp.float32)
        zcol = jnp.zeros((TB, H, 1, cin), jnp.float32)
        pad_ref[:, pl.ds(0, 1), :, :] = zrow           # top halo row (incl. corners)
        pad_ref[:, pl.ds(H + 1, 1), :, :] = zrow       # bottom halo row (incl. corners)
        pad_ref[:, pl.ds(1, H), pl.ds(0, 1), :] = zcol      # left halo column
        pad_ref[:, pl.ds(1, H), pl.ds(W + 1, 1), :] = zcol  # right halo column

    def im2col(pad_ref, cin):
        # Build the (M, 9*cin) im2col matrix in registers (no VMEM scratch round-trip).
        taps = []
        for ky in range(3):
            for kx in range(3):
                t = pad_ref[:, pl.ds(ky, H), pl.ds(kx, W), :]   # (TB, H, W, cin)
                taps.append(t.reshape(M, cin))
        return jnp.concatenate(taps, axis=-1).astype(compute_dtype)

    def kernel(col1_ref, w1_ref, w2_ref, b2_ref, w3_ref,
               bn_scale_ref, bn_shift_ref, o_ref, pad2, pad3):
        # col1_ref:     (TB, HW, K1)  stage-1 im2col from wrapper (bias ones-column folded in)
        # w1_ref:       (K1, C1)
        # w2_ref:       (9*C1, C2),  b2_ref: (1, C2)
        # w3_ref:       (9*C2, C3)
        # bn_*_ref:     (1, C3)      folded BN affine (conv3 bias folded into shift)
        # o_ref:        (TB, H, W, C3)
        # pad2 / pad3:  (TB, H+2, W+2, C1|C2) f32 halo'd activation scratch

        zero_border(pad2, C1)
        zero_border(pad3, C2)

        # ---- stage 1: Conv(C0 -> C1) + ReLU  (bias via ones-column of col1) --------
        col1 = col1_ref[...].reshape(M, K1)
        h1 = jnp.dot(col1, w1_ref[...], preferred_element_type=jnp.float32)
        h1 = jnp.maximum(h1, 0.0)
        pad2[:, pl.ds(1, H), pl.ds(1, W), :] = h1.reshape(TB, H, W, C1)

        # ---- stage 2: Conv(C1 -> C2) + ReLU -----------------------------------------
        col2 = im2col(pad2, C1)                                  # (M, 9*C1)
        h2 = jnp.dot(col2, w2_ref[...], preferred_element_type=jnp.float32)
        h2 = jnp.maximum(h2 + b2_ref[...], 0.0)
        pad3[:, pl.ds(1, H), pl.ds(1, W), :] = h2.reshape(TB, H, W, C2)

        # ---- stage 3: Conv(C2 -> C3) + folded BatchNorm affine ----------------------
        col3 = im2col(pad3, C2)                                  # (M, 9*C2)
        h3 = jnp.dot(col3, w3_ref[...], preferred_element_type=jnp.float32)
        y = h3 * bn_scale_ref[...] + bn_shift_ref[...]
        o_ref[...] = y.reshape(TB, H, W, C3).astype(o_ref.dtype)

    return kernel


def _stage1_cols(x_nhwc, K1):
    """Wrapper-side im2col for the tiny Cin=3 stage-1 input (+ ones column for bias)."""
    N, H, W, C0 = x_nhwc.shape
    xp = jnp.pad(x_nhwc, ((0, 0), (1, 1), (1, 1), (0, 0)))
    taps = [xp[:, ky:ky + H, kx:kx + W, :] for ky in range(3) for kx in range(3)]
    col = jnp.concatenate(taps, axis=-1).reshape(N, H * W, 9 * C0)
    parts = [col, jnp.ones((N, H * W, 1), col.dtype)]
    extra = K1 - 9 * C0 - 1
    if extra:
        parts.append(jnp.zeros((N, H * W, extra), col.dtype))
    return jnp.concatenate(parts, axis=-1)                       # (N, HW, K1)


def simple_encoder_pallas(x_nhwc, params, *, eps=1e-5, batch_tile=None,
                          compute_dtype=jnp.float32):
    """Fused SimpleEncoder forward on NHWC activations via one pallas_call."""
    N, H, W, C0 = x_nhwc.shape
    w1, b1 = params["w1"], params["b1"]
    w2, b2 = params["w2"], params["b2"]
    w3, b3 = params["w3"], params["b3"]
    C1, C2, C3 = w1.shape[-1], w2.shape[-1], w3.shape[-1]
    HW = H * W

    # Batch tile: bigger M per matmul; keep a divisor of N. (W should stay a multiple
    # of 8 so (H,W,C)<->(H*W,C) reshapes are relayout-free.)
    TB = batch_tile if batch_tile is not None else math.gcd(N, 8)
    assert N % TB == 0

    # Stage-1 prep in XLA: im2col + bias ones-column, zero-padded to a sublane-aligned K1.
    K1 = _round_up(9 * C0 + 1, 8)
    col1 = _stage1_cols(x_nhwc, K1).astype(compute_dtype)

    # Flatten HWIO -> (9*Cin, Cout); row order (ky, kx, cin) matches im2col layout.
    w1_parts = [w1.reshape(9 * C0, C1), b1.reshape(1, C1)]
    if K1 - 9 * C0 - 1:
        w1_parts.append(jnp.zeros((K1 - 9 * C0 - 1, C1), w1.dtype))
    w1f = jnp.concatenate(w1_parts, axis=0).astype(compute_dtype)    # (K1, C1)
    w2f = w2.reshape(9 * C1, C2).astype(compute_dtype)
    w3f = w3.reshape(9 * C2, C3).astype(compute_dtype)

    # Fold eval-mode BatchNorm2d (and conv3 bias) into a per-channel scale/shift.
    scale = params["bn_gamma"] * lax.rsqrt(params["bn_var"] + eps)
    shift = params["bn_beta"] + (b3 - params["bn_mean"]) * scale

    kernel = _make_encoder_kernel(TB, H, W, K1, C1, C2, C3, compute_dtype)

    return pl.pallas_call(
        kernel,
        out_shape=jax.ShapeDtypeStruct((N, H, W, C3), x_nhwc.dtype),
        grid_spec=pltpu.PrefetchScalarGridSpec(
            num_scalar_prefetch=0,
            grid=(N // TB,),
            in_specs=[
                pl.BlockSpec((TB, HW, K1), lambda b: (b, 0, 0)),     # stage-1 im2col
                pl.BlockSpec((K1, C1), lambda b: (0, 0)),            # w1 (+bias row)
                pl.BlockSpec((9 * C1, C2), lambda b: (0, 0)),        # w2 (flat)
                pl.BlockSpec((1, C2), lambda b: (0, 0)),             # b2
                pl.BlockSpec((9 * C2, C3), lambda b: (0, 0)),        # w3 (flat)
                pl.BlockSpec((1, C3), lambda b: (0, 0)),             # bn scale
                pl.BlockSpec((1, C3), lambda b: (0, 0)),             # bn shift (+b3)
            ],
            out_specs=pl.BlockSpec((TB, H, W, C3), lambda b: (b, 0, 0, 0)),
            scratch_shapes=[
                pltpu.VMEM((TB, H + 2, W + 2, C1), jnp.float32),     # halo'd act 1
                pltpu.VMEM((TB, H + 2, W + 2, C2), jnp.float32),     # halo'd act 2
            ],
        ),
        compiler_params=pltpu.CompilerParams(
            dimension_semantics=("parallel",),
            vmem_limit_bytes=48 * 1024 * 1024),
    )(col1, w1f, w2f, b2.reshape(1, C2).astype(jnp.float32), w3f,
      scale.reshape(1, C3), shift.reshape(1, C3))


@partial(jax.jit, static_argnames=("compute_dtype",))
def simple_encoder_forward(x_nchw, params, compute_dtype=jnp.float32):
    """Equivalent of SimpleEncoder.forward (NCHW in / NCHW out)."""
    x = jnp.transpose(x_nchw, (0, 2, 3, 1))              # NCHW -> NHWC (TPU-native)
    y = simple_encoder_pallas(x, params, compute_dtype=compute_dtype)
    return jnp.transpose(y, (0, 3, 1, 2))                # NHWC -> NCHW


def init_simple_encoder_params(key, in_c, base):
    """Deterministic synthetic parameters (shapes match the nn.Sequential layers)."""
    C1, C2, C3 = base, 2 * base, 4 * base
    ks = jax.random.split(key, 10)
    return dict(
        w1=jax.random.normal(ks[0], (3, 3, in_c, C1), jnp.float32) * 0.1,   # HWIO
        b1=jax.random.normal(ks[1], (C1,), jnp.float32) * 0.1,
        w2=jax.random.normal(ks[2], (3, 3, C1, C2), jnp.float32) * 0.1,
        b2=jax.random.normal(ks[3], (C2,), jnp.float32) * 0.1,
        w3=jax.random.normal(ks[4], (3, 3, C2, C3), jnp.float32) * 0.1,
        b3=jax.random.normal(ks[5], (C3,), jnp.float32) * 0.1,
        bn_gamma=1.0 + 0.1 * jax.random.normal(ks[6], (C3,), jnp.float32),
        bn_beta=0.1 * jax.random.normal(ks[7], (C3,), jnp.float32),
        bn_mean=0.1 * jax.random.normal(ks[8], (C3,), jnp.float32),
        bn_var=jax.random.uniform(ks[9], (C3,), jnp.float32, 0.5, 1.5),
    )


def reference_forward(x_nchw, params, eps=1e-5):
    """Pure-JAX reference (lax conv + eval-mode BN) for correctness checking."""
    x = jnp.transpose(x_nchw, (0, 2, 3, 1))
    dn = ("NHWC", "HWIO", "NHWC")
    h = lax.conv_general_dilated(x, params["w1"], (1, 1), "SAME",
                                 dimension_numbers=dn) + params["b1"]
    h = jnp.maximum(h, 0.0)
    h = lax.conv_general_dilated(h, params["w2"], (1, 1), "SAME",
                                 dimension_numbers=dn) + params["b2"]
    h = jnp.maximum(h, 0.0)
    h = lax.conv_general_dilated(h, params["w3"], (1, 1), "SAME",
                                 dimension_numbers=dn) + params["b3"]
    h = ((h - params["bn_mean"]) * lax.rsqrt(params["bn_var"] + eps)
         * params["bn_gamma"] + params["bn_beta"])
    return jnp.transpose(h, (0, 3, 1, 2))


if __name__ == "__main__":
    key = jax.random.PRNGKey(0)
    kx, kp = jax.random.split(key)

    # N=2, in_channels=3, base_channels=32, 16x16 spatial (final channel dim = 128
    # -> lane-dense output store; W multiple of 8 -> relayout-free reshapes).
    N, in_c, base, H, W = 2, 3, 32, 16, 16
    x = jax.random.normal(kx, (N, in_c, H, W), jnp.float32)
    params = init_simple_encoder_params(kp, in_c, base)

    ref = jax.block_until_ready(reference_forward(x, params))

    # f32 MXU operands: tight tolerance.
    out = jax.block_until_ready(simple_encoder_forward(x, params))
    np.testing.assert_allclose(np.asarray(out), np.asarray(ref),
                               rtol=1e-4, atol=1e-4)

    # bf16 MXU operands / f32 accumulation (v6e/v7x fast path): loose tolerance.
    out_bf16 = jax.block_until_ready(
        simple_encoder_forward(x, params, compute_dtype=jnp.bfloat16))
    np.testing.assert_allclose(np.asarray(out_bf16), np.asarray(ref),
                               rtol=1e-1, atol=2e-1)

    print("KERNEL_OK")
</pallas_src>

<mosaic_0001>
module attributes {stable_mosaic.version = 11 : i64} {
  func.func @kernel(%arg0: i32, %arg1: memref<2x256x32xf32, #tpu.memory_space<vmem>>, %arg2: memref<32x32xf32, #tpu.memory_space<vmem>>, %arg3: memref<288x64xf32, #tpu.memory_space<vmem>>, %arg4: memref<1x64xf32, #tpu.memory_space<vmem>>, %arg5: memref<576x128xf32, #tpu.memory_space<vmem>>, %arg6: memref<1x128xf32, #tpu.memory_space<vmem>>, %arg7: memref<1x128xf32, #tpu.memory_space<vmem>>, %arg8: memref<2x16x16x128xf32, #tpu.memory_space<vmem>>, %arg9: memref<2x18x18x32xf32, #tpu.memory_space<vmem>>, %arg10: memref<2x18x18x64xf32, #tpu.memory_space<vmem>>) attributes {dimension_semantics = [#tpu.dimension_semantics<parallel>], iteration_bounds = array<i64: 1>, scalar_prefetch = 0 : i64, scratch_operands = 2 : i64, tpu.core_type = #tpu.core_type<tc>, window_params = [{transform_indices = @transform_0, window_bounds = array<i64: 2, 256, 32>}, {pipeline_mode = #tpu.pipeline_mode<synchronous>, transform_indices = @transform_1, window_bounds = array<i64: 32, 32>}, {pipeline_mode = #tpu.pipeline_mode<synchronous>, transform_indices = @transform_2, window_bounds = array<i64: 288, 64>}, {pipeline_mode = #tpu.pipeline_mode<synchronous>, transform_indices = @transform_3, window_bounds = array<i64: 1, 64>}, {pipeline_mode = #tpu.pipeline_mode<synchronous>, transform_indices = @transform_4, window_bounds = array<i64: 576, 128>}, {pipeline_mode = #tpu.pipeline_mode<synchronous>, transform_indices = @transform_5, window_bounds = array<i64: 1, 128>}, {pipeline_mode = #tpu.pipeline_mode<synchronous>, transform_indices = @transform_6, window_bounds = array<i64: 1, 128>}, {transform_indices = @transform_7, window_bounds = array<i64: 2, 16, 16, 128>}]} {
    %cst = arith.constant 0.000000e+00 : f32
    %0 = vector.broadcast %cst : f32 to vector<2x1x18x32xf32>
    %cst_0 = arith.constant 0.000000e+00 : f32
    %1 = vector.broadcast %cst_0 : f32 to vector<2x16x1x32xf32>
    %c0 = arith.constant 0 : index
    %c0_1 = arith.constant 0 : index
    %c0_2 = arith.constant 0 : index
    %c0_3 = arith.constant 0 : index
    %2 = vector.load %arg9[%c0, %c0_1, %c0_2, %c0_3] : memref<2x18x18x32xf32, #tpu.memory_space<vmem>>, vector<2x1x18x32xf32>
    tpu.vector_store %arg9[%c0, %c0_1, %c0_2, %c0_3], %0 {strides = array<i32>} : memref<2x18x18x32xf32, #tpu.memory_space<vmem>>, vector<2x1x18x32xf32>,
    %c0_4 = arith.constant 0 : index
    %c17 = arith.constant 17 : index
    %c0_5 = arith.constant 0 : index
    %c0_6 = arith.constant 0 : index
    %3 = vector.load %arg9[%c0_4, %c17, %c0_5, %c0_6] : memref<2x18x18x32xf32, #tpu.memory_space<vmem>>, vector<2x1x18x32xf32>
    tpu.vector_store %arg9[%c0_4, %c17, %c0_5, %c0_6], %0 {strides = array<i32>} : memref<2x18x18x32xf32, #tpu.memory_space<vmem>>, vector<2x1x18x32xf32>,
    %c0_7 = arith.constant 0 : index
    %c1 = arith.constant 1 : index
    %c0_8 = arith.constant 0 : index
    %c0_9 = arith.constant 0 : index
    %4 = vector.load %arg9[%c0_7, %c1, %c0_8, %c0_9] : memref<2x18x18x32xf32, #tpu.memory_space<vmem>>, vector<2x16x1x32xf32>
    tpu.vector_store %arg9[%c0_7, %c1, %c0_8, %c0_9], %1 {strides = array<i32>} : memref<2x18x18x32xf32, #tpu.memory_space<vmem>>, vector<2x16x1x32xf32>,
    %c0_10 = arith.constant 0 : index
    %c1_11 = arith.constant 1 : index
    %c17_12 = arith.constant 17 : index
    %c0_13 = arith.constant 0 : index
    %5 = vector.load %arg9[%c0_10, %c1_11, %c17_12, %c0_13] : memref<2x18x18x32xf32, #tpu.memory_space<vmem>>, vector<2x16x1x32xf32>
    tpu.vector_store %arg9[%c0_10, %c1_11, %c17_12, %c0_13], %1 {strides = array<i32>} : memref<2x18x18x32xf32, #tpu.memory_space<vmem>>, vector<2x16x1x32xf32>,
    %cst_14 = arith.constant 0.000000e+00 : f32
    %6 = vector.broadcast %cst_14 : f32 to vector<2x1x18x64xf32>
    %cst_15 = arith.constant 0.000000e+00 : f32
    %7 = vector.broadcast %cst_15 : f32 to vector<2x16x1x64xf32>
    %c0_16 = arith.constant 0 : index
    %c0_17 = arith.constant 0 : index
    %c0_18 = arith.constant 0 : index
    %c0_19 = arith.constant 0 : index
    %8 = vector.load %arg10[%c0_16, %c0_17, %c0_18, %c0_19] : memref<2x18x18x64xf32, #tpu.memory_space<vmem>>, vector<2x1x18x64xf32>
    tpu.vector_store %arg10[%c0_16, %c0_17, %c0_18, %c0_19], %6 {strides = array<i32>} : memref<2x18x18x64xf32, #tpu.memory_space<vmem>>, vector<2x1x18x64xf32>,
    %c0_20 = arith.constant 0 : index
    %c17_21 = arith.constant 17 : index
    %c0_22 = arith.constant 0 : index
    %c0_23 = arith.constant 0 : index
    %9 = vector.load %arg10[%c0_20, %c17_21, %c0_22, %c0_23] : memref<2x18x18x64xf32, #tpu.memory_space<vmem>>, vector<2x1x18x64xf32>
    tpu.vector_store %arg10[%c0_20, %c17_21, %c0_22, %c0_23], %6 {strides = array<i32>} : memref<2x18x18x64xf32, #tpu.memory_space<vmem>>, vector<2x1x18x64xf32>,
    %c0_24 = arith.constant 0 : index
    %c1_25 = arith.constant 1 : index
    %c0_26 = arith.constant 0 : index
    %c0_27 = arith.constant 0 : index
    %10 = vector.load %arg10[%c0_24, %c1_25, %c0_26, %c0_27] : memref<2x18x18x64xf32, #tpu.memory_space<vmem>>, vector<2x16x1x64xf32>
    tpu.vector_store %arg10[%c0_24, %c1_25, %c0_26, %c0_27], %7 {strides = array<i32>} : memref<2x18x18x64xf32, #tpu.memory_space<vmem>>, vector<2x16x1x64xf32>,
    %c0_28 = arith.constant 0 : index
    %c1_29 = arith.constant 1 : index
    %c17_30 = arith.constant 17 : index
    %c0_31 = arith.constant 0 : index
    %11 = vector.load %arg10[%c0_28, %c1_29, %c17_30, %c0_31] : memref<2x18x18x64xf32, #tpu.memory_space<vmem>>, vector<2x16x1x64xf32>
    tpu.vector_store %arg10[%c0_28, %c1_29, %c17_30, %c0_31], %7 {strides = array<i32>} : memref<2x18x18x64xf32, #tpu.memory_space<vmem>>, vector<2x16x1x64xf32>,
    %c0_32 = arith.constant 0 : index
    %c0_33 = arith.constant 0 : index
    %c0_34 = arith.constant 0 : index
    %12 = vector.load %arg1[%c0_32, %c0_33, %c0_34] : memref<2x256x32xf32, #tpu.memory_space<vmem>>, vector<2x256x32xf32>
    %13 = vector.shape_cast %12 : vector<2x256x32xf32> to vector<512x32xf32>
    %c0_35 = arith.constant 0 : index
    %c0_36 = arith.constant 0 : index
    %14 = vector.load %arg2[%c0_35, %c0_36] : memref<32x32xf32, #tpu.memory_space<vmem>>, vector<32x32xf32>
    %cst_37 = arith.constant dense<0.000000e+00> : vector<512x32xf32>
    %15 = tpu.matmul %13, %14, %cst_37 {dimension_numbers = #tpu.dot_dimension_numbers<[1], [0], [0], [1], [0, 0, 1, 1], [], []>} : vector<512x32xf32>, vector<32x32xf32>, vector<512x32xf32> -> vector<512x32xf32>
    %cst_38 = arith.constant 0.000000e+00 : f32
    %16 = vector.broadcast %cst_38 : f32 to vector<512x32xf32>
    %17 = arith.maximumf %15, %16 : vector<512x32xf32>
    %18 = vector.shape_cast %17 : vector<512x32xf32> to vector<2x16x16x32xf32>
    %c0_39 = arith.constant 0 : index
    %c1_40 = arith.constant 1 : index
    %c1_41 = arith.constant 1 : index
    %c0_42 = arith.constant 0 : index
    %19 = vector.load %arg9[%c0_39, %c1_40, %c1_41, %c0_42] : memref<2x18x18x32xf32, #tpu.memory_space<vmem>>, vector<2x16x16x32xf32>
    tpu.vector_store %arg9[%c0_39, %c1_40, %c1_41, %c0_42], %18 {strides = array<i32>} : memref<2x18x18x32xf32, #tpu.memory_space<vmem>>, vector<2x16x16x32xf32>,
    %c0_43 = arith.constant 0 : index
    %c0_44 = arith.constant 0 : index
    %c0_45 = arith.constant 0 : index
    %c0_46 = arith.constant 0 : index
    %20 = vector.load %arg9[%c0_43, %c0_44, %c0_45, %c0_46] : memref<2x18x18x32xf32, #tpu.memory_space<vmem>>, vector<2x16x16x32xf32>
    %21 = vector.shape_cast %20 : vector<2x16x16x32xf32> to vector<512x32xf32>
    %c0_47 = arith.constant 0 : index
    %c0_48 = arith.constant 0 : index
    %c1_49 = arith.constant 1 : index
    %c0_50 = arith.constant 0 : index
    %22 = vector.load %arg9[%c0_47, %c0_48, %c1_49, %c0_50] : memref<2x18x18x32xf32, #tpu.memory_space<vmem>>, vector<2x16x16x32xf32>
    %23 = vector.shape_cast %22 : vector<2x16x16x32xf32> to vector<512x32xf32>
    %c0_51 = arith.constant 0 : index
    %c0_52 = arith.constant 0 : index
    %c2 = arith.constant 2 : index
    %c0_53 = arith.constant 0 : index
    %24 = vector.load %arg9[%c0_51, %c0_52, %c2, %c0_53] : memref<2x18x18x32xf32, #tpu.memory_space<vmem>>, vector<2x16x16x32xf32>
    %25 = vector.shape_cast %24 : vector<2x16x16x32xf32> to vector<512x32xf32>
    %c0_54 = arith.constant 0 : index
    %c1_55 = arith.constant 1 : index
    %c0_56 = arith.constant 0 : index
    %c0_57 = arith.constant 0 : index
    %26 = vector.load %arg9[%c0_54, %c1_55, %c0_56, %c0_57] : memref<2x18x18x32xf32, #tpu.memory_space<vmem>>, vector<2x16x16x32xf32>
    %27 = vector.shape_cast %26 : vector<2x16x16x32xf32> to vector<512x32xf32>
    %c0_58 = arith.constant 0 : index
    %c1_59 = arith.constant 1 : index
    %c1_60 = arith.constant 1 : index
    %c0_61 = arith.constant 0 : index
    %28 = vector.load %arg9[%c0_58, %c1_59, %c1_60, %c0_61] : memref<2x18x18x32xf32, #tpu.memory_space<vmem>>, vector<2x16x16x32xf32>
    %29 = vector.shape_cast %28 : vector<2x16x16x32xf32> to vector<512x32xf32>
    %c0_62 = arith.constant 0 : index
    %c1_63 = arith.constant 1 : index
    %c2_64 = arith.constant 2 : index
    %c0_65 = arith.constant 0 : index
    %30 = vector.load %arg9[%c0_62, %c1_63, %c2_64, %c0_65] : memref<2x18x18x32xf32, #tpu.memory_space<vmem>>, vector<2x16x16x32xf32>
    %31 = vector.shape_cast %30 : vector<2x16x16x32xf32> to vector<512x32xf32>
    %c0_66 = arith.constant 0 : index
    %c2_67 = arith.constant 2 : index
    %c0_68 = arith.constant 0 : index
    %c0_69 = arith.constant 0 : index
    %32 = vector.load %arg9[%c0_66, %c2_67, %c0_68, %c0_69] : memref<2x18x18x32xf32, #tpu.memory_space<vmem>>, vector<2x16x16x32xf32>
    %33 = vector.shape_cast %32 : vector<2x16x16x32xf32> to vector<512x32xf32>
    %c0_70 = arith.constant 0 : index
    %c2_71 = arith.constant 2 : index
    %c1_72 = arith.constant 1 : index
    %c0_73 = arith.constant 0 : index
    %34 = vector.load %arg9[%c0_70, %c2_71, %c1_72, %c0_73] : memref<2x18x18x32xf32, #tpu.memory_space<vmem>>, vector<2x16x16x32xf32>
    %35 = vector.shape_cast %34 : vector<2x16x16x32xf32> to vector<512x32xf32>
    %c0_74 = arith.constant 0 : index
    %c2_75 = arith.constant 2 : index
    %c2_76 = arith.constant 2 : index
    %c0_77 = arith.constant 0 : index
    %36 = vector.load %arg9[%c0_74, %c2_75, %c2_76, %c0_77] : memref<2x18x18x32xf32, #tpu.memory_space<vmem>>, vector<2x16x16x32xf32>
    %37 = vector.shape_cast %36 : vector<2x16x16x32xf32> to vector<512x32xf32>
    %38 = tpu.concatenate %21, %23, %25, %27, %29, %31, %33, %35, %37 in 1 : vector<512x32xf32>, vector<512x32xf32>, vector<512x32xf32>, vector<512x32xf32>, vector<512x32xf32>, vector<512x32xf32>, vector<512x32xf32>, vector<512x32xf32>, vector<512x32xf32> -> vector<512x288xf32>
    %c0_78 = arith.constant 0 : index
    %c0_79 = arith.constant 0 : index
    %39 = vector.load %arg3[%c0_78, %c0_79] : memref<288x64xf32, #tpu.memory_space<vmem>>, vector<288x64xf32>
    %cst_80 = arith.constant dense<0.000000e+00> : vector<512x64xf32>
    %40 = tpu.matmul %38, %39, %cst_80 {dimension_numbers = #tpu.dot_dimension_numbers<[1], [0], [0], [1], [0, 0, 1, 1], [], []>} : vector<512x288xf32>, vector<288x64xf32>, vector<512x64xf32> -> vector<512x64xf32>
    %c0_81 = arith.constant 0 : index
    %c0_82 = arith.constant 0 : index
    %41 = vector.load %arg4[%c0_81, %c0_82] : memref<1x64xf32, #tpu.memory_space<vmem>>, vector<1x64xf32>
    %42 = vector.broadcast %41 : vector<1x64xf32> to vector<512x64xf32>
    %43 = arith.addf %40, %42 : vector<512x64xf32>
    %cst_83 = arith.constant 0.000000e+00 : f32
    %44 = vector.broadcast %cst_83 : f32 to vector<512x64xf32>
    %45 = arith.maximumf %43, %44 : vector<512x64xf32>
    %46 = vector.shape_cast %45 : vector<512x64xf32> to vector<2x16x16x64xf32>
    %c0_84 = arith.constant 0 : index
    %c1_85 = arith.constant 1 : index
    %c1_86 = arith.constant 1 : index
    %c0_87 = arith.constant 0 : index
    %47 = vector.load %arg10[%c0_84, %c1_85, %c1_86, %c0_87] : memref<2x18x18x64xf32, #tpu.memory_space<vmem>>, vector<2x16x16x64xf32>
    tpu.vector_store %arg10[%c0_84, %c1_85, %c1_86, %c0_87], %46 {strides = array<i32>} : memref<2x18x18x64xf32, #tpu.memory_space<vmem>>, vector<2x16x16x64xf32>,
    %c0_88 = arith.constant 0 : index
    %c0_89 = arith.constant 0 : index
    %c0_90 = arith.constant 0 : index
    %c0_91 = arith.constant 0 : index
    %48 = vector.load %arg10[%c0_88, %c0_89, %c0_90, %c0_91] : memref<2x18x18x64xf32, #tpu.memory_space<vmem>>, vector<2x16x16x64xf32>
    %49 = vector.shape_cast %48 : vector<2x16x16x64xf32> to vector<512x64xf32>
    %c0_92 = arith.constant 0 : index
    %c0_93 = arith.constant 0 : index
    %c1_94 = arith.constant 1 : index
    %c0_95 = arith.constant 0 : index
    %50 = vector.load %arg10[%c0_92, %c0_93, %c1_94, %c0_95] : memref<2x18x18x64xf32, #tpu.memory_space<vmem>>, vector<2x16x16x64xf32>
    %51 = vector.shape_cast %50 : vector<2x16x16x64xf32> to vector<512x64xf32>
    %c0_96 = arith.constant 0 : index
    %c0_97 = arith.constant 0 : index
    %c2_98 = arith.constant 2 : index
    %c0_99 = arith.constant 0 : index
    %52 = vector.load %arg10[%c0_96, %c0_97, %c2_98, %c0_99] : memref<2x18x18x64xf32, #tpu.memory_space<vmem>>, vector<2x16x16x64xf32>
    %53 = vector.shape_cast %52 : vector<2x16x16x64xf32> to vector<512x64xf32>
    %c0_100 = arith.constant 0 : index
    %c1_101 = arith.constant 1 : index
    %c0_102 = arith.constant 0 : index
    %c0_103 = arith.constant 0 : index
    %54 = vector.load %arg10[%c0_100, %c1_101, %c0_102, %c0_103] : memref<2x18x18x64xf32, #tpu.memory_space<vmem>>, vector<2x16x16x64xf32>
    %55 = vector.shape_cast %54 : vector<2x16x16x64xf32> to vector<512x64xf32>
    %c0_104 = arith.constant 0 : index
    %c1_105 = arith.constant 1 : index
    %c1_106 = arith.constant 1 : index
    %c0_107 = arith.constant 0 : index
    %56 = vector.load %arg10[%c0_104, %c1_105, %c1_106, %c0_107] : memref<2x18x18x64xf32, #tpu.memory_space<vmem>>, vector<2x16x16x64xf32>
    %57 = vector.shape_cast %56 : vector<2x16x16x64xf32> to vector<512x64xf32>
    %c0_108 = arith.constant 0 : index
    %c1_109 = arith.constant 1 : index
    %c2_110 = arith.constant 2 : index
    %c0_111 = arith.constant 0 : index
    %58 = vector.load %arg10[%c0_108, %c1_109, %c2_110, %c0_111] : memref<2x18x18x64xf32, #tpu.memory_space<vmem>>, vector<2x16x16x64xf32>
    %59 = vector.shape_cast %58 : vector<2x16x16x64xf32> to vector<512x64xf32>
    %c0_112 = arith.constant 0 : index
    %c2_113 = arith.constant 2 : index
    %c0_114 = arith.constant 0 : index
    %c0_115 = arith.constant 0 : index
    %60 = vector.load %arg10[%c0_112, %c2_113, %c0_114, %c0_115] : memref<2x18x18x64xf32, #tpu.memory_space<vmem>>, vector<2x16x16x64xf32>
    %61 = vector.shape_cast %60 : vector<2x16x16x64xf32> to vector<512x64xf32>
    %c0_116 = arith.constant 0 : index
    %c2_117 = arith.constant 2 : index
    %c1_118 = arith.constant 1 : index
    %c0_119 = arith.constant 0 : index
    %62 = vector.load %arg10[%c0_116, %c2_117, %c1_118, %c0_119] : memref<2x18x18x64xf32, #tpu.memory_space<vmem>>, vector<2x16x16x64xf32>
    %63 = vector.shape_cast %62 : vector<2x16x16x64xf32> to vector<512x64xf32>
    %c0_120 = arith.constant 0 : index
    %c2_121 = arith.constant 2 : index
    %c2_122 = arith.constant 2 : index
    %c0_123 = arith.constant 0 : index
    %64 = vector.load %arg10[%c0_120, %c2_121, %c2_122, %c0_123] : memref<2x18x18x64xf32, #tpu.memory_space<vmem>>, vector<2x16x16x64xf32>
    %65 = vector.shape_cast %64 : vector<2x16x16x64xf32> to vector<512x64xf32>
    %66 = tpu.concatenate %49, %51, %53, %55, %57, %59, %61, %63, %65 in 1 : vector<512x64xf32>, vector<512x64xf32>, vector<512x64xf32>, vector<512x64xf32>, vector<512x64xf32>, vector<512x64xf32>, vector<512x64xf32>, vector<512x64xf32>, vector<512x64xf32> -> vector<512x576xf32>
    %c0_124 = arith.constant 0 : index
    %c0_125 = arith.constant 0 : index
    %67 = vector.load %arg5[%c0_124, %c0_125] : memref<576x128xf32, #tpu.memory_space<vmem>>, vector<576x128xf32>
    %cst_126 = arith.constant dense<0.000000e+00> : vector<512x128xf32>
    %68 = tpu.matmul %66, %67, %cst_126 {dimension_numbers = #tpu.dot_dimension_numbers<[1], [0], [0], [1], [0, 0, 1, 1], [], []>} : vector<512x576xf32>, vector<576x128xf32>, vector<512x128xf32> -> vector<512x128xf32>
    %c0_127 = arith.constant 0 : index
    %c0_128 = arith.constant 0 : index
    %69 = vector.load %arg6[%c0_127, %c0_128] : memref<1x128xf32, #tpu.memory_space<vmem>>, vector<1x128xf32>
    %70 = vector.broadcast %69 : vector<1x128xf32> to vector<512x128xf32>
    %71 = arith.mulf %68, %70 : vector<512x128xf32>
    %c0_129 = arith.constant 0 : index
    %c0_130 = arith.constant 0 : index
    %72 = vector.load %arg7[%c0_129, %c0_130] : memref<1x128xf32, #tpu.memory_space<vmem>>, vector<1x128xf32>
    %73 = vector.broadcast %72 : vector<1x128xf32> to vector<512x128xf32>
    %74 = arith.addf %71, %73 : vector<512x128xf32>
    %75 = vector.shape_cast %74 : vector<512x128xf32> to vector<2x16x16x128xf32>
    %c0_131 = arith.constant 0 : index
    %c0_132 = arith.constant 0 : index
    %c0_133 = arith.constant 0 : index
    %c0_134 = arith.constant 0 : index
    %76 = vector.load %arg8[%c0_131, %c0_132, %c0_133, %c0_134] : memref<2x16x16x128xf32, #tpu.memory_space<vmem>>, vector<2x16x16x128xf32>
    tpu.vector_store %arg8[%c0_131, %c0_132, %c0_133, %c0_134], %75 {strides = array<i32>} : memref<2x16x16x128xf32, #tpu.memory_space<vmem>>, vector<2x16x16x128xf32>,
    return
  }
  func.func @transform_0(%arg0: i32) -> (i32, i32, i32) {
    %c0_i32 = arith.constant 0 : i32
    %c0_i32_0 = arith.constant 0 : i32
    %c0_i32_1 = arith.constant 0 : i32
    return %arg0, %c0_i32, %c0_i32_0 : i32, i32, i32
  }
  func.func @transform_1(%arg0: i32) -> (i32, i32) {
    %c0_i32 = arith.constant 0 : i32
    %c0_i32_0 = arith.constant 0 : i32
    %c0_i32_1 = arith.constant 0 : i32
    return %c0_i32, %c0_i32_0 : i32, i32
  }
  func.func @transform_2(%arg0: i32) -> (i32, i32) {
    %c0_i32 = arith.constant 0 : i32
    %c0_i32_0 = arith.constant 0 : i32
    %c0_i32_1 = arith.constant 0 : i32
    return %c0_i32, %c0_i32_0 : i32, i32
  }
  func.func @transform_3(%arg0: i32) -> (i32, i32) {
    %c0_i32 = arith.constant 0 : i32
    %c0_i32_0 = arith.constant 0 : i32
    %c0_i32_1 = arith.constant 0 : i32
    return %c0_i32, %c0_i32_0 : i32, i32
  }
  func.func @transform_4(%arg0: i32) -> (i32, i32) {
    %c0_i32 = arith.constant 0 : i32
    %c0_i32_0 = arith.constant 0 : i32
    %c0_i32_1 = arith.constant 0 : i32
    return %c0_i32, %c0_i32_0 : i32, i32
  }
  func.func @transform_5(%arg0: i32) -> (i32, i32) {
    %c0_i32 = arith.constant 0 : i32
    %c0_i32_0 = arith.constant 0 : i32
    %c0_i32_1 = arith.constant 0 : i32
    return %c0_i32, %c0_i32_0 : i32, i32
  }
  func.func @transform_6(%arg0: i32) -> (i32, i32) {
    %c0_i32 = arith.constant 0 : i32
    %c0_i32_0 = arith.constant 0 : i32
    %c0_i32_1 = arith.constant 0 : i32
    return %c0_i32, %c0_i32_0 : i32, i32
  }
  func.func @transform_7(%arg0: i32) -> (i32, i32, i32, i32) {
    %c0_i32 = arith.constant 0 : i32
    %c0_i32_0 = arith.constant 0 : i32
    %c0_i32_1 = arith.constant 0 : i32
    %c0_i32_2 = arith.constant 0 : i32
    return %arg0, %c0_i32, %c0_i32_0, %c0_i32_1 : i32, i32, i32, i32
  }
}

</mosaic_0001>

<bundles_post_ra>
// kernel: simple_encoder_forward.1
= control target key start
LH: loop header
LB: loop body
LE: loop exit
PB: predicated region body
PF: predicated region fallthrough
CT: control target
= control target key end

     0   :  { %vm27_vm0 = vcmask 261120   ;;  %vm30_vm1 = vcmask 254976   ;;  %v10744_v6 = vmov 0.0   ;;  %s14954_s0 = inlined_call_operand.vmem [shape: f32[2,256,32], index: 0, kind: input, shape index: {}]   ;;  %s14955_s1 = inlined_call_operand.vmem [shape: f32[32,32], index: 1, kind: input, shape index: {}]   ;;  %s14956_s2 = inlined_call_operand.vmem [shape: f32[288,64], index: 2, kind: input, shape index: {}]   ;;  %s14957_s3 = inlined_call_operand.vmem [shape: f32[1,64], index: 3, kind: input, shape index: {}]   ;;  %s14958_s4 = inlined_call_operand.vmem [shape: f32[576,128], index: 4, kind: input, shape index: {}]   ;;  %s14959_s5 = inlined_call_operand.vmem [shape: f32[1,128], index: 5, kind: input, shape index: {}]   ;;  %s14960_s6 = inlined_call_operand.vmem [shape: f32[1,128], index: 6, kind: input, shape index: {}]   ;;  %s14961_s7 = inlined_call_operand.hbm [shape: f32[2,16,16,128], index: 7, kind: output, shape index: {}]  }
   0x1   :  { %v253_v0 = vld [vmem:[%s14955_s1] sm:$0xff]  ;;  %v254_v1 = vld [vmem:[%s14955_s1 + $0x8] sm:$0xff]  ;;  %v255_v2 = vld [vmem:[%s14955_s1 + $0x10] sm:$0xff]  ;;  %28 = vst.msk [vmem:[#allocation2] sm:$0xff] %vm27_vm0, %v10744_v6 }
   0x2   :  { %v8814_v3 = vpack.c.bf16 %v254_v1, %v253_v0  ;;  %v256_v4 = vld [vmem:[%s14955_s1 + $0x18] sm:$0xff]  ;;  %v189_v5 = vld [vmem:[%s14954_s0] sm:$0xff]  ;;  %29 = vst.msk [vmem:[#allocation2 + $0x8] sm:$0xff] %vm27_vm0, %v10744_v6  ;;  %32 = vst.msk [vmem:[#allocation2 + $0x1b0] sm:$0xff] %vm27_vm0, %v10744_v6 }
   0x3   :  { %31 = vst.msk [vmem:[#allocation2 + $0x10] sm:$0x3] %vm30_vm1, %v10744_v6  ;;  %34 = vst.msk [vmem:[#allocation2 + $0x1c0] sm:$0x3] %vm30_vm1, %v10744_v6  ;;  %v8818_v7 = vpack.c.bf16 %v256_v4, %v255_v2  ;;  %8502 = vmatprep.mubr.msk.f32.mxu0 %vm27_vm0, %v189_v5  ;;  %v190_v8 = vld [vmem:[%s14954_s0 + $0x8] sm:$0xff]  ;;  %v191_v9 = vld [vmem:[%s14954_s0 + $0x10] sm:$0xff] }
   0x4   :  { %33 = vst.msk [vmem:[#allocation2 + $0x1b8] sm:$0xff] %vm27_vm0, %v10744_v6  ;;  %36 = vst.msk [vmem:[#allocation2 + $0x198] sm:$0xff] %vm27_vm0, %v10744_v6  ;;  %8815 = vmatprep.subr.bf16.mxu0 %v8814_v3  ;;  %v192_v10 = vld [vmem:[%s14954_s0 + $0x18] sm:$0xff]  ;;  %v193_v11 = vld [vmem:[%s14954_s0 + $0x20] sm:$0xff] }
   0x5   :  { %37 = vst.msk [vmem:[#allocation2 + $0x1a0] sm:$0xff] %vm27_vm0, %v10744_v6  ;;  %39 = vst.msk [vmem:[#allocation2 + $0x348] sm:$0xff] %vm27_vm0, %v10744_v6  ;;  %8817 = vmatpush3.bf16.msra.mxu0 %v8814_v3  ;;  %v194_v12 = vld [vmem:[%s14954_s0 + $0x28] sm:$0xff]  ;;  %v195_v13 = vld [vmem:[%s14954_s0 + $0x30] sm:$0xff] }
   0x6   :  { %38 = vst.msk [vmem:[#allocation2 + $0x1a8] sm:$0x3] %vm30_vm1, %v10744_v6  ;;  %41 = vst.msk [vmem:[#allocation2 + $0x358] sm:$0x3] %vm30_vm1, %v10744_v6  ;;  %8819 = vmatprep.subr.bf16.mxu0 %v8818_v7  ;;  %v196_v16 = vld [vmem:[%s14954_s0 + $0x38] sm:$0xff]  ;;  %v197_v19 = vld [vmem:[%s14954_s0 + $0x40] sm:$0xff] }
   0x7   :  { %40 = vst.msk [vmem:[#allocation2 + $0x350] sm:$0xff] %vm27_vm0, %v10744_v6 }
   0x9   :  { %8821 = vmatpush3.bf16.msra.mxu0 %v8818_v7  ;;  %v1026_v14 = vld [vmem:[#allocation2 + $0x1] sm:$0xff] }
   0xa   :  { %v1027_v15 = vld [vmem:[#allocation2 + $0x9] sm:$0xff] }
   0xb   :  { %v9117_v17 = vpack.i.bf16 %v1027_v15, %v1026_v14  ;;  %v1058_v18 = vld [vmem:[#allocation2 + $0x1b1] sm:$0xff]  ;;  %v1059_v20 = vld [vmem:[#allocation2 + $0x1b9] sm:$0xff] }
   0xc   :  { %8503 = vmatmul.mubr.msk.f32.vlgmr.msra.gmra.mrb[0].mxu0 %vm27_vm0, %v190_v8 }
   0xd   :  { %8505 = vmatprep.mubr.msk.f32.mxu0 %vm27_vm0, %v191_v9 }
  0x10   :  { %8506 = vmatmul.mubr.msk.f32.gmra.mrb[2].mxu0 %vm27_vm0, %v192_v10 }
  0x11   :  { %8508 = vmatprep.mubr.msk.f32.mxu0 %vm27_vm0, %v193_v11 }
  0x14   :  { %8509 = vmatmul.mubr.msk.f32.gmra.mrb[4].mxu0 %vm27_vm0, %v194_v12 }
  0x15   :  { %8511 = vmatprep.mubr.msk.f32.mxu0 %vm27_vm0, %v195_v13 }
  0x16   :  { %12 = vsyncpa [#allocation5], 0  ;;  %s10745_s26 = smov 32   ;;  %v9122_v21 = vpack.i.bf16 %v1059_v20, %v1058_v18  ;;  %v198_v22 = vld [vmem:[%s14954_s0 + $0x48] sm:$0xff]  ;;  %v199_v23 = vld [vmem:[%s14954_s0 + $0x50] sm:$0xff]  ;;  %s10746_s9 = smov 64  }
  0x17   :  { %9118 = vrot.lane.b32.xlu0 %v9117_v17, %s10745_s26  ;;  %v200_v24 = vld [vmem:[%s14954_s0 + $0x58] sm:$0xff]  ;;  %v201_v25 = vld [vmem:[%s14954_s0 + $0x60] sm:$0xff]  ;;  %v202_v26 = vld [vmem:[%s14954_s0 + $0x68] sm:$0xff]  ;;  %vm43_vm2 = vcmask 253952   ;;  %s10747_s28 = smov 96   ;;  %vm108_vm3 = vcmask 523264  }
  0x18   :  { %8512 = vmatmul.mubr.msk.f32.gmra.mrb[6].mxu0 %vm27_vm0, %v196_v16  ;;  %v203_v27 = vld [vmem:[%s14954_s0 + $0x70] sm:$0xff]  ;;  %v204_v28 = vld [vmem:[%s14954_s0 + $0x78] sm:$0xff]  ;;  %v205_v29 = vld [vmem:[%s14954_s0 + $0x80] sm:$0xff]  ;;  %76 = vst.msk [vmem:[#allocation2 + $0x29] sm:$0x1] %vm43_vm2, %v10744_v6  ;;  %vm3203_vm4 = vcmask 785408  }
  0x19   :  { %8514 = vmatprep.mubr.msk.f32.mxu0 %vm27_vm0, %v197_v19  ;;  %v206_v30 = vld [vmem:[%s14954_s0 + $0x88] sm:$0xff]  ;;  %v207_v31 = vld [vmem:[%s14954_s0 + $0x90] sm:$0xff]  ;;  %v208_v32 = vld [vmem:[%s14954_s0 + $0x98] sm:$0xff]  ;;  %44 = vst.msk [vmem:[#allocation2 + $0x18] sm:$0x1] %vm43_vm2, %v10744_v6  ;;  %vm124_vm5 = vcmask 516096  }
  0x1a   :  { %v209_v33 = vld [vmem:[%s14954_s0 + $0xa0] sm:$0xff]  ;;  %v210_v34 = vld [vmem:[%s14954_s0 + $0xa8] sm:$0xff]  ;;  %v211_v35 = vld [vmem:[%s14954_s0 + $0xb0] sm:$0xff]  ;;  %45 = vst.msk [vmem:[#allocation2 + $0x30] sm:$0x1] %vm43_vm2, %v10744_v6  ;;  %vm111_vm6 = vcmask 517120  }
  0x1b   :  { %9123 = vrot.lane.b32.xlu0 %v9122_v21, %s10745_s26  ;;  %v212_v36 = vld [vmem:[%s14954_s0 + $0xb8] sm:$0xff]  ;;  %v213_v37 = vld [vmem:[%s14954_s0 + $0xc0] sm:$0xff]  ;;  %v214_v38 = vld [vmem:[%s14954_s0 + $0xc8] sm:$0xff]  ;;  %46 = vst.msk [vmem:[#allocation2 + $0x48] sm:$0x1] %vm43_vm2, %v10744_v6 }
  0x1c   :  { %8515 = vmatmul.mubr.msk.f32.gmra.mrb[8].mxu0 %vm27_vm0, %v198_v22  ;;  %v215_v39 = vld [vmem:[%s14954_s0 + $0xd0] sm:$0xff]  ;;  %v216_v40 = vld [vmem:[%s14954_s0 + $0xd8] sm:$0xff]  ;;  %v217_v41 = vld [vmem:[%s14954_s0 + $0xe0] sm:$0xff]  ;;  %47 = vst.msk [vmem:[#allocation2 + $0x60] sm:$0x1] %vm43_vm2, %v10744_v6 }
  0x1d   :  { %8517 = vmatprep.mubr.msk.f32.mxu0 %vm27_vm0, %v199_v23  ;;  %v218_v42 = vld [vmem:[%s14954_s0 + $0xe8] sm:$0xff]  ;;  %v219_v43 = vld [vmem:[%s14954_s0 + $0xf0] sm:$0xff]  ;;  %v220_v44 = vld [vmem:[%s14954_s0 + $0xf8] sm:$0xff]  ;;  %48 = vst.msk [vmem:[#allocation2 + $0x78] sm:$0x1] %vm43_vm2, %v10744_v6 }
  0x1e   :  { %v221_v45 = vld [vmem:[%s14954_s0 + $0x100] sm:$0xff]  ;;  %v222_v46 = vld [vmem:[%s14954_s0 + $0x108] sm:$0xff]  ;;  %v223_v47 = vld [vmem:[%s14954_s0 + $0x110] sm:$0xff]  ;;  %49 = vst.msk [vmem:[#allocation2 + $0x90] sm:$0x1] %vm43_vm2, %v10744_v6 }
  0x1f   :  { %v224_v48 = vld [vmem:[%s14954_s0 + $0x118] sm:$0xff]  ;;  %v225_v49 = vld [vmem:[%s14954_s0 + $0x120] sm:$0xff]  ;;  %v226_v50 = vld [vmem:[%s14954_s0 + $0x128] sm:$0xff]  ;;  %50 = vst.msk [vmem:[#allocation2 + $0xa8] sm:$0x1] %vm43_vm2, %v10744_v6 }
  0x20   :  { %8518 = vmatmul.mubr.msk.f32.gmra.mrb[10].mxu0 %vm27_vm0, %v200_v24  ;;  %v227_v51 = vld [vmem:[%s14954_s0 + $0x130] sm:$0xff]  ;;  %v228_v52 = vld [vmem:[%s14954_s0 + $0x138] sm:$0xff]  ;;  %v229_v53 = vld [vmem:[%s14954_s0 + $0x140] sm:$0xff]  ;;  %51 = vst.msk [vmem:[#allocation2 + $0xc0] sm:$0x1] %vm43_vm2, %v10744_v6 }
  0x21   :  { %8520 = vmatprep.mubr.msk.f32.mxu0 %vm27_vm0, %v201_v25  ;;  %v230_v54 = vld [vmem:[%s14954_s0 + $0x148] sm:$0xff]  ;;  %v231_v55 = vld [vmem:[%s14954_s0 + $0x150] sm:$0xff]  ;;  %v232_v56 = vld [vmem:[%s14954_s0 + $0x158] sm:$0xff]  ;;  %52 = vst.msk [vmem:[#allocation2 + $0xd8] sm:$0x1] %vm43_vm2, %v10744_v6 }
  0x22   :  { %v233_v57 = vld [vmem:[%s14954_s0 + $0x160] sm:$0xff]  ;;  %v1091_v59 = vld [vmem:[#allocation2 + $0xa] sm:$0xff]  ;;  %v11021_v63 = vld [vmem:[#allocation2 + $0x1b2] sm:$0xff]  ;;  %53 = vst.msk [vmem:[#allocation2 + $0xf0] sm:$0x1] %vm43_vm2, %v10744_v6 }
  0x23   :  { %v1090_v58 = vld [vmem:[#allocation2 + $0x2] sm:$0xff]  ;;  %v11019_v62 = vld [vmem:[%s14954_s0 + $0x170] sm:$0xff]  ;;  %v11023_v0 = vld [vmem:[#allocation2 + $0x1ba] sm:$0xff]  ;;  %54 = vst.msk [vmem:[#allocation2 + $0x108] sm:$0x1] %vm43_vm2, %v10744_v6 }
  0x24   :  { %8521 = vmatmul.mubr.msk.f32.gmra.mrb[12].mxu0 %vm27_vm0, %v202_v26  ;;  %v9127_v60 = vpack.i.bf16 %v1091_v59, %v1090_v58  ;;  %v11013_v61 = vld [vmem:[%s14954_s0 + $0x168] sm:$0xff]  ;;  %55 = vst.msk [vmem:[#allocation2 + $0x120] sm:$0x1] %vm43_vm2, %v10744_v6  ;;  %56 = vst.msk [vmem:[#allocation2 + $0x138] sm:$0x1] %vm43_vm2, %v10744_v6  ;;  %v9132_v1 = vpack.i.bf16 %v11023_v0, %v11021_v63  ;;  %v236_v2 = vld [vmem:[%s14954_s0 + $0x178] sm:$0xff] }
  0x25   :  { %8523 = vmatprep.mubr.msk.f32.mxu0 %vm27_vm0, %v203_v27  ;;  %57 = vst.msk [vmem:[#allocation2 + $0x150] sm:$0x1] %vm43_vm2, %v10744_v6  ;;  %58 = vst.msk [vmem:[#allocation2 + $0x168] sm:$0x1] %vm43_vm2, %v10744_v6  ;;  %v237_v3 = vld [vmem:[%s14954_s0 + $0x180] sm:$0xff]  ;;  %v3493_v5 = vld [vmem:[%s14956_s2 + $0x108] sm:$0xff] }
  0x26   :  { %9128 = vrot.lane.b32.xlu0 %v9127_v60, %s10746_s9  ;;  %59 = vst.msk [vmem:[#allocation2 + $0x180] sm:$0x1] %vm43_vm2, %v10744_v6  ;;  %60 = vst.msk [vmem:[#allocation2 + $0x1c8] sm:$0x1] %vm43_vm2, %v10744_v6  ;;  %v3492_v4 = vld [vmem:[%s14956_s2 + $0x100] sm:$0xff]  ;;  %v1377_v7 = vld [vmem:[#allocation2 + $0x198] sm:$0xff] }
  0x27   :  { %61 = vst.msk [vmem:[#allocation2 + $0x1e0] sm:$0x1] %vm43_vm2, %v10744_v6  ;;  %62 = vst.msk [vmem:[#allocation2 + $0x1f8] sm:$0x1] %vm43_vm2, %v10744_v6  ;;  %v8870_v8 = vpack.c.bf16 %v3493_v5, %v3492_v4  ;;  %v1378_v9 = vld [vmem:[#allocation2 + $0x1a0] sm:$0xff]  ;;  %v238_v13 = vld [vmem:[%s14954_s0 + $0x188] sm:$0xff] }
  0x28   :  { %8524 = vmatmul.mubr.msk.f32.gmra.mrb[14].mxu0 %vm27_vm0, %v204_v28  ;;  %63 = vst.msk [vmem:[#allocation2 + $0x210] sm:$0x1] %vm43_vm2, %v10744_v6  ;;  %64 = vst.msk [vmem:[#allocation2 + $0x228] sm:$0x1] %vm43_vm2, %v10744_v6  ;;  %v9137_v10 = vpack.i.bf16 %v1378_v9, %v1377_v7  ;;  %v1441_v11 = vld [vmem:[#allocation2 + $0x199] sm:$0xff]  ;;  %v1442_v12 = vld [vmem:[#allocation2 + $0x1a1] sm:$0xff] }
  0x29   :  { %8526 = vmatprep.mubr.msk.f32.mxu0 %vm27_vm0, %v205_v29  ;;  %65 = vst.msk [vmem:[#allocation2 + $0x240] sm:$0x1] %vm43_vm2, %v10744_v6  ;;  %66 = vst.msk [vmem:[#allocation2 + $0x258] sm:$0x1] %vm43_vm2, %v10744_v6  ;;  %8871 = vmatprep.subr.bf16.mxu0 %v8870_v8  ;;  %v9142_v14 = vpack.i.bf16 %v1442_v12, %v1441_v11  ;;  %v3494_v15 = vld [vmem:[%s14956_s2 + $0x110] sm:$0xff]  ;;  %v3495_v16 = vld [vmem:[%s14956_s2 + $0x118] sm:$0xff] }
  0x2a   :  { %67 = vst.msk [vmem:[#allocation2 + $0x270] sm:$0x1] %vm43_vm2, %v10744_v6  ;;  %68 = vst.msk [vmem:[#allocation2 + $0x288] sm:$0x1] %vm43_vm2, %v10744_v6  ;;  %9133 = vrot.lane.b32.xlu0 %v9132_v1, %s10746_s9  ;;  %v239_v17 = vld [vmem:[%s14954_s0 + $0x190] sm:$0xff]  ;;  %9138 = vrot.lane.b32.xlu1 %v9137_v10, %s10746_s9  ;;  %v8874_v18 = vpack.c.bf16 %v3495_v16, %v3494_v15  ;;  %v240_v19 = vld [vmem:[%s14954_s0 + $0x198] sm:$0xff] }
  0x2b   :  { %69 = vst.msk [vmem:[#allocation2 + $0x2a0] sm:$0x1] %vm43_vm2, %v10744_v6  ;;  %70 = vst.msk [vmem:[#allocation2 + $0x2b8] sm:$0x1] %vm43_vm2, %v10744_v6  ;;  %8873 = vmatpush3.bf16.msra.mxu0 %v8870_v8  ;;  %v241_v20 = vld [vmem:[%s14954_s0 + $0x1a0] sm:$0xff]  ;;  %v242_v21 = vld [vmem:[%s14954_s0 + $0x1a8] sm:$0xff] }
  0x2c   :  { %8527 = vmatmul.mubr.msk.f32.gmra.mrb[16].mxu0 %vm27_vm0, %v206_v30  ;;  %71 = vst.msk [vmem:[#allocation2 + $0x2d0] sm:$0x1] %vm43_vm2, %v10744_v6  ;;  %72 = vst.msk [vmem:[#allocation2 + $0x2e8] sm:$0x1] %vm43_vm2, %v10744_v6  ;;  %8875 = vmatprep.subr.bf16.mxu0 %v8874_v18  ;;  %v243_v22 = vld [vmem:[%s14954_s0 + $0x1b0] sm:$0xff]  ;;  %v244_v23 = vld [vmem:[%s14954_s0 + $0x1b8] sm:$0xff] }
  0x2d   :  { %8529 = vmatprep.mubr.msk.f32.mxu0 %vm27_vm0, %v207_v31  ;;  %73 = vst.msk [vmem:[#allocation2 + $0x300] sm:$0x1] %vm43_vm2, %v10744_v6  ;;  %74 = vst.msk [vmem:[#allocation2 + $0x318] sm:$0x1] %vm43_vm2, %v10744_v6  ;;  %v245_v24 = vld [vmem:[%s14954_s0 + $0x1c0] sm:$0xff]  ;;  %v246_v25 = vld [vmem:[%s14954_s0 + $0x1c8] sm:$0xff] }
  0x2e   :  { %75 = vst.msk [vmem:[#allocation2 + $0x330] sm:$0x1] %vm43_vm2, %v10744_v6  ;;  %77 = vst.msk [vmem:[#allocation2 + $0x41] sm:$0x1] %vm43_vm2, %v10744_v6  ;;  %9143 = vrot.lane.b32.xlu0 %v9142_v14, %s10747_s28  ;;  %v247_v26 = vld [vmem:[%s14954_s0 + $0x1d0] sm:$0xff]  ;;  %v248_v27 = vld [vmem:[%s14954_s0 + $0x1d8] sm:$0xff] }
  0x2f   :  { %78 = vst.msk [vmem:[#allocation2 + $0x59] sm:$0x1] %vm43_vm2, %v10744_v6  ;;  %79 = vst.msk [vmem:[#allocation2 + $0x71] sm:$0x1] %vm43_vm2, %v10744_v6  ;;  %8877 = vmatpush3.bf16.msra.mxu0 %v8874_v18  ;;  %v249_v28 = vld [vmem:[%s14954_s0 + $0x1e0] sm:$0xff]  ;;  %v250_v29 = vld [vmem:[%s14954_s0 + $0x1e8] sm:$0xff] }
  0x30   :  { %8530 = vmatmul.mubr.msk.f32.gmra.mrb[18].mxu0 %vm27_vm0, %v208_v32  ;;  %80 = vst.msk [vmem:[#allocation2 + $0x89] sm:$0x1] %vm43_vm2, %v10744_v6  ;;  %81 = vst.msk [vmem:[#allocation2 + $0xa1] sm:$0x1] %vm43_vm2, %v10744_v6  ;;  %v251_v30 = vld [vmem:[%s14954_s0 + $0x1f0] sm:$0xff]  ;;  %v252_v31 = vld [vmem:[%s14954_s0 + $0x1f8] sm:$0xff] }
  0x31   :  { %8532 = vmatprep.mubr.msk.f32.mxu0 %vm27_vm0, %v209_v33  ;;  %82 = vst.msk [vmem:[#allocation2 + $0xb9] sm:$0x1] %vm43_vm2, %v10744_v6  ;;  %83 = vst.msk [vmem:[#allocation2 + $0xd1] sm:$0x1] %vm43_vm2, %v10744_v6  ;;  %v3460_v32 = vld [vmem:[%s14956_s2] sm:$0xff]  ;;  %v3461_v33 = vld [vmem:[%s14956_s2 + $0x8] sm:$0xff] }
  0x32   :  { %84 = vst.msk [vmem:[#allocation2 + $0xe9] sm:$0x1] %vm43_vm2, %v10744_v6  ;;  %85 = vst.msk [vmem:[#allocation2 + $0x101] sm:$0x1] %vm43_vm2, %v10744_v6  ;;  %v3477_v58 = vld [vmem:[%s14956_s2 + $0x88] sm:$0xff]  ;;  %v3478_v60 = vld [vmem:[%s14956_s2 + $0x90] sm:$0xff] }
  0x33   :  { %86 = vst.msk [vmem:[#allocation2 + $0x119] sm:$0x1] %vm43_vm2, %v10744_v6  ;;  %87 = vst.msk [vmem:[#allocation2 + $0x131] sm:$0x1] %vm43_vm2, %v10744_v6  ;;  %v3480_v63 = vld [vmem:[%s14956_s2 + $0xa0] sm:$0xff]  ;;  %v3481_v0 = vld [vmem:[%s14956_s2 + $0xa8] sm:$0xff] }
  0x34   :  { %8533 = vmatmul.mubr.msk.f32.gmra.mrb[20].mxu0 %vm27_vm0, %v210_v34  ;;  %88 = vst.msk [vmem:[#allocation2 + $0x149] sm:$0x1] %vm43_vm2, %v10744_v6  ;;  %89 = vst.msk [vmem:[#allocation2 + $0x161] sm:$0x1] %vm43_vm2, %v10744_v6  ;;  %v14962_v34 = vmov 0.0|0.0   ;;  %v8853_v1 = vpack.c.bf16 %v3481_v0, %v3480_v63  ;;  %v3483_v4 = vld [vmem:[%s14956_s2 + $0xb8] sm:$0xff] }
  0x35   :  { %8535 = vmatprep.mubr.msk.f32.mxu0 %vm27_vm0, %v211_v35  ;;  %90 = vst.msk [vmem:[#allocation2 + $0x179] sm:$0x1] %vm43_vm2, %v10744_v6  ;;  %91 = vst.msk [vmem:[#allocation2 + $0x191] sm:$0x1] %vm43_vm2, %v10744_v6  ;;  %8822 = vmatprep.subr.bf16.mxu1 %v14962_v34  ;;  %v8823_v35 = vpack.c.bf16 %v3461_v33, %v3460_v32  ;;  %v3484_v11 = vld [vmem:[%s14956_s2 + $0xc0] sm:$0xff]  ;;  %v3485_v12 = vld [vmem:[%s14956_s2 + $0xc8] sm:$0xff] }
  0x36   :  { %92 = vst.msk [vmem:[#allocation2 + $0x1d9] sm:$0x1] %vm43_vm2, %v10744_v6  ;;  %93 = vst.msk [vmem:[#allocation2 + $0x1f1] sm:$0x1] %vm43_vm2, %v10744_v6  ;;  %8878 = vmatprep.subr.bf16.mxu0 %v14962_v34  ;;  %v8859_v15 = vpack.c.bf16 %v3485_v12, %v3484_v11  ;;  %v3486_v18 = vld [vmem:[%s14956_s2 + $0xd0] sm:$0xff]  ;;  %v3489_v32 = vld [vmem:[%s14956_s2 + $0xe8] sm:$0xff] }
  0x37   :  { %94 = vst.msk [vmem:[#allocation2 + $0x209] sm:$0x1] %vm43_vm2, %v10744_v6  ;;  %95 = vst.msk [vmem:[#allocation2 + $0x221] sm:$0x1] %vm43_vm2, %v10744_v6  ;;  %8824 = vmatpush1.bf16.msra.mxu1 %v8823_v35 }
  0x38   :  { %8536 = vmatmul.mubr.msk.f32.gmra.mrb[22].mxu0 %vm27_vm0, %v212_v36  ;;  %96 = vst.msk [vmem:[#allocation2 + $0x239] sm:$0x1] %vm43_vm2, %v10744_v6  ;;  %97 = vst.msk [vmem:[#allocation2 + $0x251] sm:$0x1] %vm43_vm2, %v10744_v6  ;;  %8825 = vmatprep.subr.bf16.mxu1 %v14962_v34  ;;  %v3462_v36 = vld [vmem:[%s14956_s2 + $0x10] sm:$0xff] }
  0x39   :  { %8538 = vmatprep.mubr.msk.f32.mxu0 %vm27_vm0, %v213_v37  ;;  %98 = vst.msk [vmem:[#allocation2 + $0x269] sm:$0x1] %vm43_vm2, %v10744_v6  ;;  %99 = vst.msk [vmem:[#allocation2 + $0x281] sm:$0x1] %vm43_vm2, %v10744_v6  ;;  %v3463_v37 = vld [vmem:[%s14956_s2 + $0x18] sm:$0xff] }
  0x3a   :  { %100 = vst.msk [vmem:[#allocation2 + $0x299] sm:$0x1] %vm43_vm2, %v10744_v6  ;;  %101 = vst.msk [vmem:[#allocation2 + $0x2b1] sm:$0x1] %vm43_vm2, %v10744_v6 }
  0x3b   :  { %102 = vst.msk [vmem:[#allocation2 + $0x2c9] sm:$0x1] %vm43_vm2, %v10744_v6  ;;  %103 = vst.msk [vmem:[#allocation2 + $0x2e1] sm:$0x1] %vm43_vm2, %v10744_v6 }
  0x3c   :  { %8539 = vmatmul.mubr.msk.f32.gmra.mrb[24].mxu0 %vm27_vm0, %v214_v38  ;;  %104 = vst.msk [vmem:[#allocation2 + $0x2f9] sm:$0x1] %vm43_vm2, %v10744_v6  ;;  %105 = vst.msk [vmem:[#allocation2 + $0x311] sm:$0x1] %vm43_vm2, %v10744_v6  ;;  %v8826_v38 = vpack.c.bf16 %v3463_v37, %v3462_v36 }
  0x3d   :  { %8541 = vmatprep.mubr.msk.f32.mxu0 %vm27_vm0, %v215_v39  ;;  %106 = vst.msk [vmem:[#allocation2 + $0x329] sm:$0x1] %vm43_vm2, %v10744_v6  ;;  %107 = vst.msk [vmem:[#allocation2 + $0x341] sm:$0x1] %vm43_vm2, %v10744_v6  ;;  %v3464_v39 = vld [vmem:[%s14956_s2 + $0x20] sm:$0xff] }
  0x3e   :  { %8827 = vmatpush1.bf16.msra.mxu1 %v8826_v38  ;;  %109 = vst.msk [vmem:[#allocation3] sm:$0xff] %vm108_vm3, %v10744_v6  ;;  %110 = vst.msk [vmem:[#allocation3 + $0x8] sm:$0xff] %vm108_vm3, %v10744_v6 }
  0x3f   :  { %8828 = vmatprep.subr.bf16.mxu1 %v14962_v34  ;;  %113 = vst.msk [vmem:[#allocation3 + $0x1b0] sm:$0xff] %vm108_vm3, %v10744_v6  ;;  %114 = vst.msk [vmem:[#allocation3 + $0x1b8] sm:$0xff] %vm108_vm3, %v10744_v6 }
  0x40   :  { %8542 = vmatmul.mubr.msk.f32.gmra.mrb[26].mxu0 %vm27_vm0, %v216_v40  ;;  %v3465_v40 = vld [vmem:[%s14956_s2 + $0x28] sm:$0xff]  ;;  %117 = vst.msk [vmem:[#allocation3 + $0x198] sm:$0xff] %vm108_vm3, %v10744_v6  ;;  %118 = vst.msk [vmem:[#allocation3 + $0x1a0] sm:$0xff] %vm108_vm3, %v10744_v6 }
  0x41   :  { %8544 = vmatprep.mubr.msk.f32.mxu0 %vm27_vm0, %v217_v41  ;;  %v8829_v41 = vpack.c.bf16 %v3465_v40, %v3464_v39  ;;  %120 = vst.msk [vmem:[#allocation3 + $0x348] sm:$0xff] %vm108_vm3, %v10744_v6  ;;  %121 = vst.msk [vmem:[#allocation3 + $0x350] sm:$0xff] %vm108_vm3, %v10744_v6 }
  0x42   :  { %125 = vst.msk [vmem:[#allocation3 + $0x18] sm:$0x1] %vm124_vm5, %v10744_v6  ;;  %126 = vst.msk [vmem:[#allocation3 + $0x30] sm:$0x1] %vm124_vm5, %v10744_v6 }
  0x43   :  { %8830 = vmatpush1.bf16.msra.mxu1 %v8829_v41  ;;  %127 = vst.msk [vmem:[#allocation3 + $0x48] sm:$0x1] %vm124_vm5, %v10744_v6  ;;  %128 = vst.msk [vmem:[#allocation3 + $0x60] sm:$0x1] %vm124_vm5, %v10744_v6 }
  0x44   :  { %8545 = vmatmul.mubr.msk.f32.gmra.mrb[28].mxu0 %vm27_vm0, %v218_v42  ;;  %8831 = vmatprep.subr.bf16.mxu1 %v14962_v34  ;;  %v3466_v42 = vld [vmem:[%s14956_s2 + $0x30] sm:$0xff]  ;;  %129 = vst.msk [vmem:[#allocation3 + $0x78] sm:$0x1] %vm124_vm5, %v10744_v6  ;;  %130 = vst.msk [vmem:[#allocation3 + $0x90] sm:$0x1] %vm124_vm5, %v10744_v6 }
  0x45   :  { %8547 = vmatprep.mubr.msk.f32.mxu0 %vm27_vm0, %v219_v43  ;;  %v3467_v43 = vld [vmem:[%s14956_s2 + $0x38] sm:$0xff]  ;;  %131 = vst.msk [vmem:[#allocation3 + $0xa8] sm:$0x1] %vm124_vm5, %v10744_v6  ;;  %132 = vst.msk [vmem:[#allocation3 + $0xc0] sm:$0x1] %vm124_vm5, %v10744_v6 }
  0x46   :  { %133 = vst.msk [vmem:[#allocation3 + $0xd8] sm:$0x1] %vm124_vm5, %v10744_v6  ;;  %134 = vst.msk [vmem:[#allocation3 + $0xf0] sm:$0x1] %vm124_vm5, %v10744_v6 }
  0x47   :  { %135 = vst.msk [vmem:[#allocation3 + $0x108] sm:$0x1] %vm124_vm5, %v10744_v6  ;;  %136 = vst.msk [vmem:[#allocation3 + $0x120] sm:$0x1] %vm124_vm5, %v10744_v6 }
  0x48   :  { %8548 = vmatmul.mubr.msk.f32.gmra.mrb[30].mxu0 %vm27_vm0, %v220_v44  ;;  %v8832_v44 = vpack.c.bf16 %v3467_v43, %v3466_v42  ;;  %137 = vst.msk [vmem:[#allocation3 + $0x138] sm:$0x1] %vm124_vm5, %v10744_v6  ;;  %138 = vst.msk [vmem:[#allocation3 + $0x150] sm:$0x1] %vm124_vm5, %v10744_v6 }
  0x49   :  { %8550 = vmatprep.mubr.msk.f32.mxu0 %vm27_vm0, %v221_v45  ;;  %v3468_v45 = vld [vmem:[%s14956_s2 + $0x40] sm:$0xff]  ;;  %139 = vst.msk [vmem:[#allocation3 + $0x168] sm:$0x1] %vm124_vm5, %v10744_v6  ;;  %140 = vst.msk [vmem:[#allocation3 + $0x180] sm:$0x1] %vm124_vm5, %v10744_v6 }
  0x4a   :  { %8833 = vmatpush1.bf16.msra.mxu1 %v8832_v44  ;;  %141 = vst.msk [vmem:[#allocation3 + $0x1c8] sm:$0x1] %vm124_vm5, %v10744_v6  ;;  %142 = vst.msk [vmem:[#allocation3 + $0x1e0] sm:$0x1] %vm124_vm5, %v10744_v6 }
  0x4b   :  { %8834 = vmatprep.subr.bf16.mxu1 %v14962_v34  ;;  %143 = vst.msk [vmem:[#allocation3 + $0x1f8] sm:$0x1] %vm124_vm5, %v10744_v6  ;;  %144 = vst.msk [vmem:[#allocation3 + $0x210] sm:$0x1] %vm124_vm5, %v10744_v6 }
  0x4c   :  { %8551 = vmatmul.mubr.msk.f32.gmra.mrb[32].mxu0 %vm27_vm0, %v222_v46  ;;  %v3469_v46 = vld [vmem:[%s14956_s2 + $0x48] sm:$0xff]  ;;  %145 = vst.msk [vmem:[#allocation3 + $0x228] sm:$0x1] %vm124_vm5, %v10744_v6  ;;  %146 = vst.msk [vmem:[#allocation3 + $0x240] sm:$0x1] %vm124_vm5, %v10744_v6 }
  0x4d   :  { %8553 = vmatprep.mubr.msk.f32.mxu0 %vm27_vm0, %v223_v47  ;;  %v8835_v47 = vpack.c.bf16 %v3469_v46, %v3468_v45  ;;  %v3490_v46 = vld [vmem:[%s14956_s2 + $0xf0] sm:$0xff]  ;;  %147 = vst.msk [vmem:[#allocation3 + $0x258] sm:$0x1] %vm124_vm5, %v10744_v6  ;;  %148 = vst.msk [vmem:[#allocation3 + $0x270] sm:$0x1] %vm124_vm5, %v10744_v6 }
  0x4e   :  { %149 = vst.msk [vmem:[#allocation3 + $0x288] sm:$0x1] %vm124_vm5, %v10744_v6  ;;  %150 = vst.msk [vmem:[#allocation3 + $0x2a0] sm:$0x1] %vm124_vm5, %v10744_v6 }
  0x4f   :  { %8836 = vmatpush1.bf16.msra.mxu1 %v8835_v47  ;;  %v3491_v47 = vld [vmem:[%s14956_s2 + $0xf8] sm:$0xff]  ;;  %151 = vst.msk [vmem:[#allocation3 + $0x2b8] sm:$0x1] %vm124_vm5, %v10744_v6  ;;  %152 = vst.msk [vmem:[#allocation3 + $0x2d0] sm:$0x1] %vm124_vm5, %v10744_v6 }
  0x50   :  { %8554 = vmatmul.mubr.msk.f32.gmra.mrb[34].mxu0 %vm27_vm0, %v224_v48  ;;  %8837 = vmatprep.subr.bf16.mxu1 %v14962_v34  ;;  %v3470_v48 = vld [vmem:[%s14956_s2 + $0x50] sm:$0xff]  ;;  %153 = vst.msk [vmem:[#allocation3 + $0x2e8] sm:$0x1] %vm124_vm5, %v10744_v6  ;;  %154 = vst.msk [vmem:[#allocation3 + $0x300] sm:$0x1] %vm124_vm5, %v10744_v6 }
  0x51   :  { %8556 = vmatprep.mubr.msk.f32.mxu0 %vm27_vm0, %v225_v49  ;;  %v3471_v49 = vld [vmem:[%s14956_s2 + $0x58] sm:$0xff]  ;;  %155 = vst.msk [vmem:[#allocation3 + $0x318] sm:$0x1] %vm124_vm5, %v10744_v6  ;;  %156 = vst.msk [vmem:[#allocation3 + $0x330] sm:$0x1] %vm124_vm5, %v10744_v6 }
  0x52   :  { %157 = vst.msk [vmem:[#allocation3 + $0x29] sm:$0x1] %vm124_vm5, %v10744_v6  ;;  %158 = vst.msk [vmem:[#allocation3 + $0x41] sm:$0x1] %vm124_vm5, %v10744_v6 }
  0x53   :  { %159 = vst.msk [vmem:[#allocation3 + $0x59] sm:$0x1] %vm124_vm5, %v10744_v6  ;;  %160 = vst.msk [vmem:[#allocation3 + $0x71] sm:$0x1] %vm124_vm5, %v10744_v6 }
  0x54   :  { %8557 = vmatmul.mubr.msk.f32.gmra.mrb[36].mxu0 %vm27_vm0, %v226_v50  ;;  %v8838_v50 = vpack.c.bf16 %v3471_v49, %v3470_v48  ;;  %161 = vst.msk [vmem:[#allocation3 + $0x89] sm:$0x1] %vm124_vm5, %v10744_v6  ;;  %162 = vst.msk [vmem:[#allocation3 + $0xa1] sm:$0x1] %vm124_vm5, %v10744_v6 }
  0x55   :  { %8559 = vmatprep.mubr.msk.f32.mxu0 %vm27_vm0, %v227_v51  ;;  %v3472_v51 = vld [vmem:[%s14956_s2 + $0x60] sm:$0xff]  ;;  %163 = vst.msk [vmem:[#allocation3 + $0xb9] sm:$0x1] %vm124_vm5, %v10744_v6  ;;  %164 = vst.msk [vmem:[#allocation3 + $0xd1] sm:$0x1] %vm124_vm5, %v10744_v6 }
  0x56   :  { %8839 = vmatpush1.bf16.msra.mxu1 %v8838_v50  ;;  %v8868_v50 = vpack.c.bf16 %v3491_v47, %v3490_v46  ;;  %165 = vst.msk [vmem:[#allocation3 + $0xe9] sm:$0x1] %vm124_vm5, %v10744_v6  ;;  %166 = vst.msk [vmem:[#allocation3 + $0x101] sm:$0x1] %vm124_vm5, %v10744_v6 }
  0x57   :  { %8840 = vmatprep.subr.bf16.mxu1 %v14962_v34  ;;  %167 = vst.msk [vmem:[#allocation3 + $0x119] sm:$0x1] %vm124_vm5, %v10744_v6  ;;  %168 = vst.msk [vmem:[#allocation3 + $0x131] sm:$0x1] %vm124_vm5, %v10744_v6 }
  0x58   :  { %8560 = vmatmul.mubr.msk.f32.gmra.mrb[38].mxu0 %vm27_vm0, %v228_v52  ;;  %v3473_v52 = vld [vmem:[%s14956_s2 + $0x68] sm:$0xff]  ;;  %169 = vst.msk [vmem:[#allocation3 + $0x149] sm:$0x1] %vm124_vm5, %v10744_v6  ;;  %170 = vst.msk [vmem:[#allocation3 + $0x161] sm:$0x1] %vm124_vm5, %v10744_v6 }
  0x59   :  { %8562 = vmatprep.mubr.msk.f32.mxu0 %vm27_vm0, %v229_v53  ;;  %v8841_v53 = vpack.c.bf16 %v3473_v52, %v3472_v51  ;;  %171 = vst.msk [vmem:[#allocation3 + $0x179] sm:$0x1] %vm124_vm5, %v10744_v6  ;;  %172 = vst.msk [vmem:[#allocation3 + $0x191] sm:$0x1] %vm124_vm5, %v10744_v6 }
  0x5a   :  { %173 = vst.msk [vmem:[#allocation3 + $0x1d9] sm:$0x1] %vm124_vm5, %v10744_v6  ;;  %174 = vst.msk [vmem:[#allocation3 + $0x1f1] sm:$0x1] %vm124_vm5, %v10744_v6 }
  0x5b   :  { %8842 = vmatpush1.bf16.msra.mxu1 %v8841_v53  ;;  %175 = vst.msk [vmem:[#allocation3 + $0x209] sm:$0x1] %vm124_vm5, %v10744_v6  ;;  %176 = vst.msk [vmem:[#allocation3 + $0x221] sm:$0x1] %vm124_vm5, %v10744_v6 }
  0x5c   :  { %8563 = vmatmul.mubr.msk.f32.gmra.mrb[40].mxu0 %vm27_vm0, %v230_v54  ;;  %8843 = vmatprep.subr.bf16.mxu1 %v14962_v34  ;;  %v3474_v54 = vld [vmem:[%s14956_s2 + $0x70] sm:$0xff]  ;;  %177 = vst.msk [vmem:[#allocation3 + $0x239] sm:$0x1] %vm124_vm5, %v10744_v6  ;;  %178 = vst.msk [vmem:[#allocation3 + $0x251] sm:$0x1] %vm124_vm5, %v10744_v6 }
  0x5d   :  { %8565 = vmatprep.mubr.msk.f32.mxu0 %vm27_vm0, %v231_v55  ;;  %v3475_v55 = vld [vmem:[%s14956_s2 + $0x78] sm:$0xff]  ;;  %179 = vst.msk [vmem:[#allocation3 + $0x269] sm:$0x1] %vm124_vm5, %v10744_v6  ;;  %180 = vst.msk [vmem:[#allocation3 + $0x281] sm:$0x1] %vm124_vm5, %v10744_v6 }
  0x5e   :  { %181 = vst.msk [vmem:[#allocation3 + $0x299] sm:$0x1] %vm124_vm5, %v10744_v6  ;;  %182 = vst.msk [vmem:[#allocation3 + $0x2b1] sm:$0x1] %vm124_vm5, %v10744_v6 }
  0x5f   :  { %183 = vst.msk [vmem:[#allocation3 + $0x2c9] sm:$0x1] %vm124_vm5, %v10744_v6  ;;  %184 = vst.msk [vmem:[#allocation3 + $0x2e1] sm:$0x1] %vm124_vm5, %v10744_v6 }
  0x60   :  { %8566 = vmatmul.mubr.msk.f32.gmra.mrb[42].mxu0 %vm27_vm0, %v232_v56  ;;  %v8844_v56 = vpack.c.bf16 %v3475_v55, %v3474_v54  ;;  %185 = vst.msk [vmem:[#allocation3 + $0x2f9] sm:$0x1] %vm124_vm5, %v10744_v6  ;;  %186 = vst.msk [vmem:[#allocation3 + $0x311] sm:$0x1] %vm124_vm5, %v10744_v6 }
  0x61   :  { %8568 = vmatprep.mubr.msk.f32.mxu0 %vm27_vm0, %v233_v57  ;;  %v3476_v57 = vld [vmem:[%s14956_s2 + $0x80] sm:$0xff]  ;;  %187 = vst.msk [vmem:[#allocation3 + $0x329] sm:$0x1] %vm124_vm5, %v10744_v6  ;;  %188 = vst.msk [vmem:[#allocation3 + $0x341] sm:$0x1] %vm124_vm5, %v10744_v6 }
  0x62   :  { %8845 = vmatpush1.bf16.msra.mxu1 %v8844_v56  ;;  %v8847_v59 = vpack.c.bf16 %v3477_v58, %v3476_v57  ;;  %112 = vst.msk [vmem:[#allocation3 + $0x10] sm:$0x3] %vm111_vm6, %v10744_v6  ;;  %115 = vst.msk [vmem:[#allocation3 + $0x1c0] sm:$0x3] %vm111_vm6, %v10744_v6 }
  0x63   :  { %8846 = vmatprep.subr.bf16.mxu1 %v14962_v34  ;;  %119 = vst.msk [vmem:[#allocation3 + $0x1a8] sm:$0x3] %vm111_vm6, %v10744_v6  ;;  %122 = vst.msk [vmem:[#allocation3 + $0x358] sm:$0x3] %vm111_vm6, %v10744_v6 }
  0x64   :  { %8569 = vmatmul.mubr.msk.f32.gmra.mrb[44].mxu0 %vm27_vm0, %v11013_v61  ;;  %v3479_v61 = vld [vmem:[%s14956_s2 + $0x98] sm:$0xff] }
  0x65   :  { %8571 = vmatprep.mubr.msk.f32.mxu0 %vm27_vm0, %v11019_v62  ;;  %v8850_v62 = vpack.c.bf16 %v3479_v61, %v3478_v60 }
  0x66   :  { %8848 = vmatpush1.bf16.msra.mxu1 %v8847_v59 }
  0x67   :  { %8849 = vmatprep.subr.bf16.mxu1 %v14962_v34 }
  0x68   :  { %8572 = vmatmul.mubr.msk.f32.gmra.mrb[46].mxu0 %vm27_vm0, %v236_v2 }
  0x69   :  { %8574 = vmatprep.mubr.msk.f32.mxu0 %vm27_vm0, %v237_v3  ;;  %v3482_v3 = vld [vmem:[%s14956_s2 + $0xb0] sm:$0xff] }
  0x6a   :  { %8851 = vmatpush1.bf16.msra.mxu1 %v8850_v62  ;;  %v8856_v8 = vpack.c.bf16 %v3483_v4, %v3482_v3 }
  0x6b   :  { %8852 = vmatprep.subr.bf16.mxu1 %v14962_v34 }
  0x6c   :  { %8575 = vmatmul.mubr.msk.f32.gmra.mrb[48].mxu0 %vm27_vm0, %v238_v13 }
  0x6d   :  { %8577 = vmatprep.mubr.msk.f32.mxu0 %vm27_vm0, %v239_v17 }
  0x6e   :  { %8854 = vmatpush1.bf16.msra.mxu1 %v8853_v1 }
  0x6f   :  { %8855 = vmatprep.subr.bf16.mxu1 %v14962_v34 }
  0x70   :  { %8578 = vmatmul.mubr.msk.f32.gmra.mrb[50].mxu0 %vm27_vm0, %v240_v19  ;;  %v3487_v19 = vld [vmem:[%s14956_s2 + $0xd8] sm:$0xff] }
  0x71   :  { %8580 = vmatprep.mubr.msk.f32.mxu0 %vm27_vm0, %v241_v20 }
  0x72   :  { %8857 = vmatpush1.bf16.msra.mxu1 %v8856_v8 }
  0x73   :  { %8858 = vmatprep.subr.bf16.mxu1 %v14962_v34 }
  0x74   :  { %8581 = vmatmul.mubr.msk.f32.gmra.mrb[52].mxu0 %vm27_vm0, %v242_v21 }
  0x75   :  { %8583 = vmatprep.mubr.msk.f32.mxu0 %vm27_vm0, %v243_v22  ;;  %v8862_v22 = vpack.c.bf16 %v3487_v19, %v3486_v18 }
  0x76   :  { %8860 = vmatpush1.bf16.msra.mxu1 %v8859_v15 }
  0x77   :  { %8861 = vmatprep.subr.bf16.mxu1 %v14962_v34 }
  0x78   :  { %8584 = vmatmul.mubr.msk.f32.gmra.mrb[54].mxu0 %vm27_vm0, %v244_v23 }
  0x79   :  { %8586 = vmatprep.mubr.msk.f32.mxu0 %vm27_vm0, %v245_v24 }
  0x7a   :  { %8863 = vmatpush1.bf16.msra.mxu1 %v8862_v22 }
  0x7b   :  { %8864 = vmatprep.subr.bf16.mxu1 %v14962_v34 }
  0x7c   :  { %8587 = vmatmul.mubr.msk.f32.gmra.mrb[56].mxu0 %vm27_vm0, %v246_v25 }
  0x7d   :  { %8589 = vmatprep.mubr.msk.f32.mxu0 %vm27_vm0, %v247_v26 }
  0x80   :  { %8590 = vmatmul.mubr.msk.f32.gmra.mrb[58].mxu0 %vm27_vm0, %v248_v27 }
  0x81   :  { %8592 = vmatprep.mubr.msk.f32.mxu0 %vm27_vm0, %v249_v28 }
  0x84   :  { %8593 = vmatmul.mubr.msk.f32.gmra.mrb[60].mxu0 %vm27_vm0, %v250_v29 }
  0x85   :  { %8595 = vmatprep.mubr.msk.f32.mxu0 %vm27_vm0, %v251_v30 }
  0x88   :  { %8596 = vmatmul.mubr.msk.f32.gmra.mrb[62].mxu0 %vm27_vm0, %v252_v31  ;;  %v3488_v31 = vld [vmem:[%s14956_s2 + $0xe0] sm:$0xff] }
  0x89   :  { %v8865_v38 = vpack.c.bf16 %v3489_v32, %v3488_v31 }
  0x8b   :  { %8866 = vmatpush1.bf16.msra.mxu1 %v8865_v38 }
  0x8c   :  { %8867 = vmatprep.subr.bf16.mxu1 %v14962_v34 }
  0x8f   :  { %8869 = vmatpush1.bf16.msra.mxu1 %v8868_v50 }
  0x90   :  { %8990 = vmatprep.subr.bf16.mxu1 %v14962_v34 }
  0xdf   :  { %v8504_v2 = vpop.f32.mrb[0].mxu0 }
  0xe0   :  { %v835_v5 = vmax.f32 %v8504_v2, 0.0  ;;  %v515_v7 = vpop.f32.mrb[1].mxu0 }
  0xe1   :  { %v834_v9 = vmax.f32 %v515_v7, 0.0 }
  0xe2   :  { %899 = vst.msk [vmem:[#allocation2 + $0x21] sm:$0xff] %vm27_vm0, %v835_v5 }
  0xe3   :  { %898 = vst.msk [vmem:[#allocation2 + $0x19] sm:$0xff] %vm27_vm0, %v834_v9  ;;  %v8507_v10 = vpop.f32.mrb[2].mxu0 }
  0xe4   :  { %v837_v13 = vmax.f32 %v8507_v10, 0.0  ;;  %v525_v14 = vpop.f32.mrb[3].mxu0 }
  0xe5   :  { %v836_v16 = vmax.f32 %v525_v14, 0.0 }
  0xe6   :  { %901 = vst.msk [vmem:[#allocation2 + $0x39] sm:$0xff] %vm27_vm0, %v837_v13 }
  0xe7   :  { %900 = vst.msk [vmem:[#allocation2 + $0x31] sm:$0xff] %vm27_vm0, %v836_v16  ;;  %v8510_v17 = vpop.f32.mrb[4].mxu0 }
  0xe8   :  { %v839_v20 = vmax.f32 %v8510_v17, 0.0  ;;  %v535_v21 = vpop.f32.mrb[5].mxu0 }
  0xe9   :  { %v1093_v23 = vld [vmem:[#allocation2 + $0x22] sm:$0xff]  ;;  %v838_v25 = vmax.f32 %v535_v21, 0.0 }
  0xea   :  { %v1029_v24 = vld [vmem:[#allocation2 + $0x21] sm:$0xff]  ;;  %v1028_v27 = vld [vmem:[#allocation2 + $0x19] sm:$0xff]  ;;  %903 = vst.msk [vmem:[#allocation2 + $0x51] sm:$0xff] %vm27_vm0, %v839_v20 }
  0xeb   :  { %v1092_v26 = vld [vmem:[#allocation2 + $0x1a] sm:$0xff]  ;;  %v9147_v29 = vpack.i.bf16 %v1029_v24, %v1028_v27  ;;  %902 = vst.msk [vmem:[#allocation2 + $0x49] sm:$0xff] %vm27_vm0, %v838_v25  ;;  %v8513_v30 = vpop.f32.mrb[6].mxu0 }
  0xec   :  { %v9152_v28 = vpack.i.bf16 %v1093_v23, %v1092_v26  ;;  %v1154_v33 = vld [vmem:[#allocation2 + $0x18] sm:$0xff]  ;;  %v1155_v35 = vld [vmem:[#allocation2 + $0x20] sm:$0xff]  ;;  %v841_v36 = vmax.f32 %v8513_v30, 0.0  ;;  %v545_v37 = vpop.f32.mrb[7].mxu0 }
  0xed   :  { %9148 = vrot.lane.b32.xlu0 %v9147_v29, %s10745_s26  ;;  %v1476_v39 = vld [vmem:[#allocation2 + $0x3a] sm:$0xff]  ;;  %v840_v40 = vmax.f32 %v545_v37, 0.0  ;;  %v9157_v44 = vpack.i.bf16 %v1155_v35, %v1154_v33 }
  0xee   :  { %9153 = vrot.lane.b32.xlu1 %v9152_v28, %s10746_s9  ;;  %v1475_v41 = vld [vmem:[#allocation2 + $0x32] sm:$0xff]  ;;  %905 = vst.msk [vmem:[#allocation2 + $0x69] sm:$0xff] %vm27_vm0, %v841_v36 }
  0xef   :  { %v1030_v42 = vld [vmem:[#allocation2 + $0x31] sm:$0xff]  ;;  %v1031_v43 = vld [vmem:[#allocation2 + $0x39] sm:$0xff]  ;;  %8606 = vmatprep.mubr.msk.f32.mxu0 %vm27_vm0, %v1475_v41  ;;  %904 = vst.msk [vmem:[#allocation2 + $0x61] sm:$0xff] %vm27_vm0, %v840_v40  ;;  %v8516_v45 = vpop.f32.mrb[8].mxu0  ;;  %v9172_v52 = vpack.i.bf16 %v1476_v39, %v1475_v41 }
  0xf0   :  { %8607 = vmatmul.mubr.msk.f32.vlgmr.msra.gmra.mrb[64].mxu0 %vm27_vm0, %v1476_v39  ;;  %v843_v48 = vmax.f32 %v8516_v45, 0.0  ;;  %v555_v49 = vpop.f32.mrb[9].mxu0  ;;  %v9167_v51 = vpack.i.bf16 %v1031_v43, %v1030_v42  ;;  %v1156_v57 = vld [vmem:[#allocation2 + $0x30] sm:$0xff]  ;;  %v1157_v58 = vld [vmem:[#allocation2 + $0x38] sm:$0xff] }
  0xf1   :  { %9158 = vrot.lane.b32.xlu0 %v9157_v44, %s10747_s28  ;;  %v11385_v53 = vld [vmem:[#allocation2 + $0x52] sm:$0xff]  ;;  %v842_v54 = vmax.f32 %v555_v49, 0.0  ;;  %v9177_v63 = vpack.i.bf16 %v1157_v58, %v1156_v57 }
  0xf2   :  { %9163 = vrot.lane.b32.xlu1 %v9152_v28, %s10745_s26  ;;  %v11387_v55 = vld [vmem:[#allocation2 + $0x4a] sm:$0xff]  ;;  %907 = vst.msk [vmem:[#allocation2 + $0x81] sm:$0xff] %vm27_vm0, %v843_v48 }
  0xf3   :  { %8609 = vmatprep.mubr.msk.f32.mxu0 %vm27_vm0, %v11387_v55  ;;  %906 = vst.msk [vmem:[#allocation2 + $0x79] sm:$0xff] %vm27_vm0, %v842_v54  ;;  %v8519_v56 = vpop.f32.mrb[10].mxu0  ;;  %v1032_v4 = vld [vmem:[#allocation2 + $0x49] sm:$0xff]  ;;  %v1033_v5 = vld [vmem:[#allocation2 + $0x51] sm:$0xff]  ;;  %v9202_v28 = vpack.i.bf16 %v11385_v53, %v11387_v55 }
  0xf4   :  { %8610 = vmatmul.mubr.msk.f32.gmra.mrb[66].mxu0 %vm27_vm0, %v11385_v53  ;;  %v845_v59 = vmax.f32 %v8519_v56, 0.0  ;;  %v565_v60 = vpop.f32.mrb[11].mxu0  ;;  %v1158_v9 = vld [vmem:[#allocation2 + $0x48] sm:$0xff]  ;;  %v1159_v10 = vld [vmem:[#allocation2 + $0x50] sm:$0xff]  ;;  %v9197_v15 = vpack.i.bf16 %v1033_v5, %v1032_v4 }
  0xf5   :  { %9173 = vrot.lane.b32.xlu0 %v9172_v52, %s10746_s9  ;;  %v844_v61 = vmax.f32 %v565_v60, 0.0  ;;  %v11403_v0 = vld [vmem:[#allocation2 + $0x6a] sm:$0xff]  ;;  %v9207_v16 = vpack.i.bf16 %v1159_v10, %v1158_v9 }
  0xf6   :  { %9168 = vrot.lane.b32.xlu1 %v9167_v51, %s10745_s26  ;;  %v11398_v62 = vld [vmem:[#allocation2 + $0x62] sm:$0xff]  ;;  %909 = vst.msk [vmem:[#allocation2 + $0x99] sm:$0xff] %vm27_vm0, %v845_v59 }
  0xf7   :  { %8612 = vmatprep.mubr.msk.f32.mxu0 %vm27_vm0, %v11398_v62  ;;  %908 = vst.msk [vmem:[#allocation2 + $0x91] sm:$0xff] %vm27_vm0, %v844_v61  ;;  %v8522_v1 = vpop.f32.mrb[12].mxu0  ;;  %v1034_v25 = vld [vmem:[#allocation2 + $0x61] sm:$0xff]  ;;  %v1035_v26 = vld [vmem:[#allocation2 + $0x69] sm:$0xff]  ;;  %v9232_v40 = vpack.i.bf16 %v11403_v0, %v11398_v62 }
  0xf8   :  { %8613 = vmatmul.mubr.msk.f32.gmra.mrb[68].mxu0 %vm27_vm0, %v11403_v0  ;;  %v847_v2 = vmax.f32 %v8522_v1, 0.0  ;;  %v575_v3 = vpop.f32.mrb[13].mxu0  ;;  %v9227_v32 = vpack.i.bf16 %v1035_v26, %v1034_v25  ;;  %v1160_v43 = vld [vmem:[#allocation2 + $0x60] sm:$0xff]  ;;  %v1161_v44 = vld [vmem:[#allocation2 + $0x68] sm:$0xff] }
  0xf9   :  { %9183 = vrot.lane.b32.xlu0 %v9177_v63, %s10746_s9  ;;  %v11410_v7 = vld [vmem:[#allocation2 + $0x82] sm:$0xff]  ;;  %v846_v8 = vmax.f32 %v575_v3, 0.0  ;;  %v9237_v49 = vpack.i.bf16 %v1161_v44, %v1160_v43 }
  0xfa   :  { %9178 = vrot.lane.b32.xlu1 %v9177_v63, %s10747_s28  ;;  %v11412_v11 = vld [vmem:[#allocation2 + $0x7a] sm:$0xff]  ;;  %911 = vst.msk [vmem:[#allocation2 + $0xb1] sm:$0xff] %vm27_vm0, %v847_v2 }
  0xfb   :  { %8615 = vmatprep.mubr.msk.f32.mxu0 %vm27_vm0, %v11412_v11  ;;  %910 = vst.msk [vmem:[#allocation2 + $0xa9] sm:$0xff] %vm27_vm0, %v846_v8  ;;  %v8525_v12 = vpop.f32.mrb[14].mxu0  ;;  %v1036_v57 = vld [vmem:[#allocation2 + $0x79] sm:$0xff]  ;;  %v1037_v58 = vld [vmem:[#allocation2 + $0x81] sm:$0xff] }
  0xfc   :  { %8616 = vmatmul.mubr.msk.f32.gmra.mrb[70].mxu0 %vm27_vm0, %v11410_v7  ;;  %v849_v13 = vmax.f32 %v8525_v12, 0.0  ;;  %v585_v14 = vpop.f32.mrb[15].mxu0  ;;  %v1162_v61 = vld [vmem:[#allocation2 + $0x78] sm:$0xff]  ;;  %v1163_v62 = vld [vmem:[#allocation2 + $0x80] sm:$0xff]  ;;  %v9257_v4 = vpack.i.bf16 %v1037_v58, %v1036_v57 }
  0xfd   :  { %9193 = vrot.lane.b32.xlu0 %v9172_v52, %s10745_s26  ;;  %v848_v17 = vmax.f32 %v585_v14, 0.0  ;;  %v11427_v19 = vld [vmem:[#allocation2 + $0x9a] sm:$0xff]  ;;  %v9267_v5 = vpack.i.bf16 %v1163_v62, %v1162_v61  ;;  %v1506_v61 = vld [vmem:[#allocation2 + $0x1a2] sm:$0xff] }
  0xfe   :  { %9188 = vrot.lane.b32.xlu1 %v9167_v51, %s10747_s28  ;;  %v11422_v18 = vld [vmem:[#allocation2 + $0x92] sm:$0xff]  ;;  %913 = vst.msk [vmem:[#allocation2 + $0xc9] sm:$0xff] %vm27_vm0, %v849_v13  ;;  %v1505_v58 = vld [vmem:[#allocation2 + $0x19a] sm:$0xff] }
  0xff   :  { %8618 = vmatprep.mubr.msk.f32.mxu0 %vm27_vm0, %v11422_v18  ;;  %912 = vst.msk [vmem:[#allocation2 + $0xc1] sm:$0xff] %vm27_vm0, %v848_v17  ;;  %v8528_v20 = vpop.f32.mrb[16].mxu0  ;;  %v1164_v43 = vld [vmem:[#allocation2 + $0x90] sm:$0xff]  ;;  %v1165_v44 = vld [vmem:[#allocation2 + $0x98] sm:$0xff] }
 0x100   :  { %8619 = vmatmul.mubr.msk.f32.gmra.mrb[72].mxu0 %vm27_vm0, %v11427_v19  ;;  %v851_v21 = vmax.f32 %v8528_v20, 0.0  ;;  %v595_v22 = vpop.f32.mrb[17].mxu0  ;;  %v1038_v20 = vld [vmem:[#allocation2 + $0x91] sm:$0xff] }
 0x101   :  { %9208 = vrot.lane.b32.xlu0 %v9207_v16, %s10747_s28  ;;  %v11434_v23 = vld [vmem:[#allocation2 + $0xb2] sm:$0xff]  ;;  %v850_v24 = vmax.f32 %v595_v22, 0.0 }
 0x102   :  { %9198 = vrot.lane.b32.xlu1 %v9197_v15, %s10745_s26  ;;  %v11436_v27 = vld [vmem:[#allocation2 + $0xaa] sm:$0xff]  ;;  %915 = vst.msk [vmem:[#allocation2 + $0xe1] sm:$0xff] %vm27_vm0, %v851_v21  ;;  %v1039_v21 = vld [vmem:[#allocation2 + $0x99] sm:$0xff] }
 0x103   :  { %8621 = vmatprep.mubr.msk.f32.mxu0 %vm27_vm0, %v11436_v27  ;;  %914 = vst.msk [vmem:[#allocation2 + $0xd9] sm:$0xff] %vm27_vm0, %v850_v24  ;;  %v8531_v29 = vpop.f32.mrb[18].mxu0  ;;  %v9262_v24 = vpack.i.bf16 %v11410_v7, %v11412_v11  ;;  %v1040_v62 = vld [vmem:[#allocation2 + $0xa9] sm:$0xff] }
 0x104   :  { %8622 = vmatmul.mubr.msk.f32.gmra.mrb[74].mxu0 %vm27_vm0, %v11434_v23  ;;  %v853_v30 = vmax.f32 %v8531_v29, 0.0  ;;  %v605_v31 = vpop.f32.mrb[19].mxu0 }
 0x105   :  { %9218 = vrot.lane.b32.xlu0 %v9197_v15, %s10747_s28  ;;  %v852_v33 = vmax.f32 %v605_v31, 0.0  ;;  %v11453_v36 = vld [vmem:[#allocation2 + $0xca] sm:$0xff] }
 0x106   :  { %9203 = vrot.lane.b32.xlu1 %v9202_v28, %s10746_s9  ;;  %v11448_v35 = vld [vmem:[#allocation2 + $0xc2] sm:$0xff]  ;;  %917 = vst.msk [vmem:[#allocation2 + $0xf9] sm:$0xff] %vm27_vm0, %v853_v30  ;;  %v9287_v30 = vpack.i.bf16 %v1039_v21, %v1038_v20 }
 0x107   :  { %8624 = vmatprep.mubr.msk.f32.mxu0 %vm27_vm0, %v11448_v35  ;;  %916 = vst.msk [vmem:[#allocation2 + $0xf1] sm:$0xff] %vm27_vm0, %v852_v33  ;;  %v8534_v37 = vpop.f32.mrb[20].mxu0  ;;  %v1042_v21 = vld [vmem:[#allocation2 + $0xc1] sm:$0xff] }
 0x108   :  { %8625 = vmatmul.mubr.msk.f32.gmra.mrb[76].mxu0 %vm27_vm0, %v11453_v36  ;;  %v855_v38 = vmax.f32 %v8534_v37, 0.0  ;;  %v615_v39 = vpop.f32.mrb[21].mxu0 }
 0x109   :  { %9228 = vrot.lane.b32.xlu0 %v9227_v32, %s10745_s26  ;;  %v11462_v41 = vld [vmem:[#allocation2 + $0xe2] sm:$0xff]  ;;  %v854_v42 = vmax.f32 %v615_v39, 0.0  ;;  %v9292_v39 = vpack.i.bf16 %v11427_v19, %v11422_v18  ;;  %v9297_v18 = vpack.i.bf16 %v1165_v44, %v1164_v43 }
 0x10a   :  { %9213 = vrot.lane.b32.xlu1 %v9207_v16, %s10746_s9  ;;  %v11464_v45 = vld [vmem:[#allocation2 + $0xda] sm:$0xff]  ;;  %919 = vst.msk [vmem:[#allocation2 + $0x111] sm:$0xff] %vm27_vm0, %v855_v38 }
 0x10b   :  { %8627 = vmatprep.mubr.msk.f32.mxu0 %vm27_vm0, %v11464_v45  ;;  %918 = vst.msk [vmem:[#allocation2 + $0x109] sm:$0xff] %vm27_vm0, %v854_v42  ;;  %v8537_v46 = vpop.f32.mrb[22].mxu0 }
 0x10c   :  { %8628 = vmatmul.mubr.msk.f32.gmra.mrb[78].mxu0 %vm27_vm0, %v11462_v41  ;;  %v857_v47 = vmax.f32 %v8537_v46, 0.0  ;;  %v625_v48 = vpop.f32.mrb[23].mxu0 }
 0x10d   :  { %9233 = vrot.lane.b32.xlu0 %v9232_v40, %s10746_s9  ;;  %v1492_v50 = vld [vmem:[#allocation2 + $0xfa] sm:$0xff]  ;;  %v856_v51 = vmax.f32 %v625_v48, 0.0 }
 0x10e   :  { %9223 = vrot.lane.b32.xlu1 %v9202_v28, %s10745_s26  ;;  %v1491_v52 = vld [vmem:[#allocation2 + $0xf2] sm:$0xff]  ;;  %921 = vst.msk [vmem:[#allocation2 + $0x129] sm:$0xff] %vm27_vm0, %v857_v47 }
 0x10f   :  { %8630 = vmatprep.mubr.msk.f32.mxu0 %vm27_vm0, %v1491_v52  ;;  %v11476_v53 = vpack.i.bf16 %v1492_v50, %v1491_v52  ;;  %920 = vst.msk [vmem:[#allocation2 + $0x121] sm:$0xff] %vm27_vm0, %v856_v51  ;;  %v8540_v54 = vpop.f32.mrb[24].mxu0 }
 0x110   :  { %8631 = vmatmul.mubr.msk.f32.gmra.mrb[80].mxu0 %vm27_vm0, %v1492_v50  ;;  %v859_v55 = vmax.f32 %v8540_v54, 0.0  ;;  %v635_v56 = vpop.f32.mrb[25].mxu0 }
 0x111   :  { %9243 = vrot.lane.b32.xlu0 %v9237_v49, %s10746_s9  ;;  %v1494_v59 = vld [vmem:[#allocation2 + $0x112] sm:$0xff]  ;;  %v858_v60 = vmax.f32 %v635_v56, 0.0 }
 0x112   :  { %9238 = vrot.lane.b32.xlu1 %v9237_v49, %s10747_s28  ;;  %v1493_v63 = vld [vmem:[#allocation2 + $0x10a] sm:$0xff]  ;;  %923 = vst.msk [vmem:[#allocation2 + $0x141] sm:$0xff] %vm27_vm0, %v859_v55 }
 0x113   :  { %8633 = vmatprep.mubr.msk.f32.mxu0 %vm27_vm0, %v1493_v63  ;;  %v11484_v0 = vpack.i.bf16 %v1494_v59, %v1493_v63  ;;  %922 = vst.msk [vmem:[#allocation2 + $0x139] sm:$0xff] %vm27_vm0, %v858_v60  ;;  %v8543_v1 = vpop.f32.mrb[26].mxu0  ;;  %v1166_v63 = vld [vmem:[#allocation2 + $0xa8] sm:$0xff] }
 0x114   :  { %8634 = vmatmul.mubr.msk.f32.gmra.mrb[82].mxu0 %vm27_vm0, %v1494_v59  ;;  %v861_v2 = vmax.f32 %v8543_v1, 0.0  ;;  %v645_v3 = vpop.f32.mrb[27].mxu0  ;;  %v1041_v59 = vld [vmem:[#allocation2 + $0xb1] sm:$0xff] }
 0x115   :  { %9253 = vrot.lane.b32.xlu0 %v9232_v40, %s10745_s26  ;;  %v1496_v8 = vld [vmem:[#allocation2 + $0x12a] sm:$0xff]  ;;  %v860_v9 = vmax.f32 %v645_v3, 0.0 }
 0x116   :  { %9248 = vrot.lane.b32.xlu1 %v9227_v32, %s10747_s28  ;;  %v1495_v10 = vld [vmem:[#allocation2 + $0x122] sm:$0xff]  ;;  %925 = vst.msk [vmem:[#allocation2 + $0x159] sm:$0xff] %vm27_vm0, %v861_v2  ;;  %v1167_v1 = vld [vmem:[#allocation2 + $0xb0] sm:$0xff] }
 0x117   :  { %8636 = vmatprep.mubr.msk.f32.mxu0 %vm27_vm0, %v1495_v10  ;;  %v11492_v12 = vpack.i.bf16 %v1496_v8, %v1495_v10  ;;  %924 = vst.msk [vmem:[#allocation2 + $0x151] sm:$0xff] %vm27_vm0, %v860_v9  ;;  %v8546_v13 = vpop.f32.mrb[28].mxu0 }
 0x118   :  { %8637 = vmatmul.mubr.msk.f32.gmra.mrb[84].mxu0 %vm27_vm0, %v1496_v8  ;;  %v863_v14 = vmax.f32 %v8546_v13, 0.0  ;;  %v655_v15 = vpop.f32.mrb[29].mxu0  ;;  %v9327_v8 = vpack.i.bf16 %v1167_v1, %v1166_v63 }
 0x119   :  { %9268 = vrot.lane.b32.xlu0 %v9267_v5, %s10747_s28  ;;  %v1498_v16 = vld [vmem:[#allocation2 + $0x142] sm:$0xff]  ;;  %v862_v17 = vmax.f32 %v655_v15, 0.0 }
 0x11a   :  { %9258 = vrot.lane.b32.xlu1 %v9257_v4, %s10745_s26  ;;  %v1497_v22 = vld [vmem:[#allocation2 + $0x13a] sm:$0xff]  ;;  %927 = vst.msk [vmem:[#allocation2 + $0x171] sm:$0xff] %vm27_vm0, %v863_v14 }
 0x11b   :  { %8639 = vmatprep.mubr.msk.f32.mxu0 %vm27_vm0, %v1497_v22  ;;  %v11502_v25 = vpack.i.bf16 %v1498_v16, %v1497_v22  ;;  %926 = vst.msk [vmem:[#allocation2 + $0x169] sm:$0xff] %vm27_vm0, %v862_v17  ;;  %v8549_v26 = vpop.f32.mrb[30].mxu0  ;;  %v1043_v22 = vld [vmem:[#allocation2 + $0xc9] sm:$0xff] }
 0x11c   :  { %8640 = vmatmul.mubr.msk.f32.gmra.mrb[86].mxu0 %vm27_vm0, %v1498_v16  ;;  %v865_v28 = vmax.f32 %v8549_v26, 0.0  ;;  %v665_v29 = vpop.f32.mrb[31].mxu0 }
 0x11d   :  { %9278 = vrot.lane.b32.xlu0 %v9257_v4, %s10747_s28  ;;  %v1500_v31 = vld [vmem:[#allocation2 + $0x15a] sm:$0xff]  ;;  %v864_v32 = vmax.f32 %v665_v29, 0.0 }
 0x11e   :  { %9263 = vrot.lane.b32.xlu1 %v9262_v24, %s10746_s9  ;;  %v1499_v33 = vld [vmem:[#allocation2 + $0x152] sm:$0xff]  ;;  %929 = vst.msk [vmem:[#allocation2 + $0x189] sm:$0xff] %vm27_vm0, %v865_v28 }
 0x11f   :  { %8642 = vmatprep.mubr.msk.f32.mxu0 %vm27_vm0, %v1499_v33  ;;  %v11510_v7 = vpack.i.bf16 %v1500_v31, %v1499_v33  ;;  %928 = vst.msk [vmem:[#allocation2 + $0x181] sm:$0xff] %vm27_vm0, %v864_v32  ;;  %v8552_v11 = vpop.f32.mrb[32].mxu0 }
 0x120   :  { %8643 = vmatmul.mubr.msk.f32.gmra.mrb[88].mxu0 %vm27_vm0, %v1500_v31  ;;  %v867_v37 = vmax.f32 %v8552_v11, 0.0  ;;  %v675_v38 = vpop.f32.mrb[33].mxu0 }
 0x121   :  { %9288 = vrot.lane.b32.xlu0 %v9287_v30, %s10745_s26  ;;  %v1502_v40 = vld [vmem:[#allocation2 + $0x172] sm:$0xff]  ;;  %v866_v42 = vmax.f32 %v675_v38, 0.0 }
 0x122   :  { %9273 = vrot.lane.b32.xlu1 %v9267_v5, %s10746_s9  ;;  %v1501_v46 = vld [vmem:[#allocation2 + $0x16a] sm:$0xff]  ;;  %931 = vst.msk [vmem:[#allocation2 + $0x1d1] sm:$0xff] %vm27_vm0, %v867_v37  ;;  %v9317_v5 = vpack.i.bf16 %v1041_v59, %v1040_v62  ;;  %v1044_v59 = vld [vmem:[#allocation2 + $0xd9] sm:$0xff] }
 0x123   :  { %8645 = vmatprep.mubr.msk.f32.mxu0 %vm27_vm0, %v1501_v46  ;;  %930 = vst.msk [vmem:[#allocation2 + $0x1c9] sm:$0xff] %vm27_vm0, %v866_v42  ;;  %v11521_v47 = vpack.i.bf16 %v1502_v40, %v1501_v46  ;;  %v8555_v48 = vpop.f32.mrb[34].mxu0 }
 0x124   :  { %8646 = vmatmul.mubr.msk.f32.gmra.mrb[90].mxu0 %vm27_vm0, %v1502_v40  ;;  %v869_v49 = vmax.f32 %v8555_v48, 0.0  ;;  %v685_v50 = vpop.f32.mrb[35].mxu0  ;;  %v1169_v40 = vld [vmem:[#allocation2 + $0xc8] sm:$0xff] }
 0x125   :  { %9293 = vrot.lane.b32.xlu0 %v9292_v39, %s10746_s9  ;;  %v868_v19 = vmax.f32 %v685_v50, 0.0  ;;  %v11526_v51 = vld [vmem:[#allocation2 + $0x18a] sm:$0xff] }
 0x126   :  { %9283 = vrot.lane.b32.xlu1 %v9262_v24, %s10745_s26  ;;  %933 = vst.msk [vmem:[#allocation2 + $0x1e9] sm:$0xff] %vm27_vm0, %v869_v49  ;;  %v11529_v52 = vld [vmem:[#allocation2 + $0x182] sm:$0xff]  ;;  %v9322_v24 = vpack.i.bf16 %v11434_v23, %v11436_v27  ;;  %v9352_v27 = vpack.i.bf16 %v11453_v36, %v11448_v35 }
 0x127   :  { %932 = vst.msk [vmem:[#allocation2 + $0x1e1] sm:$0xff] %vm27_vm0, %v868_v19  ;;  %8648 = vmatprep.mubr.msk.f32.mxu0 %vm27_vm0, %v11529_v52  ;;  %v9602_v54 = vpack.i.bf16 %v11526_v51, %v11529_v52  ;;  %v8558_v55 = vpop.f32.mrb[36].mxu0 }
 0x128   :  { %8649 = vmatmul.mubr.msk.f32.gmra.mrb[92].mxu0 %vm27_vm0, %v11526_v51  ;;  %v871_v56 = vmax.f32 %v8558_v55, 0.0  ;;  %v695_v57 = vpop.f32.mrb[37].mxu0  ;;  %v1045_v55 = vld [vmem:[#allocation2 + $0xe1] sm:$0xff] }
 0x129   :  { %9303 = vrot.lane.b32.xlu0 %v9297_v18, %s10746_s9  ;;  %v870_v60 = vmax.f32 %v695_v57, 0.0  ;;  %8651 = vmatprep.mubr.msk.f32.mxu0 %vm27_vm0, %v1505_v58 }
 0x12a   :  { %9298 = vrot.lane.b32.xlu1 %v9297_v18, %s10747_s28  ;;  %935 = vst.msk [vmem:[#allocation2 + $0x201] sm:$0xff] %vm27_vm0, %v871_v56  ;;  %v11578_v56 = vpop.permute.xlu0 %9118 }
 0x12b   :  { %934 = vst.msk [vmem:[#allocation2 + $0x1f9] sm:$0xff] %vm27_vm0, %v870_v60  ;;  %v8561_v2 = vpop.f32.mrb[38].mxu0  ;;  %v1170_v60 = vld [vmem:[#allocation2 + $0xd8] sm:$0xff] }
 0x12c   :  { %v873_v3 = vmax.f32 %v8561_v2, 0.0  ;;  %8652 = vmatmul.mubr.msk.f32.gmra.mrb[94].mxu0 %vm27_vm0, %v1506_v61  ;;  %v705_v4 = vpop.f32.mrb[39].mxu0  ;;  %v1171_v61 = vld [vmem:[#allocation2 + $0xe0] sm:$0xff]  ;;  %v9377_v2 = vpack.i.bf16 %v1045_v55, %v1044_v59  ;;  %v1174_v59 = vld [vmem:[#allocation2 + $0x108] sm:$0xff] }
 0x12d   :  { %9313 = vrot.lane.b32.xlu0 %v9292_v39, %s10745_s26  ;;  %v1127_v9 = vld [vmem:[#allocation2 + $0x1ea] sm:$0xff]  ;;  %v872_v10 = vmax.f32 %v705_v4, 0.0  ;;  %v1168_v39 = vld [vmem:[#allocation2 + $0xc0] sm:$0xff] }
 0x12e   :  { %9308 = vrot.lane.b32.xlu1 %v9287_v30, %s10747_s28  ;;  %v1126_v13 = vld [vmem:[#allocation2 + $0x1e2] sm:$0xff]  ;;  %937 = vst.msk [vmem:[#allocation2 + $0x219] sm:$0xff] %vm27_vm0, %v873_v3  ;;  %v9347_v30 = vpack.i.bf16 %v1043_v22, %v1042_v21  ;;  %v9357_v35 = vpack.i.bf16 %v1169_v40, %v1168_v39  ;;  %v9387_v3 = vpack.i.bf16 %v1171_v61, %v1170_v60  ;;  %v1175_v60 = vld [vmem:[#allocation2 + $0x110] sm:$0xff] }
 0x12f   :  { %v11547_v14 = vpack.i.bf16 %v1127_v9, %v1126_v13  ;;  %936 = vst.msk [vmem:[#allocation2 + $0x211] sm:$0xff] %vm27_vm0, %v872_v10  ;;  %v8564_v15 = vpop.f32.mrb[40].mxu0  ;;  %8654 = vmatprep.mubr.msk.f32.mxu0 %vm27_vm0, %v1126_v13 }
 0x130   :  { %v875_v16 = vmax.f32 %v8564_v15, 0.0  ;;  %v715_v17 = vpop.f32.mrb[41].mxu0  ;;  %8655 = vmatmul.mubr.msk.f32.gmra.mrb[96].mxu0 %vm27_vm0, %v1127_v9  ;;  %v1046_v15 = vld [vmem:[#allocation2 + $0xf1] sm:$0xff] }
 0x131   :  { %9328 = vrot.lane.b32.xlu0 %v9327_v8, %s10747_s28  ;;  %v874_v20 = vmax.f32 %v715_v17, 0.0  ;;  %v1510_v23 = vld [vmem:[#allocation2 + $0x202] sm:$0xff]  ;;  %v9382_v17 = vpack.i.bf16 %v11462_v41, %v11464_v45 }
 0x132   :  { %9318 = vrot.lane.b32.xlu1 %v9317_v5, %s10745_s26  ;;  %939 = vst.msk [vmem:[#allocation2 + $0x231] sm:$0xff] %vm27_vm0, %v875_v16  ;;  %v1509_v37 = vld [vmem:[#allocation2 + $0x1fa] sm:$0xff] }
 0x133   :  { %938 = vst.msk [vmem:[#allocation2 + $0x229] sm:$0xff] %vm27_vm0, %v874_v20  ;;  %v8567_v26 = vpop.f32.mrb[42].mxu0  ;;  %8657 = vmatprep.mubr.msk.f32.mxu0 %vm27_vm0, %v1509_v37  ;;  %v11570_v46 = vpack.i.bf16 %v1510_v23, %v1509_v37  ;;  %v1047_v16 = vld [vmem:[#allocation2 + $0xf9] sm:$0xff] }
 0x134   :  { %v877_v28 = vmax.f32 %v8567_v26, 0.0  ;;  %v725_v29 = vpop.f32.mrb[43].mxu0  ;;  %8658 = vmatmul.mubr.msk.f32.gmra.mrb[98].mxu0 %vm27_vm0, %v1510_v23  ;;  %v9407_v26 = vpack.i.bf16 %v1047_v16, %v1046_v15  ;;  %v1173_v37 = vld [vmem:[#allocation2 + $0xf8] sm:$0xff] }
 0x135   :  { %9338 = vrot.lane.b32.xlu0 %v9317_v5, %s10747_s28  ;;  %v876_v31 = vmax.f32 %v725_v29, 0.0  ;;  %v1131_v19 = vld [vmem:[#allocation2 + $0x21a] sm:$0xff]  ;;  %v11589_v5 = vpop.permute.xlu0 %9123 }
 0x136   :  { %9323 = vrot.lane.b32.xlu1 %v9322_v24, %s10746_s9  ;;  %941 = vst.msk [vmem:[#allocation2 + $0x249] sm:$0xff] %vm27_vm0, %v877_v28  ;;  %v1130_v18 = vld [vmem:[#allocation2 + $0x212] sm:$0xff] }
 0x137   :  { %940 = vst.msk [vmem:[#allocation2 + $0x241] sm:$0xff] %vm27_vm0, %v876_v31  ;;  %v8570_v32 = vpop.f32.mrb[44].mxu0  ;;  %v11580_v58 = vpack.i.bf16 %v1131_v19, %v1130_v18  ;;  %8660 = vmatprep.mubr.msk.f32.mxu0 %vm27_vm0, %v1130_v18  ;;  %v1049_v18 = vld [vmem:[#allocation2 + $0x111] sm:$0xff] }
 0x138   :  { %v879_v33 = vmax.f32 %v8570_v32, 0.0  ;;  %v735_v11 = vpop.f32.mrb[45].mxu0  ;;  %8661 = vmatmul.mubr.msk.f32.gmra.mrb[100].mxu0 %vm27_vm0, %v1131_v19 }
 0x139   :  { %9348 = vrot.lane.b32.xlu0 %v9347_v30, %s10745_s26  ;;  %v878_v38 = vmax.f32 %v735_v11, 0.0  ;;  %v11600_v28 = vpop.permute.xlu0 %9128  ;;  %v1172_v11 = vld [vmem:[#allocation2 + $0xf0] sm:$0xff] }
 0x13a   :  { %9333 = vrot.lane.b32.xlu1 %v9327_v8, %s10746_s9  ;;  %943 = vst.msk [vmem:[#allocation2 + $0x261] sm:$0xff] %vm27_vm0, %v879_v33  ;;  %v9417_v40 = vpack.i.bf16 %v1173_v37, %v1172_v11  ;;  %v9130_v37 = vunpack.i.l.bf16 %v11600_v28 }
 0x13b   :  { %942 = vst.msk [vmem:[#allocation2 + $0x259] sm:$0xff] %vm27_vm0, %v878_v38  ;;  %v8573_v42 = vpop.f32.mrb[46].mxu0 }
 0x13c   :  { %v881_v43 = vmax.f32 %v8573_v42, 0.0  ;;  %v745_v44 = vpop.f32.mrb[47].mxu0 }
 0x13d   :  { %9353 = vrot.lane.b32.xlu0 %v9352_v27, %s10746_s9  ;;  %v880_v36 = vmax.f32 %v745_v44, 0.0  ;;  %v11611_v23 = vpop.permute.xlu0 %9133 }
 0x13e   :  { %9343 = vrot.lane.b32.xlu1 %v9322_v24, %s10745_s26  ;;  %945 = vst.msk [vmem:[#allocation2 + $0x279] sm:$0xff] %vm27_vm0, %v881_v43  ;;  %v1513_v24 = vld [vmem:[#allocation2 + $0x22a] sm:$0xff] }
 0x13f   :  { %944 = vst.msk [vmem:[#allocation2 + $0x271] sm:$0xff] %vm27_vm0, %v880_v36  ;;  %v8576_v48 = vpop.f32.mrb[48].mxu0  ;;  %8663 = vmatprep.mubr.msk.f32.mxu0 %vm27_vm0, %v1513_v24  ;;  %v1134_v36 = vld [vmem:[#allocation2 + $0x242] sm:$0xff] }
 0x140   :  { %v883_v49 = vmax.f32 %v8576_v48, 0.0  ;;  %v755_v50 = vpop.f32.mrb[49].mxu0  ;;  %v1135_v48 = vld [vmem:[#allocation2 + $0x24a] sm:$0xff] }
 0x141   :  { %9363 = vrot.lane.b32.xlu0 %v9357_v35, %s10746_s9  ;;  %v882_v57 = vmax.f32 %v755_v50, 0.0  ;;  %v11623_v50 = vpop.permute.xlu0 %9143  ;;  %v11625_v55 = vpack.i.bf16 %v1135_v48, %v1134_v36 }
 0x142   :  { %9358 = vrot.lane.b32.xlu1 %v9357_v35, %s10747_s28  ;;  %947 = vst.msk [vmem:[#allocation2 + $0x291] sm:$0xff] %vm27_vm0, %v883_v49  ;;  %v11621_v49 = vpop.permute.xlu1 %9138 }
 0x143   :  { %946 = vst.msk [vmem:[#allocation2 + $0x289] sm:$0xff] %vm27_vm0, %v882_v57  ;;  %v8579_v62 = vpop.f32.mrb[50].mxu0  ;;  %v1048_v57 = vld [vmem:[#allocation2 + $0x109] sm:$0xff] }
 0x144   :  { %v885_v63 = vmax.f32 %v8579_v62, 0.0  ;;  %v765_v1 = vpop.f32.mrb[51].mxu0 }
 0x145   :  { %9373 = vrot.lane.b32.xlu0 %v9352_v27, %s10745_s26  ;;  %v884_v4 = vmax.f32 %v765_v1, 0.0  ;;  %v9437_v1 = vpack.i.bf16 %v1049_v18, %v1048_v57 }
 0x146   :  { %9368 = vrot.lane.b32.xlu1 %v9347_v30, %s10747_s28  ;;  %949 = vst.msk [vmem:[#allocation2 + $0x2a9] sm:$0xff] %vm27_vm0, %v885_v63  ;;  %v1514_v30 = vld [vmem:[#allocation2 + $0x232] sm:$0xff] }
 0x147   :  { %948 = vst.msk [vmem:[#allocation2 + $0x2a1] sm:$0xff] %vm27_vm0, %v884_v4  ;;  %v8582_v8 = vpop.f32.mrb[52].mxu0  ;;  %8664 = vmatmul.mubr.msk.f32.gmra.mrb[102].mxu0 %vm27_vm0, %v1514_v30  ;;  %v11608_v33 = vpack.i.bf16 %v1514_v30, %v1513_v24  ;;  %v1176_v24 = vld [vmem:[#allocation2 + $0x120] sm:$0xff]  ;;  %v1138_v18 = vld [vmem:[#allocation2 + $0x272] sm:$0xff] }
 0x148   :  { %v887_v9 = vmax.f32 %v8582_v8, 0.0  ;;  %v775_v10 = vpop.f32.mrb[53].mxu0  ;;  %8666 = vmatprep.mubr.msk.f32.mxu0 %vm27_vm0, %v1134_v36 }
 0x149   :  { %9388 = vrot.lane.b32.xlu0 %v9387_v3, %s10747_s28  ;;  %v886_v13 = vmax.f32 %v775_v10, 0.0  ;;  %v1051_v10 = vld [vmem:[#allocation2 + $0x129] sm:$0xff] }
 0x14a   :  { %9378 = vrot.lane.b32.xlu1 %v9377_v2, %s10745_s26  ;;  %951 = vst.msk [vmem:[#allocation2 + $0x2c1] sm:$0xff] %vm27_vm0, %v887_v9  ;;  %v1050_v9 = vld [vmem:[#allocation2 + $0x121] sm:$0xff] }
 0x14b   :  { %950 = vst.msk [vmem:[#allocation2 + $0x2b9] sm:$0xff] %vm27_vm0, %v886_v13  ;;  %v8585_v20 = vpop.f32.mrb[54].mxu0  ;;  %8667 = vmatmul.mubr.msk.f32.gmra.mrb[104].mxu0 %vm27_vm0, %v1135_v48  ;;  %v9467_v16 = vpack.i.bf16 %v1051_v10, %v1050_v9  ;;  %v963_v48 = vld [vmem:[#allocation2 + $0x8] sm:$0xff]  ;;  %v1179_v9 = vld [vmem:[#allocation2 + $0x140] sm:$0xff] }
 0x14c   :  { %v889_v21 = vmax.f32 %v8585_v20, 0.0  ;;  %v785_v22 = vpop.f32.mrb[55].mxu0 }
 0x14d   :  { %9398 = vrot.lane.b32.xlu0 %v9377_v2, %s10747_s28  ;;  %v888_v29 = vmax.f32 %v785_v22, 0.0  ;;  %v9447_v2 = vpack.i.bf16 %v1175_v60, %v1174_v59  ;;  %v1219_v59 = vld [vmem:[#allocation2 + $0x21] sm:$0xff] }
 0x14e   :  { %9383 = vrot.lane.b32.xlu1 %v9382_v17, %s10746_s9  ;;  %953 = vst.msk [vmem:[#allocation2 + $0x2d9] sm:$0xff] %vm27_vm0, %v889_v21  ;;  %v1053_v60 = vld [vmem:[#allocation2 + $0x141] sm:$0xff] }
 0x14f   :  { %952 = vst.msk [vmem:[#allocation2 + $0x2d1] sm:$0xff] %vm27_vm0, %v888_v29  ;;  %v8588_v41 = vpop.f32.mrb[56].mxu0  ;;  %v9120_v29 = vunpack.i.l.bf16 %v11578_v56 }
 0x150   :  { %v891_v45 = vmax.f32 %v8588_v41, 0.0  ;;  %v795_v31 = vpop.f32.mrb[57].mxu0 }
 0x151   :  { %9408 = vrot.lane.b32.xlu0 %v9407_v26, %s10745_s26  ;;  %v890_v32 = vmax.f32 %v795_v31, 0.0  ;;  %v962_v31 = vld [vmem:[#allocation2] sm:$0xff] }
 0x152   :  { %9393 = vrot.lane.b32.xlu1 %v9387_v3, %s10746_s9  ;;  %955 = vst.msk [vmem:[#allocation2 + $0x2f1] sm:$0xff] %vm27_vm0, %v891_v45 }
 0x153   :  { %954 = vst.msk [vmem:[#allocation2 + $0x2e9] sm:$0xff] %vm27_vm0, %v890_v32  ;;  %v8591_v27 = vpop.f32.mrb[58].mxu0 }
 0x154   :  { %v893_v38 = vmax.f32 %v8591_v27, 0.0  ;;  %v805_v39 = vpop.f32.mrb[59].mxu0  ;;  %v9121_v27 = vunpack.i.h.bf16 %v11578_v56 }
 0x155   :  { %9413 = vrot.lane.b32.xlu0 %v11476_v53, %s10746_s9  ;;  %v892_v42 = vmax.f32 %v805_v39, 0.0 }
 0x156   :  { %9403 = vrot.lane.b32.xlu1 %v9382_v17, %s10745_s26  ;;  %957 = vst.msk [vmem:[#allocation2 + $0x309] sm:$0xff] %vm27_vm0, %v893_v38  ;;  %v1518_v17 = vld [vmem:[#allocation2 + $0x262] sm:$0xff] }
 0x157   :  { %956 = vst.msk [vmem:[#allocation2 + $0x301] sm:$0xff] %vm27_vm0, %v892_v42  ;;  %v8594_v43 = vpop.f32.mrb[60].mxu0 }
 0x158   :  { %v895_v44 = vmax.f32 %v8594_v43, 0.0  ;;  %v815_v35 = vpop.f32.mrb[61].mxu0  ;;  %v1218_v43 = vld [vmem:[#allocation2 + $0x19] sm:$0xff] }
 0x159   :  { %9423 = vrot.lane.b32.xlu0 %v9417_v40, %s10746_s9  ;;  %v894_v19 = vmax.f32 %v815_v35, 0.0 }
 0x15a   :  { %9418 = vrot.lane.b32.xlu1 %v9417_v40, %s10747_s28  ;;  %959 = vst.msk [vmem:[#allocation2 + $0x321] sm:$0xff] %vm27_vm0, %v895_v44  ;;  %v3075_v44 = vsel %vm27_vm0, %v962_v31, %v9120_v29 }
 0x15b   :  { %958 = vst.msk [vmem:[#allocation2 + $0x319] sm:$0xff] %vm27_vm0, %v894_v19  ;;  %v8597_v61 = vpop.f32.mrb[62].mxu0  ;;  %v1139_v19 = vld [vmem:[#allocation2 + $0x27a] sm:$0xff] }
 0x15c   :  { %v897_v62 = vmax.f32 %v8597_v61, 0.0  ;;  %v825_v63 = vpop.f32.mrb[63].mxu0  ;;  %v11674_v61 = vpack.i.bf16 %v1139_v19, %v1138_v18 }
 0x15d   :  { %9433 = vrot.lane.b32.xlu0 %v11476_v53, %s10745_s26  ;;  %v896_v3 = vmax.f32 %v825_v63, 0.0  ;;  %v1517_v53 = vld [vmem:[#allocation2 + $0x25a] sm:$0xff] }
 0x15e   :  { %9428 = vrot.lane.b32.xlu1 %v9407_v26, %s10747_s28  ;;  %961 = vst.msk [vmem:[#allocation2 + $0x339] sm:$0xff] %vm27_vm0, %v897_v62  ;;  %8669 = vmatprep.mubr.msk.f32.mxu0 %vm27_vm0, %v1517_v53  ;;  %v11655_v22 = vpack.i.bf16 %v1518_v17, %v1517_v53  ;;  %v1177_v26 = vld [vmem:[#allocation2 + $0x128] sm:$0xff]  ;;  %v9131_v62 = vunpack.i.h.bf16 %v11600_v28 }
 0x15f   :  { %v11637_v8 = vpop.permute.xlu0 %9148  ;;  %960 = vst.msk [vmem:[#allocation2 + $0x331] sm:$0xff] %vm27_vm0, %v896_v3  ;;  %8670 = vmatmul.mubr.msk.f32.gmra.mrb[106].mxu0 %vm27_vm0, %v1518_v17  ;;  %v9477_v11 = vpack.i.bf16 %v1177_v26, %v1176_v24  ;;  %v1178_v3 = vld [vmem:[#allocation2 + $0x138] sm:$0xff]  ;;  %v3076_v24 = vsel %vm27_vm0, %v963_v48, %v9121_v27 }
 0x160   :  { %v11635_v4 = vpop.permute.xlu1 %9153  ;;  %8672 = vmatprep.mubr.msk.f32.mxu0 %vm27_vm0, %v1138_v18  ;;  %v1055_v27 = vld [vmem:[#allocation2 + $0x159] sm:$0xff]  ;;  %v1220_v48 = vld [vmem:[#allocation2 + $0x31] sm:$0xff] }
 0x161   :  { %9448 = vrot.lane.b32.xlu0 %v9447_v2, %s10747_s28  ;;  %v964_v18 = vld [vmem:[#allocation2 + $0x18] sm:$0xff] }
 0x162   :  { %9438 = vrot.lane.b32.xlu1 %v9437_v1, %s10745_s26 }
 0x163   :  { %v11642_v15 = vpop.permute.xlu0 %9158  ;;  %8673 = vmatmul.mubr.msk.f32.gmra.mrb[108].mxu0 %vm27_vm0, %v1139_v19  ;;  %v1521_v19 = vld [vmem:[#allocation2 + $0x28a] sm:$0xff] }
 0x164   :  { %v9164_v13 = vpop.permute.xlu1 %9163  ;;  %v9160_v39 = vunpack.i.l.bf16 %v11642_v15  ;;  %v9161_v10 = vunpack.i.h.bf16 %v11642_v15  ;;  %8675 = vmatprep.mubr.msk.f32.mxu0 %vm27_vm0, %v1521_v19 }
 0x165   :  { %9458 = vrot.lane.b32.xlu0 %v9437_v1, %s10747_s28  ;;  %v9165_v45 = vunpack.i.l.bf16 %v9164_v13  ;;  %v9166_v38 = vunpack.i.h.bf16 %v9164_v13  ;;  %v3139_v1 = vsel %vm108_vm3, %v3075_v44, %v9130_v37  ;;  %v1054_v37 = vld [vmem:[#allocation2 + $0x151] sm:$0xff]  ;;  %v9155_v44 = vunpack.i.l.bf16 %v11635_v4 }
 0x166   :  { %9443 = vrot.lane.b32.xlu1 %v11484_v0, %s10746_s9  ;;  %v3204_v17 = vsel %vm3203_vm4, %v3139_v1, %v9160_v39 }
 0x167   :  { %v11650_v21 = vpop.permute.xlu0 %9173  ;;  %v3269_v28 = vsel %vm27_vm0, %v1219_v59, %v9166_v38 }
 0x168   :  { %v11648_v20 = vpop.permute.xlu1 %9168 }
 0x169   :  { %9468 = vrot.lane.b32.xlu0 %v9467_v16, %s10745_s26 }
 0x16a   :  { %9453 = vrot.lane.b32.xlu1 %v9447_v2, %s10746_s9  ;;  %v1052_v2 = vld [vmem:[#allocation2 + $0x139] sm:$0xff] }
 0x16b   :  { %v9184_v41 = vpop.permute.xlu0 %9183  ;;  %v9497_v29 = vpack.i.bf16 %v1053_v60, %v1052_v2  ;;  %v1221_v60 = vld [vmem:[#allocation2 + $0x39] sm:$0xff] }
 0x16c   :  { %v11658_v30 = vpop.permute.xlu1 %9178  ;;  %v9185_v32 = vunpack.i.l.bf16 %v9184_v41  ;;  %v9186_v35 = vunpack.i.h.bf16 %v9184_v41  ;;  %v9507_v41 = vpack.i.bf16 %v1179_v9, %v1178_v3 }
 0x16d   :  { %9473 = vrot.lane.b32.xlu0 %v11492_v12, %s10746_s9 }
 0x16e   :  { %9463 = vrot.lane.b32.xlu1 %v11484_v0, %s10745_s26  ;;  %v3268_v0 = vsel %vm27_vm0, %v1218_v43, %v9165_v45  ;;  %v3333_v26 = vsel %vm108_vm3, %v3269_v28, %v9186_v35  ;;  %v3140_v45 = vsel %vm108_vm3, %v3076_v24, %v9131_v62  ;;  %v11705_v43 = vpack.i.bf16 %v1055_v27, %v1054_v37  ;;  %v965_v24 = vld [vmem:[#allocation2 + $0x20] sm:$0xff] }
 0x16f   :  { %v11667_v42 = vpop.permute.xlu0 %9193  ;;  %v3332_v56 = vsel %vm108_vm3, %v3268_v0, %v9185_v32  ;;  %v9151_v35 = vunpack.i.h.bf16 %v11637_v8  ;;  %v9170_v37 = vunpack.i.l.bf16 %v11648_v20 }
 0x170   :  { %v9189_v40 = vpop.permute.xlu1 %9188  ;;  %v9195_v38 = vunpack.i.l.bf16 %v11667_v42 }
 0x171   :  { %v9190_v36 = vunpack.i.l.bf16 %v9189_v40  ;;  %v9191_v57 = vunpack.i.h.bf16 %v9189_v40  ;;  %9483 = vrot.lane.b32.xlu0 %v9477_v11, %s10746_s9 }
 0x172   :  { %9478 = vrot.lane.b32.xlu1 %v9477_v11, %s10747_s28  ;;  %v3205_v11 = vsel %vm3203_vm4, %v3140_v45, %v9161_v10  ;;  %v9156_v10 = vunpack.i.h.bf16 %v11635_v4 }
 0x173   :  { %v3396_v63 = vsel %vm3203_vm4, %v3332_v56, %v9190_v36  ;;  %v11683_v53 = vpop.permute.xlu0 %9208  ;;  %v3397_v15 = vsel %vm3203_vm4, %v3333_v26, %v9191_v57  ;;  %v9180_v57 = vunpack.i.l.bf16 %v11658_v30  ;;  %v9181_v26 = vunpack.i.h.bf16 %v11658_v30 }
 0x174   :  { %v11681_v13 = vpop.permute.xlu1 %9198  ;;  %3759 = vmatprep.mubr.f32.mxu1 %v3396_v63  ;;  %v1522_v63 = vld [vmem:[#allocation2 + $0x292] sm:$0xff] }
 0x175   :  { %3760 = vmatmul.mubr.f32.vlgmr.msra.gmra.mrb[0].mxu1 %v3204_v17  ;;  %9493 = vrot.lane.b32.xlu0 %v11492_v12, %s10745_s26  ;;  %v9196_v12 = vunpack.i.h.bf16 %v11667_v42  ;;  %v3270_v42 = vsel %vm27_vm0, %v1220_v48, %v9195_v38  ;;  %v11733_v45 = vpack.i.bf16 %v1522_v63, %v1521_v19 }
 0x176   :  { %9488 = vrot.lane.b32.xlu1 %v9467_v16, %s10747_s28  ;;  %3764 = vmatprep.mubr.f32.mxu1 %v3397_v15  ;;  %v9150_v16 = vunpack.i.l.bf16 %v11637_v8 }
 0x177   :  { %v9219_v32 = vpop.permute.xlu0 %9218  ;;  %v3271_v62 = vsel %vm27_vm0, %v1221_v60, %v9196_v12  ;;  %8676 = vmatmul.mubr.msk.f32.gmra.mrb[110].mxu0 %vm27_vm0, %v1522_v63  ;;  %v1142_v60 = vld [vmem:[#allocation2 + $0x2a2] sm:$0xff]  ;;  %v1223_v63 = vld [vmem:[#allocation2 + $0x51] sm:$0xff] }
 0x178   :  { %v11695_v31 = vpop.permute.xlu1 %9203  ;;  %v9220_v56 = vunpack.i.l.bf16 %v9219_v32  ;;  %v3077_v59 = vsel %vm27_vm0, %v964_v18, %v9150_v16  ;;  %v9221_v17 = vunpack.i.h.bf16 %v9219_v32  ;;  %v1180_v32 = vld [vmem:[#allocation2 + $0x150] sm:$0xff]  ;;  %8678 = vmatprep.mubr.msk.f32.mxu0 %vm27_vm0, %v1142_v60 }
 0x179   :  { %3765 = vmatmul.mubr.f32.gmra.mrb[2].mxu1 %v3205_v11  ;;  %9508 = vrot.lane.b32.xlu0 %v9507_v41, %s10747_s28  ;;  %v3141_v28 = vsel %vm108_vm3, %v3077_v59, %v9155_v44  ;;  %v1181_v11 = vld [vmem:[#allocation2 + $0x158] sm:$0xff]  ;;  %v9175_v44 = vunpack.i.l.bf16 %v11650_v21 }
 0x17a   :  { %9498 = vrot.lane.b32.xlu1 %v9497_v29, %s10745_s26  ;;  %v3206_v15 = vsel %vm3203_vm4, %v3141_v28, %v9180_v57 }
 0x17b   :  { %v11703_v40 = vpop.permute.xlu0 %9228 }
 0x17c   :  { %v9214_v39 = vpop.permute.xlu1 %9213  ;;  %v9231_v51 = vunpack.i.h.bf16 %v11703_v40 }
 0x17d   :  { %v9216_v36 = vunpack.i.h.bf16 %v9214_v39  ;;  %v9215_v0 = vunpack.i.l.bf16 %v9214_v39  ;;  %9518 = vrot.lane.b32.xlu0 %v9497_v29, %s10747_s28  ;;  %v3078_v29 = vsel %vm27_vm0, %v965_v24, %v9151_v35  ;;  %v9537_v39 = vpack.i.bf16 %v1181_v11, %v1180_v32  ;;  %v966_v35 = vld [vmem:[#allocation2 + $0x30] sm:$0xff] }
 0x17e   :  { %9503 = vrot.lane.b32.xlu1 %v11502_v25, %s10746_s9  ;;  %v3142_v16 = vsel %vm108_vm3, %v3078_v29, %v9156_v10  ;;  %v3079_v57 = vsel %vm27_vm0, %v966_v35, %v9170_v37  ;;  %v9176_v10 = vunpack.i.h.bf16 %v11650_v21  ;;  %v1056_v24 = vld [vmem:[#allocation2 + $0x169] sm:$0xff]  ;;  %v9211_v29 = vunpack.i.h.bf16 %v11683_v53 }
 0x17f   :  { %v3334_v8 = vsel %vm108_vm3, %v3270_v42, %v9215_v0  ;;  %v11720_v2 = vpop.permute.xlu0 %9233  ;;  %v3335_v9 = vsel %vm108_vm3, %v3271_v62, %v9216_v36  ;;  %v3207_v12 = vsel %vm3203_vm4, %v3142_v16, %v9181_v26  ;;  %v9171_v36 = vunpack.i.h.bf16 %v11648_v20  ;;  %v1182_v26 = vld [vmem:[#allocation2 + $0x168] sm:$0xff] }
 0x180   :  { %v11718_v1 = vpop.permute.xlu1 %9223  ;;  %v3398_v3 = vsel %vm3203_vm4, %v3334_v8, %v9220_v56  ;;  %v3399_v4 = vsel %vm3203_vm4, %v3335_v9, %v9221_v17  ;;  %v9210_v0 = vunpack.i.l.bf16 %v11683_v53  ;;  %v1143_v8 = vld [vmem:[#allocation2 + $0x2aa] sm:$0xff]  ;;  %v3143_v28 = vsel %vm108_vm3, %v3079_v57, %v9175_v44 }
 0x181   :  { %3769 = vmatprep.mubr.f32.mxu1 %v3398_v3  ;;  %9528 = vrot.lane.b32.xlu0 %v11705_v43, %s10745_s26  ;;  %v9225_v27 = vunpack.i.l.bf16 %v11718_v1  ;;  %v9226_v48 = vunpack.i.h.bf16 %v11718_v1  ;;  %v967_v1 = vld [vmem:[#allocation2 + $0x38] sm:$0xff]  ;;  %v11757_v9 = vpack.i.bf16 %v1143_v8, %v1142_v60 }
 0x182   :  { %9513 = vrot.lane.b32.xlu1 %v9507_v41, %s10746_s9  ;;  %3770 = vmatmul.mubr.f32.gmra.mrb[4].mxu1 %v3206_v15  ;;  %v1057_v3 = vld [vmem:[#allocation2 + $0x171] sm:$0xff]  ;;  %v3208_v11 = vsel %vm3203_vm4, %v3143_v28, %v9210_v0  ;;  %v3080_v37 = vsel %vm27_vm0, %v967_v1, %v9171_v36  ;;  %v1376_v36 = vld [vmem:[#allocation2 + $0x188] sm:$0xff]  ;;  %v9200_v0 = vunpack.i.l.bf16 %v11681_v13 }
 0x183   :  { %3774 = vmatprep.mubr.f32.mxu1 %v3399_v4  ;;  %v9244_v41 = vpop.permute.xlu0 %9243  ;;  %v1183_v15 = vld [vmem:[#allocation2 + $0x170] sm:$0xff]  ;;  %v3273_v21 = vsel %vm27_vm0, %v1223_v63, %v9226_v48  ;;  %8679 = vmatmul.mubr.msk.f32.gmra.mrb[112].mxu0 %vm27_vm0, %v1143_v8  ;;  %v968_v1 = vld [vmem:[#allocation2 + $0x48] sm:$0xff] }
 0x184   :  { %v11737_v30 = vpop.permute.xlu1 %9238  ;;  %v9245_v38 = vunpack.i.l.bf16 %v9244_v41  ;;  %v9246_v56 = vunpack.i.h.bf16 %v9244_v41  ;;  %v9567_v16 = vpack.i.bf16 %v1183_v15, %v1182_v26  ;;  %v3081_v15 = vsel %vm27_vm0, %v968_v1, %v9200_v0 }
 0x185   :  { %9533 = vrot.lane.b32.xlu0 %v11510_v7, %s10746_s9  ;;  %v9240_v60 = vunpack.i.l.bf16 %v11737_v30  ;;  %v9230_v0 = vunpack.i.l.bf16 %v11703_v40  ;;  %v9236_v40 = vunpack.i.h.bf16 %v11720_v2 }
 0x186   :  { %9523 = vrot.lane.b32.xlu1 %v11502_v25, %s10745_s26  ;;  %3775 = vmatmul.mubr.f32.gmra.mrb[6].mxu1 %v3207_v12  ;;  %v1222_v25 = vld [vmem:[#allocation2 + $0x49] sm:$0xff]  ;;  %v3337_v41 = vsel %vm108_vm3, %v3273_v21, %v9246_v56 }
 0x187   :  { %v11750_v19 = vpop.permute.xlu0 %9253  ;;  %v3272_v59 = vsel %vm27_vm0, %v1222_v25, %v9225_v27  ;;  %v9557_v27 = vpack.i.bf16 %v1057_v3, %v1056_v24  ;;  %v9205_v25 = vunpack.i.l.bf16 %v11695_v31 }
 0x188   :  { %v9249_v18 = vpop.permute.xlu1 %9248  ;;  %v3336_v20 = vsel %vm108_vm3, %v3272_v59, %v9245_v38  ;;  %v3144_v38 = vsel %vm108_vm3, %v3080_v37, %v9176_v10  ;;  %v9255_v35 = vunpack.i.l.bf16 %v11750_v19  ;;  %v1525_v59 = vld [vmem:[#allocation2 + $0x2ba] sm:$0xff]  ;;  %v1526_v10 = vld [vmem:[#allocation2 + $0x2c2] sm:$0xff] }
 0x189   :  { %v9250_v42 = vunpack.i.l.bf16 %v9249_v18  ;;  %v9251_v62 = vunpack.i.h.bf16 %v9249_v18  ;;  %9543 = vrot.lane.b32.xlu0 %v9537_v39, %s10746_s9  ;;  %v3209_v44 = vsel %vm3203_vm4, %v3144_v38, %v9211_v29  ;;  %8681 = vmatprep.mubr.msk.f32.mxu0 %vm27_vm0, %v1525_v59  ;;  %v3145_v37 = vsel %vm108_vm3, %v3081_v15, %v9205_v25  ;;  %v969_v38 = vld [vmem:[#allocation2 + $0x50] sm:$0xff] }
 0x18a   :  { %9538 = vrot.lane.b32.xlu1 %v9537_v39, %s10747_s28  ;;  %8682 = vmatmul.mubr.msk.f32.gmra.mrb[114].mxu0 %vm27_vm0, %v1526_v10 }
 0x18b   :  { %v3400_v17 = vsel %vm3203_vm4, %v3336_v20, %v9250_v42  ;;  %v11766_v32 = vpop.permute.xlu0 %9268  ;;  %v3401_v53 = vsel %vm3203_vm4, %v3337_v41, %v9251_v62  ;;  %v1224_v42 = vld [vmem:[#allocation2 + $0x61] sm:$0xff]  ;;  %v1225_v20 = vld [vmem:[#allocation2 + $0x69] sm:$0xff]  ;;  %v3210_v41 = vsel %vm3203_vm4, %v3145_v37, %v9240_v60 }
 0x18c   :  { %v11764_v4 = vpop.permute.xlu1 %9258  ;;  %3779 = vmatprep.mubr.f32.mxu1 %v3400_v17  ;;  %v9201_v17 = vunpack.i.h.bf16 %v11681_v13  ;;  %v9241_v13 = vunpack.i.h.bf16 %v11737_v30  ;;  %v1227_v37 = vld [vmem:[#allocation2 + $0x81] sm:$0xff] }
 0x18d   :  { %3780 = vmatmul.mubr.f32.gmra.mrb[8].mxu1 %v3208_v11  ;;  %9553 = vrot.lane.b32.xlu0 %v11510_v7, %s10745_s26  ;;  %v9256_v7 = vunpack.i.h.bf16 %v11750_v19  ;;  %v3274_v19 = vsel %vm27_vm0, %v1224_v42, %v9255_v35  ;;  %v9206_v11 = vunpack.i.h.bf16 %v11695_v31  ;;  %v1187_v31 = vld [vmem:[#allocation2 + $0x1d0] sm:$0xff]  ;;  %v9270_v42 = vunpack.i.l.bf16 %v11766_v32 }
 0x18e   :  { %9548 = vrot.lane.b32.xlu1 %v11705_v43, %s10747_s28  ;;  %3784 = vmatprep.mubr.f32.mxu1 %v3401_v53  ;;  %v1375_v43 = vld [vmem:[#allocation2 + $0x180] sm:$0xff]  ;;  %v11813_v53 = vpack.i.bf16 %v1526_v10, %v1525_v59  ;;  %v3082_v30 = vsel %vm27_vm0, %v969_v38, %v9201_v17  ;;  %v1146_v10 = vld [vmem:[#allocation2 + $0x2d2] sm:$0xff] }
 0x18f   :  { %v9279_v39 = vpop.permute.xlu0 %9278  ;;  %v9592_v62 = vpack.i.bf16 %v1376_v36, %v1375_v43  ;;  %v3275_v3 = vsel %vm27_vm0, %v1225_v20, %v9256_v7  ;;  %v3146_v7 = vsel %vm108_vm3, %v3082_v30, %v9206_v11  ;;  %v1062_v43 = vld [vmem:[#allocation2 + $0x1e1] sm:$0xff]  ;;  %v1063_v36 = vld [vmem:[#allocation2 + $0x1e9] sm:$0xff]  ;;  %8684 = vmatprep.mubr.msk.f32.mxu0 %vm27_vm0, %v1146_v10 }
 0x190   :  { %v11779_v12 = vpop.permute.xlu1 %9263  ;;  %v9280_v8 = vunpack.i.l.bf16 %v9279_v39  ;;  %v9281_v21 = vunpack.i.h.bf16 %v9279_v39  ;;  %v3211_v25 = vsel %vm3203_vm4, %v3146_v7, %v9241_v13  ;;  %v1440_v20 = vld [vmem:[#allocation2 + $0x189] sm:$0xff]  ;;  %v1147_v17 = vld [vmem:[#allocation2 + $0x2da] sm:$0xff] }
 0x191   :  { %3785 = vmatmul.mubr.f32.gmra.mrb[10].mxu1 %v3209_v44  ;;  %9568 = vrot.lane.b32.xlu0 %v9567_v16, %s10747_s28  ;;  %v1186_v44 = vld [vmem:[#allocation2 + $0x1c8] sm:$0xff] }
 0x192   :  { %9558 = vrot.lane.b32.xlu1 %v9557_v27, %s10745_s26  ;;  %v1060_v13 = vld [vmem:[#allocation2 + $0x1c9] sm:$0xff]  ;;  %8685 = vmatmul.mubr.msk.f32.gmra.mrb[116].mxu0 %vm27_vm0, %v1147_v17 }
 0x193   :  { %v11787_v18 = vpop.permute.xlu0 %9288  ;;  %v971_v30 = vld [vmem:[#allocation2 + $0x68] sm:$0xff] }
 0x194   :  { %v9274_v48 = vpop.permute.xlu1 %9273 }
 0x195   :  { %v9276_v57 = vunpack.i.h.bf16 %v9274_v48  ;;  %v9275_v56 = vunpack.i.l.bf16 %v9274_v48  ;;  %9578 = vrot.lane.b32.xlu0 %v9557_v27, %s10747_s28 }
 0x196   :  { %9563 = vrot.lane.b32.xlu1 %v11521_v47, %s10746_s9 }
 0x197   :  { %v3338_v63 = vsel %vm108_vm3, %v3274_v19, %v9275_v56  ;;  %v11801_v24 = vpop.permute.xlu0 %9293  ;;  %v3339_v29 = vsel %vm108_vm3, %v3275_v3, %v9276_v57  ;;  %v9617_v57 = vpack.i.bf16 %v1187_v31, %v1186_v44  ;;  %v9235_v56 = vunpack.i.l.bf16 %v11720_v2  ;;  %v1226_v19 = vld [vmem:[#allocation2 + $0x79] sm:$0xff]  ;;  %v1439_v3 = vld [vmem:[#allocation2 + $0x181] sm:$0xff] }
 0x198   :  { %v11799_v28 = vpop.permute.xlu1 %9283  ;;  %v3402_v26 = vsel %vm3203_vm4, %v3338_v63, %v9280_v8  ;;  %v3403_v27 = vsel %vm3203_vm4, %v3339_v29, %v9281_v21  ;;  %v11834_v63 = vpack.i.bf16 %v1063_v36, %v1062_v43  ;;  %v11842_v29 = vpack.i.bf16 %v1147_v17, %v1146_v10  ;;  %v1379_v36 = vld [vmem:[#allocation2 + $0x1e0] sm:$0xff]  ;;  %v1228_v10 = vld [vmem:[#allocation2 + $0x91] sm:$0xff] }
 0x199   :  { %3789 = vmatprep.mubr.f32.mxu1 %v3402_v26  ;;  %9593 = vrot.lane.b32.xlu0 %v9592_v62, %s10746_s9  ;;  %v9286_v59 = vunpack.i.h.bf16 %v11799_v28  ;;  %v9597_v31 = vpack.i.bf16 %v1440_v20, %v1439_v3  ;;  %v1529_v17 = vld [vmem:[#allocation2 + $0x2ea] sm:$0xff] }
 0x19a   :  { %9573 = vrot.lane.b32.xlu1 %v9567_v16, %s10746_s9  ;;  %3790 = vmatmul.mubr.f32.gmra.mrb[12].mxu1 %v3210_v41  ;;  %v9285_v16 = vunpack.i.l.bf16 %v11799_v28  ;;  %v1061_v41 = vld [vmem:[#allocation2 + $0x1d1] sm:$0xff] }
 0x19b   :  { %3794 = vmatprep.mubr.f32.mxu1 %v3403_v27  ;;  %v9304_v35 = vpop.permute.xlu0 %9303  ;;  %v3277_v2 = vsel %vm27_vm0, %v1227_v37, %v9286_v59  ;;  %v9607_v7 = vpack.i.bf16 %v1061_v41, %v1060_v13  ;;  %v1190_v13 = vld [vmem:[#allocation2 + $0x1f8] sm:$0xff]  ;;  %v1191_v41 = vld [vmem:[#allocation2 + $0x200] sm:$0xff]  ;;  %8687 = vmatprep.mubr.msk.f32.mxu0 %vm27_vm0, %v1529_v17 }
 0x19c   :  { %v11816_v39 = vpop.permute.xlu1 %9298  ;;  %v9305_v48 = vunpack.i.l.bf16 %v9304_v35  ;;  %v9306_v52 = vunpack.i.h.bf16 %v9304_v35  ;;  %v3276_v1 = vsel %vm27_vm0, %v1226_v19, %v9285_v16  ;;  %v3084_v16 = vsel %vm27_vm0, %v971_v30, %v9231_v51 }
 0x19d   :  { %9603 = vrot.lane.b32.xlu0 %v9602_v54, %s10745_s26  ;;  %v3148_v43 = vsel %vm108_vm3, %v3084_v16, %v9236_v40  ;;  %v1530_v40 = vld [vmem:[#allocation2 + $0x2f2] sm:$0xff] }
 0x19e   :  { %9583 = vrot.lane.b32.xlu1 %v11521_v47, %s10745_s26  ;;  %3795 = vmatmul.mubr.f32.gmra.mrb[14].mxu1 %v3211_v25  ;;  %v970_v47 = vld [vmem:[#allocation2 + $0x60] sm:$0xff]  ;;  %v3340_v28 = vsel %vm108_vm3, %v3276_v1, %v9305_v48  ;;  %v3341_v35 = vsel %vm108_vm3, %v3277_v2, %v9306_v52 }
 0x19f   :  { %v11832_v8 = vpop.permute.xlu0 %9313  ;;  %v3083_v15 = vsel %vm27_vm0, %v970_v47, %v9230_v0  ;;  %v1380_v0 = vld [vmem:[#allocation2 + $0x1e8] sm:$0xff]  ;;  %v9260_v47 = vunpack.i.l.bf16 %v11764_v4  ;;  %8688 = vmatmul.mubr.msk.f32.gmra.mrb[118].mxu0 %vm27_vm0, %v1530_v40 }
 0x1a0   :  { %v9309_v60 = vpop.permute.xlu1 %9308  ;;  %v3147_v21 = vsel %vm108_vm3, %v3083_v15, %v9235_v56  ;;  %v1124_v56 = vld [vmem:[#allocation2 + $0x1ca] sm:$0xff]  ;;  %v9315_v59 = vunpack.i.l.bf16 %v11832_v8  ;;  %v9316_v19 = vunpack.i.h.bf16 %v11832_v8  ;;  %v1229_v15 = vld [vmem:[#allocation2 + $0x99] sm:$0xff] }
 0x1a1   :  { %v9310_v54 = vunpack.i.l.bf16 %v9309_v60  ;;  %v9311_v26 = vunpack.i.h.bf16 %v9309_v60  ;;  %9618 = vrot.lane.b32.xlu0 %v9617_v57, %s10747_s28  ;;  %v3212_v44 = vsel %vm3203_vm4, %v3147_v21, %v9270_v42  ;;  %v1125_v42 = vld [vmem:[#allocation2 + $0x1d2] sm:$0xff]  ;;  %v9642_v60 = vpack.i.bf16 %v1380_v0, %v1379_v36 }
 0x1a2   :  { %9588 = vrot.lane.b32.xlu1 %v9592_v62, %s10747_s28  ;;  %v9271_v62 = vunpack.i.h.bf16 %v11766_v32  ;;  %v9612_v52 = vpack.i.bf16 %v1125_v42, %v1124_v56  ;;  %v3278_v8 = vsel %vm27_vm0, %v1228_v10, %v9315_v59  ;;  %v972_v21 = vld [vmem:[#allocation2 + $0x78] sm:$0xff]  ;;  %v3279_v37 = vsel %vm27_vm0, %v1229_v15, %v9316_v19 }
 0x1a3   :  { %v3404_v11 = vsel %vm3203_vm4, %v3340_v28, %v9310_v54  ;;  %v11851_v38 = vpop.permute.xlu0 %9328  ;;  %v3405_v32 = vsel %vm3203_vm4, %v3341_v35, %v9311_v26  ;;  %v9265_v54 = vunpack.i.l.bf16 %v11779_v12  ;;  %v9300_v26 = vunpack.i.l.bf16 %v11816_v39  ;;  %v1445_v0 = vld [vmem:[#allocation2 + $0x1f9] sm:$0xff]  ;;  %v1066_v10 = vld [vmem:[#allocation2 + $0x211] sm:$0xff] }
 0x1a4   :  { %v11849_v27 = vpop.permute.xlu1 %9318  ;;  %3799 = vmatprep.mubr.f32.mxu1 %v3404_v11  ;;  %v3213_v57 = vsel %vm3203_vm4, %v3148_v43, %v9271_v62  ;;  %v9261_v62 = vunpack.i.h.bf16 %v11764_v4  ;;  %v3085_v35 = vsel %vm27_vm0, %v972_v21, %v9260_v47  ;;  %v9301_v4 = vunpack.i.h.bf16 %v11816_v39 }
 0x1a5   :  { %3800 = vmatmul.mubr.f32.gmra.mrb[16].mxu1 %v3212_v44  ;;  %9628 = vrot.lane.b32.xlu0 %v11834_v63, %s10745_s26  ;;  %v11898_v36 = vpack.i.bf16 %v1191_v41, %v1190_v13  ;;  %v11900_v56 = vpack.i.bf16 %v1530_v40, %v1529_v17  ;;  %v1067_v17 = vld [vmem:[#allocation2 + $0x219] sm:$0xff]  ;;  %v974_v41 = vld [vmem:[#allocation2 + $0x90] sm:$0xff] }
 0x1a6   :  { %9598 = vrot.lane.b32.xlu1 %v9597_v31, %s10747_s28  ;;  %3804 = vmatprep.mubr.f32.mxu1 %v3405_v32  ;;  %v9266_v32 = vunpack.i.h.bf16 %v11779_v12 }
 0x1a7   :  { %v9339_v25 = vpop.permute.xlu0 %9338 }
 0x1a8   :  { %v11863_v48 = vpop.permute.xlu1 %9323  ;;  %v9340_v28 = vunpack.i.l.bf16 %v9339_v25  ;;  %v9341_v16 = vunpack.i.h.bf16 %v9339_v25  ;;  %v973_v25 = vld [vmem:[#allocation2 + $0x80] sm:$0xff] }
 0x1a9   :  { %3805 = vmatmul.mubr.f32.gmra.mrb[18].mxu1 %v3213_v57  ;;  %9633 = vrot.lane.b32.xlu0 %v11547_v14, %s10746_s9  ;;  %v1446_v57 = vld [vmem:[#allocation2 + $0x201] sm:$0xff]  ;;  %v3086_v59 = vsel %vm27_vm0, %v973_v25, %v9261_v62  ;;  %v11922_v62 = vpack.i.bf16 %v1067_v17, %v1066_v10  ;;  %v9320_v17 = vunpack.i.l.bf16 %v11849_v27 }
 0x1aa   :  { %9608 = vrot.lane.b32.xlu1 %v9607_v7, %s10745_s26  ;;  %v3149_v7 = vsel %vm108_vm3, %v3085_v35, %v9265_v54  ;;  %v3150_v19 = vsel %vm108_vm3, %v3086_v59, %v9266_v32  ;;  %v9677_v47 = vpack.i.bf16 %v1446_v57, %v1445_v0  ;;  %v9290_v54 = vunpack.i.l.bf16 %v11787_v18  ;;  %v11948_v59 = vld [vmem:[#allocation2 + $0x210] sm:$0xff] }
 0x1ab   :  { %v11872_v51 = vpop.permute.xlu0 %9348  ;;  %v3214_v43 = vsel %vm3203_vm4, %v3149_v7, %v9300_v26  ;;  %v9296_v32 = vunpack.i.h.bf16 %v11801_v24 }
 0x1ac   :  { %v9334_v20 = vpop.permute.xlu1 %9333 }
 0x1ad   :  { %v9336_v1 = vunpack.i.h.bf16 %v9334_v20  ;;  %v9335_v3 = vunpack.i.l.bf16 %v9334_v20  ;;  %9643 = vrot.lane.b32.xlu0 %v9642_v60, %s10746_s9  ;;  %v1150_v20 = vld [vmem:[#allocation2 + $0x302] sm:$0xff] }
 0x1ae   :  { %9613 = vrot.lane.b32.xlu1 %v9612_v52, %s10746_s9  ;;  %8690 = vmatprep.mubr.msk.f32.mxu0 %vm27_vm0, %v1150_v20 }
 0x1af   :  { %v3342_v11 = vsel %vm108_vm3, %v3278_v8, %v9335_v3  ;;  %v11885_v31 = vpop.permute.xlu0 %9353  ;;  %v3343_v30 = vsel %vm108_vm3, %v3279_v37, %v9336_v1  ;;  %v3215_v3 = vsel %vm3203_vm4, %v3150_v19, %v9301_v4  ;;  %v9330_v8 = vunpack.i.l.bf16 %v11851_v38  ;;  %v1231_v4 = vld [vmem:[#allocation2 + $0xb1] sm:$0xff] }
 0x1b0   :  { %v11883_v44 = vpop.permute.xlu1 %9343  ;;  %v3406_v2 = vsel %vm3203_vm4, %v3342_v11, %v9340_v28  ;;  %v3407_v12 = vsel %vm3203_vm4, %v3343_v30, %v9341_v16  ;;  %v9295_v28 = vunpack.i.l.bf16 %v11801_v24  ;;  %v3087_v30 = vsel %vm27_vm0, %v974_v41, %v9290_v54  ;;  %v975_v24 = vld [vmem:[#allocation2 + $0x98] sm:$0xff]  ;;  %v1534_v54 = vld [vmem:[#allocation2 + $0x322] sm:$0xff] }
 0x1b1   :  { %3809 = vmatprep.mubr.f32.mxu1 %v3406_v2  ;;  %9653 = vrot.lane.b32.xlu0 %v11547_v14, %s10745_s26  ;;  %v9345_v14 = vunpack.i.l.bf16 %v11883_v44  ;;  %v9346_v15 = vunpack.i.h.bf16 %v11883_v44  ;;  %v9291_v2 = vunpack.i.h.bf16 %v11787_v18 }
 0x1b2   :  { %9623 = vrot.lane.b32.xlu1 %v9612_v52, %s10745_s26  ;;  %3810 = vmatmul.mubr.f32.gmra.mrb[20].mxu1 %v3214_v43  ;;  %v1151_v52 = vld [vmem:[#allocation2 + $0x30a] sm:$0xff]  ;;  %v3151_v7 = vsel %vm108_vm3, %v3087_v30, %v9295_v28  ;;  %v9331_v43 = vunpack.i.h.bf16 %v11851_v38 }
 0x1b3   :  { %3814 = vmatprep.mubr.f32.mxu1 %v3407_v12  ;;  %v9364_v39 = vpop.permute.xlu0 %9363  ;;  %v11913_v26 = vpack.i.bf16 %v1151_v52, %v1150_v20  ;;  %8691 = vmatmul.mubr.msk.f32.gmra.mrb[120].mxu0 %vm27_vm0, %v1151_v52  ;;  %v3281_v57 = vsel %vm27_vm0, %v1231_v4, %v9346_v15  ;;  %v3088_v25 = vsel %vm27_vm0, %v975_v24, %v9291_v2  ;;  %v9325_v15 = vunpack.i.l.bf16 %v11863_v48 }
 0x1b4   :  { %v11903_v42 = vpop.permute.xlu1 %9358  ;;  %v9365_v1 = vunpack.i.l.bf16 %v9364_v39  ;;  %v9366_v21 = vunpack.i.h.bf16 %v9364_v39  ;;  %v3152_v39 = vsel %vm108_vm3, %v3088_v25, %v9296_v32  ;;  %v976_v32 = vld [vmem:[#allocation2 + $0xa8] sm:$0xff] }
 0x1b5   :  { %9668 = vrot.lane.b32.xlu0 %v11898_v36, %s10747_s28  ;;  %v3217_v52 = vsel %vm3203_vm4, %v3152_v39, %v9331_v43  ;;  %v11992_v25 = vld [vmem:[#allocation2 + $0x229] sm:$0xff] }
 0x1b6   :  { %9638 = vrot.lane.b32.xlu1 %v9642_v60, %s10747_s28  ;;  %3815 = vmatmul.mubr.f32.gmra.mrb[22].mxu1 %v3215_v3  ;;  %v1230_v60 = vld [vmem:[#allocation2 + $0xa9] sm:$0xff]  ;;  %v3345_v12 = vsel %vm108_vm3, %v3281_v57, %v9366_v21 }
 0x1b7   :  { %v11918_v11 = vpop.permute.xlu0 %9373  ;;  %v3280_v13 = vsel %vm27_vm0, %v1230_v60, %v9345_v14  ;;  %v11950_v14 = vld [vmem:[#allocation2 + $0x218] sm:$0xff] }
 0x1b8   :  { %v9369_v40 = vpop.permute.xlu1 %9368  ;;  %v3344_v44 = vsel %vm108_vm3, %v3280_v13, %v9365_v1  ;;  %v9375_v1 = vunpack.i.l.bf16 %v11918_v11  ;;  %v9697_v3 = vpack.i.bf16 %v11950_v14, %v11948_v59  ;;  %v9376_v10 = vunpack.i.h.bf16 %v11918_v11 }
 0x1b9   :  { %v9370_v37 = vunpack.i.l.bf16 %v9369_v40  ;;  %v9371_v35 = vunpack.i.h.bf16 %v9369_v40  ;;  %9678 = vrot.lane.b32.xlu0 %v9677_v47, %s10747_s28  ;;  %v9360_v13 = vunpack.i.l.bf16 %v11903_v42 }
 0x1ba   :  { %9648 = vrot.lane.b32.xlu1 %v11834_v63, %s10747_s28  ;;  %v3216_v63 = vsel %vm3203_vm4, %v3151_v7, %v9330_v8  ;;  %v9321_v7 = vunpack.i.h.bf16 %v11849_v27  ;;  %v9361_v27 = vunpack.i.h.bf16 %v11903_v42  ;;  %v9732_v42 = vpack.i.bf16 %v11948_v59, %v11992_v25 }
 0x1bb   :  { %v3408_v16 = vsel %vm3203_vm4, %v3344_v44, %v9370_v37  ;;  %v11937_v0 = vpop.permute.xlu0 %9388  ;;  %v3409_v38 = vsel %vm3203_vm4, %v3345_v12, %v9371_v35  ;;  %v1232_v37 = vld [vmem:[#allocation2 + $0xc1] sm:$0xff]  ;;  %v1233_v35 = vld [vmem:[#allocation2 + $0xc9] sm:$0xff]  ;;  %v9326_v12 = vunpack.i.h.bf16 %v11863_v48 }
 0x1bc   :  { %v11935_v18 = vpop.permute.xlu1 %9378  ;;  %3819 = vmatprep.mubr.f32.mxu1 %v3408_v16  ;;  %v3282_v2 = vsel %vm27_vm0, %v1232_v37, %v9375_v1  ;;  %v3283_v16 = vsel %vm27_vm0, %v1233_v35, %v9376_v10 }
 0x1bd   :  { %3820 = vmatmul.mubr.f32.gmra.mrb[24].mxu1 %v3216_v63  ;;  %9688 = vrot.lane.b32.xlu0 %v11922_v62, %s10745_s26  ;;  %v3089_v63 = vsel %vm27_vm0, %v976_v32, %v9320_v17  ;;  %v1234_v32 = vld [vmem:[#allocation2 + $0xd9] sm:$0xff] }
 0x1be   :  { %9658 = vrot.lane.b32.xlu1 %v9677_v47, %s10745_s26  ;;  %3824 = vmatprep.mubr.f32.mxu1 %v3409_v38  ;;  %v1533_v47 = vld [vmem:[#allocation2 + $0x31a] sm:$0xff]  ;;  %v3153_v38 = vsel %vm108_vm3, %v3089_v63, %v9325_v15 }
 0x1bf   :  { %v9399_v20 = vpop.permute.xlu0 %9398  ;;  %8693 = vmatprep.mubr.msk.f32.mxu0 %vm27_vm0, %v1533_v47  ;;  %v11978_v44 = vpack.i.bf16 %v1534_v54, %v1533_v47 }
 0x1c0   :  { %v11952_v19 = vpop.permute.xlu1 %9383  ;;  %8694 = vmatmul.mubr.msk.f32.gmra.mrb[122].mxu0 %vm27_vm0, %v1534_v54  ;;  %v9400_v41 = vunpack.i.l.bf16 %v9399_v20  ;;  %v9401_v24 = vunpack.i.h.bf16 %v9399_v20  ;;  %v977_v20 = vld [vmem:[#allocation2 + $0xb0] sm:$0xff] }
 0x1c1   :  { %3825 = vmatmul.mubr.f32.gmra.mrb[26].mxu1 %v3217_v52  ;;  %9693 = vrot.lane.b32.xlu0 %v11580_v58, %s10746_s9  ;;  %v3218_v52 = vsel %vm3203_vm4, %v3153_v38, %v9360_v13  ;;  %v12029_v13 = vld [vmem:[#allocation2 + $0x241] sm:$0xff]  ;;  %v12051_v38 = vld [vmem:[#allocation2 + $0x332] sm:$0xff] }
 0x1c2   :  { %9663 = vrot.lane.b32.xlu1 %v11570_v46, %s10746_s9  ;;  %8696 = vmatprep.mubr.msk.f32.mxu0 %vm27_vm0, %v12051_v38 }
 0x1c3   :  { %v11965_v8 = vpop.permute.xlu0 %9408  ;;  %v11969_v21 = vpop.f32.mrb[64].mxu0 }
 0x1c4   :  { %v9394_v28 = vpop.permute.xlu1 %9393  ;;  %v11972_v11 = vpop.f32.mrb[65].mxu0 }
 0x1c5   :  { %v9396_v40 = vunpack.i.h.bf16 %v9394_v28  ;;  %v9395_v60 = vunpack.i.l.bf16 %v9394_v28  ;;  %9698 = vrot.lane.b32.xlu0 %v9697_v3, %s10746_s9  ;;  %v12012_v3 = vld [vmem:[#allocation2 + $0x231] sm:$0xff]  ;;  %v9350_v28 = vunpack.i.l.bf16 %v11872_v51 }
 0x1c6   :  { %9673 = vrot.lane.b32.xlu1 %v11898_v36, %s10746_s9  ;;  %v9712_v37 = vpack.i.bf16 %v11950_v14, %v12012_v3  ;;  %v9356_v14 = vunpack.i.h.bf16 %v11885_v31 }
 0x1c7   :  { %v3346_v30 = vsel %vm108_vm3, %v3282_v2, %v9395_v60  ;;  %v11985_v43 = vpop.permute.xlu0 %9413  ;;  %v3347_v57 = vsel %vm108_vm3, %v3283_v16, %v9396_v40  ;;  %v11994_v39 = vpop.f32.mrb[66].mxu0  ;;  %v9355_v60 = vunpack.i.l.bf16 %v11885_v31  ;;  %v9390_v2 = vunpack.i.l.bf16 %v11937_v0 }
 0x1c8   :  { %v11983_v4 = vpop.permute.xlu1 %9403  ;;  %v3410_v36 = vsel %vm3203_vm4, %v3346_v30, %v9400_v41  ;;  %v12002_v47 = vpop.f32.mrb[67].mxu0  ;;  %v3411_v48 = vsel %vm3203_vm4, %v3347_v57, %v9401_v24  ;;  %v12031_v41 = vld [vmem:[#allocation2 + $0x249] sm:$0xff] }
 0x1c9   :  { %3829 = vmatprep.mubr.f32.mxu1 %v3410_v36  ;;  %9708 = vrot.lane.b32.xlu0 %v11580_v58, %s10745_s26  ;;  %v9405_v58 = vunpack.i.l.bf16 %v11983_v4  ;;  %v9747_v16 = vpack.i.bf16 %v12031_v41, %v12029_v13 }
 0x1ca   :  { %9683 = vrot.lane.b32.xlu1 %v11570_v46, %s10745_s26  ;;  %3830 = vmatmul.mubr.f32.gmra.mrb[28].mxu1 %v3218_v52  ;;  %v3090_v46 = vsel %vm27_vm0, %v977_v20, %v9321_v7  ;;  %v9351_v7 = vunpack.i.h.bf16 %v11872_v51 }
 0x1cb   :  { %3834 = vmatprep.mubr.f32.mxu1 %v3411_v48  ;;  %v12007_v1 = vpop.permute.xlu0 %9423  ;;  %v3154_v10 = vsel %vm108_vm3, %v3090_v46, %v9326_v12  ;;  %v12016_v17 = vpop.f32.mrb[68].mxu0  ;;  %v12045_v57 = vsel %vm27_vm0, %v1234_v32, %v9405_v58  ;;  %v12047_v12 = vld [vmem:[#allocation2 + $0xc0] sm:$0xff] }
 0x1cc   :  { %v12005_v54 = vpop.permute.xlu1 %9418  ;;  %v9425_v15 = vunpack.i.l.bf16 %v12007_v1  ;;  %v3219_v59 = vsel %vm3203_vm4, %v3154_v10, %v9361_v27  ;;  %v12024_v40 = vpop.f32.mrb[69].mxu0  ;;  %v9426_v36 = vunpack.i.h.bf16 %v12007_v1  ;;  %v12053_v27 = vld [vmem:[#allocation2 + $0x33a] sm:$0xff]  ;;  %v3091_v20 = vsel %vm27_vm0, %v12047_v12, %v9350_v28 }
 0x1cd   :  { %9733 = vrot.lane.b32.xlu0 %v9732_v42, %s10747_s28  ;;  %v3155_v10 = vsel %vm108_vm3, %v3091_v20, %v9355_v60  ;;  %v9391_v28 = vunpack.i.h.bf16 %v11937_v0  ;;  %8697 = vmatmul.mubr.msk.f32.gmra.mrb[124].mxu0 %vm27_vm0, %v12053_v27 }
 0x1ce   :  { %9703 = vrot.lane.b32.xlu1 %v11922_v62, %s10747_s28  ;;  %3835 = vmatmul.mubr.f32.gmra.mrb[30].mxu1 %v3219_v59  ;;  %v9406_v62 = vunpack.i.h.bf16 %v11983_v4  ;;  %v3348_v48 = vsel %vm108_vm3, %v12045_v57, %v9425_v15  ;;  %v9717_v15 = vpack.i.bf16 %v12012_v3, %v11992_v25  ;;  %v1235_v59 = vld [vmem:[#allocation2 + $0xe1] sm:$0xff]  ;;  %v3220_v31 = vsel %vm3203_vm4, %v3155_v10, %v9390_v2  ;;  %v1386_v57 = vld [vmem:[#allocation2 + $0x230] sm:$0xff] }
 0x1cf   :  { %v12037_v30 = vpop.permute.xlu0 %9433  ;;  %v12049_v24 = vpop.f32.mrb[70].mxu0  ;;  %v979_v3 = vld [vmem:[#allocation2 + $0xc8] sm:$0xff]  ;;  %v9385_v10 = vunpack.i.l.bf16 %v11952_v19 }
 0x1d0   :  { %v12035_v35 = vpop.permute.xlu1 %9428  ;;  %v12198_v42 = vpop.f32.mrb[71].mxu0  ;;  %v3285_v60 = vsel %vm27_vm0, %v1235_v59, %v9406_v62  ;;  %v3092_v4 = vsel %vm27_vm0, %v979_v3, %v9351_v7  ;;  %v9435_v12 = vunpack.i.l.bf16 %v12037_v30  ;;  %v9436_v7 = vunpack.i.h.bf16 %v12037_v30 }
 0x1d1   :  { %v9430_v63 = vunpack.i.l.bf16 %v12035_v35  ;;  %v9431_v52 = vunpack.i.h.bf16 %v12035_v35  ;;  %9738 = vrot.lane.b32.xlu0 %v11608_v33, %s10745_s26  ;;  %v3349_v25 = vsel %vm108_vm3, %v3285_v60, %v9426_v36  ;;  %v3156_v2 = vsel %vm108_vm3, %v3092_v4, %v9356_v14  ;;  %v980_v4 = vld [vmem:[#allocation2 + $0xd8] sm:$0xff] }
 0x1d2   :  { %9713 = vrot.lane.b32.xlu1 %v9712_v37, %s10747_s28  ;;  %v3221_v36 = vsel %vm3203_vm4, %v3156_v2, %v9391_v28 }
 0x1d3   :  { %v3412_v58 = vsel %vm3203_vm4, %v3348_v48, %v9430_v63  ;;  %v12216_v32 = vpop.permute.xlu0 %9448  ;;  %v12229_v35 = vpop.f32.mrb[72].mxu0  ;;  %v3413_v0 = vsel %vm3203_vm4, %v3349_v25, %v9431_v52  ;;  %v1385_v63 = vld [vmem:[#allocation2 + $0x228] sm:$0xff]  ;;  %v9380_v52 = vunpack.i.l.bf16 %v11935_v18  ;;  %v1237_v25 = vld [vmem:[#allocation2 + $0xf9] sm:$0xff] }
 0x1d4   :  { %v12214_v37 = vpop.permute.xlu1 %9438  ;;  %3839 = vmatprep.mubr.f32.mxu1 %v3412_v58  ;;  %v12244_v1 = vpop.f32.mrb[73].mxu0  ;;  %v9727_v14 = vpack.i.bf16 %v1386_v57, %v1385_v63  ;;  %v9762_v58 = vpack.i.bf16 %v1385_v63, %v12029_v13  ;;  %v3287_v2 = vsel %vm27_vm0, %v1237_v25, %v9436_v7  ;;  %v1388_v7 = vld [vmem:[#allocation2 + $0x248] sm:$0xff]  ;;  %v9421_v25 = vunpack.i.h.bf16 %v12005_v54 }
 0x1d5   :  { %3840 = vmatmul.mubr.f32.gmra.mrb[32].mxu1 %v3220_v31  ;;  %9748 = vrot.lane.b32.xlu0 %v9747_v16, %s10745_s26  ;;  %v9420_v31 = vunpack.i.l.bf16 %v12005_v54 }
 0x1d6   :  { %9718 = vrot.lane.b32.xlu1 %v9717_v15, %s10745_s26  ;;  %3844 = vmatprep.mubr.f32.mxu1 %v3413_v0  ;;  %v9742_v0 = vpack.i.bf16 %v1386_v57, %v12031_v41  ;;  %v1387_v57 = vld [vmem:[#allocation2 + $0x240] sm:$0xff] }
 0x1d7   :  { %v9459_v6 = vpop.permute.xlu0 %9458  ;;  %v12250_v16 = vpop.f32.mrb[74].mxu0 }
 0x1d8   :  { %v12247_v62 = vpop.permute.xlu1 %9443  ;;  %v12257_v51 = vpop.f32.mrb[75].mxu0  ;;  %v9460_v60 = vunpack.i.l.bf16 %v9459_v6 }
 0x1d9   :  { %3845 = vmatmul.mubr.f32.gmra.mrb[34].mxu1 %v3221_v36  ;;  %9753 = vrot.lane.b32.xlu0 %v11625_v55, %s10746_s9  ;;  %v9381_v36 = vunpack.i.h.bf16 %v11935_v18 }
 0x1da   :  { %9723 = vrot.lane.b32.xlu1 %v11608_v33, %s10746_s9  ;;  %v1236_v33 = vld [vmem:[#allocation2 + $0xf1] sm:$0xff] }
 0x1db   :  { %v12261_v20 = vpop.permute.xlu0 %9468  ;;  %v12265_v28 = vpop.f32.mrb[76].mxu0  ;;  %v3286_v30 = vsel %vm27_vm0, %v1236_v33, %v9435_v12  ;;  %v3093_v12 = vsel %vm27_vm0, %v980_v4, %v9380_v52  ;;  %v9386_v33 = vunpack.i.h.bf16 %v11952_v19 }
 0x1dc   :  { %v9454_v48 = vpop.permute.xlu1 %9453  ;;  %v12271_v3 = vpop.f32.mrb[77].mxu0  ;;  %v3157_v41 = vsel %vm108_vm3, %v3093_v12, %v9385_v10  ;;  %v981_v10 = vld [vmem:[#allocation2 + $0xe0] sm:$0xff] }
 0x1dd   :  { %v9456_v15 = vunpack.i.h.bf16 %v9454_v48  ;;  %v9455_v59 = vunpack.i.l.bf16 %v9454_v48  ;;  %9763 = vrot.lane.b32.xlu0 %v9762_v58, %s10747_s28  ;;  %v3222_v52 = vsel %vm3203_vm4, %v3157_v41, %v9420_v31  ;;  %v1454_v31 = vld [vmem:[#allocation2 + $0x261] sm:$0xff]  ;;  %v9450_v41 = vunpack.i.l.bf16 %v12216_v32 }
 0x1de   :  { %9728 = vrot.lane.b32.xlu1 %v9727_v14, %s10746_s9 }
 0x1df   :  { %v3350_v13 = vsel %vm108_vm3, %v3286_v30, %v9455_v59  ;;  %v12279_v48 = vpop.permute.xlu0 %9473  ;;  %v3351_v58 = vsel %vm108_vm3, %v3287_v2, %v9456_v15  ;;  %v9461_v59 = vunpack.i.h.bf16 %v9459_v6  ;;  %v12286_v30 = vld [vmem:[#allocation2 + $0x259] sm:$0xff]  ;;  %v12288_v18 = vpop.f32.mrb[78].mxu0 }
 0x1e0   :  { %v12277_v63 = vpop.permute.xlu1 %9463  ;;  %v3414_v14 = vsel %vm3203_vm4, %v3350_v13, %v9460_v60  ;;  %14964 = vst [vmem:[#allocation7_spill] sm:$0xff] %v12288_v18  ;;  %v12295_v19 = vpop.f32.mrb[79].mxu0  ;;  %v9757_v13 = vpack.i.bf16 %v1388_v7, %v1387_v57  ;;  %v9792_v54 = vpack.i.bf16 %v1387_v57, %v12286_v30  ;;  %v1239_v18 = vld [vmem:[#allocation2 + $0x111] sm:$0xff] }
 0x1e1   :  { %3849 = vmatprep.mubr.f32.mxu1 %v3414_v14  ;;  %9768 = vrot.lane.b32.xlu0 %v11625_v55, %s10745_s26  ;;  %v3415_v6 = vsel %vm3203_vm4, %v3351_v58, %v9461_v59  ;;  %v9465_v4 = vunpack.i.l.bf16 %v12277_v63  ;;  %v9410_v14 = vunpack.i.l.bf16 %v11965_v8 }
 0x1e2   :  { %9743 = vrot.lane.b32.xlu1 %v9742_v0, %s10747_s28  ;;  %3850 = vmatmul.mubr.f32.gmra.mrb[36].mxu1 %v3222_v52  ;;  %v3094_v0 = vsel %vm27_vm0, %v981_v10, %v9381_v36  ;;  %v9415_v36 = vunpack.i.l.bf16 %v11985_v43  ;;  %v1238_v10 = vld [vmem:[#allocation2 + $0x109] sm:$0xff] }
 0x1e3   :  { %3854 = vmatprep.mubr.f32.mxu1 %v3415_v6  ;;  %v9484_v60 = vpop.permute.xlu0 %9483  ;;  %v3158_v55 = vsel %vm108_vm3, %v3094_v0, %v9386_v33  ;;  %v12304_v2 = vpop.f32.mrb[80].mxu0  ;;  %v9466_v33 = vunpack.i.h.bf16 %v12277_v63  ;;  %v9772_v6 = vpack.i.bf16 %v1388_v7, %v1454_v31  ;;  %v1074_v0 = vld [vmem:[#allocation2 + $0x271] sm:$0xff] }
 0x1e4   :  { %v12298_v15 = vpop.permute.xlu1 %9478  ;;  %14965 = vst [vmem:[#allocation8_spill] sm:$0xff] %v12304_v2  ;;  %v9485_v12 = vunpack.i.l.bf16 %v9484_v60  ;;  %v3223_v58 = vsel %vm3203_vm4, %v3158_v55, %v9421_v25  ;;  %v12310_v59 = vpop.f32.mrb[81].mxu0  ;;  %v3288_v25 = vsel %vm27_vm0, %v1238_v10, %v9465_v4  ;;  %v982_v55 = vld [vmem:[#allocation2 + $0xf0] sm:$0xff]  ;;  %v9411_v2 = vunpack.i.h.bf16 %v11965_v8 }
 0x1e5   :  { %9793 = vrot.lane.b32.xlu0 %v9792_v54, %s10747_s28  ;;  %14966 = vst [vmem:[#allocation9_spill] sm:$0xff] %v12310_v59  ;;  %v9486_v54 = vunpack.i.h.bf16 %v9484_v60  ;;  %v3095_v60 = vsel %vm27_vm0, %v982_v55, %v9410_v14  ;;  %v9416_v4 = vunpack.i.h.bf16 %v11985_v43  ;;  %v9451_v8 = vunpack.i.h.bf16 %v12216_v32 }
 0x1e6   :  { %9758 = vrot.lane.b32.xlu1 %v9757_v13, %s10746_s9  ;;  %3855 = vmatmul.mubr.f32.gmra.mrb[38].mxu1 %v3223_v58  ;;  %v12317_v13 = vld [vmem:[#allocation2 + $0x279] sm:$0xff]  ;;  %v3352_v7 = vsel %vm108_vm3, %v3288_v25, %v9485_v12  ;;  %v9777_v14 = vpack.i.bf16 %v1454_v31, %v12286_v30  ;;  %v3289_v25 = vsel %vm27_vm0, %v1239_v18, %v9466_v33 }
 0x1e7   :  { %v12315_v52 = vpop.permute.xlu0 %9493  ;;  %v9807_v34 = vpack.i.bf16 %v12317_v13, %v1074_v0  ;;  %v12321_v58 = vpop.f32.mrb[82].mxu0  ;;  %v3353_v43 = vsel %vm108_vm3, %v3289_v25, %v9486_v54  ;;  %v1389_v33 = vld [vmem:[#allocation2 + $0x258] sm:$0xff]  ;;  %v1390_v54 = vld [vmem:[#allocation2 + $0x260] sm:$0xff] }
 0x1e8   :  { %v9489_v57 = vpop.permute.xlu1 %9488  ;;  %14967 = vst [vmem:[#allocation10_spill] sm:$0xff] %v12321_v58  ;;  %v12329_v59 = vpop.f32.mrb[83].mxu0  ;;  %v3159_v58 = vsel %vm108_vm3, %v3095_v60, %v9415_v36  ;;  %v9440_v60 = vunpack.i.l.bf16 %v12214_v37 }
 0x1e9   :  { %v9490_v46 = vunpack.i.l.bf16 %v9489_v57  ;;  %v9491_v63 = vunpack.i.h.bf16 %v9489_v57  ;;  %9798 = vrot.lane.b32.xlu0 %v11655_v22, %s10745_s26  ;;  %14968 = vst [vmem:[#allocation11_spill] sm:$0xff] %v12329_v59  ;;  %v3224_v12 = vsel %vm3203_vm4, %v3159_v58, %v9450_v41 }
 0x1ea   :  { %9773 = vrot.lane.b32.xlu1 %v9772_v6, %s10747_s28 }
 0x1eb   :  { %v3416_v10 = vsel %vm3203_vm4, %v3352_v7, %v9490_v46  ;;  %v12337_v6 = vpop.permute.xlu0 %9508  ;;  %v983_v46 = vld [vmem:[#allocation2 + $0xf8] sm:$0xff]  ;;  %v12343_v55 = vpop.f32.mrb[84].mxu0  ;;  %v3417_v32 = vsel %vm3203_vm4, %v3353_v43, %v9491_v63  ;;  %v9496_v63 = vunpack.i.h.bf16 %v12315_v52 }
 0x1ec   :  { %v12335_v57 = vpop.permute.xlu1 %9498  ;;  %3859 = vmatprep.mubr.f32.mxu1 %v3416_v10  ;;  %14969 = vst [vmem:[#allocation12_spill] sm:$0xff] %v12343_v55  ;;  %v3096_v36 = vsel %vm27_vm0, %v983_v46, %v9411_v2  ;;  %v12349_v7 = vpop.f32.mrb[85].mxu0  ;;  %v1240_v46 = vld [vmem:[#allocation2 + $0x121] sm:$0xff] }
 0x1ed   :  { %3860 = vmatmul.mubr.f32.gmra.mrb[40].mxu1 %v3224_v12  ;;  %9808 = vrot.lane.b32.xlu0 %v9807_v34, %s10745_s26  ;;  %14970 = vst [vmem:[#allocation13_spill] sm:$0xff] %v12349_v7  ;;  %v3160_v30 = vsel %vm108_vm3, %v3096_v36, %v9416_v4  ;;  %v9495_v34 = vunpack.i.l.bf16 %v12315_v52  ;;  %v9822_v12 = vpack.i.bf16 %v1389_v33, %v1074_v0 }
 0x1ee   :  { %9778 = vrot.lane.b32.xlu1 %v9777_v14, %s10745_s26  ;;  %3864 = vmatprep.mubr.f32.mxu1 %v3417_v32  ;;  %v3225_v41 = vsel %vm3203_vm4, %v3160_v30, %v9451_v8  ;;  %v9787_v8 = vpack.i.bf16 %v1390_v54, %v1389_v33  ;;  %v9445_v14 = vunpack.i.l.bf16 %v12247_v62  ;;  %v9480_v32 = vunpack.i.l.bf16 %v12298_v15  ;;  %v1241_v30 = vld [vmem:[#allocation2 + $0x129] sm:$0xff] }
 0x1ef   :  { %v9519_v31 = vpop.permute.xlu0 %9518  ;;  %v12355_v58 = vpop.f32.mrb[86].mxu0  ;;  %v3290_v52 = vsel %vm27_vm0, %v1240_v46, %v9495_v34  ;;  %v9802_v33 = vpack.i.bf16 %v1390_v54, %v12317_v13  ;;  %v9446_v46 = vunpack.i.h.bf16 %v12247_v62  ;;  %v1391_v54 = vld [vmem:[#allocation2 + $0x270] sm:$0xff] }
 0x1f0   :  { %v12352_v18 = vpop.permute.xlu1 %9503  ;;  %14971 = vst [vmem:[#allocation14_spill] sm:$0xff] %v12355_v58  ;;  %v12362_v2 = vpop.f32.mrb[87].mxu0  ;;  %v9520_v36 = vunpack.i.l.bf16 %v9519_v31  ;;  %v3291_v58 = vsel %vm27_vm0, %v1241_v30, %v9496_v63  ;;  %v1392_v63 = vld [vmem:[#allocation2 + $0x278] sm:$0xff]  ;;  %v9481_v30 = vunpack.i.h.bf16 %v12298_v15 }
 0x1f1   :  { %3865 = vmatmul.mubr.f32.gmra.mrb[42].mxu1 %v3225_v41  ;;  %9813 = vrot.lane.b32.xlu0 %v11674_v61, %s10746_s9  ;;  %14972 = vst [vmem:[#allocation15_spill] sm:$0xff] %v12362_v2 }
 0x1f2   :  { %9783 = vrot.lane.b32.xlu1 %v11655_v22, %s10746_s9 }
 0x1f3   :  { %v12366_v10 = vpop.permute.xlu0 %9528  ;;  %v12369_v22 = vpop.f32.mrb[88].mxu0 }
 0x1f4   :  { %v9514_v4 = vpop.permute.xlu1 %9513  ;;  %14973 = vst [vmem:[#allocation16_spill] sm:$0xff] %v12369_v22  ;;  %v12375_v41 = vpop.f32.mrb[89].mxu0  ;;  %v9441_v22 = vunpack.i.h.bf16 %v12214_v37 }
 0x1f5   :  { %v9516_v25 = vunpack.i.h.bf16 %v9514_v4  ;;  %v9515_v43 = vunpack.i.l.bf16 %v9514_v4  ;;  %9823 = vrot.lane.b32.xlu0 %v9822_v12, %s10747_s28  ;;  %14974 = vst [vmem:[#allocation17_spill] sm:$0xff] %v12375_v41  ;;  %v984_v4 = vld [vmem:[#allocation2 + $0x108] sm:$0xff] }
 0x1f6   :  { %9788 = vrot.lane.b32.xlu1 %v9787_v8, %s10746_s9  ;;  %v3097_v34 = vsel %vm27_vm0, %v984_v4, %v9440_v60  ;;  %v985_v60 = vld [vmem:[#allocation2 + $0x110] sm:$0xff]  ;;  %v1243_v41 = vld [vmem:[#allocation2 + $0x141] sm:$0xff] }
 0x1f7   :  { %v3354_v0 = vsel %vm108_vm3, %v3290_v52, %v9515_v43  ;;  %v12383_v55 = vpop.permute.xlu0 %9533  ;;  %v3355_v12 = vsel %vm108_vm3, %v3291_v58, %v9516_v25  ;;  %v9521_v43 = vunpack.i.h.bf16 %v9519_v31  ;;  %v3161_v13 = vsel %vm108_vm3, %v3097_v34, %v9445_v14  ;;  %v12390_v52 = vld [vmem:[#allocation2 + $0x289] sm:$0xff]  ;;  %v12392_v37 = vpop.f32.mrb[90].mxu0 }
 0x1f8   :  { %v12381_v2 = vpop.permute.xlu1 %9523  ;;  %v3418_v8 = vsel %vm3203_vm4, %v3354_v0, %v9520_v36  ;;  %14975 = vst [vmem:[#allocation18_spill] sm:$0xff] %v12392_v37  ;;  %v3226_v58 = vsel %vm3203_vm4, %v3161_v13, %v9480_v32  ;;  %v12399_v62 = vpop.f32.mrb[91].mxu0  ;;  %v9817_v36 = vpack.i.bf16 %v1392_v63, %v1391_v54  ;;  %v9852_v15 = vpack.i.bf16 %v1391_v54, %v12390_v52  ;;  %v1458_v32 = vld [vmem:[#allocation2 + $0x291] sm:$0xff] }
 0x1f9   :  { %3869 = vmatprep.mubr.f32.mxu1 %v3418_v8  ;;  %9828 = vrot.lane.b32.xlu0 %v11674_v61, %s10745_s26  ;;  %14976 = vst [vmem:[#allocation19_spill] sm:$0xff] %v12399_v62  ;;  %v3419_v31 = vsel %vm3203_vm4, %v3355_v12, %v9521_v43  ;;  %v3098_v0 = vsel %vm27_vm0, %v985_v60, %v9441_v22  ;;  %v9470_v8 = vunpack.i.l.bf16 %v12261_v20  ;;  %v9475_v22 = vunpack.i.l.bf16 %v12279_v48  ;;  %v1242_v60 = vld [vmem:[#allocation2 + $0x139] sm:$0xff] }
 0x1fa   :  { %9803 = vrot.lane.b32.xlu1 %v9802_v33, %s10747_s28  ;;  %3870 = vmatmul.mubr.f32.gmra.mrb[44].mxu1 %v3226_v58  ;;  %v9525_v33 = vunpack.i.l.bf16 %v12381_v2  ;;  %v3162_v61 = vsel %vm108_vm3, %v3098_v0, %v9446_v46  ;;  %v9510_v13 = vunpack.i.l.bf16 %v12337_v6  ;;  %v9526_v46 = vunpack.i.h.bf16 %v12381_v2  ;;  %v1078_v0 = vld [vmem:[#allocation2 + $0x2a1] sm:$0xff] }
 0x1fb   :  { %3874 = vmatprep.mubr.f32.mxu1 %v3419_v31  ;;  %v9544_v25 = vpop.permute.xlu0 %9543  ;;  %v12408_v4 = vpop.f32.mrb[92].mxu0  ;;  %v3227_v12 = vsel %vm3203_vm4, %v3162_v61, %v9481_v30  ;;  %v9832_v31 = vpack.i.bf16 %v1392_v63, %v1458_v32  ;;  %v986_v61 = vld [vmem:[#allocation2 + $0x120] sm:$0xff] }
 0x1fc   :  { %v12402_v14 = vpop.permute.xlu1 %9538  ;;  %14977 = vst [vmem:[#allocation20_spill] sm:$0xff] %v12408_v4  ;;  %v9545_v34 = vunpack.i.l.bf16 %v9544_v25  ;;  %v12414_v43 = vpop.f32.mrb[93].mxu0  ;;  %v3292_v30 = vsel %vm27_vm0, %v1242_v60, %v9525_v33  ;;  %v3099_v63 = vsel %vm27_vm0, %v986_v61, %v9470_v8 }
 0x1fd   :  { %9853 = vrot.lane.b32.xlu0 %v9852_v15, %s10747_s28  ;;  %14978 = vst [vmem:[#allocation21_spill] sm:$0xff] %v12414_v43  ;;  %v9546_v15 = vunpack.i.h.bf16 %v9544_v25  ;;  %v9476_v25 = vunpack.i.h.bf16 %v12279_v48  ;;  %v3163_v60 = vsel %vm108_vm3, %v3099_v63, %v9475_v22  ;;  %v3293_v48 = vsel %vm27_vm0, %v1243_v41, %v9526_v46  ;;  %v987_v22 = vld [vmem:[#allocation2 + $0x128] sm:$0xff] }
 0x1fe   :  { %9818 = vrot.lane.b32.xlu1 %v9817_v36, %s10746_s9  ;;  %3875 = vmatmul.mubr.f32.gmra.mrb[46].mxu1 %v3227_v12  ;;  %v12421_v36 = vld [vmem:[#allocation2 + $0x2a9] sm:$0xff]  ;;  %v9471_v12 = vunpack.i.h.bf16 %v12261_v20  ;;  %v3356_v2 = vsel %vm108_vm3, %v3292_v30, %v9545_v34  ;;  %v3228_v8 = vsel %vm3203_vm4, %v3163_v60, %v9510_v13  ;;  %v9837_v34 = vpack.i.bf16 %v1458_v32, %v12390_v52 }
 0x1ff   :  { %v12419_v58 = vpop.permute.xlu0 %9553  ;;  %v9867_v43 = vpack.i.bf16 %v12421_v36, %v1078_v0  ;;  %v12431_v62 = vpop.f32.mrb[94].mxu0  ;;  %v1393_v46 = vld [vmem:[#allocation2 + $0x288] sm:$0xff] }
 0x200   :  { %v9549_v54 = vpop.permute.xlu1 %9548  ;;  %14979 = vst [vmem:[#allocation22_spill] sm:$0xff] %v12431_v62  ;;  %v12436_v20 = vpop.f32.mrb[95].mxu0  ;;  %v3100_v61 = vsel %vm27_vm0, %v987_v22, %v9471_v12  ;;  %v9555_v63 = vunpack.i.l.bf16 %v12419_v58  ;;  %v9882_v60 = vpack.i.bf16 %v1393_v46, %v1078_v0  ;;  %v1245_v22 = vld [vmem:[#allocation2 + $0x159] sm:$0xff] }
 0x201   :  { %v9550_v4 = vunpack.i.l.bf16 %v9549_v54  ;;  %v9551_v37 = vunpack.i.h.bf16 %v9549_v54  ;;  %9858 = vrot.lane.b32.xlu0 %v11733_v45, %s10745_s26  ;;  %14980 = vst [vmem:[#allocation23_spill] sm:$0xff] %v12436_v20  ;;  %v9511_v54 = vunpack.i.h.bf16 %v12337_v6  ;;  %v3164_v52 = vsel %vm108_vm3, %v3100_v61, %v9476_v25  ;;  %v988_v0 = vld [vmem:[#allocation2 + $0x138] sm:$0xff] }
 0x202   :  { %9833 = vrot.lane.b32.xlu1 %v9832_v31, %s10747_s28 }
 0x203   :  { %v3420_v33 = vsel %vm3203_vm4, %v3356_v2, %v9550_v4  ;;  %v12441_v7 = vpop.permute.xlu0 %9568  ;;  %v3357_v4 = vsel %vm108_vm3, %v3293_v48, %v9546_v15  ;;  %v12447_v30 = vpop.f32.mrb[96].mxu0  ;;  %v3229_v13 = vsel %vm3203_vm4, %v3164_v52, %v9511_v54  ;;  %v1394_v15 = vld [vmem:[#allocation2 + $0x290] sm:$0xff]  ;;  %v9505_v54 = vunpack.i.l.bf16 %v12352_v18 }
 0x204   :  { %v12439_v31 = vpop.permute.xlu1 %9558  ;;  %3879 = vmatprep.mubr.f32.mxu1 %v3420_v33  ;;  %14981 = vst [vmem:[#allocation24_spill] sm:$0xff] %v12447_v30  ;;  %v3421_v6 = vsel %vm3203_vm4, %v3357_v4, %v9551_v37  ;;  %v12453_v2 = vpop.f32.mrb[97].mxu0  ;;  %v9556_v37 = vunpack.i.h.bf16 %v12419_v58  ;;  %v9847_v33 = vpack.i.bf16 %v1394_v15, %v1393_v46  ;;  %v1244_v48 = vld [vmem:[#allocation2 + $0x151] sm:$0xff]  ;;  %v9540_v4 = vunpack.i.l.bf16 %v12402_v14 }
 0x205   :  { %3880 = vmatmul.mubr.f32.gmra.mrb[48].mxu1 %v3228_v8  ;;  %9868 = vrot.lane.b32.xlu0 %v9867_v43, %s10745_s26  ;;  %14982 = vst [vmem:[#allocation25_spill] sm:$0xff] %v12453_v2  ;;  %v9500_v43 = vunpack.i.l.bf16 %v12335_v57  ;;  %v3294_v58 = vsel %vm27_vm0, %v1244_v48, %v9555_v63  ;;  %v9862_v61 = vpack.i.bf16 %v1394_v15, %v12421_v36  ;;  %v9501_v46 = vunpack.i.h.bf16 %v12335_v57  ;;  %v1396_v48 = vld [vmem:[#allocation2 + $0x2a8] sm:$0xff] }
 0x206   :  { %9838 = vrot.lane.b32.xlu1 %v9837_v34, %s10745_s26  ;;  %3884 = vmatprep.mubr.f32.mxu1 %v3421_v6  ;;  %v3295_v52 = vsel %vm27_vm0, %v1245_v22, %v9556_v37  ;;  %v9506_v36 = vunpack.i.h.bf16 %v12352_v18 }
 0x207   :  { %v9579_v32 = vpop.permute.xlu0 %9578  ;;  %v3101_v63 = vsel %vm27_vm0, %v988_v0, %v9500_v43  ;;  %v6451_v43 = vld [vmem:[%s14958_s4 + $0x8] sm:$0xff] }
 0x208   :  { %v12456_v41 = vpop.permute.xlu1 %9563  ;;  %v9581_v15 = vunpack.i.h.bf16 %v9579_v32  ;;  %v3165_v37 = vsel %vm108_vm3, %v3101_v63, %v9505_v54  ;;  %v12513_v63 = vld [vmem:[#allocation2 + $0x2c1] sm:$0xff] }
 0x209   :  { %3885 = vmatmul.mubr.f32.gmra.mrb[50].mxu1 %v3229_v13  ;;  %9873 = vrot.lane.b32.xlu0 %v11757_v9, %s10746_s9  ;;  %v12476_v13 = vpop.f32.mrb[98].mxu0  ;;  %v3230_v18 = vsel %vm3203_vm4, %v3165_v37, %v9540_v4  ;;  %v1246_v37 = vld [vmem:[#allocation2 + $0x169] sm:$0xff] }
 0x20a   :  { %9843 = vrot.lane.b32.xlu1 %v11733_v45, %s10746_s9  ;;  %v9580_v45 = vunpack.i.l.bf16 %v9579_v32  ;;  %14983 = vst [vmem:[#allocation26_spill] sm:$0xff] %v12476_v13  ;;  %v12490_v57 = vpop.f32.mrb[99].mxu0  ;;  %v1247_v13 = vld [vmem:[#allocation2 + $0x171] sm:$0xff] }
 0x20b   :  { %v12466_v25 = vpop.permute.xlu0 %9593  ;;  %14984 = vst [vmem:[#allocation27_spill] sm:$0xff] %v12490_v57  ;;  %v6455_v57 = vld [vmem:[%s14958_s4 + $0x28] sm:$0xff] }
 0x20c   :  { %v9574_v12 = vpop.permute.xlu1 %9573 }
 0x20d   :  { %v9576_v8 = vunpack.i.h.bf16 %v9574_v12  ;;  %v9575_v34 = vunpack.i.l.bf16 %v9574_v12  ;;  %9883 = vrot.lane.b32.xlu0 %v9882_v60, %s10747_s28 }
 0x20e   :  { %9848 = vrot.lane.b32.xlu1 %v9847_v33, %s10746_s9 }
 0x20f   :  { %v3358_v6 = vsel %vm108_vm3, %v3294_v58, %v9575_v34  ;;  %v12481_v30 = vpop.permute.xlu0 %9603  ;;  %v3359_v60 = vsel %vm108_vm3, %v3295_v52, %v9576_v8  ;;  %v1395_v34 = vld [vmem:[#allocation2 + $0x2a0] sm:$0xff]  ;;  %v9541_v8 = vunpack.i.h.bf16 %v12402_v14 }
 0x210   :  { %v12479_v12 = vpop.permute.xlu1 %9583  ;;  %v3422_v33 = vsel %vm3203_vm4, %v3358_v6, %v9580_v45  ;;  %v12488_v58 = vld [vmem:[#allocation2 + $0x2b9] sm:$0xff]  ;;  %v3423_v22 = vsel %vm3203_vm4, %v3359_v60, %v9581_v15  ;;  %v9877_v14 = vpack.i.bf16 %v1396_v48, %v1395_v34  ;;  %v6452_v60 = vld [vmem:[%s14958_s4 + $0x10] sm:$0xff]  ;;  %v9606_v59 = vunpack.i.h.bf16 %v12481_v30 }
 0x211   :  { %3889 = vmatprep.mubr.f32.mxu1 %v3422_v33  ;;  %v6450_v45 = vld [vmem:[%s14958_s4] sm:$0xff]  ;;  %9888 = vrot.lane.b32.xlu0 %v11757_v9, %s10745_s26  ;;  %v9585_v54 = vunpack.i.l.bf16 %v12479_v12  ;;  %v9530_v9 = vunpack.i.l.bf16 %v12366_v10  ;;  %v6453_v15 = vld [vmem:[%s14958_s4 + $0x18] sm:$0xff] }
 0x212   :  { %9863 = vrot.lane.b32.xlu1 %v9862_v61, %s10747_s28  ;;  %v8879_v32 = vpack.c.bf16 %v6451_v43, %v6450_v45  ;;  %3890 = vmatmul.mubr.f32.gmra.mrb[52].mxu1 %v3230_v18  ;;  %v989_v6 = vld [vmem:[#allocation2 + $0x140] sm:$0xff]  ;;  %v9912_v61 = vpack.i.bf16 %v1395_v34, %v12488_v58  ;;  %v9595_v34 = vunpack.i.l.bf16 %v12466_v25  ;;  %v8882_v45 = vpack.c.bf16 %v6453_v15, %v6452_v60 }
 0x213   :  { %3894 = vmatprep.mubr.f32.mxu1 %v3423_v22  ;;  %v12507_v52 = vpop.permute.xlu0 %9618  ;;  %v3102_v33 = vsel %vm27_vm0, %v989_v6, %v9501_v46  ;;  %v9586_v46 = vunpack.i.h.bf16 %v12479_v12  ;;  %v9535_v43 = vunpack.i.l.bf16 %v12383_v55  ;;  %v3296_v18 = vsel %vm27_vm0, %v1246_v37, %v9585_v54  ;;  %v12528_v22 = vld [vmem:[#allocation2 + $0x2d1] sm:$0xff] }
 0x214   :  { %v12505_v0 = vpop.permute.xlu1 %9588  ;;  %v3166_v4 = vsel %vm108_vm3, %v3102_v33, %v9506_v36  ;;  %8880 = vmatpush1.bf16.msra.mxu0 %v8879_v32  ;;  %9006 = vmatpush1.bf16.msra.mxu1 %v8879_v32  ;;  %v12530_v32 = vld [vmem:[#allocation2 + $0x2d9] sm:$0xff]  ;;  %v9570_v6 = vunpack.i.l.bf16 %v12441_v7  ;;  %v9605_v12 = vunpack.i.l.bf16 %v12481_v30  ;;  %v14985_v60 = vmov 0.0|0.0   ;;  %v6456_v30 = vld [vmem:[%s14958_s4 + $0x30] sm:$0xff] }
 0x215   :  { %9913 = vrot.lane.b32.xlu0 %v9912_v61, %s10747_s28  ;;  %v3231_v36 = vsel %vm3203_vm4, %v3166_v4, %v9541_v8  ;;  %v9892_v8 = vpack.i.bf16 %v1396_v48, %v12513_v63  ;;  %v990_v61 = vld [vmem:[#allocation2 + $0x150] sm:$0xff]  ;;  %v9927_v4 = vpack.i.bf16 %v12530_v32, %v12528_v22  ;;  %8881 = vmatprep.subr.bf16.mxu0 %v14985_v60  ;;  %v9531_v54 = vunpack.i.h.bf16 %v12366_v10  ;;  %v6454_v48 = vld [vmem:[%s14958_s4 + $0x20] sm:$0xff] }
 0x216   :  { %9878 = vrot.lane.b32.xlu1 %v9877_v14, %s10746_s9  ;;  %3895 = vmatmul.mubr.f32.gmra.mrb[54].mxu1 %v3231_v36  ;;  %v9596_v15 = vunpack.i.h.bf16 %v12466_v25  ;;  %v3103_v37 = vsel %vm27_vm0, %v990_v61, %v9530_v9  ;;  %v3360_v10 = vsel %vm108_vm3, %v3296_v18, %v9595_v34  ;;  %v3297_v25 = vsel %vm27_vm0, %v1247_v13, %v9586_v46  ;;  %v991_v46 = vld [vmem:[#allocation2 + $0x158] sm:$0xff] }
 0x217   :  { %v12534_v33 = vpop.permute.xlu0 %9628  ;;  %8991 = vmatprep.subr.bf16.mxu1 %v14985_v60  ;;  %v8885_v9 = vpack.c.bf16 %v6455_v57, %v6454_v48  ;;  %v9536_v61 = vunpack.i.h.bf16 %v12383_v55  ;;  %v3167_v20 = vsel %vm108_vm3, %v3103_v37, %v9535_v43  ;;  %v3104_v18 = vsel %vm27_vm0, %v991_v46, %v9531_v54  ;;  %v1249_v48 = vld [vmem:[#allocation2 + $0x189] sm:$0xff] }
 0x218   :  { %v9599_v14 = vpop.permute.xlu1 %9598  ;;  %8883 = vmatpush1.bf16.msra.mxu0 %v8882_v45  ;;  %9007 = vmatpush1.bf16.msra.mxu1 %v8882_v45  ;;  %v9897_v45 = vpack.i.bf16 %v12513_v63, %v12488_v58  ;;  %v3232_v55 = vsel %vm3203_vm4, %v3167_v20, %v9570_v6  ;;  %v9140_v58 = vunpack.i.l.bf16 %v11621_v49  ;;  %v3361_v63 = vsel %vm108_vm3, %v3297_v25, %v9596_v15 }
 0x219   :  { %v9600_v36 = vunpack.i.l.bf16 %v9599_v14  ;;  %v9601_v2 = vunpack.i.h.bf16 %v9599_v14  ;;  %9918 = vrot.lane.b32.xlu0 %v11813_v53, %s10745_s26  ;;  %v1248_v14 = vld [vmem:[#allocation2 + $0x181] sm:$0xff]  ;;  %8884 = vmatprep.subr.bf16.mxu0 %v14985_v60  ;;  %v9560_v20 = vunpack.i.l.bf16 %v12439_v31  ;;  %v9565_v15 = vunpack.i.l.bf16 %v12456_v41 }
 0x21a   :  { %9893 = vrot.lane.b32.xlu1 %v9892_v8, %s10747_s28  ;;  %v9571_v8 = vunpack.i.h.bf16 %v12441_v7  ;;  %v3298_v57 = vsel %vm27_vm0, %v1248_v14, %v9605_v12  ;;  %8992 = vmatprep.subr.bf16.mxu1 %v14985_v60  ;;  %v12572_v7 = vpop.f32.mrb[100].mxu0  ;;  %v1397_v14 = vld [vmem:[#allocation2 + $0x2b8] sm:$0xff]  ;;  %v9146_v46 = vunpack.i.h.bf16 %v11623_v50 }
 0x21b   :  { %v3424_v62 = vsel %vm3203_vm4, %v3360_v10, %v9600_v36  ;;  %v12565_v13 = vpop.permute.xlu0 %9633  ;;  %14986 = vst [vmem:[#allocation28_spill] sm:$0xff] %v12572_v7  ;;  %v3425_v43 = vsel %vm3203_vm4, %v3361_v63, %v9601_v2  ;;  %v12585_v6 = vpop.f32.mrb[101].mxu0  ;;  %v3168_v36 = vsel %vm108_vm3, %v3104_v18, %v9536_v61  ;;  %v3362_v37 = vsel %vm108_vm3, %v3298_v57, %v9140_v58  ;;  %v1398_v57 = vld [vmem:[#allocation2 + $0x2c0] sm:$0xff] }
 0x21c   :  { %v12563_v34 = vpop.permute.xlu1 %9608  ;;  %3899 = vmatprep.mubr.f32.mxu1 %v3424_v62  ;;  %8886 = vmatpush1.bf16.msra.mxu0 %v8885_v9  ;;  %v6457_v62 = vld [vmem:[%s14958_s4 + $0x38] sm:$0xff]  ;;  %v9145_v10 = vunpack.i.l.bf16 %v11623_v50  ;;  %v3233_v54 = vsel %vm3203_vm4, %v3168_v36, %v9571_v8  ;;  %v9141_v61 = vunpack.i.h.bf16 %v11621_v49  ;;  %v6458_v58 = vld [vmem:[%s14958_s4 + $0x40] sm:$0xff]  ;;  %v6459_v8 = vld [vmem:[%s14958_s4 + $0x48] sm:$0xff]  ;;  %v9561_v63 = vunpack.i.h.bf16 %v12439_v31 }
 0x21d   :  { %3900 = vmatmul.mubr.f32.gmra.mrb[56].mxu1 %v3232_v55  ;;  %9928 = vrot.lane.b32.xlu0 %v9927_v4, %s10745_s26  ;;  %v12587_v12 = vpack.c.bf16 %v6457_v62, %v6456_v30  ;;  %v9590_v4 = vunpack.i.l.bf16 %v12505_v0  ;;  %v3299_v55 = vsel %vm27_vm0, %v1249_v48, %v9606_v59  ;;  %v9566_v30 = vunpack.i.h.bf16 %v12456_v41  ;;  %v993_v41 = vld [vmem:[#allocation2 + $0x170] sm:$0xff] }
 0x21e   :  { %9898 = vrot.lane.b32.xlu1 %v9897_v45, %s10745_s26  ;;  %3904 = vmatprep.mubr.f32.mxu1 %v3425_v43  ;;  %v992_v45 = vld [vmem:[#allocation2 + $0x168] sm:$0xff]  ;;  %v3426_v49 = vsel %vm3203_vm4, %v3362_v37, %v9145_v10  ;;  %v3363_v31 = vsel %vm108_vm3, %v3299_v55, %v9141_v61  ;;  %v9907_v36 = vpack.i.bf16 %v1398_v57, %v1397_v14  ;;  %v6461_v37 = vld [vmem:[%s14958_s4 + $0x58] sm:$0xff] }
 0x21f   :  { %v12596_v2 = vpop.permute.xlu0 %9643  ;;  %8887 = vmatprep.subr.bf16.mxu0 %v14985_v60  ;;  %9008 = vmatpush1.bf16.msra.mxu1 %v8885_v9  ;;  %v3105_v59 = vsel %vm27_vm0, %v992_v45, %v9560_v20  ;;  %v12616_v9 = vpack.c.bf16 %v6459_v8, %v6458_v58  ;;  %v9942_v50 = vpack.i.bf16 %v1397_v14, %v12528_v22  ;;  %v9125_v14 = vunpack.i.l.bf16 %v11589_v5 }
 0x220   :  { %v12594_v25 = vpop.permute.xlu1 %9613  ;;  %8889 = vmatpush1.bf16.msra.mxu0 %v12587_v12  ;;  %v3169_v62 = vsel %vm108_vm3, %v3105_v59, %v9565_v15  ;;  %8993 = vmatprep.subr.bf16.mxu1 %v14985_v60  ;;  %v12631_v15 = vpop.f32.mrb[102].mxu0  ;;  %v3427_v22 = vsel %vm3203_vm4, %v3363_v31, %v9146_v46  ;;  %v3106_v48 = vsel %vm27_vm0, %v993_v41, %v9561_v63  ;;  %v1399_v63 = vld [vmem:[#allocation2 + $0x2d0] sm:$0xff]  ;;  %v12673_v31 = vld [vmem:[#allocation2 + $0x301] sm:$0xff] }
 0x221   :  { %3905 = vmatmul.mubr.f32.gmra.mrb[58].mxu1 %v3233_v54  ;;  %9933 = vrot.lane.b32.xlu0 %v11842_v29, %s10746_s9  ;;  %v3234_v20 = vsel %vm3203_vm4, %v3169_v62, %v9590_v4  ;;  %14987 = vst [vmem:[#allocation29_spill] sm:$0xff] %v12631_v15  ;;  %v12644_v10 = vpop.f32.mrb[103].mxu0  ;;  %v3170_v45 = vsel %vm108_vm3, %v3106_v48, %v9566_v30  ;;  %v994_v59 = vld [vmem:[#allocation2 + $0x1b0] sm:$0xff]  ;;  %v6462_v30 = vld [vmem:[%s14958_s4 + $0x60] sm:$0xff]  ;;  %v9136_v15 = vunpack.i.h.bf16 %v11611_v23 }
 0x222   :  { %9903 = vrot.lane.b32.xlu1 %v11813_v53, %s10746_s9  ;;  %3909 = vmatprep.mubr.f32.mxu1 %v3426_v49  ;;  %v9591_v53 = vunpack.i.h.bf16 %v12505_v0  ;;  %v6460_v0 = vld [vmem:[%s14958_s4 + $0x50] sm:$0xff]  ;;  %14988 = vst [vmem:[#allocation30_spill] sm:$0xff] %v12644_v10  ;;  %v9922_v8 = vpack.i.bf16 %v1398_v57, %v12530_v32  ;;  %v1400_v49 = vld [vmem:[#allocation2 + $0x2d8] sm:$0xff]  ;;  %v6463_v32 = vld [vmem:[%s14958_s4 + $0x68] sm:$0xff]  ;;  %v9645_v57 = vunpack.i.l.bf16 %v12596_v2  ;;  %v3107_v48 = vsel %vm27_vm0, %v994_v59, %v9125_v14 }
 0x223   :  { %8890 = vmatprep.subr.bf16.mxu0 %v14985_v60  ;;  %v12626_v18 = vpop.permute.xlu0 %9653  ;;  %v12646_v4 = vpack.c.bf16 %v6461_v37, %v6460_v0  ;;  %9009 = vmatpush1.bf16.msra.mxu1 %v12587_v12  ;;  %v12659_v46 = vld [vmem:[#allocation2 + $0x2e9] sm:$0xff]  ;;  %v6465_v14 = vld [vmem:[%s14958_s4 + $0x78] sm:$0xff] }
 0x224   :  { %v12624_v43 = vpop.permute.xlu1 %9623  ;;  %8892 = vmatpush1.bf16.msra.mxu0 %v12616_v9  ;;  %v3235_v58 = vsel %vm3203_vm4, %v3170_v45, %v9591_v53  ;;  %v1250_v12 = vld [vmem:[#allocation2 + $0x1c9] sm:$0xff]  ;;  %v1251_v45 = vld [vmem:[#allocation2 + $0x1d1] sm:$0xff]  ;;  %8994 = vmatprep.subr.bf16.mxu1 %v14985_v60 }
 0x225   :  { %3910 = vmatmul.mubr.f32.gmra.mrb[60].mxu1 %v3234_v20  ;;  %9943 = vrot.lane.b32.xlu0 %v9942_v50, %s10747_s28  ;;  %v9625_v54 = vunpack.i.l.bf16 %v12624_v43  ;;  %v9626_v62 = vunpack.i.h.bf16 %v12624_v43  ;;  %v12675_v53 = vld [vmem:[#allocation2 + $0x309] sm:$0xff]  ;;  %v12677_v20 = vpack.c.bf16 %v6463_v32, %v6462_v30  ;;  %v9135_v50 = vunpack.i.l.bf16 %v11611_v23 }
 0x226   :  { %9908 = vrot.lane.b32.xlu1 %v9907_v36, %s10746_s9  ;;  %3914 = vmatprep.mubr.f32.mxu1 %v3427_v22  ;;  %v9126_v36 = vunpack.i.h.bf16 %v11589_v5  ;;  %v9620_v43 = vunpack.i.l.bf16 %v12507_v52  ;;  %v9972_v22 = vpack.i.bf16 %v1399_v63, %v12659_v46  ;;  %v9646_v5 = vunpack.i.h.bf16 %v12596_v2  ;;  %v6464_v32 = vld [vmem:[%s14958_s4 + $0x70] sm:$0xff] }
 0x227   :  { %v12653_v61 = vpop.permute.xlu0 %9668  ;;  %8893 = vmatprep.subr.bf16.mxu0 %v14985_v60  ;;  %v3300_v41 = vsel %vm27_vm0, %v1250_v12, %v9625_v54  ;;  %v1466_v54 = vld [vmem:[#allocation2 + $0x2f1] sm:$0xff]  ;;  %v9977_v30 = vpack.i.bf16 %v12675_v53, %v12673_v31  ;;  %9010 = vmatpush1.bf16.msra.mxu1 %v12616_v9  ;;  %v3301_v59 = vsel %vm27_vm0, %v1251_v45, %v9626_v62  ;;  %v9621_v9 = vunpack.i.h.bf16 %v12507_v52  ;;  %v6467_v52 = vld [vmem:[%s14958_s4 + $0x88] sm:$0xff]  ;;  %v12740_v45 = vpop.f32.mrb[104].mxu0 }
 0x228   :  { %v12651_v55 = vpop.permute.xlu1 %9638  ;;  %8895 = vmatpush1.bf16.msra.mxu0 %v12646_v4  ;;  %v3364_v2 = vsel %vm108_vm3, %v3300_v41, %v9645_v57  ;;  %v12704_v12 = vpack.c.bf16 %v6465_v14, %v6464_v32  ;;  %v3171_v7 = vsel %vm108_vm3, %v3107_v48, %v9135_v50  ;;  %8995 = vmatprep.subr.bf16.mxu1 %v14985_v60  ;;  %v6466_v50 = vld [vmem:[%s14958_s4 + $0x80] sm:$0xff]  ;;  %v9610_v32 = vunpack.i.l.bf16 %v12563_v34 }
 0x229   :  { %3915 = vmatmul.mubr.f32.gmra.mrb[62].mxu1 %v3235_v58  ;;  %9948 = vrot.lane.b32.xlu0 %v11842_v29, %s10745_s26  ;;  %v9937_v29 = vpack.i.bf16 %v1400_v49, %v1399_v63  ;;  %v995_v58 = vld [vmem:[#allocation2 + $0x1b8] sm:$0xff]  ;;  %v3236_v57 = vsel %vm3203_vm4, %v3171_v7, %v9620_v43  ;;  %v9952_v62 = vpack.i.bf16 %v1400_v49, %v1466_v54 }
 0x22a   :  { %9923 = vrot.lane.b32.xlu1 %v9922_v8, %s10747_s28  ;;  %8896 = vmatprep.subr.bf16.mxu0 %v14985_v60  ;;  %v3108_v23 = vsel %vm27_vm0, %v995_v58, %v9126_v36  ;;  %v3365_v41 = vsel %vm108_vm3, %v3301_v59, %v9646_v5  ;;  %v9957_v48 = vpack.i.bf16 %v1466_v54, %v12659_v46  ;;  %v6469_v58 = vld [vmem:[%s14958_s4 + $0x98] sm:$0xff]  ;;  %v9655_v5 = vunpack.i.l.bf16 %v12626_v18  ;;  %v12753_v46 = vld [vmem:[#allocation2 + $0x2f0] sm:$0xff] }
 0x22b   :  { %v12684_v37 = vpop.permute.xlu0 %9678  ;;  %v3172_v49 = vsel %vm108_vm3, %v3108_v23, %v9136_v15  ;;  %9011 = vmatpush1.bf16.msra.mxu1 %v12646_v4  ;;  %14989 = vst [vmem:[#allocation31_spill] sm:$0xff] %v12740_v45  ;;  %v6468_v15 = vld [vmem:[%s14958_s4 + $0x90] sm:$0xff]  ;;  %v1401_v4 = vld [vmem:[#allocation2 + $0x2e8] sm:$0xff] }
 0x22c   :  { %v9649_v0 = vpop.permute.xlu1 %9648  ;;  %8898 = vmatpush1.bf16.msra.mxu0 %v12677_v20  ;;  %v12757_v54 = vpack.c.bf16 %v6469_v58, %v6468_v15  ;;  %8996 = vmatprep.subr.bf16.mxu1 %v14985_v60  ;;  %v6471_v23 = vld [vmem:[%s14958_s4 + $0xa8] sm:$0xff]  ;;  %v9611_v58 = vunpack.i.h.bf16 %v12563_v34 }
 0x22d   :  { %v9650_v8 = vunpack.i.l.bf16 %v9649_v0  ;;  %v9651_v63 = vunpack.i.h.bf16 %v9649_v0  ;;  %9973 = vrot.lane.b32.xlu0 %v9972_v22, %s10747_s28  ;;  %8899 = vmatprep.subr.bf16.mxu0 %v14985_v60  ;;  %v3237_v22 = vsel %vm3203_vm4, %v3172_v49, %v9621_v9  ;;  %v12800_v34 = vld [vmem:[#allocation2 + $0x308] sm:$0xff] }
 0x22e   :  { %9938 = vrot.lane.b32.xlu1 %v9937_v29, %s10746_s9 }
 0x22f   :  { %v3428_v10 = vsel %vm3203_vm4, %v3364_v2, %v9650_v8  ;;  %v12714_v29 = vpop.permute.xlu0 %9688  ;;  %v3429_v7 = vsel %vm3203_vm4, %v3365_v41, %v9651_v63  ;;  %v12755_v8 = vpop.f32.mrb[105].mxu0  ;;  %v9615_v2 = vunpack.i.l.bf16 %v12594_v25  ;;  %9012 = vmatpush1.bf16.msra.mxu1 %v12677_v20  ;;  %v9640_v41 = vunpack.i.l.bf16 %v12651_v55  ;;  %v996_v20 = vld [vmem:[#allocation2 + $0x1c8] sm:$0xff] }
 0x230   :  { %v12712_v0 = vpop.permute.xlu1 %9658  ;;  %3919 = vmatprep.mubr.f32.mxu1 %v3428_v10  ;;  %8901 = vmatpush1.bf16.msra.mxu0 %v12704_v12  ;;  %v12729_v10 = vpack.c.bf16 %v6467_v52, %v6466_v50  ;;  %14990 = vst [vmem:[#allocation32_spill] sm:$0xff] %v12755_v8  ;;  %v9680_v50 = vunpack.i.l.bf16 %v12684_v37  ;;  %v998_v8 = vld [vmem:[#allocation2 + $0x1e0] sm:$0xff] }
 0x231   :  { %3920 = vmatmul.mubr.f32.gmra.mrb[64].mxu1 %v3236_v57  ;;  %9978 = vrot.lane.b32.xlu0 %v9977_v30, %s10745_s26  ;;  %v9656_v30 = vunpack.i.h.bf16 %v12626_v18  ;;  %v1252_v57 = vld [vmem:[#allocation2 + $0x1e1] sm:$0xff] }
 0x232   :  { %9953 = vrot.lane.b32.xlu1 %v9952_v62, %s10747_s28  ;;  %3924 = vmatprep.mubr.f32.mxu1 %v3429_v7  ;;  %v9967_v62 = vpack.i.bf16 %v12753_v46, %v1401_v4  ;;  %v6470_v18 = vld [vmem:[%s14958_s4 + $0xa0] sm:$0xff]  ;;  %v3302_v52 = vsel %vm27_vm0, %v1252_v57, %v9655_v5  ;;  %v1253_v7 = vld [vmem:[#allocation2 + $0x1e9] sm:$0xff]  ;;  %v3109_v57 = vsel %vm27_vm0, %v996_v20, %v9610_v32 }
 0x233   :  { %v12734_v43 = vpop.permute.xlu0 %9693  ;;  %8902 = vmatprep.subr.bf16.mxu0 %v14985_v60  ;;  %v12782_v49 = vpack.c.bf16 %v6471_v23, %v6470_v18  ;;  %v3303_v15 = vsel %vm27_vm0, %v1253_v7, %v9656_v30  ;;  %8997 = vmatprep.subr.bf16.mxu1 %v14985_v60  ;;  %v12795_v18 = vld [vmem:[#allocation2 + $0x300] sm:$0xff]  ;;  %v3173_v23 = vsel %vm108_vm3, %v3109_v57, %v9615_v2  ;;  %v6472_v32 = vld [vmem:[%s14958_s4 + $0xb0] sm:$0xff] }
 0x234   :  { %v12732_v36 = vpop.permute.xlu1 %9663  ;;  %8904 = vmatpush1.bf16.msra.mxu0 %v12729_v10  ;;  %v3238_v2 = vsel %vm3203_vm4, %v3173_v23, %v9640_v41  ;;  %v1088_v57 = vld [vmem:[#allocation2 + $0x319] sm:$0xff]  ;;  %v9992_v23 = vpack.i.bf16 %v12800_v34, %v12795_v18  ;;  %9013 = vmatpush1.bf16.msra.mxu1 %v12704_v12 }
 0x235   :  { %3925 = vmatmul.mubr.f32.gmra.mrb[66].mxu1 %v3237_v22  ;;  %9983 = vrot.lane.b32.xlu0 %v11913_v26, %s10746_s9 }
 0x236   :  { %9958 = vrot.lane.b32.xlu1 %v9957_v48, %s10745_s26  ;;  %8905 = vmatprep.subr.bf16.mxu0 %v14985_v60  ;;  %v9997_v48 = vpack.i.bf16 %v1401_v4, %v12673_v31  ;;  %v9616_v31 = vunpack.i.h.bf16 %v12594_v25  ;;  %v9681_v4 = vunpack.i.h.bf16 %v12684_v37  ;;  %v6473_v25 = vld [vmem:[%s14958_s4 + $0xb8] sm:$0xff]  ;;  %v9641_v37 = vunpack.i.h.bf16 %v12651_v55 }
 0x237   :  { %v12762_v63 = vpop.permute.xlu0 %9698  ;;  %8998 = vmatprep.subr.bf16.mxu1 %v14985_v60 }
 0x238   :  { %v9674_v14 = vpop.permute.xlu1 %9673  ;;  %8907 = vmatpush1.bf16.msra.mxu0 %v12757_v54  ;;  %9014 = vmatpush1.bf16.msra.mxu1 %v12729_v10  ;;  %v999_v10 = vld [vmem:[#allocation2 + $0x1e8] sm:$0xff] }
 0x239   :  { %v9676_v59 = vunpack.i.h.bf16 %v9674_v14  ;;  %v9675_v9 = vunpack.i.l.bf16 %v9674_v14  ;;  %9988 = vrot.lane.b32.xlu0 %v11900_v56, %s10745_s26  ;;  %8908 = vmatprep.subr.bf16.mxu0 %v14985_v60 }
 0x23a   :  { %9963 = vrot.lane.b32.xlu1 %v11900_v56, %s10746_s9  ;;  %8999 = vmatprep.subr.bf16.mxu1 %v14985_v60 }
 0x23b   :  { %v3366_v22 = vsel %vm108_vm3, %v3302_v52, %v9675_v9  ;;  %v12790_v56 = vpop.permute.xlu0 %9708  ;;  %v3367_v9 = vsel %vm108_vm3, %v3303_v15, %v9676_v59  ;;  %v12802_v52 = vpop.f32.mrb[106].mxu0  ;;  %v9700_v59 = vunpack.i.l.bf16 %v12762_v63 }
 0x23c   :  { %v9684_v14 = vpop.permute.xlu1 %9683  ;;  %v3430_v5 = vsel %vm3203_vm4, %v3366_v22, %v9680_v50  ;;  %14991 = vst [vmem:[#allocation33_spill] sm:$0xff] %v12802_v52  ;;  %8910 = vmatpush1.bf16.msra.mxu0 %v12782_v49  ;;  %v1254_v50 = vld [vmem:[#allocation2 + $0x1f9] sm:$0xff]  ;;  %v12816_v7 = vpop.f32.mrb[107].mxu0  ;;  %v12818_v22 = vpack.c.bf16 %v6473_v25, %v6472_v32  ;;  %v3431_v15 = vsel %vm3203_vm4, %v3367_v9, %v9681_v4  ;;  %v12822_v52 = vld [vmem:[#allocation2 + $0x321] sm:$0xff]  ;;  %v9635_v9 = vunpack.i.l.bf16 %v12565_v13 }
 0x23d   :  { %v9685_v30 = vunpack.i.l.bf16 %v9684_v14  ;;  %3929 = vmatprep.mubr.f32.mxu1 %v3430_v5  ;;  %9998 = vrot.lane.b32.xlu0 %v9997_v48, %s10747_s28  ;;  %14992 = vst [vmem:[#allocation34_spill] sm:$0xff] %v12816_v7  ;;  %v9686_v20 = vunpack.i.h.bf16 %v9684_v14  ;;  %v997_v5 = vld [vmem:[#allocation2 + $0x1d0] sm:$0xff]  ;;  %v10002_v32 = vpack.i.bf16 %v12822_v52, %v1088_v57  ;;  %v9670_v4 = vunpack.i.l.bf16 %v12653_v61 }
 0x23e   :  { %9968 = vrot.lane.b32.xlu1 %v9967_v62, %s10746_s9  ;;  %3930 = vmatmul.mubr.f32.gmra.mrb[68].mxu1 %v3238_v2  ;;  %v9630_v62 = vunpack.i.l.bf16 %v12534_v33  ;;  %v3110_v14 = vsel %vm27_vm0, %v997_v5, %v9611_v58  ;;  %v6474_v2 = vld [vmem:[%s14958_s4 + $0xc0] sm:$0xff]  ;;  %v6475_v58 = vld [vmem:[%s14958_s4 + $0xc8] sm:$0xff] }
 0x23f   :  { %v3304_v55 = vsel %vm27_vm0, %v1254_v50, %v9685_v30  ;;  %3934 = vmatprep.mubr.f32.mxu1 %v3431_v15  ;;  %v12825_v41 = vpop.permute.xlu0 %9733  ;;  %8911 = vmatprep.subr.bf16.mxu0 %v14985_v60  ;;  %v3174_v25 = vsel %vm108_vm3, %v3110_v14, %v9616_v31  ;;  %v9701_v50 = vunpack.i.h.bf16 %v12762_v63  ;;  %v1255_v5 = vld [vmem:[#allocation2 + $0x201] sm:$0xff]  ;;  %v12849_v14 = vpack.c.bf16 %v6475_v58, %v6474_v2 }
 0x240   :  { %v9704_v48 = vpop.permute.xlu1 %9703  ;;  %8913 = vmatpush1.bf16.msra.mxu0 %v12818_v22  ;;  %v3239_v31 = vsel %vm3203_vm4, %v3174_v25, %v9641_v37  ;;  %v3368_v15 = vsel %vm108_vm3, %v3304_v55, %v9700_v59  ;;  %v3305_v12 = vsel %vm27_vm0, %v1255_v5, %v9686_v20  ;;  %v9631_v63 = vunpack.i.h.bf16 %v12534_v33  ;;  %v6476_v33 = vld [vmem:[%s14958_s4 + $0xd0] sm:$0xff]  ;;  %v6478_v2 = vld [vmem:[%s14958_s4 + $0xe0] sm:$0xff]  ;;  %v6479_v58 = vld [vmem:[%s14958_s4 + $0xe8] sm:$0xff]  ;;  %9015 = vmatpush1.bf16.msra.mxu1 %v12757_v54 }
 0x241   :  { %v9705_v30 = vunpack.i.l.bf16 %v9704_v48  ;;  %10018 = vrot.lane.b32.xlu0 %v11913_v26, %s10745_s26  ;;  %v9706_v7 = vunpack.i.h.bf16 %v9704_v48  ;;  %8914 = vmatprep.subr.bf16.mxu0 %v14985_v60  ;;  %v10027_v37 = vpack.i.bf16 %v12795_v18, %v1088_v57  ;;  %v3111_v59 = vsel %vm27_vm0, %v998_v8, %v9630_v62  ;;  %v12883_v62 = vld [vmem:[%s14957_s3] ss:$0 sm:$0xff]  ;;  %v1471_v25 = vld [vmem:[#allocation2 + $0x331] sm:$0xff] }
 0x242   :  { %9993 = vrot.lane.b32.xlu1 %v9992_v23, %s10746_s9  ;;  %3935 = vmatmul.mubr.f32.gmra.mrb[70].mxu1 %v3239_v31  ;;  %v9636_v55 = vunpack.i.h.bf16 %v12565_v13  ;;  %v3175_v48 = vsel %vm108_vm3, %v3111_v59, %v9635_v9  ;;  %v9671_v8 = vunpack.i.h.bf16 %v12653_v61  ;;  %v3369_v18 = vsel %vm108_vm3, %v3305_v12, %v9701_v50 }
 0x243   :  { %v3432_v45 = vsel %vm3203_vm4, %v3368_v15, %v9705_v30  ;;  %v12857_v26 = vpop.permute.xlu0 %9738  ;;  %v3240_v13 = vsel %vm3203_vm4, %v3175_v48, %v9670_v4  ;;  %v3433_v57 = vsel %vm3203_vm4, %v3369_v18, %v9706_v7  ;;  %v3112_v9 = vsel %vm27_vm0, %v999_v10, %v9631_v63  ;;  %v1214_v4 = vld [vmem:[#allocation2 + $0x318] sm:$0xff]  ;;  %9000 = vmatprep.subr.bf16.mxu1 %v14985_v60  ;;  %v12918_v48 = vld [vmem:[#allocation2 + $0x320] sm:$0xff]  ;;  %v12934_v18 = vld [vmem:[#allocation2 + $0x330] sm:$0xff] }
 0x244   :  { %v12855_v23 = vpop.permute.xlu1 %9713  ;;  %3939 = vmatprep.mubr.f32.mxu1 %v3432_v45  ;;  %8916 = vmatpush1.bf16.msra.mxu0 %v12849_v14  ;;  %v6477_v45 = vld [vmem:[%s14958_s4 + $0xd8] sm:$0xff]  ;;  %v3176_v7 = vsel %vm108_vm3, %v3112_v9, %v9636_v55  ;;  %v12907_v5 = vpack.c.bf16 %v6479_v58, %v6478_v2  ;;  %v10012_v54 = vpack.i.bf16 %v12753_v46, %v12675_v53  ;;  %v1537_v55 = vld [vmem:[#allocation2 + $0x34a] sm:$0xff]  ;;  %v9710_v46 = vunpack.i.l.bf16 %v12790_v56 }
 0x245   :  { %10028 = vrot.lane.b32.xlu0 %v10027_v37, %s10747_s28  ;;  %v12877_v20 = vpack.c.bf16 %v6477_v45, %v6476_v33  ;;  %8917 = vmatprep.subr.bf16.mxu0 %v14985_v60  ;;  %v3241_v15 = vsel %vm3203_vm4, %v3176_v7, %v9671_v8  ;;  %v10047_v59 = vpack.i.bf16 %v1214_v4, %v1471_v25  ;;  %v12920_v33 = vpop.f32.mrb[108].mxu0  ;;  %v6481_v53 = vld [vmem:[%s14958_s4 + $0xf8] sm:$0xff]  ;;  %v9711_v7 = vunpack.i.h.bf16 %v12790_v56 }
 0x246   :  { %10003 = vrot.lane.b32.xlu1 %v10002_v32, %s10745_s26  ;;  %3940 = vmatmul.mubr.f32.gmra.mrb[72].mxu1 %v3240_v13  ;;  %v12936_v10 = vpop.f32.mrb[109].mxu0  ;;  %v1538_v9 = vld [vmem:[#allocation2 + $0x352] sm:$0xff]  ;;  %v9660_v25 = vunpack.i.l.bf16 %v12712_v0 }
 0x247   :  { %3944 = vmatprep.mubr.f32.mxu1 %v3433_v57  ;;  %v12888_v32 = vpop.permute.xlu0 %9748  ;;  %8699 = vmatprep.mubr.msk.f32.mxu0 %vm27_vm0, %v1537_v55  ;;  %v1473_v57 = vld [vmem:[#allocation2 + $0x349] sm:$0xff]  ;;  %v9735_v55 = vunpack.i.l.bf16 %v12825_v41 }
 0x248   :  { %v12886_v61 = vpop.permute.xlu1 %9718  ;;  %v3761_v30 = vpop.f32.mrb[0].mxu1  ;;  %8919 = vmatpush1.bf16.msra.mxu0 %v12877_v20  ;;  %9016 = vmatpush1.bf16.msra.mxu1 %v12782_v49  ;;  %v14993_v49 = vpack.i.bf16 %v12053_v27, %v12051_v38 }
 0x249   :  { %v3762_v50 = vadd.f32 %v12883_v62, %v3761_v30  ;;  %v3763_v31 = vpop.f32.mrb[1].mxu1  ;;  %10038 = vrot.lane.b32.xlu0 %v11978_v44, %s10745_s26  ;;  %8920 = vmatprep.subr.bf16.mxu0 %v14985_v60 }
 0x24a   :  { %10008 = vrot.lane.b32.xlu1 %v11978_v44, %s10746_s9  ;;  %3945 = vmatmul.mubr.f32.gmra.mrb[74].mxu1 %v3241_v15  ;;  %v10022_v31 = vpack.i.bf16 %v12918_v48, %v1214_v4  ;;  %v9665_v15 = vunpack.i.l.bf16 %v12732_v36 }
 0x24b   :  { %v4147_v12 = vadd.f32 %v11972_v11, %v3762_v50  ;;  %v12912_v37 = vpop.permute.xlu0 %9753  ;;  %v6480_v11 = vld [vmem:[%s14958_s4 + $0xf0] sm:$0xff]  ;;  %8700 = vmatmul.mubr.msk.f32.gmra.mrb[126].mxu0 %vm27_vm0, %v1538_v9  ;;  %9001 = vmatprep.subr.bf16.mxu1 %v14985_v60 }
 0x24c   :  { %v12910_v63 = vpop.permute.xlu1 %9723  ;;  %v3766_v44 = vpop.f32.mrb[2].mxu1  ;;  %8922 = vmatpush1.bf16.msra.mxu0 %v12907_v5  ;;  %v12938_v30 = vpack.c.bf16 %v6481_v53, %v6480_v11  ;;  %v1257_v11 = vld [vmem:[#allocation2 + $0x219] sm:$0xff]  ;;  %9017 = vmatpush1.bf16.msra.mxu1 %v12818_v22 }
 0x24d   :  { %v4465_v45 = vmax.f32 %v4147_v12, 0.0  ;;  %v3767_v8 = vadd.f32 %v12883_v62, %v3766_v44  ;;  %v3768_v13 = vpop.f32.mrb[3].mxu1  ;;  %10048 = vrot.lane.b32.xlu0 %v10047_v59, %s10747_s28  ;;  %8923 = vmatprep.subr.bf16.mxu0 %v14985_v60  ;;  %v10067_v59 = vpack.i.bf16 %v12934_v18, %v1473_v57  ;;  %v9661_v57 = vunpack.i.h.bf16 %v12712_v0 }
 0x24e   :  { %10013 = vrot.lane.b32.xlu1 %v10012_v54, %s10747_s28  ;;  %v1256_v54 = vld [vmem:[#allocation2 + $0x211] sm:$0xff]  ;;  %v3307_v13 = vsel %vm27_vm0, %v1257_v11, %v9711_v7  ;;  %v9666_v7 = vunpack.i.h.bf16 %v12732_v36  ;;  %v9715_v0 = vunpack.i.l.bf16 %v12855_v23  ;;  %9002 = vmatprep.subr.bf16.mxu1 %v14985_v60  ;;  %v9695_v11 = vunpack.i.l.bf16 %v12734_v43 }
 0x24f   :  { %4529 = vst.msk [vmem:[#allocation3 + $0x19] sm:$0xff] %vm108_vm3, %v4465_v45  ;;  %v4152_v2 = vadd.f32 %v11969_v21, %v3767_v8  ;;  %v12945_v50 = vpop.permute.xlu0 %9763  ;;  %v9736_v21 = vunpack.i.h.bf16 %v12825_v41  ;;  %v3306_v44 = vsel %vm27_vm0, %v1256_v54, %v9710_v46  ;;  %v10032_v45 = vpack.i.bf16 %v12800_v34, %v12822_v52  ;;  %v1000_v8 = vld [vmem:[#allocation2 + $0x1f8] sm:$0xff] }
 0x250   :  { %v9729_v58 = vpop.permute.xlu1 %9728  ;;  %8925 = vmatpush1.bf16.msra.mxu0 %v12938_v30  ;;  %v12966_v41 = vld [vmem:[#allocation2 + $0x338] sm:$0xff]  ;;  %v3113_v9 = vsel %vm27_vm0, %v1000_v8, %v9660_v25  ;;  %v9716_v25 = vunpack.i.h.bf16 %v12855_v23  ;;  %v9741_v54 = vunpack.i.h.bf16 %v12857_v26  ;;  %9018 = vmatpush1.bf16.msra.mxu1 %v12849_v14 }
 0x251   :  { %v9731_v56 = vunpack.i.h.bf16 %v9729_v58  ;;  %v9730_v12 = vunpack.i.l.bf16 %v9729_v58  ;;  %v4466_v4 = vmax.f32 %v4152_v2, 0.0  ;;  %10058 = vrot.lane.b32.xlu0 %v14993_v49, %s10745_s26  ;;  %8926 = vmatprep.subr.bf16.mxu0 %v14985_v60  ;;  %v12978_v52 = vld [vmem:[#allocation2 + $0x339] sm:$0xff]  ;;  %v3177_v2 = vsel %vm108_vm3, %v3113_v9, %v9665_v15  ;;  %v4657_v58 = vld [vmem:[#allocation3 + $0x1] sm:$0xff]  ;;  %v1259_v14 = vld [vmem:[#allocation2 + $0x231] sm:$0xff] }
 0x252   :  { %10023 = vrot.lane.b32.xlu1 %v10022_v31, %s10746_s9  ;;  %v12984_v31 = vpop.f32.mrb[110].mxu0  ;;  %v3242_v36 = vsel %vm3203_vm4, %v3177_v2, %v9736_v21  ;;  %v10042_v22 = vpack.i.bf16 %v12966_v41, %v12934_v18  ;;  %v1001_v49 = vld [vmem:[#allocation2 + $0x200] sm:$0xff]  ;;  %v9690_v21 = vunpack.i.l.bf16 %v12714_v29  ;;  %9003 = vmatprep.subr.bf16.mxu1 %v14985_v60 }
 0x253   :  { %v3370_v53 = vsel %vm108_vm3, %v3306_v44, %v9730_v12  ;;  %4530 = vst.msk [vmem:[#allocation3 + $0x21] sm:$0xff] %vm108_vm3, %v4466_v4  ;;  %v12973_v27 = vpop.permute.xlu0 %9768  ;;  %v3371_v34 = vsel %vm108_vm3, %v3307_v13, %v9731_v56  ;;  %v9740_v56 = vunpack.i.l.bf16 %v12857_v26  ;;  %v12994_v15 = vpop.f32.mrb[111].mxu0  ;;  %v3114_v26 = vsel %vm27_vm0, %v1001_v49, %v9661_v57 }
 0x254   :  { %v12971_v38 = vpop.permute.xlu1 %9743  ;;  %v3434_v46 = vsel %vm3203_vm4, %v3370_v53, %v9735_v55  ;;  %v3435_v23 = vsel %vm3203_vm4, %v3371_v34, %v9715_v0  ;;  %v3178_v9 = vsel %vm108_vm3, %v3114_v26, %v9666_v7  ;;  %v9766_v34 = vunpack.i.h.bf16 %v12945_v50  ;;  %9019 = vmatpush1.bf16.msra.mxu1 %v12877_v20 }
 0x255   :  { %3949 = vmatprep.mubr.f32.mxu1 %v3434_v46  ;;  %v3771_v12 = vpop.f32.mrb[4].mxu1  ;;  %10068 = vrot.lane.b32.xlu0 %v10067_v59, %s10747_s28  ;;  %v10052_v59 = vpack.i.bf16 %v12918_v48, %v12978_v52  ;;  %v1258_v48 = vld [vmem:[#allocation2 + $0x229] sm:$0xff]  ;;  %v9765_v52 = vunpack.i.l.bf16 %v12945_v50  ;;  %v3243_v57 = vsel %vm3203_vm4, %v3178_v9, %v9716_v25  ;;  %v3309_v50 = vsel %vm27_vm0, %v1259_v14, %v9741_v54  ;;  %v1474_v9 = vld [vmem:[#allocation2 + $0x351] sm:$0xff] }
 0x256   :  { %10033 = vrot.lane.b32.xlu1 %v10032_v45, %s10747_s28  ;;  %v3772_v55 = vadd.f32 %v12883_v62, %v3771_v12  ;;  %v3773_v4 = vpop.f32.mrb[5].mxu1  ;;  %3950 = vmatmul.mubr.f32.gmra.mrb[76].mxu1 %v3242_v36  ;;  %v4785_v44 = vld [vmem:[#allocation3 + $0x18] sm:$0xff]  ;;  %v1002_v36 = vld [vmem:[#allocation2 + $0x210] sm:$0xff]  ;;  %v9745_v54 = vunpack.i.l.bf16 %v12971_v38  ;;  %v10072_v14 = vpack.i.bf16 %v12966_v41, %v1474_v9 }
 0x257   :  { %3954 = vmatprep.mubr.f32.mxu1 %v3435_v23  ;;  %v13003_v53 = vpop.permute.xlu0 %9793  ;;  %v10077_v45 = vpack.i.bf16 %v4657_v58, %v4785_v44  ;;  %v1410_v4 = vld [vmem:[#allocation2 + $0x350] sm:$0xff]  ;;  %v3115_v49 = vsel %vm27_vm0, %v1002_v36, %v9690_v21  ;;  %9004 = vmatprep.subr.bf16.mxu1 %v14985_v60  ;;  %v4659_v36 = vld [vmem:[#allocation3 + $0x19] sm:$0xff] }
 0x258   :  { %v9759_v18 = vpop.permute.xlu1 %9758  ;;  %v4157_v8 = vadd.f32 %v12002_v47, %v3772_v55  ;;  %v3308_v47 = vsel %vm27_vm0, %v1258_v48, %v9740_v56  ;;  %v1409_v55 = vld [vmem:[#allocation2 + $0x348] sm:$0xff]  ;;  %v3179_v26 = vsel %vm108_vm3, %v3115_v49, %v9695_v11  ;;  %9020 = vmatpush1.bf16.msra.mxu1 %v12907_v5 }
 0x259   :  { %v9761_v13 = vunpack.i.h.bf16 %v9759_v18  ;;  %v9760_v46 = vunpack.i.l.bf16 %v9759_v18  ;;  %v3776_v0 = vpop.f32.mrb[6].mxu1  ;;  %10078 = vrot.lane.b32.xlu0 %v10077_v45, %s10746_s9  ;;  %v9696_v18 = vunpack.i.h.bf16 %v12734_v43  ;;  %v9746_v45 = vunpack.i.h.bf16 %v12971_v38  ;;  %9005 = vmatprep.subr.bf16.mxu1 %v14985_v60 }
 0x25a   :  { %10043 = vrot.lane.b32.xlu1 %v10042_v22, %s10746_s9  ;;  %v4467_v2 = vmax.f32 %v4157_v8, 0.0  ;;  %v3777_v7 = vadd.f32 %v12883_v62, %v3776_v0  ;;  %v3778_v58 = vpop.f32.mrb[7].mxu1  ;;  %3955 = vmatmul.mubr.f32.gmra.mrb[78].mxu1 %v3243_v57  ;;  %v9691_v22 = vunpack.i.h.bf16 %v12714_v29  ;;  %v3244_v21 = vsel %vm3203_vm4, %v3179_v26, %v9766_v34  ;;  %v13050_v0 = vpop.f32.mrb[112].mxu0 }
 0x25b   :  { %v3372_v12 = vsel %vm108_vm3, %v3308_v47, %v9760_v46  ;;  %v13022_v23 = vpop.permute.xlu0 %9798  ;;  %v3373_v44 = vsel %vm108_vm3, %v3309_v50, %v9761_v13  ;;  %v10062_v20 = vpack.i.bf16 %v1410_v4, %v1409_v55  ;;  %v1003_v13 = vld [vmem:[#allocation2 + $0x218] sm:$0xff]  ;;  %v9771_v58 = vunpack.i.h.bf16 %v12973_v27  ;;  %v4658_v50 = vld [vmem:[#allocation3 + $0x9] sm:$0xff]  ;;  %v4786_v55 = vld [vmem:[#allocation3 + $0x20] sm:$0xff]  ;;  %v13061_v4 = vpop.f32.mrb[113].mxu0 }
 0x25c   :  { %v13020_v25 = vpop.permute.xlu1 %9773  ;;  %v3436_v56 = vsel %vm3203_vm4, %v3372_v12, %v9765_v52  ;;  %4531 = vst.msk [vmem:[#allocation3 + $0x31] sm:$0xff] %vm108_vm3, %v4467_v2  ;;  %v4162_v29 = vadd.f32 %v11994_v39, %v3777_v7  ;;  %v3437_v43 = vsel %vm3203_vm4, %v3373_v44, %v9745_v54  ;;  %v3116_v11 = vsel %vm27_vm0, %v1003_v13, %v9691_v22 }
 0x25d   :  { %3959 = vmatprep.mubr.f32.mxu1 %v3436_v56  ;;  %9021 = vmatpush1.bf16.msra.mxu1 %v12938_v30  ;;  %v9720_v7 = vunpack.i.l.bf16 %v12886_v61  ;;  %v9725_v30 = vunpack.i.l.bf16 %v12910_v63  ;;  %v9721_v44 = vunpack.i.h.bf16 %v12886_v61  ;;  %v10082_v26 = vpack.i.bf16 %v4658_v50, %v4786_v55  ;;  %v1005_v50 = vld [vmem:[#allocation2 + $0x230] sm:$0xff]  ;;  %v13093_v55 = vpop.f32.mrb[114].mxu0 }
 0x25e   :  { %10053 = vrot.lane.b32.xlu1 %v10052_v59, %s10747_s28  ;;  %v4468_v8 = vmax.f32 %v4162_v29, 0.0  ;;  %3960 = vmatmul.mubr.f32.gmra.mrb[80].mxu1 %v3244_v21  ;;  %v3180_v59 = vsel %vm108_vm3, %v3116_v11, %v9696_v18  ;;  %v9750_v18 = vunpack.i.l.bf16 %v12888_v32  ;;  %v9796_v21 = vunpack.i.h.bf16 %v13003_v53  ;;  %v1261_v11 = vld [vmem:[#allocation2 + $0x249] sm:$0xff] }
 0x25f   :  { %3964 = vmatprep.mubr.f32.mxu1 %v3437_v43  ;;  %v13040_v39 = vpop.permute.xlu0 %9808  ;;  %v3245_v52 = vsel %vm3203_vm4, %v3180_v59, %v9746_v45  ;;  %v1004_v45 = vld [vmem:[#allocation2 + $0x228] sm:$0xff]  ;;  %v3311_v9 = vsel %vm27_vm0, %v1261_v11, %v9771_v58 }
 0x260   :  { %v13038_v46 = vpop.permute.xlu1 %9778  ;;  %4532 = vst.msk [vmem:[#allocation3 + $0x39] sm:$0xff] %vm108_vm3, %v4468_v8  ;;  %v3781_v38 = vpop.f32.mrb[8].mxu1  ;;  %v1260_v43 = vld [vmem:[#allocation2 + $0x241] sm:$0xff]  ;;  %v3117_v61 = vsel %vm27_vm0, %v1004_v45, %v9720_v7 }
 0x261   :  { %v3782_v48 = vadd.f32 %v12883_v62, %v3781_v38  ;;  %v3783_v34 = vpop.f32.mrb[9].mxu1  ;;  %v9795_v38 = vunpack.i.l.bf16 %v13003_v53  ;;  %v9775_v53 = vunpack.i.l.bf16 %v13020_v25 }
 0x262   :  { %10063 = vrot.lane.b32.xlu1 %v10062_v20, %s10746_s9  ;;  %3965 = vmatmul.mubr.f32.gmra.mrb[82].mxu1 %v3245_v52  ;;  %v3181_v52 = vsel %vm108_vm3, %v3117_v61, %v9725_v30  ;;  %v9751_v30 = vunpack.i.h.bf16 %v12888_v32 }
 0x263   :  { %v4167_v5 = vadd.f32 %v12024_v40, %v3782_v48  ;;  %v13055_v47 = vpop.permute.xlu0 %9813  ;;  %v4787_v2 = vld [vmem:[#allocation3 + $0x30] sm:$0xff]  ;;  %v9770_v40 = vunpack.i.l.bf16 %v12973_v27  ;;  %v9726_v48 = vunpack.i.h.bf16 %v12910_v63 }
 0x264   :  { %v13053_v57 = vpop.permute.xlu1 %9783  ;;  %v3786_v12 = vpop.f32.mrb[10].mxu1  ;;  %v10087_v41 = vpack.i.bf16 %v4659_v36, %v4787_v2  ;;  %v9776_v2 = vunpack.i.h.bf16 %v13020_v25  ;;  %v3246_v36 = vsel %vm3203_vm4, %v3181_v52, %v9796_v21  ;;  %v1006_v21 = vld [vmem:[#allocation2 + $0x240] sm:$0xff] }
 0x265   :  { %v4469_v22 = vmax.f32 %v4167_v5, 0.0  ;;  %v3787_v56 = vadd.f32 %v12883_v62, %v3786_v12  ;;  %v3788_v49 = vpop.f32.mrb[11].mxu1  ;;  %v4660_v5 = vld [vmem:[#allocation3 + $0x21] sm:$0xff] }
 0x266   :  { %10073 = vrot.lane.b32.xlu1 %v10072_v14, %s10747_s28  ;;  %10088 = vrot.lane.b32.xlu0 %v10087_v41, %s10746_s9  ;;  %v3118_v49 = vsel %vm27_vm0, %v1005_v50, %v9721_v44  ;;  %v13100_v41 = vpop.f32.mrb[115].mxu0 }
 0x267   :  { %4533 = vst.msk [vmem:[#allocation3 + $0x49] sm:$0xff] %vm108_vm3, %v4469_v22  ;;  %v4172_v54 = vadd.f32 %v12016_v17, %v3787_v56  ;;  %v13072_v29 = vpop.permute.xlu0 %9823  ;;  %v4788_v13 = vld [vmem:[#allocation3 + $0x38] sm:$0xff]  ;;  %v3310_v17 = vsel %vm27_vm0, %v1260_v43, %v9770_v40  ;;  %v9801_v40 = vunpack.i.h.bf16 %v13022_v23  ;;  %v9800_v22 = vunpack.i.l.bf16 %v13022_v23 }
 0x268   :  { %v9789_v27 = vpop.permute.xlu1 %9788  ;;  %v10092_v63 = vpack.i.bf16 %v4660_v5, %v4788_v13  ;;  %v3182_v23 = vsel %vm108_vm3, %v3118_v49, %v9726_v48  ;;  %v3119_v13 = vsel %vm27_vm0, %v1006_v21, %v9750_v18  ;;  %v9826_v32 = vunpack.i.h.bf16 %v13072_v29 }
 0x269   :  { %v9791_v20 = vunpack.i.h.bf16 %v9789_v27  ;;  %v9790_v8 = vunpack.i.l.bf16 %v9789_v27  ;;  %v4470_v59 = vmax.f32 %v4172_v54, 0.0  ;;  %v3247_v44 = vsel %vm3203_vm4, %v3182_v23, %v9776_v2 }
 0x26a   :  { %10083 = vrot.lane.b32.xlu1 %v10082_v26, %s10746_s9  ;;  %v4661_v26 = vld [vmem:[#allocation3 + $0x31] sm:$0xff]  ;;  %v9756_v48 = vunpack.i.h.bf16 %v12912_v37 }
 0x26b   :  { %v3374_v34 = vsel %vm108_vm3, %v3310_v17, %v9790_v8  ;;  %v3375_v14 = vsel %vm108_vm3, %v3311_v9, %v9791_v20  ;;  %4534 = vst.msk [vmem:[#allocation3 + $0x51] sm:$0xff] %vm108_vm3, %v4470_v59  ;;  %v13089_v12 = vpop.permute.xlu0 %9828  ;;  %v9755_v20 = vunpack.i.l.bf16 %v12912_v37  ;;  %v1262_v17 = vld [vmem:[#allocation2 + $0x259] sm:$0xff]  ;;  %v1263_v9 = vld [vmem:[#allocation2 + $0x261] sm:$0xff] }
 0x26c   :  { %v13087_v7 = vpop.permute.xlu1 %9803  ;;  %v3438_v58 = vsel %vm3203_vm4, %v3374_v34, %v9795_v38  ;;  %v3439_v56 = vsel %vm3203_vm4, %v3375_v14, %v9775_v53  ;;  %v9825_v34 = vunpack.i.l.bf16 %v13072_v29  ;;  %v3312_v5 = vsel %vm27_vm0, %v1262_v17, %v9800_v22 }
 0x26d   :  { %3969 = vmatprep.mubr.f32.mxu1 %v3438_v58  ;;  %v3791_v25 = vpop.f32.mrb[12].mxu1  ;;  %v3313_v18 = vsel %vm27_vm0, %v1263_v9, %v9801_v40  ;;  %v4662_v58 = vld [vmem:[#allocation3 + $0x39] sm:$0xff]  ;;  %v9805_v29 = vunpack.i.l.bf16 %v13087_v7  ;;  %v3183_v40 = vsel %vm108_vm3, %v3119_v13, %v9755_v20  ;;  %v13148_v9 = vpop.f32.mrb[116].mxu0 }
 0x26e   :  { %3970 = vmatmul.mubr.f32.gmra.mrb[84].mxu1 %v3246_v36  ;;  %10093 = vrot.lane.b32.xlu1 %v10092_v63, %s10746_s9  ;;  %v3792_v54 = vadd.f32 %v12883_v62, %v3791_v25  ;;  %v3793_v27 = vpop.f32.mrb[13].mxu1  ;;  %v4789_v45 = vld [vmem:[#allocation3 + $0x48] sm:$0xff] }
 0x26f   :  { %3974 = vmatprep.mubr.f32.mxu1 %v3439_v56  ;;  %v13106_v43 = vpop.permute.xlu0 %9853  ;;  %v10097_v61 = vpack.i.bf16 %v4661_v26, %v4789_v45  ;;  %v9806_v56 = vunpack.i.h.bf16 %v13087_v7  ;;  %v1007_v26 = vld [vmem:[#allocation2 + $0x248] sm:$0xff] }
 0x270   :  { %v9819_v8 = vpop.permute.xlu1 %9818  ;;  %v4177_v11 = vadd.f32 %v12198_v42, %v3792_v54  ;;  %v3248_v54 = vsel %vm3203_vm4, %v3183_v40, %v9826_v32  ;;  %v3120_v23 = vsel %vm27_vm0, %v1007_v26, %v9751_v30  ;;  %v4663_v17 = vld [vmem:[#allocation3 + $0x49] sm:$0xff] }
 0x271   :  { %v9821_v38 = vunpack.i.h.bf16 %v9819_v8  ;;  %v9820_v59 = vunpack.i.l.bf16 %v9819_v8  ;;  %v3796_v52 = vpop.f32.mrb[14].mxu1  ;;  %10098 = vrot.lane.b32.xlu0 %v10097_v61, %s10746_s9  ;;  %v3184_v20 = vsel %vm108_vm3, %v3120_v23, %v9756_v48  ;;  %v9831_v48 = vunpack.i.h.bf16 %v13089_v12 }
 0x272   :  { %3975 = vmatmul.mubr.f32.gmra.mrb[86].mxu1 %v3247_v44  ;;  %v4471_v14 = vmax.f32 %v4177_v11, 0.0  ;;  %v3797_v2 = vadd.f32 %v12883_v62, %v3796_v52  ;;  %v3798_v42 = vpop.f32.mrb[15].mxu1  ;;  %v4790_v63 = vld [vmem:[#allocation3 + $0x50] sm:$0xff]  ;;  %v3249_v8 = vsel %vm3203_vm4, %v3184_v20, %v9806_v56  ;;  %v9786_v23 = vunpack.i.h.bf16 %v13053_v57 }
 0x273   :  { %v3376_v53 = vsel %vm108_vm3, %v3312_v5, %v9820_v59  ;;  %v3377_v37 = vsel %vm108_vm3, %v3313_v18, %v9821_v38  ;;  %v13123_v50 = vpop.permute.xlu0 %9858  ;;  %v10102_v25 = vpack.i.bf16 %v4662_v58, %v4790_v63  ;;  %v9830_v38 = vunpack.i.l.bf16 %v13089_v12 }
 0x274   :  { %v13121_v36 = vpop.permute.xlu1 %9833  ;;  %v3440_v22 = vsel %vm3203_vm4, %v3376_v53, %v9825_v34  ;;  %4535 = vst.msk [vmem:[#allocation3 + $0x61] sm:$0xff] %vm108_vm3, %v4471_v14  ;;  %v4182_v49 = vadd.f32 %v12049_v24, %v3797_v2  ;;  %v3441_v27 = vsel %vm3203_vm4, %v3377_v37, %v9805_v29  ;;  %v13152_v14 = vpop.f32.mrb[117].mxu0  ;;  %v9781_v2 = vunpack.i.h.bf16 %v13038_v46  ;;  %v1264_v29 = vld [vmem:[#allocation2 + $0x271] sm:$0xff] }
 0x275   :  { %3979 = vmatprep.mubr.f32.mxu1 %v3440_v22  ;;  %10103 = vrot.lane.b32.xlu1 %v10102_v25, %s10746_s9  ;;  %v9810_v42 = vunpack.i.l.bf16 %v13040_v39  ;;  %v9785_v53 = vunpack.i.l.bf16 %v13053_v57  ;;  %v9856_v22 = vunpack.i.h.bf16 %v13106_v43  ;;  %v3314_v56 = vsel %vm27_vm0, %v1264_v29, %v9830_v38 }
 0x276   :  { %3980 = vmatmul.mubr.f32.gmra.mrb[88].mxu1 %v3248_v54  ;;  %v4472_v45 = vmax.f32 %v4182_v49, 0.0  ;;  %v1265_v49 = vld [vmem:[#allocation2 + $0x279] sm:$0xff]  ;;  %v9855_v54 = vunpack.i.l.bf16 %v13106_v43 }
 0x277   :  { %3984 = vmatprep.mubr.f32.mxu1 %v3441_v27  ;;  %v13136_v7 = vpop.permute.xlu0 %9868 }
 0x278   :  { %v13134_v21 = vpop.permute.xlu1 %9838  ;;  %4536 = vst.msk [vmem:[#allocation3 + $0x69] sm:$0xff] %vm108_vm3, %v4472_v45  ;;  %v3801_v24 = vpop.f32.mrb[16].mxu1  ;;  %v3315_v45 = vsel %vm27_vm0, %v1265_v49, %v9831_v48 }
 0x279   :  { %v3802_v61 = vadd.f32 %v12883_v62, %v3801_v24  ;;  %v3803_v44 = vpop.f32.mrb[17].mxu1 }
 0x27a   :  { %3985 = vmatmul.mubr.f32.gmra.mrb[90].mxu1 %v3249_v8  ;;  %v9836_v44 = vunpack.i.h.bf16 %v13121_v36 }
 0x27b   :  { %v4187_v13 = vadd.f32 %v12244_v1, %v3802_v61  ;;  %v13145_v30 = vpop.permute.xlu0 %9873  ;;  %v4791_v11 = vld [vmem:[#allocation3 + $0x60] sm:$0xff]  ;;  %v9780_v1 = vunpack.i.l.bf16 %v13038_v46  ;;  %v4664_v46 = vld [vmem:[#allocation3 + $0x51] sm:$0xff]  ;;  %v13171_v61 = vpop.f32.mrb[118].mxu0 }
 0x27c   :  { %v13143_v32 = vpop.permute.xlu1 %9843  ;;  %v3806_v59 = vpop.f32.mrb[18].mxu1  ;;  %v10107_v18 = vpack.i.bf16 %v4663_v17, %v4791_v11  ;;  %v1009_v17 = vld [vmem:[#allocation2 + $0x260] sm:$0xff] }
 0x27d   :  { %v4473_v34 = vmax.f32 %v4187_v13, 0.0  ;;  %v3807_v52 = vadd.f32 %v12883_v62, %v3806_v59  ;;  %v3808_v5 = vpop.f32.mrb[19].mxu1  ;;  %v9835_v13 = vunpack.i.l.bf16 %v13121_v36  ;;  %v13184_v48 = vpop.f32.mrb[119].mxu0  ;;  %v9861_v36 = vunpack.i.h.bf16 %v13123_v50 }
 0x27e   :  { %10108 = vrot.lane.b32.xlu0 %v10107_v18, %s10746_s9  ;;  %v3122_v18 = vsel %vm27_vm0, %v1009_v17, %v9781_v2 }
 0x27f   :  { %4537 = vst.msk [vmem:[#allocation3 + $0x79] sm:$0xff] %vm108_vm3, %v4473_v34  ;;  %v4192_v58 = vadd.f32 %v12229_v35, %v3807_v52  ;;  %v13161_v63 = vpop.permute.xlu0 %9883  ;;  %v4792_v37 = vld [vmem:[#allocation3 + $0x68] sm:$0xff]  ;;  %v1008_v35 = vld [vmem:[#allocation2 + $0x258] sm:$0xff]  ;;  %v9860_v34 = vunpack.i.l.bf16 %v13123_v50  ;;  %v3186_v29 = vsel %vm108_vm3, %v3122_v18, %v9786_v23 }
 0x280   :  { %v9849_v12 = vpop.permute.xlu1 %9848  ;;  %v10112_v26 = vpack.i.bf16 %v4664_v46, %v4792_v37  ;;  %v3121_v24 = vsel %vm27_vm0, %v1008_v35, %v9780_v1  ;;  %v9811_v1 = vunpack.i.h.bf16 %v13040_v39  ;;  %v9886_v39 = vunpack.i.h.bf16 %v13161_v63  ;;  %v1267_v35 = vld [vmem:[#allocation2 + $0x291] sm:$0xff] }
 0x281   :  { %v9851_v25 = vunpack.i.h.bf16 %v9849_v12  ;;  %v9850_v40 = vunpack.i.l.bf16 %v9849_v12  ;;  %v4474_v27 = vmax.f32 %v4192_v58, 0.0  ;;  %v3185_v38 = vsel %vm108_vm3, %v3121_v24, %v9785_v53  ;;  %v4665_v12 = vld [vmem:[#allocation3 + $0x61] sm:$0xff] }
 0x282   :  { %10113 = vrot.lane.b32.xlu1 %v10112_v26, %s10746_s9  ;;  %v3250_v59 = vsel %vm3203_vm4, %v3185_v38, %v9856_v22  ;;  %v1010_v22 = vld [vmem:[#allocation2 + $0x270] sm:$0xff]  ;;  %v9885_v23 = vunpack.i.l.bf16 %v13161_v63 }
 0x283   :  { %v3378_v20 = vsel %vm108_vm3, %v3314_v56, %v9850_v40  ;;  %v3379_v8 = vsel %vm108_vm3, %v3315_v45, %v9851_v25  ;;  %4538 = vst.msk [vmem:[#allocation3 + $0x81] sm:$0xff] %vm108_vm3, %v4474_v27  ;;  %v13179_v11 = vpop.permute.xlu0 %9888  ;;  %v9815_v25 = vunpack.i.l.bf16 %v13055_v47  ;;  %v3251_v56 = vsel %vm3203_vm4, %v3186_v29, %v9836_v44  ;;  %v1266_v26 = vld [vmem:[#allocation2 + $0x289] sm:$0xff] }
 0x284   :  { %v13177_v43 = vpop.permute.xlu1 %9863  ;;  %v3442_v57 = vsel %vm3203_vm4, %v3378_v20, %v9855_v54  ;;  %v3443_v5 = vsel %vm3203_vm4, %v3379_v8, %v9835_v13  ;;  %v3123_v2 = vsel %vm27_vm0, %v1010_v22, %v9810_v42  ;;  %v9816_v45 = vunpack.i.h.bf16 %v13055_v47 }
 0x285   :  { %3989 = vmatprep.mubr.f32.mxu1 %v3442_v57  ;;  %v3811_v52 = vpop.f32.mrb[20].mxu1  ;;  %v3316_v24 = vsel %vm27_vm0, %v1266_v26, %v9860_v34  ;;  %v3317_v42 = vsel %vm27_vm0, %v1267_v35, %v9861_v36  ;;  %v4666_v57 = vld [vmem:[#allocation3 + $0x69] sm:$0xff]  ;;  %v9865_v63 = vunpack.i.l.bf16 %v13177_v43  ;;  %v3187_v36 = vsel %vm108_vm3, %v3123_v2, %v9815_v25 }
 0x286   :  { %3990 = vmatmul.mubr.f32.gmra.mrb[92].mxu1 %v3250_v59  ;;  %v3812_v53 = vadd.f32 %v12883_v62, %v3811_v52  ;;  %v3813_v58 = vpop.f32.mrb[21].mxu1  ;;  %v4793_v37 = vld [vmem:[#allocation3 + $0x78] sm:$0xff]  ;;  %v13222_v22 = vpop.f32.mrb[120].mxu0  ;;  %v9890_v26 = vunpack.i.l.bf16 %v13179_v11 }
 0x287   :  { %3994 = vmatprep.mubr.f32.mxu1 %v3443_v5  ;;  %v13194_v40 = vpop.permute.xlu0 %9913  ;;  %v10117_v46 = vpack.i.bf16 %v4665_v12, %v4793_v37  ;;  %v9866_v5 = vunpack.i.h.bf16 %v13177_v43  ;;  %v1011_v12 = vld [vmem:[#allocation2 + $0x278] sm:$0xff] }
 0x288   :  { %v9879_v50 = vpop.permute.xlu1 %9878  ;;  %v4197_v49 = vadd.f32 %v12257_v51, %v3812_v53  ;;  %v3252_v53 = vsel %vm3203_vm4, %v3187_v36, %v9886_v39  ;;  %v3124_v29 = vsel %vm27_vm0, %v1011_v12, %v9811_v1 }
 0x289   :  { %v9881_v54 = vunpack.i.h.bf16 %v9879_v50  ;;  %v9880_v27 = vunpack.i.l.bf16 %v9879_v50  ;;  %v3816_v20 = vpop.f32.mrb[22].mxu1  ;;  %10118 = vrot.lane.b32.xlu0 %v10117_v46, %s10746_s9 }
 0x28a   :  { %3995 = vmatmul.mubr.f32.gmra.mrb[94].mxu1 %v3251_v56  ;;  %v4475_v8 = vmax.f32 %v4197_v49, 0.0  ;;  %v3817_v44 = vadd.f32 %v12883_v62, %v3816_v20  ;;  %v3818_v51 = vpop.f32.mrb[23].mxu1  ;;  %v4794_v38 = vld [vmem:[#allocation3 + $0x80] sm:$0xff]  ;;  %v13231_v56 = vpop.f32.mrb[121].mxu0 }
 0x28b   :  { %v3380_v13 = vsel %vm108_vm3, %v3316_v24, %v9880_v27  ;;  %v3381_v47 = vsel %vm108_vm3, %v3317_v42, %v9881_v54  ;;  %v13211_v17 = vpop.permute.xlu0 %9918  ;;  %v10122_v52 = vpack.i.bf16 %v4666_v57, %v4794_v38  ;;  %v9870_v51 = vunpack.i.l.bf16 %v13136_v7 }
 0x28c   :  { %v13209_v59 = vpop.permute.xlu1 %9893  ;;  %v3444_v34 = vsel %vm3203_vm4, %v3380_v13, %v9885_v23  ;;  %4539 = vst.msk [vmem:[#allocation3 + $0x91] sm:$0xff] %vm108_vm3, %v4475_v8  ;;  %v4202_v18 = vadd.f32 %v12250_v16, %v3817_v44  ;;  %v3445_v58 = vsel %vm3203_vm4, %v3381_v47, %v9865_v63  ;;  %v3188_v16 = vsel %vm108_vm3, %v3124_v29, %v9816_v45  ;;  %v4667_v45 = vld [vmem:[#allocation3 + $0x79] sm:$0xff]  ;;  %v1268_v63 = vld [vmem:[#allocation2 + $0x2a1] sm:$0xff] }
 0x28d   :  { %3999 = vmatprep.mubr.f32.mxu1 %v3444_v34  ;;  %10123 = vrot.lane.b32.xlu1 %v10122_v52, %s10746_s9  ;;  %v3253_v46 = vsel %vm3203_vm4, %v3188_v16, %v9866_v5  ;;  %v9891_v23 = vunpack.i.h.bf16 %v13179_v11  ;;  %v9840_v44 = vunpack.i.l.bf16 %v13134_v21  ;;  %v9845_v13 = vunpack.i.l.bf16 %v13143_v32 }
 0x28e   :  { %4000 = vmatmul.mubr.f32.gmra.mrb[96].mxu1 %v3252_v53  ;;  %v4476_v37 = vmax.f32 %v4202_v18, 0.0  ;;  %v9916_v34 = vunpack.i.h.bf16 %v13194_v40  ;;  %v3318_v5 = vsel %vm27_vm0, %v1268_v63, %v9890_v26  ;;  %v1269_v18 = vld [vmem:[#allocation2 + $0x2a9] sm:$0xff] }
 0x28f   :  { %4004 = vmatprep.mubr.f32.mxu1 %v3445_v58  ;;  %v13226_v25 = vpop.permute.xlu0 %9928  ;;  %v9915_v58 = vunpack.i.l.bf16 %v13194_v40  ;;  %v3319_v29 = vsel %vm27_vm0, %v1269_v18, %v9891_v23  ;;  %v1013_v23 = vld [vmem:[#allocation2 + $0x290] sm:$0xff] }
 0x290   :  { %v13224_v43 = vpop.permute.xlu1 %9898  ;;  %4540 = vst.msk [vmem:[#allocation3 + $0x99] sm:$0xff] %vm108_vm3, %v4476_v37  ;;  %v3821_v50 = vpop.f32.mrb[24].mxu1  ;;  %v1012_v37 = vld [vmem:[#allocation2 + $0x288] sm:$0xff] }
 0x291   :  { %v3822_v2 = vadd.f32 %v12883_v62, %v3821_v50  ;;  %v3823_v39 = vpop.f32.mrb[25].mxu1  ;;  %v9846_v50 = vunpack.i.h.bf16 %v13143_v32 }
 0x292   :  { %4005 = vmatmul.mubr.f32.gmra.mrb[98].mxu1 %v3253_v46 }
 0x293   :  { %v4207_v1 = vadd.f32 %v12271_v3, %v3822_v2  ;;  %v13237_v54 = vpop.permute.xlu0 %9933  ;;  %v4795_v27 = vld [vmem:[#allocation3 + $0x90] sm:$0xff]  ;;  %v9841_v3 = vunpack.i.h.bf16 %v13134_v21  ;;  %v4668_v21 = vld [vmem:[#allocation3 + $0x81] sm:$0xff]  ;;  %v13253_v53 = vpop.f32.mrb[122].mxu0  ;;  %v3125_v2 = vsel %vm27_vm0, %v1012_v37, %v9840_v44  ;;  %v9871_v44 = vunpack.i.h.bf16 %v13136_v7 }
 0x294   :  { %v13235_v49 = vpop.permute.xlu1 %9903  ;;  %v3826_v35 = vpop.f32.mrb[26].mxu1  ;;  %v10127_v8 = vpack.i.bf16 %v4667_v45, %v4795_v27  ;;  %v9895_v27 = vunpack.i.l.bf16 %v13209_v59  ;;  %v9876_v37 = vunpack.i.h.bf16 %v13145_v30 }
 0x295   :  { %v4477_v20 = vmax.f32 %v4207_v1, 0.0  ;;  %v3827_v24 = vadd.f32 %v12883_v62, %v3826_v35  ;;  %v3828_v42 = vpop.f32.mrb[27].mxu1  ;;  %v13257_v16 = vpop.f32.mrb[123].mxu0  ;;  %v9896_v1 = vunpack.i.h.bf16 %v13209_v59  ;;  %v3189_v35 = vsel %vm108_vm3, %v3125_v2, %v9845_v13  ;;  %v4669_v13 = vld [vmem:[#allocation3 + $0x91] sm:$0xff] }
 0x296   :  { %10128 = vrot.lane.b32.xlu0 %v10127_v8, %s10746_s9  ;;  %v3254_v45 = vsel %vm3203_vm4, %v3189_v35, %v9916_v34  ;;  %v9920_v59 = vunpack.i.l.bf16 %v13211_v17  ;;  %v3126_v8 = vsel %vm27_vm0, %v1013_v23, %v9841_v3  ;;  %v1014_v34 = vld [vmem:[#allocation2 + $0x2a0] sm:$0xff] }
 0x297   :  { %4541 = vst.msk [vmem:[#allocation3 + $0xa9] sm:$0xff] %vm108_vm3, %v4477_v20  ;;  %v4212_v57 = vadd.f32 %v12265_v28, %v3827_v24  ;;  %v13249_v38 = vpop.permute.xlu0 %9943  ;;  %v4796_v47 = vld [vmem:[#allocation3 + $0x98] sm:$0xff]  ;;  %v9921_v20 = vunpack.i.h.bf16 %v13211_v17  ;;  %v3190_v63 = vsel %vm108_vm3, %v3126_v8, %v9846_v50  ;;  %v3127_v3 = vsel %vm27_vm0, %v1014_v34, %v9870_v51  ;;  %v14994_v8 = vld [vmem:[#allocation7_spill] sm:$0xff] }
 0x298   :  { %v9909_v11 = vpop.permute.xlu1 %9908  ;;  %v10132_v12 = vpack.i.bf16 %v4668_v21, %v4796_v47  ;;  %v9946_v7 = vunpack.i.h.bf16 %v13249_v38 }
 0x299   :  { %v9911_v52 = vunpack.i.h.bf16 %v9909_v11  ;;  %v9910_v36 = vunpack.i.l.bf16 %v9909_v11  ;;  %v4478_v28 = vmax.f32 %v4212_v57, 0.0 }
 0x29a   :  { %10133 = vrot.lane.b32.xlu1 %v10132_v12, %s10746_s9  ;;  %v1271_v12 = vld [vmem:[#allocation2 + $0x2c1] sm:$0xff] }
 0x29b   :  { %v3382_v46 = vsel %vm108_vm3, %v3318_v5, %v9910_v36  ;;  %v3383_v39 = vsel %vm108_vm3, %v3319_v29, %v9911_v52  ;;  %4542 = vst.msk [vmem:[#allocation3 + $0xb1] sm:$0xff] %vm108_vm3, %v4478_v28  ;;  %v13269_v26 = vpop.permute.xlu0 %9948  ;;  %v9875_v52 = vunpack.i.l.bf16 %v13145_v30  ;;  %v3255_v5 = vsel %vm3203_vm4, %v3190_v63, %v9896_v1  ;;  %v1270_v28 = vld [vmem:[#allocation2 + $0x2b9] sm:$0xff] }
 0x29c   :  { %v13267_v40 = vpop.permute.xlu1 %9923  ;;  %v3446_v32 = vsel %vm3203_vm4, %v3382_v46, %v9915_v58  ;;  %v3447_v42 = vsel %vm3203_vm4, %v3383_v39, %v9895_v27  ;;  %v9945_v29 = vunpack.i.l.bf16 %v13249_v38  ;;  %v3320_v46 = vsel %vm27_vm0, %v1270_v28, %v9920_v59  ;;  %v4670_v38 = vld [vmem:[#allocation3 + $0x99] sm:$0xff] }
 0x29d   :  { %4009 = vmatprep.mubr.f32.mxu1 %v3446_v32  ;;  %v3831_v24 = vpop.f32.mrb[28].mxu1  ;;  %v3321_v51 = vsel %vm27_vm0, %v1271_v12, %v9921_v20  ;;  %v9925_v35 = vunpack.i.l.bf16 %v13267_v40 }
 0x29e   :  { %4010 = vmatmul.mubr.f32.gmra.mrb[100].mxu1 %v3254_v45  ;;  %v3832_v57 = vadd.f32 %v12883_v62, %v3831_v24  ;;  %v3833_v11 = vpop.f32.mrb[29].mxu1  ;;  %v4797_v47 = vld [vmem:[#allocation3 + $0xa8] sm:$0xff]  ;;  %v3191_v24 = vsel %vm108_vm3, %v3127_v3, %v9875_v52 }
 0x29f   :  { %4014 = vmatprep.mubr.f32.mxu1 %v3447_v42  ;;  %v13282_v36 = vpop.permute.xlu0 %9973  ;;  %v10137_v21 = vpack.i.bf16 %v4669_v13, %v4797_v47  ;;  %v9926_v42 = vunpack.i.h.bf16 %v13267_v40  ;;  %v3256_v11 = vsel %vm3203_vm4, %v3191_v24, %v9946_v7  ;;  %v1015_v47 = vld [vmem:[#allocation2 + $0x2a8] sm:$0xff] }
 0x2a0   :  { %v9939_v17 = vpop.permute.xlu1 %9938  ;;  %v4217_v62 = vadd.f32 %v12295_v19, %v3832_v57  ;;  %v13296_v19 = vld [vmem:[%s14957_s3] ss:$0 sm:$0xff]  ;;  %v3128_v34 = vsel %vm27_vm0, %v1015_v47, %v9871_v44 }
 0x2a1   :  { %v9941_v18 = vunpack.i.h.bf16 %v9939_v17  ;;  %v9940_v58 = vunpack.i.l.bf16 %v9939_v17  ;;  %v3836_v50 = vpop.f32.mrb[30].mxu1  ;;  %10138 = vrot.lane.b32.xlu0 %v10137_v21, %s10746_s9  ;;  %v3192_v17 = vsel %vm108_vm3, %v3128_v34, %v9876_v37  ;;  %v9951_v37 = vunpack.i.h.bf16 %v13269_v26 }
 0x2a2   :  { %4015 = vmatmul.mubr.f32.gmra.mrb[102].mxu1 %v3255_v5  ;;  %v4479_v2 = vmax.f32 %v4217_v62, 0.0  ;;  %v3837_v39 = vadd.f32 %v13296_v19, %v3836_v50  ;;  %v3838_v1 = vpop.f32.mrb[31].mxu1  ;;  %v4798_v27 = vld [vmem:[#allocation3 + $0xb0] sm:$0xff]  ;;  %v3257_v5 = vsel %vm3203_vm4, %v3192_v17, %v9926_v42  ;;  %v9950_v62 = vunpack.i.l.bf16 %v13269_v26 }
 0x2a3   :  { %v3384_v30 = vsel %vm108_vm3, %v3320_v46, %v9940_v58  ;;  %v3385_v32 = vsel %vm108_vm3, %v3321_v51, %v9941_v18  ;;  %v13304_v23 = vpop.permute.xlu0 %9978  ;;  %v10142_v59 = vpack.i.bf16 %v4670_v38, %v4798_v27  ;;  %v14995_v18 = vld [vmem:[#allocation9_spill] sm:$0xff]  ;;  %v13330_v46 = vpop.f32.mrb[124].mxu0  ;;  %v9900_v38 = vunpack.i.l.bf16 %v13224_v43 }
 0x2a4   :  { %v13302_v45 = vpop.permute.xlu1 %9953  ;;  %v3448_v20 = vsel %vm3203_vm4, %v3384_v30, %v9945_v29  ;;  %4543 = vst.msk [vmem:[#allocation3 + $0xc1] sm:$0xff] %vm108_vm3, %v4479_v2  ;;  %v4222_v57 = vadd.f32 %v14994_v8, %v3837_v39  ;;  %v3449_v13 = vsel %vm3203_vm4, %v3385_v32, %v9925_v35  ;;  %v4671_v50 = vld [vmem:[#allocation3 + $0xa9] sm:$0xff]  ;;  %v13333_v30 = vpop.f32.mrb[125].mxu0  ;;  %v1272_v27 = vld [vmem:[#allocation2 + $0x2d1] sm:$0xff]  ;;  %v9905_v32 = vunpack.i.l.bf16 %v13235_v49  ;;  %v1273_v8 = vld [vmem:[#allocation2 + $0x2d9] sm:$0xff] }
 0x2a5   :  { %4019 = vmatprep.mubr.f32.mxu1 %v3448_v20  ;;  %10143 = vrot.lane.b32.xlu1 %v10142_v59, %s10746_s9  ;;  %v14996_v35 = vld [vmem:[#allocation8_spill] sm:$0xff]  ;;  %v3322_v42 = vsel %vm27_vm0, %v1272_v27, %v9950_v62  ;;  %v4672_v47 = vld [vmem:[#allocation3 + $0xb1] sm:$0xff]  ;;  %v9975_v34 = vunpack.i.l.bf16 %v13282_v36  ;;  %v1017_v27 = vld [vmem:[#allocation2 + $0x2c0] sm:$0xff] }
 0x2a6   :  { %4020 = vmatmul.mubr.f32.gmra.mrb[104].mxu1 %v3256_v11  ;;  %v4480_v63 = vmax.f32 %v4222_v57, 0.0  ;;  %v9976_v57 = vunpack.i.h.bf16 %v13282_v36 }
 0x2a7   :  { %4024 = vmatprep.mubr.f32.mxu1 %v3449_v13  ;;  %v13317_v40 = vpop.permute.xlu0 %9983 }
 0x2a8   :  { %v13315_v52 = vpop.permute.xlu1 %9958  ;;  %4544 = vst.msk [vmem:[#allocation3 + $0xc9] sm:$0xff] %vm108_vm3, %v4480_v63  ;;  %v3841_v21 = vpop.f32.mrb[32].mxu1  ;;  %v3323_v63 = vsel %vm27_vm0, %v1273_v8, %v9951_v37 }
 0x2a9   :  { %v3842_v3 = vadd.f32 %v13296_v19, %v3841_v21  ;;  %v3843_v7 = vpop.f32.mrb[33].mxu1 }
 0x2aa   :  { %4025 = vmatmul.mubr.f32.gmra.mrb[106].mxu1 %v3257_v5  ;;  %v9901_v7 = vunpack.i.h.bf16 %v13224_v43 }
 0x2ab   :  { %v4227_v58 = vadd.f32 %v14995_v18, %v3842_v3  ;;  %v13327_v28 = vpop.permute.xlu0 %9988  ;;  %v4799_v12 = vld [vmem:[#allocation3 + $0xc0] sm:$0xff]  ;;  %v1016_v3 = vld [vmem:[#allocation2 + $0x2b8] sm:$0xff] }
 0x2ac   :  { %v13325_v44 = vpop.permute.xlu1 %9963  ;;  %v3846_v29 = vpop.f32.mrb[34].mxu1  ;;  %v10147_v1 = vpack.i.bf16 %v4671_v50, %v4799_v12  ;;  %v9990_v17 = vunpack.i.l.bf16 %v13327_v28  ;;  %v3129_v62 = vsel %vm27_vm0, %v1016_v3, %v9900_v38  ;;  %v9906_v12 = vunpack.i.h.bf16 %v13235_v49 }
 0x2ad   :  { %v4481_v51 = vmax.f32 %v4227_v58, 0.0  ;;  %v3847_v2 = vadd.f32 %v13296_v19, %v3846_v29  ;;  %v3848_v39 = vpop.f32.mrb[35].mxu1  ;;  %v9955_v29 = vunpack.i.l.bf16 %v13302_v45  ;;  %v3193_v50 = vsel %vm108_vm3, %v3129_v62, %v9905_v32  ;;  %v1018_v62 = vld [vmem:[#allocation2 + $0x2d0] sm:$0xff] }
 0x2ae   :  { %10148 = vrot.lane.b32.xlu0 %v10147_v1, %s10746_s9  ;;  %v3258_v49 = vsel %vm3203_vm4, %v3193_v50, %v9976_v57  ;;  %v1274_v39 = vld [vmem:[#allocation2 + $0x2e9] sm:$0xff]  ;;  %v9935_v57 = vunpack.i.l.bf16 %v13237_v54 }
 0x2af   :  { %4545 = vst.msk [vmem:[#allocation3 + $0xd9] sm:$0xff] %vm108_vm3, %v4481_v51  ;;  %v4232_v26 = vadd.f32 %v14996_v35, %v3847_v2  ;;  %v13340_v59 = vpop.permute.xlu0 %9998  ;;  %v4800_v24 = vld [vmem:[#allocation3 + $0xc8] sm:$0xff]  ;;  %v9956_v51 = vunpack.i.h.bf16 %v13302_v45  ;;  %v3324_v35 = vsel %vm27_vm0, %v1274_v39, %v9990_v17 }
 0x2b0   :  { %v9969_v20 = vpop.permute.xlu1 %9968  ;;  %v10152_v5 = vpack.i.bf16 %v4672_v47, %v4800_v24  ;;  %v4673_v45 = vld [vmem:[#allocation3 + $0xc1] sm:$0xff]  ;;  %v10001_v17 = vunpack.i.h.bf16 %v13340_v59  ;;  %v4674_v50 = vld [vmem:[#allocation3 + $0xc9] sm:$0xff] }
 0x2b1   :  { %v9971_v11 = vunpack.i.h.bf16 %v9969_v20  ;;  %v9970_v13 = vunpack.i.l.bf16 %v9969_v20  ;;  %v4482_v21 = vmax.f32 %v4232_v26, 0.0  ;;  %v9930_v26 = vunpack.i.l.bf16 %v13226_v25 }
 0x2b2   :  { %10153 = vrot.lane.b32.xlu0 %v10152_v5, %s10746_s9 }
 0x2b3   :  { %v3386_v18 = vsel %vm108_vm3, %v3322_v42, %v9970_v13  ;;  %v3387_v58 = vsel %vm108_vm3, %v3323_v63, %v9971_v11  ;;  %4546 = vst.msk [vmem:[#allocation3 + $0xe1] sm:$0xff] %vm108_vm3, %v4482_v21  ;;  %v13357_v37 = vpop.permute.xlu0 %10018  ;;  %v3130_v42 = vsel %vm27_vm0, %v1017_v27, %v9901_v7  ;;  %v10000_v11 = vunpack.i.l.bf16 %v13340_v59  ;;  %v14997_v21 = vld [vmem:[#allocation11_spill] sm:$0xff]  ;;  %v14998_v27 = vld [vmem:[#allocation10_spill] sm:$0xff] }
 0x2b4   :  { %v13355_v36 = vpop.permute.xlu1 %9993  ;;  %v3450_v43 = vsel %vm3203_vm4, %v3386_v18, %v9975_v34  ;;  %v3451_v38 = vsel %vm3203_vm4, %v3387_v58, %v9955_v29  ;;  %v3194_v34 = vsel %vm108_vm3, %v3130_v42, %v9906_v12  ;;  %v3131_v59 = vsel %vm27_vm0, %v1018_v62, %v9930_v26 }
 0x2b5   :  { %v9995_v2 = vunpack.i.l.bf16 %v13355_v36  ;;  %4029 = vmatprep.mubr.f32.mxu1 %v3450_v43  ;;  %v3851_v1 = vpop.f32.mrb[36].mxu1  ;;  %v3259_v3 = vsel %vm3203_vm4, %v3194_v34, %v9956_v51  ;;  %v9996_v26 = vunpack.i.h.bf16 %v13355_v36 }
 0x2b6   :  { %4030 = vmatmul.mubr.f32.gmra.mrb[108].mxu1 %v3258_v49  ;;  %v3852_v20 = vadd.f32 %v13296_v19, %v3851_v1  ;;  %v3853_v32 = vpop.f32.mrb[37].mxu1  ;;  %v4801_v24 = vld [vmem:[#allocation3 + $0xd8] sm:$0xff]  ;;  %v3195_v1 = vsel %vm108_vm3, %v3131_v59, %v9935_v57  ;;  %v10020_v57 = vunpack.i.l.bf16 %v13357_v37 }
 0x2b7   :  { %4034 = vmatprep.mubr.f32.mxu1 %v3451_v38  ;;  %v3388_v8 = vsel %vm108_vm3, %v3324_v35, %v9995_v2  ;;  %v13374_v47 = vpop.permute.xlu0 %10028  ;;  %v10157_v63 = vpack.i.bf16 %v4673_v45, %v4801_v24  ;;  %v9931_v2 = vunpack.i.h.bf16 %v13226_v25  ;;  %v9991_v38 = vunpack.i.h.bf16 %v13327_v28  ;;  %v1019_v45 = vld [vmem:[#allocation2 + $0x2d8] sm:$0xff] }
 0x2b8   :  { %v13372_v13 = vpop.permute.xlu1 %10003  ;;  %v4237_v5 = vadd.f32 %v14997_v21, %v3852_v20  ;;  %v3452_v18 = vsel %vm3203_vm4, %v3388_v8, %v10000_v11  ;;  %v3260_v20 = vsel %vm3203_vm4, %v3195_v1, %v10001_v17  ;;  %v9936_v32 = vunpack.i.h.bf16 %v13237_v54  ;;  %v1275_v8 = vld [vmem:[#allocation2 + $0x2f1] sm:$0xff]  ;;  %v1276_v1 = vld [vmem:[#allocation2 + $0x301] sm:$0xff] }
 0x2b9   :  { %v3856_v7 = vpop.f32.mrb[38].mxu1  ;;  %10158 = vrot.lane.b32.xlu0 %v10157_v63, %s10746_s9  ;;  %v3132_v28 = vsel %vm27_vm0, %v1019_v45, %v9931_v2  ;;  %v3325_v36 = vsel %vm27_vm0, %v1275_v8, %v9991_v38  ;;  %v10031_v38 = vunpack.i.h.bf16 %v13374_v47  ;;  %v1020_v8 = vld [vmem:[#allocation2 + $0x2e8] sm:$0xff] }
 0x2ba   :  { %4035 = vmatmul.mubr.f32.gmra.mrb[110].mxu1 %v3259_v3  ;;  %v4483_v58 = vmax.f32 %v4237_v5, 0.0  ;;  %v3857_v29 = vadd.f32 %v13296_v19, %v3856_v7  ;;  %v3858_v43 = vpop.f32.mrb[39].mxu1  ;;  %v4802_v12 = vld [vmem:[#allocation3 + $0xe0] sm:$0xff]  ;;  %v3389_v21 = vsel %vm108_vm3, %v3325_v36, %v9996_v26  ;;  %v3196_v5 = vsel %vm108_vm3, %v3132_v28, %v9936_v32  ;;  %v1023_v28 = vld [vmem:[#allocation2 + $0x308] sm:$0xff] }
 0x2bb   :  { %4039 = vmatprep.mubr.f32.mxu1 %v3452_v18  ;;  %v13387_v51 = vpop.permute.xlu0 %10038  ;;  %v10162_v39 = vpack.i.bf16 %v4674_v50, %v4802_v12  ;;  %v9981_v3 = vunpack.i.h.bf16 %v13304_v23  ;;  %v9960_v7 = vunpack.i.l.bf16 %v13315_v52  ;;  %v10021_v43 = vunpack.i.h.bf16 %v13357_v37  ;;  %v14999_v50 = vld [vmem:[#allocation13_spill] sm:$0xff] }
 0x2bc   :  { %v13385_v49 = vpop.permute.xlu1 %10008  ;;  %4547 = vst.msk [vmem:[#allocation3 + $0xf1] sm:$0xff] %vm108_vm3, %v4483_v58  ;;  %v4242_v35 = vadd.f32 %v14998_v27, %v3857_v29  ;;  %v9980_v58 = vunpack.i.l.bf16 %v13304_v23  ;;  %v9965_v29 = vunpack.i.l.bf16 %v13325_v44  ;;  %v10030_v27 = vunpack.i.l.bf16 %v13374_v47  ;;  %v4675_v23 = vld [vmem:[#allocation3 + $0xd9] sm:$0xff] }
 0x2bd   :  { %10163 = vrot.lane.b32.xlu0 %v10162_v39, %s10746_s9  ;;  %v3326_v32 = vsel %vm27_vm0, %v1276_v1, %v10020_v57  ;;  %v3133_v47 = vsel %vm27_vm0, %v1020_v8, %v9960_v7  ;;  %v9966_v36 = vunpack.i.h.bf16 %v13325_v44  ;;  %v15000_v57 = vld [vmem:[#allocation12_spill] sm:$0xff] }
 0x2be   :  { %4040 = vmatmul.mubr.f32.gmra.mrb[112].mxu1 %v3260_v20  ;;  %v4484_v25 = vmax.f32 %v4242_v35, 0.0  ;;  %v1277_v7 = vld [vmem:[#allocation2 + $0x309] sm:$0xff] }
 0x2bf   :  { %v13397_v42 = vpop.permute.xlu0 %10048  ;;  %v4721_v8 = vld [vmem:[#allocation3 + $0x2] sm:$0xff] }
 0x2c0   :  { %v10014_v24 = vpop.permute.xlu1 %10013  ;;  %4548 = vst.msk [vmem:[#allocation3 + $0xf9] sm:$0xff] %vm108_vm3, %v4484_v25  ;;  %v3861_v54 = vpop.f32.mrb[40].mxu1 }
 0x2c1   :  { %v10016_v11 = vunpack.i.h.bf16 %v10014_v24  ;;  %v10015_v63 = vunpack.i.l.bf16 %v10014_v24  ;;  %v3862_v34 = vadd.f32 %v13296_v19, %v3861_v54  ;;  %v3863_v17 = vpop.f32.mrb[41].mxu1  ;;  %v13424_v54 = vsel %vm27_vm0, %v1023_v28, %v9981_v3  ;;  %v4593_v28 = vld [vmem:[#allocation3] sm:$0xff] }
 0x2c3   :  { %v3453_v18 = vsel %vm3203_vm4, %v3389_v21, %v10015_v63  ;;  %v3261_v62 = vsel %vm3203_vm4, %v3196_v5, %v10016_v11  ;;  %v4247_v12 = vadd.f32 %v14999_v50, %v3862_v34  ;;  %v13414_v2 = vpop.permute.xlu0 %10058  ;;  %v4803_v39 = vld [vmem:[#allocation3 + $0xf0] sm:$0xff]  ;;  %v9961_v11 = vunpack.i.h.bf16 %v13315_v52  ;;  %v4676_v50 = vld [vmem:[#allocation3 + $0xe1] sm:$0xff] }
 0x2c4   :  { %v10024_v59 = vpop.permute.xlu1 %10023  ;;  %4044 = vmatprep.mubr.f32.mxu1 %v3453_v18  ;;  %v3866_v20 = vpop.f32.mrb[42].mxu1  ;;  %v10167_v24 = vpack.i.bf16 %v4675_v23, %v4803_v39  ;;  %v3197_v5 = vsel %vm108_vm3, %v3133_v47, %v9965_v29  ;;  %v9986_v29 = vunpack.i.h.bf16 %v13317_v40  ;;  %v1278_v47 = vld [vmem:[#allocation2 + $0x319] sm:$0xff] }
 0x2c5   :  { %v10025_v35 = vunpack.i.l.bf16 %v10024_v59  ;;  %4045 = vmatmul.mubr.f32.gmra.mrb[114].mxu1 %v3261_v62  ;;  %v4485_v26 = vmax.f32 %v4247_v12, 0.0  ;;  %v10026_v37 = vunpack.i.h.bf16 %v10024_v59  ;;  %v3867_v25 = vadd.f32 %v13296_v19, %v3866_v20  ;;  %v3868_v45 = vpop.f32.mrb[43].mxu1  ;;  %v1022_v20 = vld [vmem:[#allocation2 + $0x300] sm:$0xff] }
 0x2c6   :  { %10168 = vrot.lane.b32.xlu0 %v10167_v24, %s10746_s9  ;;  %v3262_v44 = vsel %vm3203_vm4, %v3197_v5, %v10031_v38  ;;  %v3327_v12 = vsel %vm27_vm0, %v1277_v7, %v10021_v43  ;;  %v10040_v59 = vunpack.i.l.bf16 %v13387_v51  ;;  %v3135_v38 = vsel %vm27_vm0, %v1022_v20, %v9980_v58  ;;  %v15001_v20 = vld [vmem:[#allocation15_spill] sm:$0xff] }
 0x2c7   :  { %v3390_v63 = vsel %vm108_vm3, %v3326_v32, %v10025_v35  ;;  %4549 = vst.msk [vmem:[#allocation3 + $0x109] sm:$0xff] %vm108_vm3, %v4485_v26  ;;  %v4252_v34 = vadd.f32 %v15000_v57, %v3867_v25  ;;  %v13430_v21 = vpop.permute.xlu0 %10068  ;;  %v4804_v18 = vld [vmem:[#allocation3 + $0xf8] sm:$0xff]  ;;  %v3391_v35 = vsel %vm108_vm3, %v3327_v12, %v10026_v37  ;;  %v9985_v26 = vunpack.i.l.bf16 %v13317_v40  ;;  %v6483_v57 = vld [vmem:[%s14958_s4 + $0x108] sm:$0xff] }
 0x2c8   :  { %v10034_v17 = vpop.permute.xlu1 %10033  ;;  %v3454_v52 = vsel %vm3203_vm4, %v3390_v63, %v10030_v27  ;;  %v10172_v1 = vpack.i.bf16 %v4676_v50, %v4804_v18  ;;  %v1021_v27 = vld [vmem:[#allocation2 + $0x2f0] sm:$0xff]  ;;  %v10041_v43 = vunpack.i.h.bf16 %v13387_v51  ;;  %v10051_v25 = vunpack.i.h.bf16 %v13397_v42  ;;  %v6482_v51 = vld [vmem:[%s14958_s4 + $0x100] sm:$0xff] }
 0x2c9   :  { %v10036_v62 = vunpack.i.h.bf16 %v10034_v17  ;;  %v10035_v3 = vunpack.i.l.bf16 %v10034_v17  ;;  %4049 = vmatprep.mubr.f32.mxu1 %v3454_v52  ;;  %v4486_v39 = vmax.f32 %v4252_v34, 0.0  ;;  %v3134_v32 = vsel %vm27_vm0, %v1021_v27, %v9961_v11  ;;  %v4677_v50 = vld [vmem:[#allocation3 + $0xf1] sm:$0xff] }
 0x2ca   :  { %4050 = vmatmul.mubr.f32.gmra.mrb[116].mxu1 %v3262_v44  ;;  %10173 = vrot.lane.b32.xlu0 %v10172_v1, %s10746_s9  ;;  %v3198_v24 = vsel %vm108_vm3, %v3134_v32, %v9966_v36  ;;  %v10050_v34 = vunpack.i.l.bf16 %v13397_v42  ;;  %v3328_v52 = vsel %vm27_vm0, %v1278_v47, %v10040_v59  ;;  %v8927_v5 = vpack.c.bf16 %v6483_v57, %v6482_v51  ;;  %v4678_v47 = vld [vmem:[#allocation3 + $0xf9] sm:$0xff] }
 0x2cb   :  { %v3455_v23 = vsel %vm3203_vm4, %v3391_v35, %v10035_v3  ;;  %4550 = vst.msk [vmem:[#allocation3 + $0x111] sm:$0xff] %vm108_vm3, %v4486_v39  ;;  %v10079_v45 = vpop.permute.xlu0 %10078  ;;  %v3263_v40 = vsel %vm3203_vm4, %v3198_v24, %v10036_v62  ;;  %v1279_v39 = vld [vmem:[#allocation2 + $0x321] sm:$0xff]  ;;  %v3199_v59 = vsel %vm108_vm3, %v3135_v38, %v9985_v26  ;;  %v6484_v24 = vld [vmem:[%s14958_s4 + $0x110] sm:$0xff]  ;;  %v10005_v38 = vunpack.i.l.bf16 %v13372_v13 }
 0x2cc   :  { %v10044_v37 = vpop.permute.xlu1 %10043  ;;  %4054 = vmatprep.mubr.f32.mxu1 %v3455_v23  ;;  %v10081_v63 = vunpack.i.h.bf16 %v10079_v45  ;;  %v10080_v58 = vunpack.i.l.bf16 %v10079_v45  ;;  %v3329_v27 = vsel %vm27_vm0, %v1279_v39, %v10041_v43  ;;  %v3264_v45 = vsel %vm3203_vm4, %v3199_v59, %v10051_v25 }
 0x2cd   :  { %v10045_v11 = vunpack.i.l.bf16 %v10044_v37  ;;  %v10046_v17 = vunpack.i.h.bf16 %v10044_v37  ;;  %v3871_v36 = vpop.f32.mrb[44].mxu1  ;;  %v10060_v26 = vunpack.i.l.bf16 %v13414_v2  ;;  %v3200_v25 = vsel %vm108_vm3, %v13424_v54, %v9986_v29  ;;  %v1024_v54 = vld [vmem:[#allocation2 + $0x318] sm:$0xff] }
 0x2ce   :  { %4055 = vmatmul.mubr.f32.gmra.mrb[118].mxu1 %v3263_v40  ;;  %v3872_v18 = vadd.f32 %v13296_v19, %v3871_v36  ;;  %v3873_v7 = vpop.f32.mrb[45].mxu1  ;;  %v6258_v62 = vsel %vm108_vm3, %v4721_v8, %v10080_v58  ;;  %v6194_v44 = vsel %vm108_vm3, %v4593_v28, %v10081_v63  ;;  %v4805_v12 = vld [vmem:[#allocation3 + $0x108] sm:$0xff]  ;;  %v6485_v8 = vld [vmem:[%s14958_s4 + $0x118] sm:$0xff]  ;;  %v10010_v36 = vunpack.i.l.bf16 %v13385_v49 }
 0x2cf   :  { %v3392_v3 = vsel %vm108_vm3, %v3328_v52, %v10045_v11  ;;  %6778 = vmatprep.mubr.f32.mxu0 %v6258_v62  ;;  %v10177_v35 = vpack.i.bf16 %v4677_v50, %v4805_v12  ;;  %v3393_v28 = vsel %vm108_vm3, %v3329_v27, %v10046_v17  ;;  %v8930_v57 = vpack.c.bf16 %v6485_v8, %v6484_v24  ;;  %v15002_v7 = vld [vmem:[#allocation14_spill] sm:$0xff] }
 0x2d0   :  { %v10054_v1 = vpop.permute.xlu1 %10053  ;;  %v3456_v42 = vsel %vm3203_vm4, %v3392_v3, %v10050_v34  ;;  %v4257_v23 = vadd.f32 %v15001_v20, %v3872_v18  ;;  %6779 = vmatmul.mubr.f32.vlgmr.msra.gmra.mrb[128].mxu0 %v6194_v44  ;;  %v10006_v34 = vunpack.i.h.bf16 %v13372_v13  ;;  %v10061_v52 = vunpack.i.h.bf16 %v13414_v2  ;;  %v1280_v13 = vld [vmem:[#allocation2 + $0x331] sm:$0xff]  ;;  %v6486_v2 = vld [vmem:[%s14958_s4 + $0x120] sm:$0xff]  ;;  %v6487_v44 = vld [vmem:[%s14958_s4 + $0x128] sm:$0xff] }
 0x2d1   :  { %v10056_v32 = vunpack.i.h.bf16 %v10054_v1  ;;  %v10055_v37 = vunpack.i.l.bf16 %v10054_v1  ;;  %4059 = vmatprep.mubr.f32.mxu1 %v3456_v42  ;;  %v3876_v43 = vpop.f32.mrb[46].mxu1  ;;  %10178 = vrot.lane.b32.xlu0 %v10177_v35, %s10746_s9  ;;  %v10071_v29 = vunpack.i.h.bf16 %v13430_v21  ;;  %v10070_v50 = vunpack.i.l.bf16 %v13430_v21  ;;  %v1281_v27 = vld [vmem:[#allocation2 + $0x339] sm:$0xff] }
 0x2d2   :  { %4060 = vmatmul.mubr.f32.gmra.mrb[120].mxu1 %v3264_v45  ;;  %v4487_v11 = vmax.f32 %v4257_v23, 0.0  ;;  %v3877_v63 = vadd.f32 %v13296_v19, %v3876_v43  ;;  %v3878_v58 = vpop.f32.mrb[47].mxu1  ;;  %v4806_v51 = vld [vmem:[#allocation3 + $0x110] sm:$0xff]  ;;  %8928 = vmatpush1.bf16.msra.mxu0 %v8927_v5  ;;  %v3330_v39 = vsel %vm27_vm0, %v1280_v13, %v10060_v26  ;;  %v3137_v1 = vsel %vm27_vm0, %v1024_v54, %v10005_v38  ;;  %v1025_v43 = vld [vmem:[#allocation2 + $0x320] sm:$0xff] }
 0x2d3   :  { %v3457_v40 = vsel %vm3203_vm4, %v3393_v28, %v10055_v37  ;;  %v10182_v18 = vpack.i.bf16 %v4678_v47, %v4806_v51  ;;  %8929 = vmatprep.subr.bf16.mxu0 %v14985_v60  ;;  %v3265_v3 = vsel %vm3203_vm4, %v3200_v25, %v10056_v32  ;;  %v10011_v42 = vunpack.i.h.bf16 %v13385_v49  ;;  %v6488_v28 = vld [vmem:[%s14958_s4 + $0x130] sm:$0xff]  ;;  %v6489_v25 = vld [vmem:[%s14958_s4 + $0x138] sm:$0xff] }
 0x2d4   :  { %v10064_v17 = vpop.permute.xlu1 %10063  ;;  %4064 = vmatprep.mubr.f32.mxu1 %v3457_v40  ;;  %4551 = vst.msk [vmem:[#allocation3 + $0x121] sm:$0xff] %vm108_vm3, %v4487_v11  ;;  %v4262_v62 = vadd.f32 %v15002_v7, %v3877_v63  ;;  %v8933_v20 = vpack.c.bf16 %v6487_v44, %v6486_v2  ;;  %v3201_v37 = vsel %vm108_vm3, %v3137_v1, %v10010_v36  ;;  %v15003_v40 = vld [vmem:[#allocation17_spill] sm:$0xff]  ;;  %v15004_v1 = vld [vmem:[#allocation16_spill] sm:$0xff] }
 0x2d5   :  { %v10065_v5 = vunpack.i.l.bf16 %v10064_v17  ;;  %v10066_v12 = vunpack.i.h.bf16 %v10064_v17  ;;  %10183 = vrot.lane.b32.xlu0 %v10182_v18, %s10746_s9  ;;  %v3331_v45 = vsel %vm27_vm0, %v1281_v27, %v10061_v52  ;;  %v3266_v26 = vsel %vm3203_vm4, %v3201_v37, %v10071_v29  ;;  %v4722_v7 = vld [vmem:[#allocation3 + $0xa] sm:$0xff]  ;;  %v13532_v37 = vld [vmem:[#allocation3 + $0x1a] sm:$0xff] }
 0x2d6   :  { %4065 = vmatmul.mubr.f32.gmra.mrb[122].mxu1 %v3265_v3  ;;  %v4488_v35 = vmax.f32 %v4262_v62, 0.0  ;;  %8931 = vmatpush1.bf16.msra.mxu0 %v8930_v57  ;;  %v3138_v58 = vsel %vm27_vm0, %v1025_v43, %v10006_v34  ;;  %v8936_v36 = vpack.c.bf16 %v6489_v25, %v6488_v28  ;;  %v4594_v62 = vld [vmem:[#allocation3 + $0x8] sm:$0xff]  ;;  %v4595_v43 = vld [vmem:[#allocation3 + $0x18] sm:$0xff] }
 0x2d7   :  { %v3394_v59 = vsel %vm108_vm3, %v3330_v39, %v10065_v5  ;;  %8932 = vmatprep.subr.bf16.mxu0 %v14985_v60  ;;  %v3395_v63 = vsel %vm108_vm3, %v3331_v45, %v10066_v12  ;;  %v3202_v57 = vsel %vm108_vm3, %v3138_v58, %v10011_v42  ;;  %v4679_v44 = vld [vmem:[#allocation3 + $0x109] sm:$0xff] }
 0x2d8   :  { %v10074_v23 = vpop.permute.xlu1 %10073  ;;  %v3881_v32 = vpop.f32.mrb[48].mxu1  ;;  %v3458_v21 = vsel %vm3203_vm4, %v3394_v59, %v10070_v50  ;;  %4552 = vst.msk [vmem:[#allocation3 + $0x129] sm:$0xff] %vm108_vm3, %v4488_v35  ;;  %v6490_v50 = vld [vmem:[%s14958_s4 + $0x140] sm:$0xff]  ;;  %v6491_v12 = vld [vmem:[%s14958_s4 + $0x148] sm:$0xff] }
 0x2d9   :  { %v10076_v24 = vunpack.i.h.bf16 %v10074_v23  ;;  %v10075_v49 = vunpack.i.l.bf16 %v10074_v23  ;;  %v3882_v8 = vadd.f32 %v13296_v19, %v3881_v32  ;;  %v3883_v38 = vpop.f32.mrb[49].mxu1  ;;  %4069 = vmatprep.mubr.f32.mxu1 %v3458_v21  ;;  %v10089_v11 = vpop.permute.xlu0 %10088  ;;  %v8939_v27 = vpack.c.bf16 %v6491_v12, %v6490_v50  ;;  %v4680_v32 = vld [vmem:[#allocation3 + $0x111] sm:$0xff]  ;;  %v13546_v58 = vld [vmem:[#allocation3 + $0x22] sm:$0xff] }
 0x2da   :  { %4070 = vmatmul.mubr.f32.gmra.mrb[124].mxu1 %v3266_v26  ;;  %8934 = vmatpush1.bf16.msra.mxu0 %v8933_v20  ;;  %v10090_v52 = vunpack.i.l.bf16 %v10089_v11  ;;  %v10091_v20 = vunpack.i.h.bf16 %v10089_v11  ;;  %v6492_v38 = vld [vmem:[%s14958_s4 + $0x150] sm:$0xff]  ;;  %v6493_v26 = vld [vmem:[%s14958_s4 + $0x158] sm:$0xff] }
 0x2db   :  { %v4267_v47 = vadd.f32 %v15003_v40, %v3882_v8  ;;  %v3459_v51 = vsel %vm3203_vm4, %v3395_v63, %v10075_v49  ;;  %v3267_v54 = vsel %vm3203_vm4, %v3202_v57, %v10076_v24  ;;  %v4807_v29 = vld [vmem:[#allocation3 + $0x120] sm:$0xff]  ;;  %8935 = vmatprep.subr.bf16.mxu0 %v14985_v60  ;;  %v8942_v28 = vpack.c.bf16 %v6493_v26, %v6492_v38  ;;  %v6495_v57 = vld [vmem:[%s14958_s4 + $0x168] sm:$0xff]  ;;  %v15006_v38 = vld [vmem:[#allocation18_spill] sm:$0xff] }
 0x2dc   :  { %v3886_v17 = vpop.f32.mrb[50].mxu1  ;;  %4074 = vmatprep.mubr.f32.mxu1 %v3459_v51  ;;  %v10084_v18 = vpop.permute.xlu1 %10083  ;;  %v10187_v39 = vpack.i.bf16 %v4679_v44, %v4807_v29  ;;  %v6260_v8 = vsel %vm108_vm3, %v13532_v37, %v10090_v52  ;;  %v6196_v63 = vsel %vm108_vm3, %v4595_v43, %v10091_v20  ;;  %v6494_v51 = vld [vmem:[%s14958_s4 + $0x160] sm:$0xff] }
 0x2dd   :  { %v4489_v34 = vmax.f32 %v4267_v47, 0.0  ;;  %v3887_v5 = vadd.f32 %v13296_v19, %v3886_v17  ;;  %v10086_v3 = vunpack.i.h.bf16 %v10084_v18  ;;  %v10085_v13 = vunpack.i.l.bf16 %v10084_v18  ;;  %v3888_v2 = vpop.f32.mrb[51].mxu1  ;;  %v4681_v52 = vld [vmem:[#allocation3 + $0x121] sm:$0xff] }
 0x2de   :  { %4075 = vmatmul.mubr.f32.gmra.mrb[126].mxu1 %v3267_v54  ;;  %8937 = vmatpush1.bf16.msra.mxu0 %v8936_v36  ;;  %v15005_v2 = vld [vmem:[#allocation19_spill] sm:$0xff] }
 0x2df   :  { %4553 = vst.msk [vmem:[#allocation3 + $0x139] sm:$0xff] %vm108_vm3, %v4489_v34  ;;  %v4272_v42 = vadd.f32 %v15004_v1, %v3887_v5  ;;  %v6259_v35 = vsel %vm108_vm3, %v4722_v7, %v10085_v13  ;;  %v6195_v59 = vsel %vm108_vm3, %v4594_v62, %v10086_v3  ;;  %10188 = vrot.lane.b32.xlu0 %v10187_v39, %s10746_s9  ;;  %v4808_v21 = vld [vmem:[#allocation3 + $0x128] sm:$0xff]  ;;  %v4596_v7 = vld [vmem:[#allocation3 + $0x20] sm:$0xff]  ;;  %v13559_v13 = vld [vmem:[#allocation3 + $0x32] sm:$0xff] }
 0x2e0   :  { %v10094_v23 = vpop.permute.xlu1 %10093  ;;  %6783 = vmatprep.mubr.f32.mxu0 %v6259_v35  ;;  %v10192_v49 = vpack.i.bf16 %v4680_v32, %v4808_v21  ;;  %8938 = vmatprep.subr.bf16.mxu0 %v14985_v60  ;;  %v8945_v62 = vpack.c.bf16 %v6495_v57, %v6494_v51  ;;  %v6496_v39 = vld [vmem:[%s14958_s4 + $0x170] sm:$0xff]  ;;  %v6497_v1 = vld [vmem:[%s14958_s4 + $0x178] sm:$0xff] }
 0x2e1   :  { %v4490_v45 = vmax.f32 %v4272_v42, 0.0  ;;  %v10095_v24 = vunpack.i.l.bf16 %v10094_v23  ;;  %6784 = vmatmul.mubr.f32.gmra.mrb[130].mxu0 %v6195_v59  ;;  %v10096_v25 = vunpack.i.h.bf16 %v10094_v23  ;;  %v4682_v35 = vld [vmem:[#allocation3 + $0x129] sm:$0xff] }
 0x2e2   :  { %6788 = vmatprep.mubr.f32.mxu0 %v6260_v8  ;;  %10193 = vrot.lane.b32.xlu1 %v10192_v49, %s10746_s9  ;;  %v4597_v21 = vld [vmem:[#allocation3 + $0x30] sm:$0xff]  ;;  %v13574_v8 = vld [vmem:[#allocation3 + $0x3a] sm:$0xff] }
 0x2e3   :  { %4554 = vst.msk [vmem:[#allocation3 + $0x141] sm:$0xff] %vm108_vm3, %v4490_v45  ;;  %8940 = vmatpush1.bf16.msra.mxu0 %v8939_v27  ;;  %v10099_v11 = vpop.permute.xlu0 %10098  ;;  %v6261_v47 = vsel %vm108_vm3, %v13546_v58, %v10095_v24  ;;  %v6197_v3 = vsel %vm108_vm3, %v4596_v7, %v10096_v25  ;;  %v8948_v45 = vpack.c.bf16 %v6497_v1, %v6496_v39  ;;  %v6499_v25 = vld [vmem:[%s14958_s4 + $0x188] sm:$0xff] }
 0x2e4   :  { %8941 = vmatprep.subr.bf16.mxu0 %v14985_v60  ;;  %v10100_v40 = vunpack.i.l.bf16 %v10099_v11  ;;  %v10101_v34 = vunpack.i.h.bf16 %v10099_v11 }
 0x2e5   :  { %6789 = vmatmul.mubr.f32.gmra.mrb[132].mxu0 %v6196_v63  ;;  %v3891_v36 = vpop.f32.mrb[52].mxu1  ;;  %v4598_v63 = vld [vmem:[#allocation3 + $0x38] sm:$0xff] }
 0x2e6   :  { %6793 = vmatprep.mubr.f32.mxu0 %v6261_v47  ;;  %v4809_v17 = vld [vmem:[#allocation3 + $0x138] sm:$0xff]  ;;  %v3892_v18 = vadd.f32 %v13296_v19, %v3891_v36  ;;  %v3893_v54 = vpop.f32.mrb[53].mxu1  ;;  %v6262_v12 = vsel %vm108_vm3, %v13559_v13, %v10100_v40  ;;  %v6198_v49 = vsel %vm108_vm3, %v4597_v21, %v10101_v34 }
 0x2e7   :  { %v10197_v29 = vpack.i.bf16 %v4681_v52, %v4809_v17  ;;  %8943 = vmatpush1.bf16.msra.mxu0 %v8942_v28  ;;  %v10104_v5 = vpop.permute.xlu1 %10103  ;;  %v6498_v28 = vld [vmem:[%s14958_s4 + $0x180] sm:$0xff]  ;;  %v6500_v52 = vld [vmem:[%s14958_s4 + $0x190] sm:$0xff]  ;;  %v6501_v17 = vld [vmem:[%s14958_s4 + $0x198] sm:$0xff] }
 0x2e8   :  { %8944 = vmatprep.subr.bf16.mxu0 %v14985_v60  ;;  %v4277_v44 = vadd.f32 %v15005_v2, %v3892_v18  ;;  %v10105_v50 = vunpack.i.l.bf16 %v10104_v5  ;;  %v10106_v24 = vunpack.i.h.bf16 %v10104_v5  ;;  %v8951_v40 = vpack.c.bf16 %v6499_v25, %v6498_v28  ;;  %v15007_v54 = vld [vmem:[#allocation21_spill] sm:$0xff] }
 0x2e9   :  { %10198 = vrot.lane.b32.xlu1 %v10197_v29, %s10746_s9  ;;  %6794 = vmatmul.mubr.f32.gmra.mrb[134].mxu0 %v6197_v3  ;;  %v3896_v42 = vpop.f32.mrb[54].mxu1  ;;  %v13599_v5 = vld [vmem:[#allocation3 + $0x4a] sm:$0xff] }
 0x2ea   :  { %6798 = vmatprep.mubr.f32.mxu0 %v6262_v12  ;;  %v4810_v59 = vld [vmem:[#allocation3 + $0x140] sm:$0xff]  ;;  %v4491_v27 = vmax.f32 %v4277_v44, 0.0  ;;  %v3897_v20 = vadd.f32 %v13296_v19, %v3896_v42  ;;  %v3898_v23 = vpop.f32.mrb[55].mxu1  ;;  %v6263_v43 = vsel %vm108_vm3, %v13574_v8, %v10105_v50  ;;  %v6199_v51 = vsel %vm108_vm3, %v4598_v63, %v10106_v24  ;;  %v4599_v3 = vld [vmem:[#allocation3 + $0x48] sm:$0xff] }
 0x2eb   :  { %v10202_v32 = vpack.i.bf16 %v4682_v35, %v4810_v59  ;;  %8946 = vmatpush1.bf16.msra.mxu0 %v8945_v62  ;;  %v8954_v44 = vpack.c.bf16 %v6501_v17, %v6500_v52  ;;  %v4683_v35 = vld [vmem:[#allocation3 + $0x139] sm:$0xff] }
 0x2ec   :  { %8947 = vmatprep.subr.bf16.mxu0 %v14985_v60  ;;  %4555 = vst.msk [vmem:[#allocation3 + $0x151] sm:$0xff] %vm108_vm3, %v4491_v27  ;;  %v4282_v26 = vadd.f32 %v15006_v38, %v3897_v20  ;;  %v6502_v59 = vld [vmem:[%s14958_s4 + $0x1a0] sm:$0xff]  ;;  %v6503_v27 = vld [vmem:[%s14958_s4 + $0x1a8] sm:$0xff]  ;;  %v13615_v38 = vld [vmem:[#allocation3 + $0x52] sm:$0xff] }
 0x2ed   :  { %10203 = vrot.lane.b32.xlu1 %v10202_v32, %s10746_s9  ;;  %6799 = vmatmul.mubr.f32.gmra.mrb[136].mxu0 %v6198_v49  ;;  %v15008_v32 = vld [vmem:[#allocation20_spill] sm:$0xff]  ;;  %v8957_v28 = vpack.c.bf16 %v6503_v27, %v6502_v59  ;;  %v15009_v17 = vld [vmem:[#allocation23_spill] sm:$0xff]  ;;  %v15010_v59 = vld [vmem:[#allocation22_spill] sm:$0xff] }
 0x2ee   :  { %6803 = vmatprep.mubr.f32.mxu0 %v6263_v43  ;;  %v4492_v11 = vmax.f32 %v4282_v26, 0.0  ;;  %v4600_v26 = vld [vmem:[#allocation3 + $0x50] sm:$0xff] }
 0x2ef   :  { %8949 = vmatpush1.bf16.msra.mxu0 %v8948_v45 }
 0x2f0   :  { %v3901_v47 = vpop.f32.mrb[56].mxu1  ;;  %8950 = vmatprep.subr.bf16.mxu0 %v14985_v60  ;;  %4556 = vst.msk [vmem:[#allocation3 + $0x159] sm:$0xff] %vm108_vm3, %v4492_v11  ;;  %v10109_v18 = vpop.permute.xlu0 %10108 }
 0x2f1   :  { %v3902_v57 = vadd.f32 %v13296_v19, %v3901_v47  ;;  %v3903_v36 = vpop.f32.mrb[57].mxu1  ;;  %6804 = vmatmul.mubr.f32.gmra.mrb[138].mxu0 %v6199_v51  ;;  %v10111_v7 = vunpack.i.h.bf16 %v10109_v18  ;;  %v10110_v62 = vunpack.i.l.bf16 %v10109_v18  ;;  %v4684_v51 = vld [vmem:[#allocation3 + $0x141] sm:$0xff] }
 0x2f2   :  { %v6505_v36 = vld [vmem:[%s14958_s4 + $0x1b8] sm:$0xff] }
 0x2f3   :  { %v4287_v29 = vadd.f32 %v15007_v54, %v3902_v57  ;;  %8952 = vmatpush1.bf16.msra.mxu0 %v8951_v40  ;;  %v4811_v2 = vld [vmem:[#allocation3 + $0x150] sm:$0xff]  ;;  %v6264_v39 = vsel %vm108_vm3, %v13599_v5, %v10110_v62  ;;  %v6200_v42 = vsel %vm108_vm3, %v4599_v3, %v10111_v7 }
 0x2f4   :  { %v3906_v34 = vpop.f32.mrb[58].mxu1  ;;  %8953 = vmatprep.subr.bf16.mxu0 %v14985_v60  ;;  %v10114_v20 = vpop.permute.xlu1 %10113  ;;  %6808 = vmatprep.mubr.f32.mxu0 %v6264_v39  ;;  %v10207_v23 = vpack.i.bf16 %v4683_v35, %v4811_v2  ;;  %v6504_v57 = vld [vmem:[%s14958_s4 + $0x1b0] sm:$0xff]  ;;  %v6507_v39 = vld [vmem:[%s14958_s4 + $0x1c8] sm:$0xff] }
 0x2f5   :  { %v4493_v50 = vmax.f32 %v4287_v29, 0.0  ;;  %v3907_v12 = vadd.f32 %v13296_v19, %v3906_v34  ;;  %v3908_v1 = vpop.f32.mrb[59].mxu1  ;;  %v10116_v45 = vunpack.i.h.bf16 %v10114_v20  ;;  %v10115_v24 = vunpack.i.l.bf16 %v10114_v20  ;;  %6809 = vmatmul.mubr.f32.gmra.mrb[140].mxu0 %v6200_v42  ;;  %v4685_v42 = vld [vmem:[#allocation3 + $0x151] sm:$0xff] }
 0x2f6   :  { %10208 = vrot.lane.b32.xlu1 %v10207_v23, %s10746_s9  ;;  %v8960_v7 = vpack.c.bf16 %v6505_v36, %v6504_v57  ;;  %v13639_v1 = vld [vmem:[#allocation3 + $0x62] sm:$0xff] }
 0x2f7   :  { %4557 = vst.msk [vmem:[#allocation3 + $0x169] sm:$0xff] %vm108_vm3, %v4493_v50  ;;  %v4292_v21 = vadd.f32 %v15008_v32, %v3907_v12  ;;  %v4812_v43 = vld [vmem:[#allocation3 + $0x158] sm:$0xff]  ;;  %8955 = vmatpush1.bf16.msra.mxu0 %v8954_v44  ;;  %v6265_v63 = vsel %vm108_vm3, %v13615_v38, %v10115_v24  ;;  %v6201_v47 = vsel %vm108_vm3, %v4600_v26, %v10116_v45  ;;  %v4601_v50 = vld [vmem:[#allocation3 + $0x60] sm:$0xff]  ;;  %v13647_v26 = vld [vmem:[#allocation3 + $0x6a] sm:$0xff] }
 0x2f8   :  { %v3911_v49 = vpop.f32.mrb[60].mxu1  ;;  %8956 = vmatprep.subr.bf16.mxu0 %v14985_v60  ;;  %6813 = vmatprep.mubr.f32.mxu0 %v6265_v63  ;;  %v10212_v52 = vpack.i.bf16 %v4684_v51, %v4812_v43  ;;  %v6506_v12 = vld [vmem:[%s14958_s4 + $0x1c0] sm:$0xff]  ;;  %v6508_v43 = vld [vmem:[%s14958_s4 + $0x1d0] sm:$0xff] }
 0x2f9   :  { %v4494_v25 = vmax.f32 %v4292_v21, 0.0  ;;  %v3912_v11 = vadd.f32 %v13296_v19, %v3911_v49  ;;  %v3913_v40 = vpop.f32.mrb[61].mxu1  ;;  %6814 = vmatmul.mubr.f32.gmra.mrb[142].mxu0 %v6201_v47  ;;  %v8963_v21 = vpack.c.bf16 %v6507_v39, %v6506_v12 }
 0x2fa   :  { %10213 = vrot.lane.b32.xlu1 %v10212_v52, %s10746_s9  ;;  %v13663_v52 = vld [vmem:[%s14957_s3] ss:$0 sm:$0xff] }
 0x2fb   :  { %4558 = vst.msk [vmem:[#allocation3 + $0x171] sm:$0xff] %vm108_vm3, %v4494_v25  ;;  %v4297_v18 = vadd.f32 %v15009_v17, %v3912_v11  ;;  %v10119_v54 = vpop.permute.xlu0 %10118  ;;  %8958 = vmatpush1.bf16.msra.mxu0 %v8957_v28  ;;  %v6509_v28 = vld [vmem:[%s14958_s4 + $0x1d8] sm:$0xff]  ;;  %v4602_v25 = vld [vmem:[#allocation3 + $0x68] sm:$0xff] }
 0x2fc   :  { %v3916_v29 = vpop.f32.mrb[62].mxu1  ;;  %v10121_v34 = vunpack.i.h.bf16 %v10119_v54  ;;  %v10120_v3 = vunpack.i.l.bf16 %v10119_v54  ;;  %8959 = vmatprep.subr.bf16.mxu0 %v14985_v60  ;;  %v4686_v11 = vld [vmem:[#allocation3 + $0x159] sm:$0xff]  ;;  %v8966_v36 = vpack.c.bf16 %v6509_v28, %v6508_v43  ;;  %v4689_v28 = vld [vmem:[#allocation3 + $0x1b1] sm:$0xff] }
 0x2fd   :  { %v4495_v62 = vmax.f32 %v4297_v18, 0.0  ;;  %v3917_v2 = vadd.f32 %v13296_v19, %v3916_v29  ;;  %v3918_v44 = vpop.f32.mrb[63].mxu1  ;;  %v6510_v54 = vld [vmem:[%s14958_s4 + $0x1e0] sm:$0xff]  ;;  %v6511_v29 = vld [vmem:[%s14958_s4 + $0x1e8] sm:$0xff]  ;;  %v4603_v43 = vld [vmem:[#allocation3 + $0x78] sm:$0xff] }
 0x2fe   :  { %v4813_v35 = vld [vmem:[#allocation3 + $0x168] sm:$0xff]  ;;  %v6266_v27 = vsel %vm108_vm3, %v13639_v1, %v10120_v3  ;;  %v6202_v20 = vsel %vm108_vm3, %v4601_v50, %v10121_v34  ;;  %v15011_v34 = vld [vmem:[#allocation25_spill] sm:$0xff]  ;;  %v8969_v50 = vpack.c.bf16 %v6511_v29, %v6510_v54  ;;  %v4690_v54 = vld [vmem:[#allocation3 + $0x1b9] sm:$0xff] }
 0x2ff   :  { %4559 = vst.msk [vmem:[#allocation3 + $0x181] sm:$0xff] %vm108_vm3, %v4495_v62  ;;  %v4302_v19 = vadd.f32 %v15010_v59, %v3917_v2  ;;  %v10217_v23 = vpack.i.bf16 %v4685_v42, %v4813_v35  ;;  %v10124_v32 = vpop.permute.xlu1 %10123  ;;  %6818 = vmatprep.mubr.f32.mxu0 %v6266_v27  ;;  %8961 = vmatpush1.bf16.msra.mxu0 %v8960_v7  ;;  %v4687_v7 = vld [vmem:[#allocation3 + $0x169] sm:$0xff]  ;;  %v6513_v59 = vld [vmem:[%s14958_s4 + $0x1f8] sm:$0xff] }
 0x300   :  { %v10126_v24 = vunpack.i.h.bf16 %v10124_v32  ;;  %v10125_v49 = vunpack.i.l.bf16 %v10124_v32  ;;  %6819 = vmatmul.mubr.f32.gmra.mrb[144].mxu0 %v6202_v20  ;;  %8962 = vmatprep.subr.bf16.mxu0 %v14985_v60  ;;  %v6512_v35 = vld [vmem:[%s14958_s4 + $0x1f0] sm:$0xff] }
 0x301   :  { %v4496_v45 = vmax.f32 %v4302_v19, 0.0  ;;  %10218 = vrot.lane.b32.xlu1 %v10217_v23, %s10746_s9  ;;  %v15012_v23 = vld [vmem:[#allocation24_spill] sm:$0xff] }
 0x302   :  { %v4814_v63 = vld [vmem:[#allocation3 + $0x170] sm:$0xff]  ;;  %v6267_v40 = vsel %vm108_vm3, %v13647_v26, %v10125_v49  ;;  %v6203_v47 = vsel %vm108_vm3, %v4602_v25, %v10126_v24  ;;  %v13686_v49 = vld [vmem:[#allocation3 + $0x7a] sm:$0xff]  ;;  %v8972_v25 = vpack.c.bf16 %v6513_v59, %v6512_v35 }
 0x303   :  { %4560 = vst.msk [vmem:[#allocation3 + $0x189] sm:$0xff] %vm108_vm3, %v4496_v45  ;;  %v10222_v51 = vpack.i.bf16 %v4686_v11, %v4814_v63  ;;  %6823 = vmatprep.mubr.f32.mxu0 %v6267_v40  ;;  %8964 = vmatpush1.bf16.msra.mxu0 %v8963_v21  ;;  %v4688_v27 = vld [vmem:[#allocation3 + $0x171] sm:$0xff] }
 0x304   :  { %v3921_v57 = vpop.f32.mrb[64].mxu1  ;;  %6824 = vmatmul.mubr.f32.gmra.mrb[146].mxu0 %v6203_v47  ;;  %8965 = vmatprep.subr.bf16.mxu0 %v14985_v60 }
 0x305   :  { %v3922_v17 = vadd.f32 %v13663_v52, %v3921_v57  ;;  %v3923_v18 = vpop.f32.mrb[65].mxu1  ;;  %10223 = vrot.lane.b32.xlu1 %v10222_v51, %s10746_s9 }
 0x306   :  { %v4815_v62 = vld [vmem:[#allocation3 + $0x180] sm:$0xff] }
 0x307   :  { %v4307_v3 = vadd.f32 %v15011_v34, %v3922_v17  ;;  %v10227_v2 = vpack.i.bf16 %v4687_v7, %v4815_v62  ;;  %8967 = vmatpush1.bf16.msra.mxu0 %v8966_v36  ;;  %v10237_v36 = vpack.i.bf16 %v4689_v28, %v13532_v37  ;;  %v13695_v17 = vld [vmem:[#allocation3 + $0x82] sm:$0xff]  ;;  %v5042_v34 = vld [vmem:[#allocation3 + $0x31] sm:$0xff]  ;;  %v5043_v28 = vld [vmem:[#allocation3 + $0x39] sm:$0xff] }
 0x308   :  { %v3926_v44 = vpop.f32.mrb[66].mxu1  ;;  %8968 = vmatprep.subr.bf16.mxu0 %v14985_v60  ;;  %v10129_v19 = vpop.permute.xlu0 %10128  ;;  %v4604_v18 = vld [vmem:[#allocation3 + $0x80] sm:$0xff] }
 0x309   :  { %v4497_v12 = vmax.f32 %v4307_v3, 0.0  ;;  %v3927_v39 = vadd.f32 %v13663_v52, %v3926_v44  ;;  %v3928_v42 = vpop.f32.mrb[67].mxu1  ;;  %10228 = vrot.lane.b32.xlu1 %v10227_v2, %s10746_s9  ;;  %v10131_v21 = vunpack.i.h.bf16 %v10129_v19  ;;  %v10130_v45 = vunpack.i.l.bf16 %v10129_v19 }
 0x30a   :  { %v4816_v20 = vld [vmem:[#allocation3 + $0x188] sm:$0xff]  ;;  %v10242_v2 = vpack.i.bf16 %v4690_v54, %v13546_v58 }
 0x30b   :  { %4561 = vst.msk [vmem:[#allocation3 + $0x1c9] sm:$0xff] %vm108_vm3, %v4497_v12  ;;  %v4312_v32 = vadd.f32 %v15012_v23, %v3927_v39  ;;  %v10232_v24 = vpack.i.bf16 %v4688_v27, %v4816_v20  ;;  %8970 = vmatpush1.bf16.msra.mxu0 %v8969_v50  ;;  %v6268_v63 = vsel %vm108_vm3, %v13686_v49, %v10130_v45  ;;  %v15013_v39 = vld [vmem:[#allocation27_spill] sm:$0xff]  ;;  %v13706_v27 = vld [vmem:[#allocation3 + $0x92] sm:$0xff] }
 0x30c   :  { %v6204_v40 = vsel %vm108_vm3, %v4603_v43, %v10131_v21  ;;  %8971 = vmatprep.subr.bf16.mxu0 %v14985_v60  ;;  %v10134_v47 = vpop.permute.xlu1 %10133  ;;  %6828 = vmatprep.mubr.f32.mxu0 %v6268_v63  ;;  %v4605_v20 = vld [vmem:[#allocation3 + $0x90] sm:$0xff] }
 0x30d   :  { %v4498_v11 = vmax.f32 %v4312_v32, 0.0  ;;  %10233 = vrot.lane.b32.xlu1 %v10232_v24, %s10746_s9  ;;  %v10136_v51 = vunpack.i.h.bf16 %v10134_v47  ;;  %v10135_v57 = vunpack.i.l.bf16 %v10134_v47  ;;  %6829 = vmatmul.mubr.f32.gmra.mrb[148].mxu0 %v6204_v40  ;;  %v15014_v40 = vld [vmem:[#allocation26_spill] sm:$0xff] }
 0x30f   :  { %4562 = vst.msk [vmem:[#allocation3 + $0x1d1] sm:$0xff] %vm108_vm3, %v4498_v11  ;;  %8973 = vmatpush1.bf16.msra.mxu0 %v8972_v25  ;;  %v6269_v29 = vsel %vm108_vm3, %v13695_v17, %v10135_v57  ;;  %v6205_v60 = vsel %vm108_vm3, %v4604_v18, %v10136_v51  ;;  %v4606_v18 = vld [vmem:[#allocation3 + $0x98] sm:$0xff] }
 0x310   :  { %6833 = vmatprep.mubr.f32.mxu0 %v6269_v29 }
 0x311   :  { %10238 = vrot.lane.b32.xlu1 %v10237_v36, %s10746_s9  ;;  %v3931_v7 = vpop.f32.mrb[68].mxu1  ;;  %6834 = vmatmul.mubr.f32.gmra.mrb[150].mxu0 %v6205_v60  ;;  %v13717_v36 = vld [vmem:[#allocation3 + $0x9a] sm:$0xff] }
 0x312   :  { %v4817_v62 = vld [vmem:[#allocation3 + $0x1c8] sm:$0xff]  ;;  %v3932_v3 = vadd.f32 %v13663_v52, %v3931_v7  ;;  %v3933_v37 = vpop.f32.mrb[69].mxu1 }
 0x313   :  { %v10247_v44 = vpack.i.bf16 %v4817_v62, %v5042_v34  ;;  %v4691_v50 = vld [vmem:[#allocation3 + $0x1c9] sm:$0xff]  ;;  %v10139_v12 = vpop.permute.xlu0 %10138 }
 0x314   :  { %v4317_v42 = vadd.f32 %v15013_v39, %v3932_v3  ;;  %v10141_v35 = vunpack.i.h.bf16 %v10139_v12  ;;  %v10140_v59 = vunpack.i.l.bf16 %v10139_v12  ;;  %v10252_v23 = vpack.i.bf16 %v4691_v50, %v13559_v13  ;;  %v6514_v50 = vld [vmem:[%s14958_s4 + $0x200] sm:$0xff]  ;;  %v6515_v12 = vld [vmem:[%s14958_s4 + $0x208] sm:$0xff] }
 0x315   :  { %10243 = vrot.lane.b32.xlu1 %v10242_v2, %s10746_s9  ;;  %10248 = vrot.lane.b32.xlu0 %v10247_v44, %s10746_s9  ;;  %v3936_v19 = vpop.f32.mrb[70].mxu1 }
 0x316   :  { %v4818_v32 = vld [vmem:[#allocation3 + $0x1d0] sm:$0xff]  ;;  %v4499_v21 = vmax.f32 %v4317_v42, 0.0  ;;  %v3937_v58 = vadd.f32 %v13663_v52, %v3936_v19  ;;  %v3938_v45 = vpop.f32.mrb[71].mxu1  ;;  %v6270_v24 = vsel %vm108_vm3, %v13706_v27, %v10140_v59  ;;  %v6206_v43 = vsel %vm108_vm3, %v4605_v20, %v10141_v35  ;;  %v15015_v59 = vld [vmem:[#allocation28_spill] sm:$0xff] }
 0x317   :  { %v4692_v25 = vld [vmem:[#allocation3 + $0x1d1] sm:$0xff]  ;;  %v10144_v11 = vpop.permute.xlu1 %10143  ;;  %6838 = vmatprep.mubr.f32.mxu0 %v6270_v24  ;;  %v10257_v63 = vpack.i.bf16 %v4818_v32, %v5043_v28  ;;  %v5044_v35 = vld [vmem:[#allocation3 + $0x49] sm:$0xff] }
 0x318   :  { %4563 = vst.msk [vmem:[#allocation3 + $0x1e1] sm:$0xff] %vm108_vm3, %v4499_v21  ;;  %v4322_v47 = vadd.f32 %v15014_v40, %v3937_v58  ;;  %v10146_v13 = vunpack.i.h.bf16 %v10144_v11  ;;  %v10145_v51 = vunpack.i.l.bf16 %v10144_v11  ;;  %6839 = vmatmul.mubr.f32.gmra.mrb[152].mxu0 %v6206_v43  ;;  %v10262_v54 = vpack.i.bf16 %v4692_v25, %v13574_v8  ;;  %v4607_v24 = vld [vmem:[#allocation3 + $0xa8] sm:$0xff]  ;;  %v5045_v43 = vld [vmem:[#allocation3 + $0x51] sm:$0xff] }
 0x319   :  { %10253 = vrot.lane.b32.xlu1 %v10252_v23, %s10746_s9  ;;  %v3941_v57 = vpop.f32.mrb[72].mxu1  ;;  %10258 = vrot.lane.b32.xlu0 %v10257_v63, %s10746_s9  ;;  %v13742_v28 = vld [vmem:[#allocation3 + $0xaa] sm:$0xff] }
 0x31a   :  { %v4500_v29 = vmax.f32 %v4322_v47, 0.0  ;;  %v3942_v60 = vadd.f32 %v13663_v52, %v3941_v57  ;;  %v3943_v7 = vpop.f32.mrb[73].mxu1  ;;  %v6271_v62 = vsel %vm108_vm3, %v13717_v36, %v10145_v51  ;;  %v6207_v34 = vsel %vm108_vm3, %v4606_v18, %v10146_v13  ;;  %v13750_v18 = vld [vmem:[#allocation3 + $0xb2] sm:$0xff] }
 0x31b   :  { %6843 = vmatprep.mubr.f32.mxu0 %v6271_v62 }
 0x31c   :  { %4564 = vst.msk [vmem:[#allocation3 + $0x1e9] sm:$0xff] %vm108_vm3, %v4500_v29  ;;  %v4327_v3 = vadd.f32 %v12585_v6, %v3942_v60  ;;  %6844 = vmatmul.mubr.f32.gmra.mrb[154].mxu0 %v6207_v34  ;;  %v13734_v6 = vpack.c.bf16 %v6515_v12, %v6514_v50  ;;  %v4608_v29 = vld [vmem:[#allocation3 + $0xb0] sm:$0xff] }
 0x31d   :  { %10263 = vrot.lane.b32.xlu1 %v10262_v54, %s10746_s9  ;;  %v3946_v37 = vpop.f32.mrb[74].mxu1  ;;  %v5046_v54 = vld [vmem:[#allocation3 + $0x61] sm:$0xff] }
 0x31e   :  { %v4501_v2 = vmax.f32 %v4327_v3, 0.0  ;;  %v3947_v8 = vadd.f32 %v13663_v52, %v3946_v37  ;;  %v3948_v44 = vpop.f32.mrb[75].mxu1  ;;  %8975 = vmatprep.subr.bf16.mxu1 %v13734_v6 }
 0x31f   :  { %v4693_v39 = vld [vmem:[#allocation3 + $0x1e1] sm:$0xff] }
 0x320   :  { %v4819_v42 = vld [vmem:[#allocation3 + $0x1e0] sm:$0xff]  ;;  %4565 = vst.msk [vmem:[#allocation3 + $0x1f9] sm:$0xff] %vm108_vm3, %v4501_v2  ;;  %v4332_v19 = vadd.f32 %v15015_v59, %v3947_v8  ;;  %v10272_v20 = vpack.i.bf16 %v4693_v39, %v13599_v5  ;;  %v10149_v32 = vpop.permute.xlu0 %10148  ;;  %v15016_v39 = vld [vmem:[#allocation30_spill] sm:$0xff] }
 0x321   :  { %v10267_v23 = vpack.i.bf16 %v4819_v42, %v5044_v35  ;;  %v10151_v58 = vunpack.i.h.bf16 %v10149_v32  ;;  %v10150_v45 = vunpack.i.l.bf16 %v10149_v32  ;;  %v13762_v32 = vld [vmem:[#allocation3 + $0xc2] sm:$0xff] }
 0x322   :  { %v4502_v21 = vmax.f32 %v4332_v19, 0.0  ;;  %10273 = vrot.lane.b32.xlu1 %v10272_v20, %s10746_s9  ;;  %v5047_v19 = vld [vmem:[#allocation3 + $0x69] sm:$0xff] }
 0x323   :  { %10268 = vrot.lane.b32.xlu0 %v10267_v23, %s10746_s9  ;;  %v4694_v25 = vld [vmem:[#allocation3 + $0x1e9] sm:$0xff]  ;;  %v6272_v5 = vsel %vm108_vm3, %v13742_v28, %v10150_v45  ;;  %v6208_v63 = vsel %vm108_vm3, %v4607_v24, %v10151_v58 }
 0x324   :  { %v4820_v11 = vld [vmem:[#allocation3 + $0x1e8] sm:$0xff]  ;;  %4566 = vst.msk [vmem:[#allocation3 + $0x201] sm:$0xff] %vm108_vm3, %v4502_v21  ;;  %v10282_v40 = vpack.i.bf16 %v4694_v25, %v13615_v38  ;;  %v10154_v13 = vpop.permute.xlu0 %10153  ;;  %6848 = vmatprep.mubr.f32.mxu0 %v6272_v5  ;;  %v4609_v21 = vld [vmem:[#allocation3 + $0xc0] sm:$0xff]  ;;  %v15017_v5 = vld [vmem:[#allocation29_spill] sm:$0xff] }
 0x325   :  { %v10277_v47 = vpack.i.bf16 %v4820_v11, %v5045_v43  ;;  %v10156_v51 = vunpack.i.h.bf16 %v10154_v13  ;;  %v10155_v57 = vunpack.i.l.bf16 %v10154_v13  ;;  %6849 = vmatmul.mubr.f32.gmra.mrb[156].mxu0 %v6208_v63  ;;  %v13770_v11 = vpop.f32.mrb[126].mxu0 }
 0x326   :  { %10283 = vrot.lane.b32.xlu1 %v10282_v40, %s10746_s9  ;;  %v13774_v13 = vpop.f32.mrb[127].mxu0 }
 0x327   :  { %10278 = vrot.lane.b32.xlu0 %v10277_v47, %s10746_s9  ;;  %v4695_v60 = vld [vmem:[#allocation3 + $0x1f9] sm:$0xff]  ;;  %v6273_v62 = vsel %vm108_vm3, %v13750_v18, %v10155_v57  ;;  %v6209_v38 = vsel %vm108_vm3, %v4608_v29, %v10156_v51  ;;  %v13776_v57 = vld [vmem:[#allocation3 + $0xca] sm:$0xff] }
 0x328   :  { %v4821_v7 = vld [vmem:[#allocation3 + $0x1f8] sm:$0xff]  ;;  %v10292_v34 = vpack.i.bf16 %v4695_v60, %v13639_v1  ;;  %6853 = vmatprep.mubr.f32.mxu0 %v6273_v62 }
 0x329   :  { %v10287_v3 = vpack.i.bf16 %v4821_v7, %v5046_v54  ;;  %v3951_v37 = vpop.f32.mrb[76].mxu1  ;;  %6854 = vmatmul.mubr.f32.gmra.mrb[158].mxu0 %v6209_v38  ;;  %v4610_v54 = vld [vmem:[#allocation3 + $0xc8] sm:$0xff] }
 0x32a   :  { %v3952_v2 = vadd.f32 %v13663_v52, %v3951_v37  ;;  %v3953_v8 = vpop.f32.mrb[77].mxu1  ;;  %10293 = vrot.lane.b32.xlu1 %v10292_v34, %s10746_s9  ;;  %v15018_v34 = vld [vmem:[#allocation32_spill] sm:$0xff] }
 0x32b   :  { %10288 = vrot.lane.b32.xlu0 %v10287_v3, %s10746_s9  ;;  %v10159_v44 = vpop.permute.xlu0 %10158  ;;  %v4696_v50 = vld [vmem:[#allocation3 + $0x201] sm:$0xff] }
 0x32c   :  { %v4822_v12 = vld [vmem:[#allocation3 + $0x200] sm:$0xff]  ;;  %v4337_v42 = vadd.f32 %v15016_v39, %v3952_v2  ;;  %v10161_v35 = vunpack.i.h.bf16 %v10159_v44  ;;  %v10160_v59 = vunpack.i.l.bf16 %v10159_v44  ;;  %v10302_v1 = vpack.i.bf16 %v4696_v50, %v13647_v26 }
 0x32d   :  { %v3956_v20 = vpop.f32.mrb[78].mxu1  ;;  %v10297_v23 = vpack.i.bf16 %v4822_v12, %v5047_v19  ;;  %v5048_v39 = vld [vmem:[#allocation3 + $0x79] sm:$0xff] }
 0x32e   :  { %v4503_v58 = vmax.f32 %v4337_v42, 0.0  ;;  %v3957_v45 = vadd.f32 %v13663_v52, %v3956_v20  ;;  %v3958_v24 = vpop.f32.mrb[79].mxu1  ;;  %10303 = vrot.lane.b32.xlu1 %v10302_v1, %s10746_s9  ;;  %v6274_v43 = vsel %vm108_vm3, %v13762_v32, %v10160_v59  ;;  %v6210_v25 = vsel %vm108_vm3, %v4609_v21, %v10161_v35  ;;  %v15019_v42 = vld [vmem:[#allocation31_spill] sm:$0xff] }
 0x32f   :  { %10298 = vrot.lane.b32.xlu0 %v10297_v23, %s10746_s9  ;;  %v10164_v26 = vpop.permute.xlu0 %10163  ;;  %6858 = vmatprep.mubr.f32.mxu0 %v6274_v43  ;;  %v13790_v24 = vld [vmem:[#allocation3 + $0xda] sm:$0xff] }
 0x330   :  { %4567 = vst.msk [vmem:[#allocation3 + $0x211] sm:$0xff] %vm108_vm3, %v4503_v58  ;;  %v4342_v63 = vadd.f32 %v15017_v5, %v3957_v45  ;;  %v10166_v40 = vunpack.i.h.bf16 %v10164_v26  ;;  %v10165_v47 = vunpack.i.l.bf16 %v10164_v26  ;;  %6859 = vmatmul.mubr.f32.gmra.mrb[160].mxu0 %v6210_v25  ;;  %v4611_v58 = vld [vmem:[#allocation3 + $0xd8] sm:$0xff]  ;;  %v5049_v45 = vld [vmem:[#allocation3 + $0x81] sm:$0xff] }
 0x331   :  { %v3961_v51 = vpop.f32.mrb[80].mxu1 }
 0x332   :  { %v4504_v29 = vmax.f32 %v4342_v63, 0.0  ;;  %v3962_v60 = vadd.f32 %v13663_v52, %v3961_v51  ;;  %v3963_v7 = vpop.f32.mrb[81].mxu1  ;;  %v6275_v62 = vsel %vm108_vm3, %v13776_v57, %v10165_v47  ;;  %v6211_v38 = vsel %vm108_vm3, %v4610_v54, %v10166_v40  ;;  %v13798_v54 = vld [vmem:[#allocation3 + $0xe2] sm:$0xff] }
 0x333   :  { %6863 = vmatprep.mubr.f32.mxu0 %v6275_v62 }
 0x334   :  { %4568 = vst.msk [vmem:[#allocation3 + $0x219] sm:$0xff] %vm108_vm3, %v4504_v29  ;;  %v4347_v3 = vadd.f32 %v15018_v34, %v3962_v60  ;;  %6864 = vmatmul.mubr.f32.gmra.mrb[162].mxu0 %v6211_v38  ;;  %v5050_v29 = vld [vmem:[#allocation3 + $0x91] sm:$0xff]  ;;  %v4612_v60 = vld [vmem:[#allocation3 + $0xe0] sm:$0xff] }
 0x335   :  { %v3966_v37 = vpop.f32.mrb[82].mxu1 }
 0x336   :  { %v4505_v2 = vmax.f32 %v4347_v3, 0.0  ;;  %v3967_v8 = vadd.f32 %v13663_v52, %v3966_v37  ;;  %v3968_v44 = vpop.f32.mrb[83].mxu1 }
 0x337   :  { %v4697_v50 = vld [vmem:[#allocation3 + $0x211] sm:$0xff] }
 0x338   :  { %v4823_v12 = vld [vmem:[#allocation3 + $0x210] sm:$0xff]  ;;  %4569 = vst.msk [vmem:[#allocation3 + $0x229] sm:$0xff] %vm108_vm3, %v4505_v2  ;;  %v4352_v35 = vadd.f32 %v15019_v42, %v3967_v8  ;;  %v10312_v59 = vpack.i.bf16 %v4697_v50, %v13686_v49  ;;  %v10169_v19 = vpop.permute.xlu0 %10168  ;;  %v15020_v44 = vld [vmem:[#allocation34_spill] sm:$0xff] }
 0x339   :  { %v10307_v1 = vpack.i.bf16 %v4823_v12, %v5048_v39  ;;  %v10171_v23 = vunpack.i.h.bf16 %v10169_v19  ;;  %v10170_v21 = vunpack.i.l.bf16 %v10169_v19 }
 0x33a   :  { %v4506_v20 = vmax.f32 %v4352_v35, 0.0  ;;  %10313 = vrot.lane.b32.xlu1 %v10312_v59, %s10746_s9  ;;  %v5051_v35 = vld [vmem:[#allocation3 + $0x99] sm:$0xff] }
 0x33b   :  { %10308 = vrot.lane.b32.xlu0 %v10307_v1, %s10746_s9  ;;  %v4698_v43 = vld [vmem:[#allocation3 + $0x219] sm:$0xff]  ;;  %v6276_v49 = vsel %vm108_vm3, %v13790_v24, %v10170_v21  ;;  %v6212_v26 = vsel %vm108_vm3, %v4611_v58, %v10171_v23 }
 0x33c   :  { %v4824_v25 = vld [vmem:[#allocation3 + $0x218] sm:$0xff]  ;;  %4570 = vst.msk [vmem:[#allocation3 + $0x231] sm:$0xff] %vm108_vm3, %v4506_v20  ;;  %v10322_v5 = vpack.i.bf16 %v4698_v43, %v13695_v17  ;;  %v10174_v40 = vpop.permute.xlu0 %10173  ;;  %6868 = vmatprep.mubr.f32.mxu0 %v6276_v49  ;;  %v4613_v43 = vld [vmem:[#allocation3 + $0xf0] sm:$0xff] }
 0x33d   :  { %v10317_v63 = vpack.i.bf16 %v4824_v25, %v5049_v45  ;;  %v10176_v47 = vunpack.i.h.bf16 %v10174_v40  ;;  %v10175_v51 = vunpack.i.l.bf16 %v10174_v40  ;;  %6869 = vmatmul.mubr.f32.gmra.mrb[164].mxu0 %v6212_v26  ;;  %v13811_v45 = vld [vmem:[#allocation3 + $0xf2] sm:$0xff] }
 0x33e   :  { %10323 = vrot.lane.b32.xlu1 %v10322_v5, %s10746_s9  ;;  %v15021_v26 = vld [vmem:[#allocation33_spill] sm:$0xff] }
 0x33f   :  { %10318 = vrot.lane.b32.xlu0 %v10317_v63, %s10746_s9  ;;  %v4699_v7 = vld [vmem:[#allocation3 + $0x229] sm:$0xff]  ;;  %v6277_v38 = vsel %vm108_vm3, %v13798_v54, %v10175_v51  ;;  %v6213_v34 = vsel %vm108_vm3, %v4612_v60, %v10176_v47 }
 0x340   :  { %v4825_v62 = vld [vmem:[#allocation3 + $0x228] sm:$0xff]  ;;  %v10332_v3 = vpack.i.bf16 %v4699_v7, %v13706_v27  ;;  %6873 = vmatprep.mubr.f32.mxu0 %v6277_v38  ;;  %v13821_v7 = vld [vmem:[#allocation3 + $0xfa] sm:$0xff] }
 0x341   :  { %v3971_v17 = vpop.f32.mrb[84].mxu1  ;;  %v10327_v37 = vpack.i.bf16 %v4825_v62, %v5050_v29  ;;  %6874 = vmatmul.mubr.f32.gmra.mrb[166].mxu0 %v6213_v34  ;;  %v4614_v62 = vld [vmem:[#allocation3 + $0xf8] sm:$0xff] }
 0x342   :  { %v3972_v2 = vadd.f32 %v13663_v52, %v3971_v17  ;;  %v3973_v8 = vpop.f32.mrb[85].mxu1  ;;  %10333 = vrot.lane.b32.xlu1 %v10332_v3, %s10746_s9 }
 0x343   :  { %10328 = vrot.lane.b32.xlu0 %v10327_v37, %s10746_s9  ;;  %v10179_v12 = vpop.permute.xlu0 %10178  ;;  %v4700_v39 = vld [vmem:[#allocation3 + $0x231] sm:$0xff] }
 0x344   :  { %v4357_v50 = vadd.f32 %v15020_v44, %v3972_v2  ;;  %v4826_v42 = vld [vmem:[#allocation3 + $0x230] sm:$0xff]  ;;  %v10181_v59 = vunpack.i.h.bf16 %v10179_v12  ;;  %v10180_v1 = vunpack.i.l.bf16 %v10179_v12  ;;  %v10342_v27 = vpack.i.bf16 %v4700_v39, %v13717_v36 }
 0x345   :  { %v3976_v19 = vpop.f32.mrb[86].mxu1  ;;  %v10337_v20 = vpack.i.bf16 %v4826_v42, %v5051_v35  ;;  %v5052_v12 = vld [vmem:[#allocation3 + $0xa9] sm:$0xff] }
 0x346   :  { %v4507_v23 = vmax.f32 %v4357_v50, 0.0  ;;  %v3977_v21 = vadd.f32 %v13663_v52, %v3976_v19  ;;  %v3978_v58 = vpop.f32.mrb[87].mxu1  ;;  %10343 = vrot.lane.b32.xlu1 %v10342_v27, %s10746_s9  ;;  %v6278_v25 = vsel %vm108_vm3, %v13811_v45, %v10180_v1  ;;  %v6214_v49 = vsel %vm108_vm3, %v4613_v43, %v10181_v59  ;;  %v6516_v43 = vld [vmem:[%s14958_s4 + $0x210] sm:$0xff] }
 0x347   :  { %10338 = vrot.lane.b32.xlu0 %v10337_v20, %s10746_s9  ;;  %v10184_v36 = vpop.permute.xlu0 %10183  ;;  %6878 = vmatprep.mubr.f32.mxu0 %v6278_v25  ;;  %v4615_v20 = vld [vmem:[#allocation3 + $0x108] sm:$0xff]  ;;  %v6517_v25 = vld [vmem:[%s14958_s4 + $0x218] sm:$0xff] }
 0x348   :  { %4571 = vst.msk [vmem:[#allocation3 + $0x241] sm:$0xff] %vm108_vm3, %v4507_v23  ;;  %v4362_v5 = vadd.f32 %v15021_v26, %v3977_v21  ;;  %v10186_v63 = vunpack.i.h.bf16 %v10184_v36  ;;  %v10185_v40 = vunpack.i.l.bf16 %v10184_v36  ;;  %6879 = vmatmul.mubr.f32.gmra.mrb[168].mxu0 %v6214_v49  ;;  %v13835_v58 = vld [vmem:[#allocation3 + $0x10a] sm:$0xff] }
 0x349   :  { %v3981_v47 = vpop.f32.mrb[88].mxu1 }
 0x34a   :  { %v4508_v51 = vmax.f32 %v4362_v5, 0.0  ;;  %v3982_v29 = vadd.f32 %v13663_v52, %v3981_v47  ;;  %v3983_v60 = vpop.f32.mrb[89].mxu1  ;;  %v6279_v38 = vsel %vm108_vm3, %v13821_v7, %v10185_v40  ;;  %v6215_v17 = vsel %vm108_vm3, %v4614_v62, %v10186_v63  ;;  %v5054_v40 = vld [vmem:[#allocation3 + $0xc1] sm:$0xff]  ;;  %v4616_v47 = vld [vmem:[#allocation3 + $0x110] sm:$0xff] }
 0x34b   :  { %6883 = vmatprep.mubr.f32.mxu0 %v6279_v38  ;;  %v8978_v60 = vpack.c.bf16 %v6517_v25, %v6516_v43  ;;  %v13871_v25 = vld [vmem:[#allocation3 + $0x12a] sm:$0xff] }
 0x34c   :  { %4572 = vst.msk [vmem:[#allocation3 + $0x249] sm:$0xff] %vm108_vm3, %v4508_v51  ;;  %v4367_v34 = vadd.f32 %v12936_v10, %v3982_v29  ;;  %6884 = vmatmul.mubr.f32.gmra.mrb[170].mxu0 %v6215_v17  ;;  %v5053_v10 = vld [vmem:[#allocation3 + $0xb1] sm:$0xff] }
 0x34d   :  { %v3986_v3 = vpop.f32.mrb[90].mxu1 }
 0x34e   :  { %v4509_v37 = vmax.f32 %v4367_v34, 0.0  ;;  %v3987_v2 = vadd.f32 %v13663_v52, %v3986_v3  ;;  %v3988_v8 = vpop.f32.mrb[91].mxu1 }
 0x34f   :  { %v4701_v44 = vld [vmem:[#allocation3 + $0x241] sm:$0xff] }
 0x350   :  { %v4827_v50 = vld [vmem:[#allocation3 + $0x240] sm:$0xff]  ;;  %4573 = vst.msk [vmem:[#allocation3 + $0x259] sm:$0xff] %vm108_vm3, %v4509_v37  ;;  %v4372_v39 = vadd.f32 %v12920_v33, %v3987_v2  ;;  %v10352_v42 = vpack.i.bf16 %v4701_v44, %v13742_v28 }
 0x351   :  { %v10347_v35 = vpack.i.bf16 %v4827_v50, %v5052_v12  ;;  %v10189_v1 = vpop.permute.xlu0 %10188 }
 0x352   :  { %v4510_v59 = vmax.f32 %v4372_v39, 0.0  ;;  %10353 = vrot.lane.b32.xlu1 %v10352_v42, %s10746_s9  ;;  %v10191_v19 = vunpack.i.h.bf16 %v10189_v1  ;;  %v10190_v27 = vunpack.i.l.bf16 %v10189_v1 }
 0x353   :  { %10348 = vrot.lane.b32.xlu0 %v10347_v35, %s10746_s9  ;;  %v4702_v23 = vld [vmem:[#allocation3 + $0x249] sm:$0xff] }
 0x354   :  { %v4828_v21 = vld [vmem:[#allocation3 + $0x248] sm:$0xff]  ;;  %4574 = vst.msk [vmem:[#allocation3 + $0x261] sm:$0xff] %vm108_vm3, %v4510_v59  ;;  %v10362_v33 = vpack.i.bf16 %v4702_v23, %v13750_v18  ;;  %v10194_v49 = vpop.permute.xlu1 %10193  ;;  %v6280_v26 = vsel %vm108_vm3, %v13835_v58, %v10190_v27  ;;  %v6216_v5 = vsel %vm108_vm3, %v4615_v20, %v10191_v19  ;;  %v13848_v18 = vld [vmem:[#allocation3 + $0x112] sm:$0xff]  ;;  %v4617_v19 = vld [vmem:[#allocation3 + $0x120] sm:$0xff] }
 0x355   :  { %v10357_v28 = vpack.i.bf16 %v4828_v21, %v5053_v10  ;;  %v10196_v36 = vunpack.i.h.bf16 %v10194_v49  ;;  %v10195_v63 = vunpack.i.l.bf16 %v10194_v49  ;;  %6888 = vmatprep.mubr.f32.mxu0 %v6280_v26  ;;  %v5055_v35 = vld [vmem:[#allocation3 + $0xc9] sm:$0xff] }
 0x356   :  { %10363 = vrot.lane.b32.xlu1 %v10362_v33, %s10746_s9  ;;  %6889 = vmatmul.mubr.f32.gmra.mrb[172].mxu0 %v6216_v5  ;;  %v13861_v10 = vld [vmem:[#allocation3 + $0x122] sm:$0xff] }
 0x357   :  { %10358 = vrot.lane.b32.xlu0 %v10357_v28, %s10746_s9  ;;  %v4703_v51 = vld [vmem:[#allocation3 + $0x259] sm:$0xff]  ;;  %v6281_v62 = vsel %vm108_vm3, %v13848_v18, %v10195_v63  ;;  %v6217_v38 = vsel %vm108_vm3, %v4616_v47, %v10196_v36  ;;  %v4618_v49 = vld [vmem:[#allocation3 + $0x128] sm:$0xff] }
 0x358   :  { %v4829_v29 = vld [vmem:[#allocation3 + $0x258] sm:$0xff]  ;;  %v10372_v17 = vpack.i.bf16 %v4703_v51, %v13762_v32  ;;  %6893 = vmatprep.mubr.f32.mxu1 %v6281_v62 }
 0x359   :  { %v10367_v34 = vpack.i.bf16 %v4829_v29, %v5054_v40  ;;  %v3991_v3 = vpop.f32.mrb[92].mxu1  ;;  %6894 = vmatmul.mubr.f32.vlgmr.msra.gmra.mrb[128].mxu1 %v6217_v38 }
 0x35a   :  { %v3992_v37 = vadd.f32 %v13663_v52, %v3991_v3  ;;  %v3993_v2 = vpop.f32.mrb[93].mxu1  ;;  %10373 = vrot.lane.b32.xlu1 %v10372_v17, %s10746_s9  ;;  %8977 = vmatpush3.bf16.msra.mxu1 %v13734_v6  ;;  %v5056_v17 = vld [vmem:[#allocation3 + $0xd9] sm:$0xff] }
 0x35b   :  { %10368 = vrot.lane.b32.xlu0 %v10367_v34, %s10746_s9  ;;  %v10199_v8 = vpop.permute.xlu1 %10198  ;;  %v4704_v44 = vld [vmem:[#allocation3 + $0x261] sm:$0xff]  ;;  %8979 = vmatprep.subr.bf16.mxu1 %v8978_v60 }
 0x35c   :  { %v4830_v50 = vld [vmem:[#allocation3 + $0x260] sm:$0xff]  ;;  %v4377_v12 = vadd.f32 %v12994_v15, %v3992_v37  ;;  %v10201_v39 = vunpack.i.h.bf16 %v10199_v8  ;;  %v10200_v32 = vunpack.i.l.bf16 %v10199_v8  ;;  %v10382_v42 = vpack.i.bf16 %v4704_v44, %v13776_v57 }
 0x35d   :  { %v3996_v59 = vpop.f32.mrb[94].mxu1  ;;  %v10377_v1 = vpack.i.bf16 %v4830_v50, %v5055_v35  ;;  %v6518_v35 = vld [vmem:[%s14958_s4 + $0x220] sm:$0xff] }
 0x35e   :  { %v4511_v27 = vmax.f32 %v4377_v12, 0.0  ;;  %v3997_v20 = vadd.f32 %v13663_v52, %v3996_v59  ;;  %v3998_v23 = vpop.f32.mrb[95].mxu1  ;;  %10383 = vrot.lane.b32.xlu1 %v10382_v42, %s10746_s9  ;;  %v6282_v15 = vsel %vm108_vm3, %v13861_v10, %v10200_v32  ;;  %v6218_v6 = vsel %vm108_vm3, %v4617_v19, %v10201_v39  ;;  %8981 = vmatpush3.bf16.msra.mxu1 %v8978_v60  ;;  %v5057_v39 = vld [vmem:[#allocation3 + $0xe1] sm:$0xff]  ;;  %v4619_v42 = vld [vmem:[#allocation3 + $0x138] sm:$0xff] }
 0x35f   :  { %10378 = vrot.lane.b32.xlu0 %v10377_v1, %s10746_s9  ;;  %v10204_v57 = vpop.permute.xlu1 %10203  ;;  %6898 = vmatprep.mubr.f32.mxu1 %v6282_v15  ;;  %v13886_v32 = vld [vmem:[#allocation3 + $0x13a] sm:$0xff]  ;;  %v6519_v19 = vld [vmem:[%s14958_s4 + $0x228] sm:$0xff] }
 0x360   :  { %4575 = vst.msk [vmem:[#allocation3 + $0x271] sm:$0xff] %vm108_vm3, %v4511_v27  ;;  %v4382_v21 = vadd.f32 %v12984_v31, %v3997_v20  ;;  %v10206_v33 = vunpack.i.h.bf16 %v10204_v57  ;;  %v10205_v28 = vunpack.i.l.bf16 %v10204_v57  ;;  %6899 = vmatmul.mubr.f32.gmra.mrb[130].mxu1 %v6218_v6  ;;  %v8982_v20 = vpack.c.bf16 %v6519_v19, %v6518_v35  ;;  %v5058_v57 = vld [vmem:[#allocation3 + $0xf1] sm:$0xff] }
 0x361   :  { %v4001_v43 = vpop.f32.mrb[96].mxu1 }
 0x362   :  { %v4512_v26 = vmax.f32 %v4382_v21, 0.0  ;;  %v4002_v5 = vadd.f32 %v13663_v52, %v4001_v43  ;;  %v4003_v36 = vpop.f32.mrb[97].mxu1  ;;  %v6283_v63 = vsel %vm108_vm3, %v13871_v25, %v10205_v28  ;;  %v6219_v40 = vsel %vm108_vm3, %v4618_v49, %v10206_v33  ;;  %v13900_v21 = vld [vmem:[#allocation3 + $0x142] sm:$0xff]  ;;  %8983 = vmatprep.subr.bf16.mxu1 %v8982_v20 }
 0x363   :  { %6903 = vmatprep.mubr.f32.mxu1 %v6283_v63  ;;  %v4620_v33 = vld [vmem:[#allocation3 + $0x140] sm:$0xff]  ;;  %8985 = vmatpush3.bf16.msra.mxu1 %v8982_v20 }
 0x364   :  { %4576 = vst.msk [vmem:[#allocation3 + $0x279] sm:$0xff] %vm108_vm3, %v4512_v26  ;;  %v4387_v31 = vadd.f32 %v13061_v4, %v4002_v5  ;;  %6904 = vmatmul.mubr.f32.gmra.mrb[132].mxu1 %v6219_v40 }
 0x365   :  { %v4006_v47 = vpop.f32.mrb[98].mxu1 }
 0x366   :  { %v4513_v51 = vmax.f32 %v4387_v31, 0.0  ;;  %v4007_v29 = vadd.f32 %v13663_v52, %v4006_v47  ;;  %v4008_v60 = vpop.f32.mrb[99].mxu1 }
 0x367   :  { %v4705_v62 = vld [vmem:[#allocation3 + $0x271] sm:$0xff] }
 0x368   :  { %v4831_v38 = vld [vmem:[#allocation3 + $0x270] sm:$0xff]  ;;  %4577 = vst.msk [vmem:[#allocation3 + $0x289] sm:$0xff] %vm108_vm3, %v4513_v51  ;;  %v4392_v34 = vadd.f32 %v13050_v0, %v4007_v29  ;;  %v10392_v3 = vpack.i.bf16 %v4705_v62, %v13790_v24  ;;  %v10209_v8 = vpop.permute.xlu1 %10208  ;;  %v5059_v62 = vld [vmem:[#allocation3 + $0xf9] sm:$0xff] }
 0x369   :  { %v10387_v37 = vpack.i.bf16 %v4831_v38, %v5056_v17  ;;  %v10211_v4 = vunpack.i.h.bf16 %v10209_v8  ;;  %v10210_v44 = vunpack.i.l.bf16 %v10209_v8 }
 0x36a   :  { %v4514_v2 = vmax.f32 %v4392_v34, 0.0  ;;  %10393 = vrot.lane.b32.xlu1 %v10392_v3, %s10746_s9  ;;  %v13911_v34 = vld [vmem:[#allocation3 + $0x152] sm:$0xff] }
 0x36b   :  { %10388 = vrot.lane.b32.xlu0 %v10387_v37, %s10746_s9  ;;  %v4706_v50 = vld [vmem:[#allocation3 + $0x279] sm:$0xff]  ;;  %v6284_v59 = vsel %vm108_vm3, %v13886_v32, %v10210_v44  ;;  %v6220_v1 = vsel %vm108_vm3, %v4619_v42, %v10211_v4  ;;  %v4621_v3 = vld [vmem:[#allocation3 + $0x150] sm:$0xff] }
 0x36c   :  { %v4832_v12 = vld [vmem:[#allocation3 + $0x278] sm:$0xff]  ;;  %4578 = vst.msk [vmem:[#allocation3 + $0x291] sm:$0xff] %vm108_vm3, %v4514_v2  ;;  %v10402_v0 = vpack.i.bf16 %v4706_v50, %v13798_v54  ;;  %v10214_v27 = vpop.permute.xlu1 %10213  ;;  %6908 = vmatprep.mubr.f32.mxu1 %v6284_v59 }
 0x36d   :  { %v10397_v24 = vpack.i.bf16 %v4832_v12, %v5057_v39  ;;  %v10216_v54 = vunpack.i.h.bf16 %v10214_v27  ;;  %v10215_v23 = vunpack.i.l.bf16 %v10214_v27  ;;  %6909 = vmatmul.mubr.f32.gmra.mrb[134].mxu1 %v6220_v1  ;;  %v13921_v42 = vld [vmem:[#allocation3 + $0x15a] sm:$0xff] }
 0x36e   :  { %10403 = vrot.lane.b32.xlu1 %v10402_v0, %s10746_s9  ;;  %v4622_v0 = vld [vmem:[#allocation3 + $0x158] sm:$0xff] }
 0x36f   :  { %10398 = vrot.lane.b32.xlu0 %v10397_v24, %s10746_s9  ;;  %v4707_v15 = vld [vmem:[#allocation3 + $0x289] sm:$0xff]  ;;  %v6285_v49 = vsel %vm108_vm3, %v13900_v21, %v10215_v23  ;;  %v6221_v5 = vsel %vm108_vm3, %v4620_v33, %v10216_v54 }
 0x370   :  { %v4833_v6 = vld [vmem:[#allocation3 + $0x288] sm:$0xff]  ;;  %v10412_v28 = vpack.i.bf16 %v4707_v15, %v13811_v45  ;;  %6913 = vmatprep.mubr.f32.mxu1 %v6285_v49 }
 0x371   :  { %v10407_v43 = vpack.i.bf16 %v4833_v6, %v5058_v57  ;;  %v4011_v26 = vpop.f32.mrb[100].mxu1  ;;  %6914 = vmatmul.mubr.f32.gmra.mrb[136].mxu1 %v6221_v5  ;;  %v13929_v15 = vld [vmem:[#allocation3 + $0x16a] sm:$0xff] }
 0x372   :  { %v4012_v36 = vadd.f32 %v13663_v52, %v4011_v26  ;;  %v4013_v63 = vpop.f32.mrb[101].mxu1  ;;  %10413 = vrot.lane.b32.xlu1 %v10412_v28, %s10746_s9  ;;  %v4623_v6 = vld [vmem:[#allocation3 + $0x168] sm:$0xff] }
 0x373   :  { %10408 = vrot.lane.b32.xlu0 %v10407_v43, %s10746_s9  ;;  %v10219_v40 = vpop.permute.xlu1 %10218  ;;  %v4708_v45 = vld [vmem:[#allocation3 + $0x291] sm:$0xff] }
 0x374   :  { %v4834_v31 = vld [vmem:[#allocation3 + $0x290] sm:$0xff]  ;;  %v4397_v47 = vadd.f32 %v13100_v41, %v4012_v36  ;;  %v10221_v51 = vunpack.i.h.bf16 %v10219_v40  ;;  %v10220_v29 = vunpack.i.l.bf16 %v10219_v40  ;;  %v10422_v60 = vpack.i.bf16 %v4708_v45, %v13821_v7 }
 0x375   :  { %v4016_v38 = vpop.f32.mrb[102].mxu1  ;;  %v10417_v17 = vpack.i.bf16 %v4834_v31, %v5059_v62 }
 0x376   :  { %v4515_v37 = vmax.f32 %v4397_v47, 0.0  ;;  %v4017_v2 = vadd.f32 %v13663_v52, %v4016_v38  ;;  %v4018_v8 = vpop.f32.mrb[103].mxu1  ;;  %10423 = vrot.lane.b32.xlu1 %v10422_v60, %s10746_s9  ;;  %v6286_v4 = vsel %vm108_vm3, %v13911_v34, %v10220_v29  ;;  %v6222_v41 = vsel %vm108_vm3, %v4621_v3, %v10221_v51  ;;  %v13938_v47 = vld [vmem:[#allocation3 + $0x172] sm:$0xff] }
 0x377   :  { %10418 = vrot.lane.b32.xlu0 %v10417_v17, %s10746_s9  ;;  %v10224_v7 = vpop.permute.xlu1 %10223  ;;  %6918 = vmatprep.mubr.f32.mxu1 %v6286_v4  ;;  %v4624_v51 = vld [vmem:[#allocation3 + $0x170] sm:$0xff] }
 0x378   :  { %4579 = vst.msk [vmem:[#allocation3 + $0x2a1] sm:$0xff] %vm108_vm3, %v4515_v37  ;;  %v4402_v44 = vadd.f32 %v13093_v55, %v4017_v2  ;;  %v10226_v50 = vunpack.i.h.bf16 %v10224_v7  ;;  %v10225_v12 = vunpack.i.l.bf16 %v10224_v7  ;;  %6919 = vmatmul.mubr.f32.gmra.mrb[138].mxu1 %v6222_v41  ;;  %v5061_v17 = vld [vmem:[#allocation3 + $0x111] sm:$0xff] }
 0x379   :  { %v4021_v39 = vpop.f32.mrb[104].mxu1 }
 0x37a   :  { %v4516_v24 = vmax.f32 %v4402_v44, 0.0  ;;  %v4022_v35 = vadd.f32 %v13663_v52, %v4021_v39  ;;  %v4023_v59 = vpop.f32.mrb[105].mxu1  ;;  %v6287_v1 = vsel %vm108_vm3, %v13921_v42, %v10225_v12  ;;  %v6223_v19 = vsel %vm108_vm3, %v4622_v0, %v10226_v50  ;;  %v4753_v50 = vld [vmem:[#allocation3 + $0x1b2] sm:$0xff]  ;;  %v5062_v0 = vld [vmem:[#allocation3 + $0x121] sm:$0xff] }
 0x37b   :  { %v10229_v27 = vpop.permute.xlu1 %10228  ;;  %6923 = vmatprep.mubr.f32.mxu1 %v6287_v1  ;;  %v4978_v1 = vld [vmem:[#allocation3 + $0x30] sm:$0xff] }
 0x37c   :  { %4580 = vst.msk [vmem:[#allocation3 + $0x2a9] sm:$0xff] %vm108_vm3, %v4516_v24  ;;  %v4407_v55 = vadd.f32 %v13152_v14, %v4022_v35  ;;  %v10231_v20 = vunpack.i.h.bf16 %v10229_v27  ;;  %v10230_v54 = vunpack.i.l.bf16 %v10229_v27  ;;  %6924 = vmatmul.mubr.f32.gmra.mrb[140].mxu1 %v6223_v19  ;;  %v4625_v24 = vld [vmem:[#allocation3 + $0x1b0] sm:$0xff]  ;;  %v13956_v19 = vld [vmem:[%s14957_s3] ss:$0 sm:$0xff] }
 0x37d   :  { %v4026_v23 = vpop.f32.mrb[106].mxu1 }
 0x37e   :  { %v4517_v57 = vmax.f32 %v4407_v55, 0.0  ;;  %v4027_v33 = vadd.f32 %v13663_v52, %v4026_v23  ;;  %v4028_v28 = vpop.f32.mrb[107].mxu1  ;;  %v6288_v43 = vsel %vm108_vm3, %v13929_v15, %v10230_v54  ;;  %v6224_v49 = vsel %vm108_vm3, %v4623_v6, %v10231_v20  ;;  %v5060_v52 = vld [vmem:[#allocation3 + $0x109] sm:$0xff]  ;;  %v4849_v23 = vld [vmem:[#allocation3 + $0x19] sm:$0xff] }
 0x37f   :  { %v10234_v26 = vpop.permute.xlu1 %10233  ;;  %6928 = vmatprep.mubr.f32.mxu1 %v6288_v43  ;;  %v4709_v5 = vld [vmem:[#allocation3 + $0x2a1] sm:$0xff] }
 0x380   :  { %v4835_v14 = vld [vmem:[#allocation3 + $0x2a0] sm:$0xff]  ;;  %4581 = vst.msk [vmem:[#allocation3 + $0x2b9] sm:$0xff] %vm108_vm3, %v4517_v57  ;;  %v4412_v36 = vadd.f32 %v13148_v9, %v4027_v33  ;;  %v10236_v63 = vunpack.i.h.bf16 %v10234_v26  ;;  %v10235_v40 = vunpack.i.l.bf16 %v10234_v26  ;;  %6929 = vmatmul.mubr.f32.gmra.mrb[142].mxu1 %v6224_v49  ;;  %v10432_v45 = vpack.i.bf16 %v4709_v5, %v13835_v58 }
 0x381   :  { %v10427_v31 = vpack.i.bf16 %v4835_v14, %v5060_v52  ;;  %v5063_v14 = vld [vmem:[#allocation3 + $0x129] sm:$0xff] }
 0x382   :  { %v4518_v29 = vmax.f32 %v4412_v36, 0.0  ;;  %10433 = vrot.lane.b32.xlu1 %v10432_v45, %s10746_s9  ;;  %v6289_v60 = vsel %vm108_vm3, %v13938_v47, %v10235_v40  ;;  %v6225_v62 = vsel %vm108_vm3, %v4624_v51, %v10236_v63  ;;  %v4754_v36 = vld [vmem:[#allocation3 + $0x1ba] sm:$0xff] }
 0x383   :  { %10428 = vrot.lane.b32.xlu0 %v10427_v31, %s10746_s9  ;;  %v10239_v9 = vpop.permute.xlu1 %10238  ;;  %6933 = vmatprep.mubr.f32.mxu1 %v6289_v60  ;;  %v13945_v38 = vld [vmem:[#allocation3 + $0x2a9] sm:$0xff]  ;;  %v4626_v51 = vld [vmem:[#allocation3 + $0x1b8] sm:$0xff] }
 0x384   :  { %v4836_v58 = vld [vmem:[#allocation3 + $0x2a8] sm:$0xff]  ;;  %4582 = vst.msk [vmem:[#allocation3 + $0x2c1] sm:$0xff] %vm108_vm3, %v4518_v29  ;;  %6934 = vmatmul.mubr.f32.gmra.mrb[144].mxu1 %v6225_v62  ;;  %v10442_v3 = vpack.i.bf16 %v13945_v38, %v13848_v18  ;;  %v10241_v2 = vunpack.i.h.bf16 %v10239_v9  ;;  %v10240_v8 = vunpack.i.l.bf16 %v10239_v9  ;;  %v4979_v62 = vld [vmem:[#allocation3 + $0x38] sm:$0xff] }
 0x385   :  { %v10437_v37 = vpack.i.bf16 %v4836_v58, %v5061_v17  ;;  %v4850_v58 = vld [vmem:[#allocation3 + $0x21] sm:$0xff] }
 0x386   :  { %10443 = vrot.lane.b32.xlu1 %v10442_v3, %s10746_s9  ;;  %v6322_v6 = vsel %vm108_vm3, %v4849_v23, %v10240_v8 }
 0x387   :  { %10438 = vrot.lane.b32.xlu0 %v10437_v37, %s10746_s9  ;;  %v10244_v4 = vpop.permute.xlu1 %10243  ;;  %v10249_v41 = vpop.permute.xlu0 %10248  ;;  %v4711_v7 = vld [vmem:[#allocation3 + $0x2b9] sm:$0xff] }
 0x388   :  { %v4837_v44 = vld [vmem:[#allocation3 + $0x2b8] sm:$0xff]  ;;  %v10251_v12 = vunpack.i.h.bf16 %v10249_v41  ;;  %v10250_v39 = vunpack.i.l.bf16 %v10249_v41  ;;  %v10452_v59 = vpack.i.bf16 %v4711_v7, %v13861_v10  ;;  %v6226_v10 = vsel %vm108_vm3, %v4625_v24, %v10241_v2  ;;  %v13988_v24 = vld [vmem:[#allocation3 + $0x1ca] sm:$0xff] }
 0x389   :  { %v4031_v35 = vpop.f32.mrb[108].mxu1  ;;  %v10447_v18 = vpack.i.bf16 %v4837_v44, %v5062_v0  ;;  %v10246_v28 = vunpack.i.h.bf16 %v10244_v4  ;;  %v10245_v43 = vunpack.i.l.bf16 %v10244_v4 }
 0x38a   :  { %v4032_v27 = vadd.f32 %v13956_v19, %v4031_v35  ;;  %v4033_v55 = vpop.f32.mrb[109].mxu1  ;;  %v6290_v20 = vsel %vm108_vm3, %v4753_v50, %v10251_v12  ;;  %v6386_v54 = vsel %vm108_vm3, %v4978_v1, %v10250_v39  ;;  %10453 = vrot.lane.b32.xlu1 %v10452_v59, %s10746_s9  ;;  %v5064_v35 = vld [vmem:[#allocation3 + $0x139] sm:$0xff] }
 0x38b   :  { %10448 = vrot.lane.b32.xlu0 %v10447_v18, %s10746_s9  ;;  %v13965_v57 = vld [vmem:[#allocation3 + $0x2c1] sm:$0xff]  ;;  %v10259_v26 = vpop.permute.xlu0 %10258  ;;  %6938 = vmatprep.mubr.f32.mxu1 %v6290_v20  ;;  %v13970_v63 = vpop.permute.xlu1 %10253  ;;  %v6227_v3 = vsel %vm108_vm3, %v4626_v51, %v10246_v28  ;;  %v6323_v37 = vsel %vm108_vm3, %v4850_v58, %v10245_v43 }
 0x38c   :  { %v4838_v33 = vld [vmem:[#allocation3 + $0x2c0] sm:$0xff]  ;;  %v4417_v49 = vadd.f32 %v13184_v48, %v4032_v27  ;;  %7163 = vmatprep.mubr.f32.mxu0 %v6386_v54  ;;  %v10462_v5 = vpack.i.bf16 %v13965_v57, %v13871_v25  ;;  %v10261_v40 = vunpack.i.h.bf16 %v10259_v26  ;;  %v10260_v45 = vunpack.i.l.bf16 %v10259_v26  ;;  %6939 = vmatmul.mubr.f32.gmra.mrb[146].mxu1 %v6226_v10  ;;  %v6520_v27 = vld [vmem:[%s14958_s4 + $0x230] sm:$0xff]  ;;  %v4980_v20 = vld [vmem:[#allocation3 + $0x48] sm:$0xff] }
 0x38d   :  { %7164 = vmatmul.mubr.f32.vlgmr.msra.gmra.mrb[128].mxu0 %v6322_v6  ;;  %v4036_v52 = vpop.f32.mrb[110].mxu1  ;;  %v10457_v31 = vpack.i.bf16 %v4838_v33, %v5063_v14  ;;  %v10255_v12 = vunpack.i.l.bf16 %v13970_v63  ;;  %v4627_v54 = vld [vmem:[#allocation3 + $0x1c8] sm:$0xff]  ;;  %v6521_v6 = vld [vmem:[%s14958_s4 + $0x238] sm:$0xff] }
 0x38e   :  { %v4519_v29 = vmax.f32 %v4417_v49, 0.0  ;;  %v4037_v48 = vadd.f32 %v13956_v19, %v4036_v52  ;;  %v4038_v60 = vpop.f32.mrb[111].mxu1  ;;  %10463 = vrot.lane.b32.xlu1 %v10462_v5, %s10746_s9  ;;  %v6291_v25 = vsel %vm108_vm3, %v4754_v36, %v10261_v40  ;;  %v6387_v9 = vsel %vm108_vm3, %v4979_v62, %v10260_v45  ;;  %v4851_v5 = vld [vmem:[#allocation3 + $0x31] sm:$0xff] }
 0x38f   :  { %10458 = vrot.lane.b32.xlu0 %v10457_v31, %s10746_s9  ;;  %6943 = vmatprep.mubr.f32.mxu1 %v6291_v25  ;;  %v13982_v7 = vpop.permute.xlu1 %10263  ;;  %v8986_v40 = vpack.c.bf16 %v6521_v6, %v6520_v27  ;;  %v14017_v62 = vld [vmem:[#allocation3 + $0x1d2] sm:$0xff] }
 0x390   :  { %4583 = vst.msk [vmem:[#allocation3 + $0x2d1] sm:$0xff] %vm108_vm3, %v4519_v29  ;;  %v4422_v17 = vadd.f32 %v13171_v61, %v4037_v48  ;;  %7168 = vmatprep.mubr.f32.mxu0 %v6387_v9  ;;  %6944 = vmatmul.mubr.f32.gmra.mrb[148].mxu1 %v6227_v3  ;;  %v10256_v61 = vunpack.i.h.bf16 %v13970_v63  ;;  %v10266_v14 = vunpack.i.h.bf16 %v13982_v7  ;;  %v6324_v63 = vsel %vm108_vm3, %v4851_v5, %v10255_v12  ;;  %v5065_v48 = vld [vmem:[#allocation3 + $0x141] sm:$0xff]  ;;  %v4981_v25 = vld [vmem:[#allocation3 + $0x50] sm:$0xff] }
 0x391   :  { %7169 = vmatmul.mubr.f32.gmra.mrb[130].mxu0 %v6323_v37  ;;  %v4041_v2 = vpop.f32.mrb[112].mxu1  ;;  %8987 = vmatprep.subr.bf16.mxu1 %v8986_v40 }
 0x392   :  { %v4520_v8 = vmax.f32 %v4422_v17, 0.0  ;;  %v4042_v4 = vadd.f32 %v13956_v19, %v4041_v2  ;;  %v4043_v41 = vpop.f32.mrb[113].mxu1  ;;  %v6228_v26 = vsel %vm108_vm3, %v4627_v54, %v10256_v61  ;;  %8989 = vmatpush3.bf16.msra.mxu1 %v8986_v40  ;;  %v14048_v40 = vld [vmem:[#allocation3 + $0x1ea] sm:$0xff] }
 0x394   :  { %4584 = vst.msk [vmem:[#allocation3 + $0x2d9] sm:$0xff] %vm108_vm3, %v4520_v8  ;;  %v4427_v44 = vadd.f32 %v13231_v56, %v4042_v4  ;;  %v14003_v33 = vpop.permute.xlu1 %10273  ;;  %v4628_v8 = vld [vmem:[#allocation3 + $0x1d0] sm:$0xff]  ;;  %v4852_v4 = vld [vmem:[#allocation3 + $0x39] sm:$0xff] }
 0x395   :  { %v10269_v50 = vpop.permute.xlu0 %10268  ;;  %v10276_v60 = vunpack.i.h.bf16 %v14003_v33  ;;  %v10275_v58 = vunpack.i.l.bf16 %v14003_v33 }
 0x396   :  { %v4521_v39 = vmax.f32 %v4427_v44, 0.0  ;;  %v10271_v0 = vunpack.i.h.bf16 %v10269_v50  ;;  %v10270_v59 = vunpack.i.l.bf16 %v10269_v50  ;;  %v4853_v50 = vld [vmem:[#allocation3 + $0x49] sm:$0xff] }
 0x397   :  { %v13990_v18 = vld [vmem:[#allocation3 + $0x2d1] sm:$0xff] }
 0x398   :  { %v4839_v1 = vld [vmem:[#allocation3 + $0x2d0] sm:$0xff]  ;;  %4585 = vst.msk [vmem:[#allocation3 + $0x2e9] sm:$0xff] %vm108_vm3, %v4521_v39  ;;  %v4046_v56 = vpop.f32.mrb[114].mxu1  ;;  %v6292_v55 = vsel %vm108_vm3, %v13988_v24, %v10271_v0  ;;  %v10472_v23 = vpack.i.bf16 %v13990_v18, %v13886_v32  ;;  %v6388_v43 = vsel %vm108_vm3, %v4980_v20, %v10270_v59  ;;  %v10265_v32 = vunpack.i.l.bf16 %v13982_v7  ;;  %v10284_v12 = vpop.permute.xlu1 %10283  ;;  %v4629_v20 = vld [vmem:[#allocation3 + $0x1e0] sm:$0xff] }
 0x399   :  { %v10467_v10 = vpack.i.bf16 %v4839_v1, %v5064_v35  ;;  %v4047_v28 = vadd.f32 %v13956_v19, %v4046_v56  ;;  %6948 = vmatprep.mubr.f32.mxu1 %v6292_v55  ;;  %v4048_v49 = vpop.f32.mrb[115].mxu1  ;;  %v10279_v36 = vpop.permute.xlu0 %10278  ;;  %7173 = vmatprep.mubr.f32.mxu0 %v6388_v43  ;;  %v5066_v1 = vld [vmem:[#allocation3 + $0x151] sm:$0xff]  ;;  %v14034_v56 = vld [vmem:[#allocation3 + $0x1e2] sm:$0xff]  ;;  %v10286_v43 = vunpack.i.h.bf16 %v10284_v12 }
 0x39a   :  { %6949 = vmatmul.mubr.f32.gmra.mrb[150].mxu1 %v6228_v26  ;;  %v10281_v52 = vunpack.i.h.bf16 %v10279_v36  ;;  %v10280_v31 = vunpack.i.l.bf16 %v10279_v36  ;;  %7174 = vmatmul.mubr.f32.gmra.mrb[132].mxu0 %v6324_v63  ;;  %v6325_v44 = vsel %vm108_vm3, %v4852_v4, %v10265_v32  ;;  %v4982_v55 = vld [vmem:[#allocation3 + $0x60] sm:$0xff]  ;;  %v10285_v49 = vunpack.i.l.bf16 %v10284_v12 }
 0x39b   :  { %v4432_v45 = vadd.f32 %v13222_v22, %v4047_v28  ;;  %10473 = vrot.lane.b32.xlu1 %v10472_v23, %s10746_s9  ;;  %v14013_v51 = vld [vmem:[#allocation3 + $0x2d9] sm:$0xff]  ;;  %10468 = vrot.lane.b32.xlu0 %v10467_v10, %s10746_s9  ;;  %v6326_v28 = vsel %vm108_vm3, %v4853_v50, %v10275_v58 }
 0x39c   :  { %v4840_v29 = vld [vmem:[#allocation3 + $0x2d8] sm:$0xff]  ;;  %v10482_v9 = vpack.i.bf16 %v14013_v51, %v13900_v21  ;;  %v6293_v3 = vsel %vm108_vm3, %v14017_v62, %v10281_v52  ;;  %v6389_v37 = vsel %vm108_vm3, %v4981_v25, %v10280_v31  ;;  %v6229_v21 = vsel %vm108_vm3, %v4628_v8, %v10266_v14 }
 0x39d   :  { %v10477_v22 = vpack.i.bf16 %v4840_v29, %v5065_v48  ;;  %v4522_v17 = vmax.f32 %v4432_v45, 0.0  ;;  %v4051_v2 = vpop.f32.mrb[116].mxu1  ;;  %v10289_v41 = vpop.permute.xlu0 %10288  ;;  %6953 = vmatprep.mubr.f32.mxu1 %v6293_v3  ;;  %7178 = vmatprep.mubr.f32.mxu0 %v6389_v37  ;;  %v4983_v45 = vld [vmem:[#allocation3 + $0x68] sm:$0xff]  ;;  %v5067_v37 = vld [vmem:[#allocation3 + $0x159] sm:$0xff] }
 0x39e   :  { %v4052_v7 = vadd.f32 %v13956_v19, %v4051_v2  ;;  %v4053_v61 = vpop.f32.mrb[117].mxu1  ;;  %v10291_v39 = vunpack.i.h.bf16 %v10289_v41  ;;  %v10290_v0 = vunpack.i.l.bf16 %v10289_v41  ;;  %6954 = vmatmul.mubr.f32.gmra.mrb[152].mxu1 %v6229_v21  ;;  %7179 = vmatmul.mubr.f32.gmra.mrb[134].mxu0 %v6325_v44  ;;  %v4630_v48 = vld [vmem:[#allocation3 + $0x1e8] sm:$0xff]  ;;  %v10294_v2 = vpop.permute.xlu1 %10293 }
 0x39f   :  { %4586 = vst.msk [vmem:[#allocation3 + $0x2f1] sm:$0xff] %vm108_vm3, %v4522_v17  ;;  %v14029_v35 = vld [vmem:[#allocation3 + $0x2e9] sm:$0xff]  ;;  %10483 = vrot.lane.b32.xlu1 %v10482_v9, %s10746_s9  ;;  %10478 = vrot.lane.b32.xlu0 %v10477_v22, %s10746_s9  ;;  %v6231_v9 = vsel %vm108_vm3, %v4630_v48, %v10286_v43 }
 0x3a0   :  { %v4841_v59 = vld [vmem:[#allocation3 + $0x2e8] sm:$0xff]  ;;  %v4437_v27 = vadd.f32 %v13257_v16, %v4052_v7  ;;  %v10492_v54 = vpack.i.bf16 %v14029_v35, %v13911_v34  ;;  %v6294_v10 = vsel %vm108_vm3, %v14034_v56, %v10291_v39  ;;  %v6390_v6 = vsel %vm108_vm3, %v4982_v55, %v10290_v0 }
 0x3a1   :  { %v10487_v23 = vpack.i.bf16 %v4841_v59, %v5066_v1  ;;  %v4056_v33 = vpop.f32.mrb[118].mxu1  ;;  %v6230_v16 = vsel %vm108_vm3, %v4629_v20, %v10276_v60  ;;  %v10299_v5 = vpop.permute.xlu0 %10298  ;;  %6958 = vmatprep.mubr.f32.mxu1 %v6294_v10  ;;  %7183 = vmatprep.mubr.f32.mxu0 %v6390_v6  ;;  %v4854_v60 = vld [vmem:[#allocation3 + $0x51] sm:$0xff]  ;;  %v5068_v39 = vld [vmem:[#allocation3 + $0x169] sm:$0xff]  ;;  %v10296_v59 = vunpack.i.h.bf16 %v10294_v2  ;;  %v10295_v55 = vunpack.i.l.bf16 %v10294_v2 }
 0x3a2   :  { %v4523_v26 = vmax.f32 %v4437_v27, 0.0  ;;  %v4057_v34 = vadd.f32 %v13956_v19, %v4056_v33  ;;  %v4058_v14 = vpop.f32.mrb[119].mxu1  ;;  %v10301_v32 = vunpack.i.h.bf16 %v10299_v5  ;;  %v10300_v36 = vunpack.i.l.bf16 %v10299_v5  ;;  %6959 = vmatmul.mubr.f32.gmra.mrb[154].mxu1 %v6230_v16  ;;  %7184 = vmatmul.mubr.f32.gmra.mrb[136].mxu0 %v6326_v28  ;;  %v14071_v1 = vpop.permute.xlu1 %10303  ;;  %v5069_v10 = vld [vmem:[#allocation3 + $0x171] sm:$0xff]  ;;  %v14076_v16 = vld [vmem:[#allocation3 + $0x1fa] sm:$0xff] }
 0x3a3   :  { %10493 = vrot.lane.b32.xlu1 %v10492_v54, %s10746_s9  ;;  %10488 = vrot.lane.b32.xlu0 %v10487_v23, %s10746_s9  ;;  %v6327_v22 = vsel %vm108_vm3, %v4854_v60, %v10285_v49  ;;  %v4984_v49 = vld [vmem:[#allocation3 + $0x78] sm:$0xff]  ;;  %v10306_v14 = vunpack.i.h.bf16 %v14071_v1 }
 0x3a4   :  { %4587 = vst.msk [vmem:[#allocation3 + $0x301] sm:$0xff] %vm108_vm3, %v4523_v26  ;;  %v4442_v63 = vadd.f32 %v13253_v53, %v4057_v34  ;;  %v6295_v52 = vsel %vm108_vm3, %v14048_v40, %v10301_v32  ;;  %v6391_v31 = vsel %vm108_vm3, %v4983_v45, %v10300_v36  ;;  %v4631_v26 = vld [vmem:[#allocation3 + $0x1f8] sm:$0xff] }
 0x3a5   :  { %v4061_v29 = vpop.f32.mrb[120].mxu1  ;;  %6963 = vmatprep.mubr.f32.mxu1 %v6295_v52  ;;  %7188 = vmatprep.mubr.f32.mxu0 %v6391_v31  ;;  %v6232_v52 = vsel %vm108_vm3, %v4631_v26, %v10296_v59  ;;  %v4855_v31 = vld [vmem:[#allocation3 + $0x61] sm:$0xff]  ;;  %v4944_v59 = vld [vmem:[#allocation3 + $0x18a] sm:$0xff]  ;;  %v4857_v26 = vld [vmem:[#allocation3 + $0x79] sm:$0xff] }
 0x3a6   :  { %v4524_v25 = vmax.f32 %v4442_v63, 0.0  ;;  %v4062_v53 = vadd.f32 %v13956_v19, %v4061_v29  ;;  %v4063_v58 = vpop.f32.mrb[121].mxu1  ;;  %v14056_v17 = vld [vmem:[#allocation3 + $0x2f1] sm:$0xff]  ;;  %6964 = vmatmul.mubr.f32.gmra.mrb[156].mxu1 %v6231_v9  ;;  %7189 = vmatmul.mubr.f32.gmra.mrb[138].mxu0 %v6327_v22  ;;  %v10305_v29 = vunpack.i.l.bf16 %v14071_v1  ;;  %v6328_v60 = vsel %vm108_vm3, %v4855_v31, %v10295_v55  ;;  %v5075_v31 = vld [vmem:[#allocation3 + $0x1e9] sm:$0xff] }
 0x3a7   :  { %v4842_v3 = vld [vmem:[#allocation3 + $0x2f0] sm:$0xff]  ;;  %v10502_v8 = vpack.i.bf16 %v14056_v17, %v13921_v42 }
 0x3a8   :  { %v10497_v4 = vpack.i.bf16 %v4842_v3, %v5067_v37  ;;  %4588 = vst.msk [vmem:[#allocation3 + $0x309] sm:$0xff] %vm108_vm3, %v4524_v25  ;;  %v4447_v41 = vadd.f32 %v13333_v30, %v4062_v53  ;;  %v5070_v53 = vld [vmem:[#allocation3 + $0x181] sm:$0xff] }
 0x3a9   :  { %v4066_v7 = vpop.f32.mrb[122].mxu1  ;;  %10503 = vrot.lane.b32.xlu1 %v10502_v8, %s10746_s9  ;;  %v4943_v3 = vld [vmem:[#allocation3 + $0x182] sm:$0xff] }
 0x3aa   :  { %10498 = vrot.lane.b32.xlu0 %v10497_v4, %s10746_s9  ;;  %v4525_v21 = vmax.f32 %v4447_v41, 0.0  ;;  %v4067_v44 = vadd.f32 %v13956_v19, %v4066_v7  ;;  %v4068_v61 = vpop.f32.mrb[123].mxu1  ;;  %v4985_v8 = vld [vmem:[#allocation3 + $0x80] sm:$0xff] }
 0x3ab   :  { %v14065_v50 = vld [vmem:[#allocation3 + $0x301] sm:$0xff] }
 0x3ac   :  { %v4843_v12 = vld [vmem:[#allocation3 + $0x300] sm:$0xff]  ;;  %4589 = vst.msk [vmem:[#allocation3 + $0x319] sm:$0xff] %vm108_vm3, %v4525_v21  ;;  %v4452_v42 = vadd.f32 %v13330_v46, %v4067_v44  ;;  %v10512_v30 = vpack.i.bf16 %v14065_v50, %v13929_v15  ;;  %v14086_v32 = vpop.permute.xlu1 %10313 }
 0x3ad   :  { %v10507_v0 = vpack.i.bf16 %v4843_v12, %v5068_v39  ;;  %v10309_v27 = vpop.permute.xlu0 %10308  ;;  %v4071_v23 = vpop.f32.mrb[124].mxu1  ;;  %v4632_v4 = vld [vmem:[#allocation3 + $0x200] sm:$0xff]  ;;  %v4856_v12 = vld [vmem:[#allocation3 + $0x69] sm:$0xff]  ;;  %v10315_v39 = vunpack.i.l.bf16 %v14086_v32 }
 0x3ae   :  { %v4526_v20 = vmax.f32 %v4452_v42, 0.0  ;;  %v10311_v54 = vunpack.i.h.bf16 %v10309_v27  ;;  %10513 = vrot.lane.b32.xlu1 %v10512_v30, %s10746_s9  ;;  %v10310_v6 = vunpack.i.l.bf16 %v10309_v27  ;;  %v4072_v46 = vadd.f32 %v13956_v19, %v4071_v23  ;;  %v4073_v33 = vpop.f32.mrb[125].mxu1  ;;  %v5071_v23 = vld [vmem:[#allocation3 + $0x189] sm:$0xff] }
 0x3af   :  { %10508 = vrot.lane.b32.xlu0 %v10507_v0, %s10746_s9  ;;  %v14078_v15 = vld [vmem:[#allocation3 + $0x309] sm:$0xff]  ;;  %v6233_v61 = vsel %vm108_vm3, %v4632_v4, %v10306_v14  ;;  %v6329_v0 = vsel %vm108_vm3, %v4856_v12, %v10305_v29  ;;  %v14125_v29 = vld [vmem:[#allocation3 + $0x21a] sm:$0xff] }
 0x3b0   :  { %v4844_v28 = vld [vmem:[#allocation3 + $0x308] sm:$0xff]  ;;  %4590 = vst.msk [vmem:[#allocation3 + $0x321] sm:$0xff] %vm108_vm3, %v4526_v20  ;;  %v6296_v43 = vsel %vm108_vm3, %v14076_v16, %v10311_v54  ;;  %v10522_v5 = vpack.i.bf16 %v14078_v15, %v13938_v47  ;;  %v4457_v36 = vadd.f32 %v13774_v13, %v4072_v46  ;;  %v6392_v63 = vsel %vm108_vm3, %v4984_v49, %v10310_v6  ;;  %v10324_v1 = vpop.permute.xlu1 %10323  ;;  %v4986_v6 = vld [vmem:[#allocation3 + $0x90] sm:$0xff] }
 0x3b1   :  { %v10517_v34 = vpack.i.bf16 %v4844_v28, %v5069_v10  ;;  %6968 = vmatprep.mubr.f32.mxu1 %v6296_v43  ;;  %v4076_v45 = vpop.f32.mrb[126].mxu1  ;;  %v10319_v48 = vpop.permute.xlu0 %10318  ;;  %7193 = vmatprep.mubr.f32.mxu0 %v6392_v63  ;;  %v14115_v10 = vld [vmem:[#allocation3 + $0x212] sm:$0xff]  ;;  %v5077_v4 = vld [vmem:[#allocation3 + $0x201] sm:$0xff] }
 0x3b2   :  { %v4077_v47 = vadd.f32 %v13956_v19, %v4076_v45  ;;  %6969 = vmatmul.mubr.f32.gmra.mrb[158].mxu1 %v6232_v52  ;;  %v4078_v25 = vpop.f32.mrb[127].mxu1  ;;  %v4527_v9 = vmax.f32 %v4457_v36, 0.0  ;;  %v10321_v13 = vunpack.i.h.bf16 %v10319_v48  ;;  %v10320_v22 = vunpack.i.l.bf16 %v10319_v48  ;;  %7194 = vmatmul.mubr.f32.gmra.mrb[140].mxu0 %v6328_v60  ;;  %v14099_v19 = vld [vmem:[#allocation3 + $0x202] sm:$0xff]  ;;  %v4633_v49 = vld [vmem:[#allocation3 + $0x210] sm:$0xff]  ;;  %v5072_v63 = vld [vmem:[#allocation3 + $0x199] sm:$0xff] }
 0x3b3   :  { %10523 = vrot.lane.b32.xlu1 %v10522_v5, %s10746_s9  ;;  %v14095_v58 = vld [vmem:[#allocation3 + $0x319] sm:$0xff]  ;;  %10518 = vrot.lane.b32.xlu0 %v10517_v34, %s10746_s9  ;;  %v10326_v5 = vunpack.i.h.bf16 %v10324_v1  ;;  %v10325_v34 = vunpack.i.l.bf16 %v10324_v1  ;;  %v6330_v36 = vsel %vm108_vm3, %v4857_v26, %v10315_v39  ;;  %v14140_v1 = vld [vmem:[#allocation3 + $0x22a] sm:$0xff] }
 0x3b4   :  { %v4845_v37 = vld [vmem:[#allocation3 + $0x318] sm:$0xff]  ;;  %v4462_v2 = vadd.f32 %v13770_v11, %v4077_v47  ;;  %v10532_v41 = vpack.i.bf16 %v14095_v58, %v4943_v3  ;;  %4591 = vst.msk [vmem:[#allocation3 + $0x331] sm:$0xff] %vm108_vm3, %v4527_v9  ;;  %v6297_v21 = vsel %vm108_vm3, %v14099_v19, %v10321_v13  ;;  %v6393_v44 = vsel %vm108_vm3, %v4985_v8, %v10320_v22  ;;  %v4858_v9 = vld [vmem:[#allocation3 + $0x81] sm:$0xff]  ;;  %v10334_v3 = vpop.permute.xlu1 %10333 }
 0x3b5   :  { %v10527_v7 = vpack.i.bf16 %v4845_v37, %v5070_v53  ;;  %v10316_v11 = vunpack.i.h.bf16 %v14086_v32  ;;  %v10329_v30 = vpop.permute.xlu0 %10328  ;;  %6973 = vmatprep.mubr.f32.mxu1 %v6297_v21  ;;  %7198 = vmatprep.mubr.f32.mxu0 %v6393_v44  ;;  %v4987_v48 = vld [vmem:[#allocation3 + $0x98] sm:$0xff]  ;;  %v5073_v22 = vld [vmem:[#allocation3 + $0x1a1] sm:$0xff]  ;;  %v10562_v8 = vpack.i.bf16 %v14017_v62, %v5075_v31  ;;  %v10572_v21 = vpack.i.bf16 %v14048_v40, %v5077_v4 }
 0x3b6   :  { %v4528_v42 = vmax.f32 %v4462_v2, 0.0  ;;  %v10331_v27 = vunpack.i.h.bf16 %v10329_v30  ;;  %v10330_v55 = vunpack.i.l.bf16 %v10329_v30  ;;  %6974 = vmatmul.mubr.f32.gmra.mrb[160].mxu1 %v6233_v61  ;;  %7199 = vmatmul.mubr.f32.gmra.mrb[142].mxu0 %v6329_v0  ;;  %v4634_v53 = vld [vmem:[#allocation3 + $0x218] sm:$0xff]  ;;  %v6331_v2 = vsel %vm108_vm3, %v4858_v9, %v10325_v34  ;;  %v5074_v61 = vld [vmem:[#allocation3 + $0x1e1] sm:$0xff] }
 0x3b7   :  { %v14110_v20 = vld [vmem:[#allocation3 + $0x321] sm:$0xff]  ;;  %10533 = vrot.lane.b32.xlu1 %v10532_v41, %s10746_s9  ;;  %10528 = vrot.lane.b32.xlu0 %v10527_v7, %s10746_s9  ;;  %v6234_v32 = vsel %vm108_vm3, %v4633_v49, %v10316_v11  ;;  %v6235_v37 = vsel %vm108_vm3, %v4634_v53, %v10326_v5  ;;  %v5079_v44 = vld [vmem:[#allocation3 + $0x219] sm:$0xff]  ;;  %v10336_v62 = vunpack.i.h.bf16 %v10334_v3  ;;  %v10335_v39 = vunpack.i.l.bf16 %v10334_v3 }
 0x3b8   :  { %v4846_v54 = vld [vmem:[#allocation3 + $0x320] sm:$0xff]  ;;  %4592 = vst.msk [vmem:[#allocation3 + $0x339] sm:$0xff] %vm108_vm3, %v4528_v42  ;;  %v10542_v46 = vpack.i.bf16 %v14110_v20, %v4944_v59  ;;  %v6298_v28 = vsel %vm108_vm3, %v14115_v10, %v10331_v27  ;;  %v6394_v43 = vsel %vm108_vm3, %v4986_v6, %v10330_v55  ;;  %v10344_v12 = vpop.permute.xlu1 %10343  ;;  %v10582_v0 = vpack.i.bf16 %v14099_v19, %v5079_v44  ;;  %v4988_v27 = vld [vmem:[#allocation3 + $0xa8] sm:$0xff] }
 0x3b9   :  { %v10537_v33 = vpack.i.bf16 %v4846_v54, %v5071_v23  ;;  %v10339_v14 = vpop.permute.xlu0 %10338  ;;  %6978 = vmatprep.mubr.f32.mxu1 %v6298_v28  ;;  %7203 = vmatprep.mubr.f32.mxu0 %v6394_v43  ;;  %v10557_v59 = vpack.i.bf16 %v13988_v24, %v5074_v61  ;;  %v5081_v54 = vld [vmem:[#allocation3 + $0x231] sm:$0xff]  ;;  %v5076_v23 = vld [vmem:[#allocation3 + $0x1f9] sm:$0xff]  ;;  %v10346_v19 = vunpack.i.h.bf16 %v10344_v12  ;;  %v10345_v28 = vunpack.i.l.bf16 %v10344_v12  ;;  %v5085_v4 = vld [vmem:[#allocation3 + $0x261] sm:$0xff] }
 0x3ba   :  { %v10341_v45 = vunpack.i.h.bf16 %v10339_v14  ;;  %v10340_v52 = vunpack.i.l.bf16 %v10339_v14  ;;  %6979 = vmatmul.mubr.f32.gmra.mrb[162].mxu1 %v6234_v32  ;;  %7204 = vmatmul.mubr.f32.gmra.mrb[144].mxu0 %v6330_v36  ;;  %v10592_v34 = vpack.i.bf16 %v14125_v29, %v5081_v54  ;;  %v10567_v14 = vpack.i.bf16 %v14034_v56, %v5076_v23  ;;  %v4989_v32 = vld [vmem:[#allocation3 + $0xb0] sm:$0xff]  ;;  %v4637_v44 = vld [vmem:[#allocation3 + $0x240] sm:$0xff] }
 0x3bb   :  { %10543 = vrot.lane.b32.xlu1 %v10542_v46, %s10746_s9  ;;  %10538 = vrot.lane.b32.xlu0 %v10537_v33, %s10746_s9  ;;  %v4847_v47 = vld [vmem:[#allocation3 + $0x330] sm:$0xff]  ;;  %v4635_v46 = vld [vmem:[#allocation3 + $0x228] sm:$0xff] }
 0x3bc   :  { %v6299_v60 = vsel %vm108_vm3, %v14125_v29, %v10341_v45  ;;  %v6395_v25 = vsel %vm108_vm3, %v4987_v48, %v10340_v52  ;;  %v10547_v13 = vpack.i.bf16 %v4847_v47, %v5072_v63  ;;  %v4859_v33 = vld [vmem:[#allocation3 + $0x91] sm:$0xff]  ;;  %v6236_v43 = vsel %vm108_vm3, %v4635_v46, %v10336_v62  ;;  %v5083_v63 = vld [vmem:[#allocation3 + $0x249] sm:$0xff]  ;;  %v4860_v47 = vld [vmem:[#allocation3 + $0x99] sm:$0xff] }
 0x3bd   :  { %6983 = vmatprep.mubr.f32.mxu1 %v6299_v60  ;;  %7208 = vmatprep.mubr.f32.mxu0 %v6395_v25  ;;  %v6332_v49 = vsel %vm108_vm3, %v4859_v33, %v10335_v39  ;;  %v4764_v36 = vld [vmem:[#allocation3 + $0x232] sm:$0xff]  ;;  %v6333_v29 = vsel %vm108_vm3, %v4860_v47, %v10345_v28  ;;  %v4861_v61 = vld [vmem:[#allocation3 + $0xa9] sm:$0xff]  ;;  %v5082_v54 = vld [vmem:[#allocation3 + $0x241] sm:$0xff] }
 0x3be   :  { %6984 = vmatmul.mubr.f32.gmra.mrb[164].mxu1 %v6235_v37  ;;  %7209 = vmatmul.mubr.f32.gmra.mrb[146].mxu0 %v6331_v2  ;;  %v5078_v45 = vld [vmem:[#allocation3 + $0x211] sm:$0xff]  ;;  %v10602_v3 = vpack.i.bf16 %v4764_v36, %v5083_v63  ;;  %v4990_v2 = vld [vmem:[#allocation3 + $0xc0] sm:$0xff]  ;;  %v4638_v46 = vld [vmem:[#allocation3 + $0x248] sm:$0xff] }
 0x3bf   :  { %v4848_v41 = vld [vmem:[#allocation3 + $0x338] sm:$0xff]  ;;  %10563 = vrot.lane.b32.xlu1 %v10562_v8, %s10746_s9  ;;  %10548 = vrot.lane.b32.xlu0 %v10547_v13, %s10746_s9  ;;  %v4636_v48 = vld [vmem:[#allocation3 + $0x230] sm:$0xff]  ;;  %v10577_v37 = vpack.i.bf16 %v14076_v16, %v5078_v45  ;;  %v4765_v8 = vld [vmem:[#allocation3 + $0x242] sm:$0xff] }
 0x3c0   :  { %v10552_v7 = vpack.i.bf16 %v4848_v41, %v5073_v22  ;;  %v6237_v56 = vsel %vm108_vm3, %v4636_v48, %v10346_v19  ;;  %v5080_v41 = vld [vmem:[#allocation3 + $0x229] sm:$0xff]  ;;  %v4862_v33 = vld [vmem:[#allocation3 + $0xb1] sm:$0xff] }
 0x3c1   :  { %v14179_v47 = vld [vmem:[#allocation3 + $0x292] sm:$0xff] }
 0x3c3   :  { %10573 = vrot.lane.b32.xlu1 %v10572_v21, %s10746_s9  ;;  %10553 = vrot.lane.b32.xlu0 %v10552_v7, %s10746_s9 }
 0x3c4   :  { %v10354_v6 = vpop.permute.xlu1 %10353 }
 0x3c5   :  { %v10349_v11 = vpop.permute.xlu0 %10348  ;;  %v10356_v60 = vunpack.i.h.bf16 %v10354_v6  ;;  %v10355_v25 = vunpack.i.l.bf16 %v10354_v6 }
 0x3c6   :  { %v10351_v42 = vunpack.i.h.bf16 %v10349_v11  ;;  %v10350_v30 = vunpack.i.l.bf16 %v10349_v11 }
 0x3c7   :  { %10583 = vrot.lane.b32.xlu1 %v10582_v0, %s10746_s9  ;;  %10558 = vrot.lane.b32.xlu0 %v10557_v59, %s10746_s9  ;;  %v6238_v16 = vsel %vm108_vm3, %v4637_v44, %v10356_v60  ;;  %v6334_v39 = vsel %vm108_vm3, %v4861_v61, %v10355_v25  ;;  %v4957_v60 = vld [vmem:[#allocation3 + $0x25a] sm:$0xff]  ;;  %v10642_v25 = vpack.i.bf16 %v14179_v47, %v13945_v38 }
 0x3c8   :  { %v6300_v40 = vsel %vm108_vm3, %v14140_v1, %v10351_v42  ;;  %v6396_v55 = vsel %vm108_vm3, %v4988_v27, %v10350_v30  ;;  %v10364_v9 = vpop.permute.xlu1 %10363  ;;  %v4956_v42 = vld [vmem:[#allocation3 + $0x24a] sm:$0xff]  ;;  %v10587_v27 = vpack.i.bf16 %v14115_v10, %v5080_v41  ;;  %v4958_v10 = vld [vmem:[#allocation3 + $0x262] sm:$0xff] }
 0x3c9   :  { %v10359_v24 = vpop.permute.xlu0 %10358  ;;  %6988 = vmatprep.mubr.f32.mxu1 %v6300_v40  ;;  %7213 = vmatprep.mubr.f32.mxu0 %v6396_v55  ;;  %v10366_v12 = vunpack.i.h.bf16 %v10364_v9  ;;  %v10365_v11 = vunpack.i.l.bf16 %v10364_v9  ;;  %v10612_v59 = vpack.i.bf16 %v4956_v42, %v5085_v4  ;;  %v4991_v40 = vld [vmem:[#allocation3 + $0xc8] sm:$0xff]  ;;  %v5087_v55 = vld [vmem:[#allocation3 + $0x279] sm:$0xff] }
 0x3ca   :  { %v10361_v26 = vunpack.i.h.bf16 %v10359_v24  ;;  %v10360_v5 = vunpack.i.l.bf16 %v10359_v24  ;;  %6989 = vmatmul.mubr.f32.gmra.mrb[166].mxu1 %v6236_v43  ;;  %7214 = vmatmul.mubr.f32.gmra.mrb[148].mxu0 %v6332_v49  ;;  %v10622_v43 = vpack.i.bf16 %v4958_v10, %v5087_v55  ;;  %v10597_v49 = vpack.i.bf16 %v14140_v1, %v5082_v54  ;;  %v14199_v54 = vld [vmem:[#allocation3 + $0x2c2] sm:$0xff] }
 0x3cb   :  { %10593 = vrot.lane.b32.xlu1 %v10592_v34, %s10746_s9  ;;  %10568 = vrot.lane.b32.xlu0 %v10567_v14, %s10746_s9  ;;  %v6239_v19 = vsel %vm108_vm3, %v4638_v46, %v10366_v12  ;;  %v6335_v28 = vsel %vm108_vm3, %v4862_v33, %v10365_v11  ;;  %v14174_v34 = vld [vmem:[#allocation3 + $0x27a] sm:$0xff] }
 0x3cc   :  { %v6301_v52 = vsel %vm108_vm3, %v4764_v36, %v10361_v26  ;;  %v6397_v31 = vsel %vm108_vm3, %v4989_v32, %v10360_v5  ;;  %v10374_v24 = vpop.permute.xlu1 %10373  ;;  %v5089_v26 = vld [vmem:[#allocation3 + $0x291] sm:$0xff]  ;;  %v5084_v5 = vld [vmem:[#allocation3 + $0x259] sm:$0xff] }
 0x3cd   :  { %v10369_v53 = vpop.permute.xlu0 %10368  ;;  %6993 = vmatprep.mubr.f32.mxu1 %v6301_v52  ;;  %7218 = vmatprep.mubr.f32.mxu0 %v6397_v31  ;;  %v10632_v14 = vpack.i.bf16 %v14174_v34, %v5089_v26  ;;  %v10607_v32 = vpack.i.bf16 %v4765_v8, %v5084_v5  ;;  %v5086_v36 = vld [vmem:[#allocation3 + $0x271] sm:$0xff]  ;;  %v10376_v52 = vunpack.i.h.bf16 %v10374_v24  ;;  %v10375_v1 = vunpack.i.l.bf16 %v10374_v24  ;;  %v5092_v24 = vld [vmem:[#allocation3 + $0x2b9] sm:$0xff] }
 0x3ce   :  { %v10371_v13 = vunpack.i.h.bf16 %v10369_v53  ;;  %v10370_v22 = vunpack.i.l.bf16 %v10369_v53  ;;  %6994 = vmatmul.mubr.f32.gmra.mrb[168].mxu1 %v6237_v56  ;;  %7219 = vmatmul.mubr.f32.gmra.mrb[150].mxu0 %v6333_v29  ;;  %v10617_v53 = vpack.i.bf16 %v4957_v60, %v5086_v36  ;;  %v4992_v56 = vld [vmem:[#allocation3 + $0xd8] sm:$0xff]  ;;  %v4641_v26 = vld [vmem:[#allocation3 + $0x270] sm:$0xff] }
 0x3cf   :  { %10603 = vrot.lane.b32.xlu1 %v10602_v3, %s10746_s9  ;;  %10578 = vrot.lane.b32.xlu0 %v10577_v37, %s10746_s9  ;;  %v4639_v3 = vld [vmem:[#allocation3 + $0x258] sm:$0xff]  ;;  %v4863_v37 = vld [vmem:[#allocation3 + $0xc1] sm:$0xff] }
 0x3d0   :  { %v6302_v7 = vsel %vm108_vm3, %v4765_v8, %v10371_v13  ;;  %v6398_v21 = vsel %vm108_vm3, %v4990_v2, %v10370_v22  ;;  %v10384_v63 = vpop.permute.xlu1 %10383  ;;  %v5088_v13 = vld [vmem:[#allocation3 + $0x289] sm:$0xff]  ;;  %v6240_v38 = vsel %vm108_vm3, %v4639_v3, %v10376_v52  ;;  %v6336_v41 = vsel %vm108_vm3, %v4863_v37, %v10375_v1  ;;  %v4865_v5 = vld [vmem:[#allocation3 + $0xd9] sm:$0xff] }
 0x3d1   :  { %v10379_v62 = vpop.permute.xlu0 %10378  ;;  %6998 = vmatprep.mubr.f32.mxu1 %v6302_v7  ;;  %7223 = vmatprep.mubr.f32.mxu0 %v6398_v21  ;;  %v10386_v2 = vunpack.i.h.bf16 %v10384_v63  ;;  %v10385_v8 = vunpack.i.l.bf16 %v10384_v63  ;;  %v14189_v7 = vld [vmem:[#allocation3 + $0x2aa] sm:$0xff]  ;;  %v4959_v21 = vld [vmem:[#allocation3 + $0x272] sm:$0xff]  ;;  %v14214_v52 = vld [vmem:[#allocation3 + $0x2a2] sm:$0xff] }
 0x3d2   :  { %v10381_v30 = vunpack.i.h.bf16 %v10379_v62  ;;  %v10380_v0 = vunpack.i.l.bf16 %v10379_v62  ;;  %6999 = vmatmul.mubr.f32.gmra.mrb[170].mxu1 %v6238_v16  ;;  %7224 = vmatmul.mubr.f32.gmra.mrb[152].mxu0 %v6334_v39  ;;  %v10652_v12 = vpack.i.bf16 %v14189_v7, %v13965_v57  ;;  %v10627_v11 = vpack.i.bf16 %v4959_v21, %v5088_v13  ;;  %v4993_v62 = vld [vmem:[#allocation3 + $0xe0] sm:$0xff]  ;;  %v14226_v3 = vld [vmem:[#allocation3 + $0x2f2] sm:$0xff] }
 0x3d3   :  { %10613 = vrot.lane.b32.xlu1 %v10612_v59, %s10746_s9  ;;  %10588 = vrot.lane.b32.xlu0 %v10587_v27, %s10746_s9  ;;  %v5090_v16 = vld [vmem:[#allocation3 + $0x2a1] sm:$0xff] }
 0x3d4   :  { %v6303_v23 = vsel %vm108_vm3, %v4956_v42, %v10381_v30  ;;  %v6399_v6 = vsel %vm108_vm3, %v4991_v40, %v10380_v0  ;;  %v4640_v30 = vld [vmem:[#allocation3 + $0x260] sm:$0xff]  ;;  %v4864_v0 = vld [vmem:[#allocation3 + $0xc9] sm:$0xff] }
 0x3d5   :  { %7003 = vmatprep.mubr.f32.mxu1 %v6303_v23  ;;  %7228 = vmatprep.mubr.f32.mxu0 %v6399_v6  ;;  %v6241_v57 = vsel %vm108_vm3, %v4640_v30, %v10386_v2  ;;  %v6337_v55 = vsel %vm108_vm3, %v4864_v0, %v10385_v8  ;;  %v14201_v23 = vld [vmem:[#allocation3 + $0x28a] sm:$0xff]  ;;  %v14228_v37 = vld [vmem:[#allocation3 + $0x2ba] sm:$0xff] }
 0x3d6   :  { %7004 = vmatmul.mubr.f32.gmra.mrb[172].mxu1 %v6239_v19  ;;  %7229 = vmatmul.mubr.f32.gmra.mrb[154].mxu0 %v6335_v28  ;;  %v10662_v19 = vpack.i.bf16 %v14199_v54, %v14013_v51  ;;  %v10637_v28 = vpack.i.bf16 %v14201_v23, %v5090_v16  ;;  %v10657_v2 = vpack.i.bf16 %v14228_v37, %v13990_v18  ;;  %v14236_v8 = vld [vmem:[#allocation3 + $0x30a] sm:$0xff]  ;;  %v4976_v30 = vld [vmem:[#allocation3 + $0x33a] sm:$0xff] }
 0x3d7   :  { %10623 = vrot.lane.b32.xlu1 %v10622_v43, %s10746_s9  ;;  %10598 = vrot.lane.b32.xlu0 %v10597_v49, %s10746_s9  ;;  %v5105_v0 = vld [vmem:[#allocation3 + $0x351] sm:$0xff] }
 0x3db   :  { %10633 = vrot.lane.b32.xlu1 %v10632_v14, %s10746_s9  ;;  %10608 = vrot.lane.b32.xlu0 %v10607_v32, %s10746_s9 }
 0x3dc   :  { %v10394_v22 = vpop.permute.xlu1 %10393 }
 0x3dd   :  { %v10389_v45 = vpop.permute.xlu0 %10388  ;;  %v10396_v59 = vunpack.i.h.bf16 %v10394_v22  ;;  %v10395_v27 = vunpack.i.l.bf16 %v10394_v22 }
 0x3de   :  { %v10391_v31 = vunpack.i.h.bf16 %v10389_v45  ;;  %v10390_v48 = vunpack.i.l.bf16 %v10389_v45  ;;  %v14212_v45 = vld [vmem:[#allocation3 + $0x2da] sm:$0xff] }
 0x3df   :  { %10643 = vrot.lane.b32.xlu1 %v10642_v25, %s10746_s9  ;;  %10618 = vrot.lane.b32.xlu0 %v10617_v53, %s10746_s9  ;;  %v6242_v51 = vsel %vm108_vm3, %v4641_v26, %v10396_v59  ;;  %v6338_v63 = vsel %vm108_vm3, %v4865_v5, %v10395_v27  ;;  %v4995_v25 = vld [vmem:[#allocation3 + $0xf8] sm:$0xff] }
 0x3e0   :  { %v6304_v29 = vsel %vm108_vm3, %v4957_v60, %v10391_v31  ;;  %v6400_v9 = vsel %vm108_vm3, %v4992_v56, %v10390_v48  ;;  %v10404_v6 = vpop.permute.xlu1 %10403  ;;  %v10672_v48 = vpack.i.bf16 %v14212_v45, %v14056_v17  ;;  %v10647_v60 = vpack.i.bf16 %v14214_v52, %v5092_v24 }
 0x3e1   :  { %v10399_v4 = vpop.permute.xlu0 %10398  ;;  %7008 = vmatprep.mubr.f32.mxu1 %v6304_v29  ;;  %7233 = vmatprep.mubr.f32.mxu0 %v6400_v9  ;;  %v10406_v14 = vunpack.i.h.bf16 %v10404_v6  ;;  %v10405_v32 = vunpack.i.l.bf16 %v10404_v6  ;;  %v4642_v29 = vld [vmem:[#allocation3 + $0x278] sm:$0xff]  ;;  %v4866_v9 = vld [vmem:[#allocation3 + $0xe1] sm:$0xff] }
 0x3e2   :  { %v10401_v44 = vunpack.i.h.bf16 %v10399_v4  ;;  %v10400_v61 = vunpack.i.l.bf16 %v10399_v4  ;;  %7009 = vmatmul.mubr.f32.gmra.mrb[174].mxu1 %v6240_v38  ;;  %7234 = vmatmul.mubr.f32.gmra.mrb[156].mxu0 %v6336_v41  ;;  %v14238_v4 = vld [vmem:[#allocation3 + $0x2d2] sm:$0xff]  ;;  %v10692_v38 = vpack.i.bf16 %v14236_v8, %v14110_v20 }
 0x3e3   :  { %10653 = vrot.lane.b32.xlu1 %v10652_v12, %s10746_s9  ;;  %10628 = vrot.lane.b32.xlu0 %v10627_v11, %s10746_s9  ;;  %v6243_v22 = vsel %vm108_vm3, %v4642_v29, %v10406_v14  ;;  %v6339_v17 = vsel %vm108_vm3, %v4866_v9, %v10405_v32  ;;  %v10667_v41 = vpack.i.bf16 %v14238_v4, %v14029_v35  ;;  %v14246_v12 = vld [vmem:[#allocation3 + $0x322] sm:$0xff]  ;;  %v14248_v11 = vld [vmem:[#allocation3 + $0x2ea] sm:$0xff]  ;;  %v4868_v32 = vld [vmem:[#allocation3 + $0xf9] sm:$0xff] }
 0x3e4   :  { %v6305_v39 = vsel %vm108_vm3, %v4958_v10, %v10401_v44  ;;  %v6401_v42 = vsel %vm108_vm3, %v4993_v62, %v10400_v61  ;;  %v4994_v10 = vld [vmem:[#allocation3 + $0xf0] sm:$0xff]  ;;  %v10414_v13 = vpop.permute.xlu1 %10413  ;;  %v5103_v44 = vld [vmem:[#allocation3 + $0x339] sm:$0xff]  ;;  %v10677_v35 = vpack.i.bf16 %v14248_v11, %v14065_v50 }
 0x3e5   :  { %v10409_v40 = vpop.permute.xlu0 %10408  ;;  %7013 = vmatprep.mubr.f32.mxu1 %v6305_v39  ;;  %7238 = vmatprep.mubr.f32.mxu0 %v6401_v42  ;;  %v10416_v18 = vunpack.i.h.bf16 %v10414_v13  ;;  %v10702_v20 = vpack.i.bf16 %v14246_v12, %v5103_v44  ;;  %v4996_v42 = vld [vmem:[#allocation3 + $0x108] sm:$0xff]  ;;  %v14269_v14 = vld [vmem:[#allocation3 + $0x290] sm:$0xff] }
 0x3e6   :  { %v10411_v46 = vunpack.i.h.bf16 %v10409_v40  ;;  %v10410_v33 = vunpack.i.l.bf16 %v10409_v40  ;;  %7014 = vmatmul.mubr.f32.gmra.mrb[176].mxu1 %v6241_v57  ;;  %7239 = vmatmul.mubr.f32.gmra.mrb[158].mxu0 %v6337_v55  ;;  %v4643_v40 = vld [vmem:[#allocation3 + $0x288] sm:$0xff]  ;;  %v4867_v57 = vld [vmem:[#allocation3 + $0xf1] sm:$0xff] }
 0x3e7   :  { %10663 = vrot.lane.b32.xlu1 %v10662_v19, %s10746_s9  ;;  %10638 = vrot.lane.b32.xlu0 %v10637_v28, %s10746_s9  ;;  %v6244_v50 = vsel %vm108_vm3, %v4643_v40, %v10416_v18  ;;  %v14260_v19 = vld [vmem:[#allocation3 + $0x302] sm:$0xff] }
 0x3e8   :  { %v6306_v43 = vsel %vm108_vm3, %v4959_v21, %v10411_v46  ;;  %v6402_v49 = vsel %vm108_vm3, %v4994_v10, %v10410_v33  ;;  %v10424_v21 = vpop.permute.xlu1 %10423  ;;  %v10687_v24 = vpack.i.bf16 %v14260_v19, %v14095_v58  ;;  %v5104_v29 = vld [vmem:[#allocation3 + $0x349] sm:$0xff] }
 0x3e9   :  { %v10419_v36 = vpop.permute.xlu0 %10418  ;;  %7018 = vmatprep.mubr.f32.mxu1 %v6306_v43  ;;  %7243 = vmatprep.mubr.f32.mxu0 %v6402_v49  ;;  %v10426_v55 = vunpack.i.h.bf16 %v10424_v21  ;;  %v10425_v6 = vunpack.i.l.bf16 %v10424_v21  ;;  %v4997_v43 = vld [vmem:[#allocation3 + $0x110] sm:$0xff] }
 0x3ea   :  { %v10421_v1 = vunpack.i.h.bf16 %v10419_v36  ;;  %v10420_v31 = vunpack.i.l.bf16 %v10419_v36  ;;  %7019 = vmatmul.mubr.f32.gmra.mrb[178].mxu1 %v6242_v51  ;;  %7244 = vmatmul.mubr.f32.gmra.mrb[160].mxu0 %v6338_v63  ;;  %v5102_v49 = vld [vmem:[#allocation3 + $0x331] sm:$0xff] }
 0x3eb   :  { %10673 = vrot.lane.b32.xlu1 %v10672_v48, %s10746_s9  ;;  %10648 = vrot.lane.b32.xlu0 %v10647_v60, %s10746_s9  ;;  %v6245_v58 = vsel %vm108_vm3, %v14269_v14, %v10426_v55  ;;  %v14274_v48 = vld [vmem:[#allocation3 + $0x31a] sm:$0xff] }
 0x3ec   :  { %v6307_v53 = vsel %vm108_vm3, %v14174_v34, %v10421_v1  ;;  %v6403_v56 = vsel %vm108_vm3, %v4995_v25, %v10420_v31  ;;  %v10682_v34 = vpack.i.bf16 %v14226_v3, %v14078_v15  ;;  %v10415_v15 = vunpack.i.l.bf16 %v10414_v13  ;;  %v5000_v55 = vld [vmem:[#allocation3 + $0x138] sm:$0xff] }
 0x3ed   :  { %7023 = vmatprep.mubr.f32.mxu1 %v6307_v53  ;;  %7248 = vmatprep.mubr.f32.mxu0 %v6403_v56  ;;  %v6341_v31 = vsel %vm108_vm3, %v4868_v32, %v10425_v6  ;;  %v10697_v25 = vpack.i.bf16 %v14274_v48, %v5102_v49  ;;  %v4998_v53 = vld [vmem:[#allocation3 + $0x120] sm:$0xff]  ;;  %v4975_v56 = vld [vmem:[#allocation3 + $0x332] sm:$0xff] }
 0x3ee   :  { %7024 = vmatmul.mubr.f32.gmra.mrb[180].mxu1 %v6243_v22  ;;  %7249 = vmatmul.mubr.f32.gmra.mrb[162].mxu0 %v6339_v17  ;;  %v6340_v33 = vsel %vm108_vm3, %v4867_v57, %v10415_v15  ;;  %v14281_v22 = vld [vmem:[#allocation3 + $0x2a0] sm:$0xff]  ;;  %v4869_v17 = vld [vmem:[#allocation3 + $0x109] sm:$0xff] }
 0x3ef   :  { %10683 = vrot.lane.b32.xlu1 %v10682_v34, %s10746_s9  ;;  %10658 = vrot.lane.b32.xlu0 %v10657_v2, %s10746_s9 }
 0x3f3   :  { %10693 = vrot.lane.b32.xlu1 %v10692_v38, %s10746_s9  ;;  %10668 = vrot.lane.b32.xlu0 %v10667_v41, %s10746_s9 }
 0x3f4   :  { %v10434_v39 = vpop.permute.xlu1 %10433 }
 0x3f5   :  { %v10429_v61 = vpop.permute.xlu0 %10428  ;;  %v10436_v36 = vunpack.i.h.bf16 %v10434_v39  ;;  %v10435_v51 = vunpack.i.l.bf16 %v10434_v39 }
 0x3f6   :  { %v10431_v62 = vunpack.i.h.bf16 %v10429_v61  ;;  %v10430_v16 = vunpack.i.l.bf16 %v10429_v61  ;;  %v4999_v61 = vld [vmem:[#allocation3 + $0x128] sm:$0xff] }
 0x3f7   :  { %10703 = vrot.lane.b32.xlu1 %v10702_v20, %s10746_s9  ;;  %10678 = vrot.lane.b32.xlu0 %v10677_v35, %s10746_s9  ;;  %v6246_v41 = vsel %vm108_vm3, %v14281_v22, %v10436_v36  ;;  %v6342_v21 = vsel %vm108_vm3, %v4869_v17, %v10435_v51  ;;  %v14290_v20 = vld [vmem:[#allocation3 + $0x2a8] sm:$0xff]  ;;  %v4870_v35 = vld [vmem:[#allocation3 + $0x111] sm:$0xff]  ;;  %v14306_v51 = vld [vmem:[#allocation3 + $0x2c0] sm:$0xff] }
 0x3f8   :  { %v6308_v59 = vsel %vm108_vm3, %v14201_v23, %v10431_v62  ;;  %v6404_v27 = vsel %vm108_vm3, %v4996_v42, %v10430_v16  ;;  %v10712_v23 = vpack.i.bf16 %v4976_v30, %v5105_v0  ;;  %v10444_v63 = vpop.permute.xlu1 %10443  ;;  %v4873_v17 = vld [vmem:[#allocation3 + $0x139] sm:$0xff] }
 0x3f9   :  { %v10439_v46 = vpop.permute.xlu0 %10438  ;;  %7028 = vmatprep.mubr.f32.mxu1 %v6308_v59  ;;  %7253 = vmatprep.mubr.f32.mxu0 %v6404_v27  ;;  %v10446_v34 = vunpack.i.h.bf16 %v10444_v63  ;;  %v10445_v2 = vunpack.i.l.bf16 %v10444_v63  ;;  %v4872_v63 = vld [vmem:[#allocation3 + $0x129] sm:$0xff] }
 0x3fa   :  { %v10441_v28 = vunpack.i.h.bf16 %v10439_v46  ;;  %v10440_v10 = vunpack.i.l.bf16 %v10439_v46  ;;  %7029 = vmatmul.mubr.f32.gmra.mrb[182].mxu1 %v6244_v50  ;;  %7254 = vmatmul.mubr.f32.gmra.mrb[164].mxu0 %v6340_v33  ;;  %v14298_v50 = vld [vmem:[#allocation3 + $0x2b8] sm:$0xff]  ;;  %v4871_v33 = vld [vmem:[#allocation3 + $0x121] sm:$0xff] }
 0x3fb   :  { %10713 = vrot.lane.b32.xlu1 %v10712_v23, %s10746_s9  ;;  %10688 = vrot.lane.b32.xlu0 %v10687_v24, %s10746_s9  ;;  %v6247_v39 = vsel %vm108_vm3, %v14290_v20, %v10446_v34  ;;  %v6343_v42 = vsel %vm108_vm3, %v4870_v35, %v10445_v2 }
 0x3fc   :  { %v6309_v26 = vsel %vm108_vm3, %v14179_v47, %v10441_v28  ;;  %v6405_v5 = vsel %vm108_vm3, %v4997_v43, %v10440_v10  ;;  %v10454_v15 = vpop.permute.xlu1 %10453 }
 0x3fd   :  { %v10449_v1 = vpop.permute.xlu0 %10448  ;;  %7033 = vmatprep.mubr.f32.mxu1 %v6309_v26  ;;  %7258 = vmatprep.mubr.f32.mxu0 %v6405_v5  ;;  %v10456_v59 = vunpack.i.h.bf16 %v10454_v15  ;;  %v10455_v27 = vunpack.i.l.bf16 %v10454_v15 }
 0x3fe   :  { %v10451_v60 = vunpack.i.h.bf16 %v10449_v1  ;;  %v10450_v47 = vunpack.i.l.bf16 %v10449_v1  ;;  %7034 = vmatmul.mubr.f32.gmra.mrb[184].mxu1 %v6245_v58  ;;  %7259 = vmatmul.mubr.f32.gmra.mrb[166].mxu0 %v6341_v31 }
 0x3ff   :  { %10698 = vrot.lane.b32.xlu0 %v10697_v25, %s10746_s9  ;;  %v6248_v43 = vsel %vm108_vm3, %v14298_v50, %v10456_v59  ;;  %v6344_v49 = vsel %vm108_vm3, %v4871_v33, %v10455_v27 }
 0x400   :  { %v6310_v9 = vsel %vm108_vm3, %v14214_v52, %v10451_v60  ;;  %v6406_v13 = vsel %vm108_vm3, %v4998_v53, %v10450_v47  ;;  %v10707_v52 = vpack.i.bf16 %v4975_v56, %v5104_v29  ;;  %v10464_v30 = vpop.permute.xlu1 %10463 }
 0x401   :  { %v10459_v38 = vpop.permute.xlu0 %10458  ;;  %7038 = vmatprep.mubr.f32.mxu1 %v6310_v9  ;;  %7263 = vmatprep.mubr.f32.mxu0 %v6406_v13  ;;  %v10466_v28 = vunpack.i.h.bf16 %v10464_v30  ;;  %v10465_v10 = vunpack.i.l.bf16 %v10464_v30  ;;  %v14314_v13 = vld [vmem:[#allocation3 + $0x2d0] sm:$0xff] }
 0x402   :  { %v10461_v44 = vunpack.i.h.bf16 %v10459_v38  ;;  %v10460_v18 = vunpack.i.l.bf16 %v10459_v38  ;;  %7039 = vmatmul.mubr.f32.gmra.mrb[186].mxu1 %v6246_v41  ;;  %7264 = vmatmul.mubr.f32.gmra.mrb[168].mxu0 %v6342_v21 }
 0x403   :  { %10708 = vrot.lane.b32.xlu0 %v10707_v52, %s10746_s9  ;;  %v6249_v60 = vsel %vm108_vm3, %v14306_v51, %v10466_v28  ;;  %v6345_v47 = vsel %vm108_vm3, %v4872_v63, %v10465_v10  ;;  %v5003_v52 = vld [vmem:[#allocation3 + $0x158] sm:$0xff] }
 0x404   :  { %v6311_v62 = vsel %vm108_vm3, %v14189_v7, %v10461_v44  ;;  %v6407_v16 = vsel %vm108_vm3, %v4999_v61, %v10460_v18 }
 0x405   :  { %7043 = vmatprep.mubr.f32.mxu1 %v6311_v62  ;;  %7268 = vmatprep.mubr.f32.mxu0 %v6407_v16  ;;  %v14322_v62 = vld [vmem:[#allocation3 + $0x2d8] sm:$0xff]  ;;  %v4874_v16 = vld [vmem:[#allocation3 + $0x141] sm:$0xff] }
 0x406   :  { %7044 = vmatmul.mubr.f32.gmra.mrb[188].mxu1 %v6247_v39  ;;  %7269 = vmatmul.mubr.f32.gmra.mrb[170].mxu0 %v6343_v42 }
 0x40d   :  { %v10474_v0 = vpop.permute.xlu1 %10473  ;;  %v10469_v40 = vpop.permute.xlu0 %10468 }
 0x40e   :  { %v10471_v7 = vunpack.i.h.bf16 %v10469_v40  ;;  %v10470_v57 = vunpack.i.l.bf16 %v10469_v40  ;;  %v10476_v1 = vunpack.i.h.bf16 %v10474_v0  ;;  %v10475_v58 = vunpack.i.l.bf16 %v10474_v0  ;;  %v5004_v40 = vld [vmem:[#allocation3 + $0x168] sm:$0xff] }
 0x410   :  { %v6312_v6 = vsel %vm108_vm3, %v14228_v37, %v10471_v7  ;;  %v6408_v46 = vsel %vm108_vm3, %v5000_v55, %v10470_v57  ;;  %v5001_v37 = vld [vmem:[#allocation3 + $0x140] sm:$0xff]  ;;  %v6250_v34 = vsel %vm108_vm3, %v14314_v13, %v10476_v1  ;;  %v6346_v2 = vsel %vm108_vm3, %v4873_v17, %v10475_v58  ;;  %v14330_v55 = vld [vmem:[#allocation3 + $0x2e8] sm:$0xff] }
 0x411   :  { %v10484_v23 = vpop.permute.xlu1 %10483  ;;  %v10479_v24 = vpop.permute.xlu0 %10478  ;;  %7048 = vmatprep.mubr.f32.mxu1 %v6312_v6  ;;  %7273 = vmatprep.mubr.f32.mxu0 %v6408_v46  ;;  %v4875_v6 = vld [vmem:[#allocation3 + $0x151] sm:$0xff] }
 0x412   :  { %v10481_v26 = vunpack.i.h.bf16 %v10479_v24  ;;  %v10480_v5 = vunpack.i.l.bf16 %v10479_v24  ;;  %7049 = vmatmul.mubr.f32.gmra.mrb[190].mxu1 %v6248_v43  ;;  %7274 = vmatmul.mubr.f32.gmra.mrb[172].mxu0 %v6344_v49  ;;  %v10486_v38 = vunpack.i.h.bf16 %v10484_v23  ;;  %v10485_v41 = vunpack.i.l.bf16 %v10484_v23  ;;  %v5005_v49 = vld [vmem:[#allocation3 + $0x170] sm:$0xff] }
 0x414   :  { %v6313_v32 = vsel %vm108_vm3, %v14199_v54, %v10481_v26  ;;  %v6409_v36 = vsel %vm108_vm3, %v5001_v37, %v10480_v5  ;;  %v5002_v54 = vld [vmem:[#allocation3 + $0x150] sm:$0xff]  ;;  %v6251_v35 = vsel %vm108_vm3, %v14322_v62, %v10486_v38  ;;  %v6347_v39 = vsel %vm108_vm3, %v4874_v16, %v10485_v41 }
 0x415   :  { %v10489_v31 = vpop.permute.xlu0 %10488  ;;  %7053 = vmatprep.mubr.f32.mxu1 %v6313_v32  ;;  %7278 = vmatprep.mubr.f32.mxu0 %v6409_v36  ;;  %v10494_v25 = vpop.permute.xlu1 %10493  ;;  %v14338_v37 = vld [vmem:[#allocation3 + $0x2f0] sm:$0xff]  ;;  %v4876_v32 = vld [vmem:[#allocation3 + $0x159] sm:$0xff] }
 0x416   :  { %v10491_v53 = vunpack.i.h.bf16 %v10489_v31  ;;  %v10490_v56 = vunpack.i.l.bf16 %v10489_v31  ;;  %7054 = vmatmul.mubr.f32.gmra.mrb[192].mxu1 %v6249_v60  ;;  %7279 = vmatmul.mubr.f32.gmra.mrb[174].mxu0 %v6345_v47  ;;  %v10496_v42 = vunpack.i.h.bf16 %v10494_v25  ;;  %v10495_v30 = vunpack.i.l.bf16 %v10494_v25  ;;  %v5006_v25 = vld [vmem:[#allocation3 + $0x180] sm:$0xff] }
 0x418   :  { %v6314_v29 = vsel %vm108_vm3, %v14238_v4, %v10491_v53  ;;  %v6410_v9 = vsel %vm108_vm3, %v5002_v54, %v10490_v56  ;;  %v6252_v46 = vsel %vm108_vm3, %v14330_v55, %v10496_v42  ;;  %v6348_v33 = vsel %vm108_vm3, %v4875_v6, %v10495_v30  ;;  %v14366_v6 = vld [vmem:[#allocation3 + $0x318] sm:$0xff] }
 0x419   :  { %7058 = vmatprep.mubr.f32.mxu1 %v6314_v29  ;;  %7283 = vmatprep.mubr.f32.mxu0 %v6410_v9  ;;  %v14348_v29 = vld [vmem:[#allocation3 + $0x300] sm:$0xff]  ;;  %v4877_v9 = vld [vmem:[#allocation3 + $0x169] sm:$0xff] }
 0x41a   :  { %7059 = vmatmul.mubr.f32.gmra.mrb[194].mxu1 %v6250_v34  ;;  %7284 = vmatmul.mubr.f32.gmra.mrb[176].mxu0 %v6346_v2 }
 0x41b   :  { %v10504_v21 = vpop.permute.xlu1 %10503 }
 0x41c   :  { %v10499_v44 = vpop.permute.xlu0 %10498  ;;  %v10506_v28 = vunpack.i.h.bf16 %v10504_v21  ;;  %v10505_v10 = vunpack.i.l.bf16 %v10504_v21 }
 0x41d   :  { %v10501_v18 = vunpack.i.h.bf16 %v10499_v44  ;;  %v10500_v4 = vunpack.i.l.bf16 %v10499_v44 }
 0x41e   :  { %v6253_v58 = vsel %vm108_vm3, %v14338_v37, %v10506_v28  ;;  %v6349_v31 = vsel %vm108_vm3, %v4876_v32, %v10505_v10 }
 0x41f   :  { %v6315_v15 = vsel %vm108_vm3, %v14212_v45, %v10501_v18  ;;  %v6411_v61 = vsel %vm108_vm3, %v5003_v52, %v10500_v4 }
 0x420   :  { %7063 = vmatprep.mubr.f32.mxu1 %v6315_v15  ;;  %7288 = vmatprep.mubr.f32.mxu0 %v6411_v61  ;;  %v10514_v0 = vpop.permute.xlu1 %10513  ;;  %v14356_v15 = vld [vmem:[#allocation3 + $0x308] sm:$0xff]  ;;  %v4878_v61 = vld [vmem:[#allocation3 + $0x171] sm:$0xff] }
 0x421   :  { %v10509_v59 = vpop.permute.xlu0 %10508  ;;  %7064 = vmatmul.mubr.f32.gmra.mrb[196].mxu1 %v6251_v35  ;;  %7289 = vmatmul.mubr.f32.gmra.mrb[178].mxu0 %v6347_v39  ;;  %v10516_v36 = vunpack.i.h.bf16 %v10514_v0  ;;  %v10515_v63 = vunpack.i.l.bf16 %v10514_v0 }
 0x422   :  { %v10511_v27 = vunpack.i.h.bf16 %v10509_v59  ;;  %v10510_v45 = vunpack.i.l.bf16 %v10509_v59  ;;  %v5008_v59 = vld [vmem:[#allocation3 + $0x198] sm:$0xff] }
 0x423   :  { %v6254_v38 = vsel %vm108_vm3, %v14348_v29, %v10516_v36  ;;  %v6350_v41 = vsel %vm108_vm3, %v4877_v9, %v10515_v63  ;;  %v14376_v63 = vld [vmem:[#allocation3 + $0x320] sm:$0xff] }
 0x424   :  { %v6316_v7 = vsel %vm108_vm3, %v14248_v11, %v10511_v27  ;;  %v6412_v57 = vsel %vm108_vm3, %v5004_v40, %v10510_v45 }
 0x425   :  { %7068 = vmatprep.mubr.f32.mxu1 %v6316_v7  ;;  %7293 = vmatprep.mubr.f32.mxu0 %v6412_v57  ;;  %v10524_v23 = vpop.permute.xlu1 %10523  ;;  %v10519_v24 = vpop.permute.xlu0 %10518 }
 0x426   :  { %7069 = vmatmul.mubr.f32.gmra.mrb[198].mxu1 %v6252_v46  ;;  %7294 = vmatmul.mubr.f32.gmra.mrb[180].mxu0 %v6348_v33  ;;  %v10521_v43 = vunpack.i.h.bf16 %v10519_v24  ;;  %v10520_v11 = vunpack.i.l.bf16 %v10519_v24  ;;  %v10526_v17 = vunpack.i.h.bf16 %v10524_v23  ;;  %v10525_v34 = vunpack.i.l.bf16 %v10524_v23  ;;  %v4879_v46 = vld [vmem:[#allocation3 + $0x181] sm:$0xff] }
 0x428   :  { %v6317_v26 = vsel %vm108_vm3, %v14226_v3, %v10521_v43  ;;  %v6413_v5 = vsel %vm108_vm3, %v5005_v49, %v10520_v11  ;;  %v6255_v30 = vsel %vm108_vm3, %v14356_v15, %v10526_v17  ;;  %v6351_v0 = vsel %vm108_vm3, %v4878_v61, %v10525_v34  ;;  %v5009_v43 = vld [vmem:[#allocation3 + $0x1a0] sm:$0xff] }
 0x429   :  { %v10529_v1 = vpop.permute.xlu0 %10528  ;;  %7073 = vmatprep.mubr.f32.mxu1 %v6317_v26  ;;  %7298 = vmatprep.mubr.f32.mxu0 %v6413_v5  ;;  %v10534_v3 = vpop.permute.xlu1 %10533 }
 0x42a   :  { %v10531_v60 = vunpack.i.h.bf16 %v10529_v1  ;;  %v10530_v47 = vunpack.i.l.bf16 %v10529_v1  ;;  %7074 = vmatmul.mubr.f32.gmra.mrb[200].mxu1 %v6253_v58  ;;  %7299 = vmatmul.mubr.f32.gmra.mrb[182].mxu0 %v6349_v31  ;;  %v10536_v16 = vunpack.i.h.bf16 %v10534_v3  ;;  %v10535_v35 = vunpack.i.l.bf16 %v10534_v3  ;;  %v4880_v1 = vld [vmem:[#allocation3 + $0x189] sm:$0xff] }
 0x42c   :  { %v14343_v53 = vpop.f32.mrb[128].mxu1  ;;  %v6318_v56 = vsel %vm108_vm3, %v14260_v19, %v10531_v60  ;;  %v6414_v54 = vsel %vm108_vm3, %v5006_v25, %v10530_v47  ;;  %v5007_v19 = vld [vmem:[#allocation3 + $0x188] sm:$0xff]  ;;  %v6256_v23 = vsel %vm108_vm3, %v14366_v6, %v10536_v16  ;;  %v6352_v24 = vsel %vm108_vm3, %v4879_v46, %v10535_v35  ;;  %v5109_v35 = vld [vmem:[#allocation3 + $0x52] sm:$0xff] }
 0x42d   :  { %v10539_v2 = vpop.permute.xlu0 %10538  ;;  %7078 = vmatprep.mubr.f32.mxu1 %v6318_v56  ;;  %7303 = vmatprep.mubr.f32.mxu0 %v6414_v54  ;;  %v6897_v18 = vpop.f32.mrb[129].mxu1  ;;  %v5106_v56 = vld [vmem:[#allocation3 + $0x32] sm:$0xff]  ;;  %v4881_v54 = vld [vmem:[#allocation3 + $0x1c9] sm:$0xff] }
 0x42e   :  { %v10541_v21 = vunpack.i.h.bf16 %v10539_v2  ;;  %v10540_v44 = vunpack.i.l.bf16 %v10539_v2  ;;  %7079 = vmatmul.mubr.f32.gmra.mrb[202].mxu1 %v6254_v38  ;;  %7304 = vmatmul.mubr.f32.gmra.mrb[184].mxu0 %v6350_v41  ;;  %v10544_v39 = vpop.permute.xlu1 %10543  ;;  %v5107_v38 = vld [vmem:[#allocation3 + $0x3a] sm:$0xff]  ;;  %v5011_v41 = vld [vmem:[#allocation3 + $0x1e8] sm:$0xff] }
 0x42f   :  { %v10546_v33 = vunpack.i.h.bf16 %v10544_v39  ;;  %v10545_v28 = vunpack.i.l.bf16 %v10544_v39  ;;  %v5108_v18 = vld [vmem:[#allocation3 + $0x4a] sm:$0xff]  ;;  %v5012_v39 = vld [vmem:[#allocation3 + $0x1f8] sm:$0xff] }
 0x430   :  { %v6319_v4 = vsel %vm108_vm3, %v14236_v8, %v10541_v21  ;;  %v6415_v52 = vsel %vm108_vm3, %v5007_v19, %v10540_v44  ;;  %v5111_v46 = vld [vmem:[#allocation3 + $0x6a] sm:$0xff] }
 0x431   :  { %v10549_v42 = vpop.permute.xlu0 %10548  ;;  %7083 = vmatprep.mubr.f32.mxu1 %v6319_v4  ;;  %7308 = vmatprep.mubr.f32.mxu0 %v6415_v52  ;;  %v6257_v31 = vsel %vm108_vm3, %v14376_v63, %v10546_v33  ;;  %v6353_v60 = vsel %vm108_vm3, %v4880_v1, %v10545_v28  ;;  %v4882_v4 = vld [vmem:[#allocation3 + $0x1d1] sm:$0xff]  ;;  %v5013_v33 = vld [vmem:[#allocation3 + $0x200] sm:$0xff] }
 0x432   :  { %v10551_v27 = vunpack.i.h.bf16 %v10549_v42  ;;  %v10550_v45 = vunpack.i.l.bf16 %v10549_v42  ;;  %7084 = vmatmul.mubr.f32.gmra.mrb[204].mxu1 %v6255_v30  ;;  %7309 = vmatmul.mubr.f32.gmra.mrb[186].mxu0 %v6351_v0  ;;  %v10564_v26 = vpop.permute.xlu1 %10563 }
 0x433   :  { %v14361_v8 = vpop.f32.mrb[130].mxu1  ;;  %v10565_v47 = vunpack.i.l.bf16 %v10564_v26  ;;  %v10566_v34 = vunpack.i.h.bf16 %v10564_v26 }
 0x434   :  { %v6902_v40 = vpop.f32.mrb[131].mxu1  ;;  %v6320_v7 = vsel %vm108_vm3, %v14274_v48, %v10551_v27  ;;  %v6416_v57 = vsel %vm108_vm3, %v5008_v59, %v10550_v45  ;;  %v5110_v59 = vld [vmem:[#allocation3 + $0x62] sm:$0xff] }
 0x435   :  { %v10554_v10 = vpop.permute.xlu0 %10553  ;;  %7088 = vmatprep.mubr.f32.mxu1 %v6320_v7  ;;  %7313 = vmatprep.mubr.f32.mxu0 %v6416_v57  ;;  %v6419_v44 = vsel %vm108_vm3, %v5011_v41, %v10565_v47  ;;  %v6355_v16 = vsel %vm108_vm3, %v4882_v4, %v10566_v34  ;;  %v4883_v45 = vld [vmem:[#allocation3 + $0x1e1] sm:$0xff]  ;;  %v5116_v34 = vld [vmem:[#allocation3 + $0xaa] sm:$0xff] }
 0x436   :  { %v10556_v11 = vunpack.i.h.bf16 %v10554_v10  ;;  %v10555_v49 = vunpack.i.l.bf16 %v10554_v10  ;;  %7089 = vmatmul.mubr.f32.gmra.mrb[206].mxu1 %v6256_v23  ;;  %7314 = vmatmul.mubr.f32.gmra.mrb[188].mxu0 %v6352_v24  ;;  %v10574_v19 = vpop.permute.xlu1 %10573  ;;  %v5112_v24 = vld [vmem:[#allocation3 + $0x7a] sm:$0xff]  ;;  %v5016_v4 = vld [vmem:[#allocation3 + $0x228] sm:$0xff] }
 0x437   :  { %v14371_v48 = vpop.f32.mrb[132].mxu1  ;;  %v10575_v42 = vunpack.i.l.bf16 %v10574_v19  ;;  %v10576_v40 = vunpack.i.h.bf16 %v10574_v19  ;;  %v5117_v19 = vld [vmem:[#allocation3 + $0xb2] sm:$0xff] }
 0x438   :  { %v6907_v5 = vpop.f32.mrb[133].mxu1  ;;  %v6321_v32 = vsel %vm108_vm3, %v14246_v12, %v10556_v11  ;;  %v6417_v36 = vsel %vm108_vm3, %v5009_v43, %v10555_v49  ;;  %v5010_v12 = vld [vmem:[#allocation3 + $0x1e0] sm:$0xff]  ;;  %v4884_v11 = vld [vmem:[#allocation3 + $0x1e9] sm:$0xff] }
 0x439   :  { %v10559_v58 = vpop.permute.xlu0 %10558  ;;  %7093 = vmatprep.mubr.f32.mxu1 %v6321_v32  ;;  %7318 = vmatprep.mubr.f32.mxu0 %v6417_v36  ;;  %v6421_v23 = vsel %vm108_vm3, %v5013_v33, %v10575_v42  ;;  %v6357_v26 = vsel %vm108_vm3, %v4884_v11, %v10576_v40  ;;  %v5113_v5 = vld [vmem:[#allocation3 + $0x82] sm:$0xff]  ;;  %v5014_v32 = vld [vmem:[#allocation3 + $0x210] sm:$0xff]  ;;  %v5120_v33 = vld [vmem:[#allocation3 + $0xda] sm:$0xff] }
 0x43a   :  { %v10561_v3 = vunpack.i.h.bf16 %v10559_v58  ;;  %v10560_v25 = vunpack.i.l.bf16 %v10559_v58  ;;  %7094 = vmatmul.mubr.f32.gmra.mrb[208].mxu1 %v6257_v31  ;;  %7319 = vmatmul.mubr.f32.gmra.mrb[190].mxu0 %v6353_v60  ;;  %v10584_v43 = vpop.permute.xlu1 %10583  ;;  %v5114_v58 = vld [vmem:[#allocation3 + $0x92] sm:$0xff] }
 0x43b   :  { %8718 = vmatprep.mubr.msk.f32.mxu1 %vm108_vm3, %v5106_v56  ;;  %v10585_v36 = vunpack.i.l.bf16 %v10584_v43  ;;  %v5017_v40 = vld [vmem:[#allocation3 + $0x230] sm:$0xff] }
 0x43c   :  { %v6418_v9 = vsel %vm108_vm3, %v5010_v12, %v10560_v25  ;;  %v6354_v17 = vsel %vm108_vm3, %v4881_v54, %v10561_v3  ;;  %v4885_v3 = vld [vmem:[#allocation3 + $0x1f9] sm:$0xff]  ;;  %v10586_v25 = vunpack.i.h.bf16 %v10584_v43 }
 0x43d   :  { %v10569_v2 = vpop.permute.xlu0 %10568  ;;  %7323 = vmatprep.mubr.f32.mxu0 %v6418_v9  ;;  %v5115_v12 = vld [vmem:[#allocation3 + $0x9a] sm:$0xff] }
 0x43e   :  { %v10570_v21 = vunpack.i.l.bf16 %v10569_v2  ;;  %7324 = vmatmul.mubr.f32.gmra.mrb[192].mxu0 %v6354_v17  ;;  %8719 = vmatmul.mubr.msk.f32.vlgmr.msra.gmra.mrb[210].mxu1 %vm108_vm3, %v5107_v38  ;;  %v10571_v52 = vunpack.i.h.bf16 %v10569_v2  ;;  %v5015_v54 = vld [vmem:[#allocation3 + $0x218] sm:$0xff]  ;;  %v10594_v38 = vpop.permute.xlu1 %10593 }
 0x43f   :  { %7328 = vmatprep.mubr.f32.mxu0 %v6419_v44  ;;  %8721 = vmatprep.mubr.msk.f32.mxu1 %vm108_vm3, %v5108_v18  ;;  %v6423_v17 = vsel %vm108_vm3, %v5015_v54, %v10585_v36  ;;  %v5122_v36 = vld [vmem:[#allocation3 + $0xf2] sm:$0xff] }
 0x440   :  { %v14387_v61 = vpop.f32.mrb[134].mxu1  ;;  %v6420_v0 = vsel %vm108_vm3, %v5012_v39, %v10570_v21  ;;  %v6356_v57 = vsel %vm108_vm3, %v4883_v45, %v10571_v52  ;;  %v4886_v21 = vld [vmem:[#allocation3 + $0x201] sm:$0xff]  ;;  %v10595_v52 = vunpack.i.l.bf16 %v10594_v38  ;;  %v5119_v45 = vld [vmem:[#allocation3 + $0xca] sm:$0xff] }
 0x441   :  { %v6912_v30 = vpop.f32.mrb[135].mxu1  ;;  %v10579_v27 = vpop.permute.xlu0 %10578  ;;  %v6359_v18 = vsel %vm108_vm3, %v4886_v21, %v10586_v25  ;;  %v5019_v25 = vld [vmem:[#allocation3 + $0x248] sm:$0xff]  ;;  %v4890_v21 = vld [vmem:[#allocation3 + $0x231] sm:$0xff] }
 0x442   :  { %7329 = vmatmul.mubr.f32.gmra.mrb[194].mxu0 %v6355_v16  ;;  %8722 = vmatmul.mubr.msk.f32.gmra.mrb[212].mxu1 %vm108_vm3, %v5109_v35  ;;  %v10580_v28 = vunpack.i.l.bf16 %v10579_v27  ;;  %v10581_v49 = vunpack.i.h.bf16 %v10579_v27  ;;  %v5118_v35 = vld [vmem:[#allocation3 + $0xc2] sm:$0xff] }
 0x443   :  { %7333 = vmatprep.mubr.f32.mxu0 %v6420_v0  ;;  %8724 = vmatprep.mubr.msk.f32.mxu1 %vm108_vm3, %v5110_v59  ;;  %v4887_v0 = vld [vmem:[#allocation3 + $0x211] sm:$0xff]  ;;  %v10596_v59 = vunpack.i.h.bf16 %v10594_v38 }
 0x444   :  { %v14393_v7 = vpop.f32.mrb[136].mxu1  ;;  %v6422_v1 = vsel %vm108_vm3, %v5014_v32, %v10580_v28  ;;  %v6358_v56 = vsel %vm108_vm3, %v4885_v3, %v10581_v49  ;;  %v5121_v49 = vld [vmem:[#allocation3 + $0xe2] sm:$0xff]  ;;  %v5123_v3 = vld [vmem:[#allocation3 + $0xfa] sm:$0xff] }
 0x445   :  { %v6917_v10 = vpop.f32.mrb[137].mxu1  ;;  %v10589_v60 = vpop.permute.xlu0 %10588 }
 0x446   :  { %7334 = vmatmul.mubr.f32.gmra.mrb[196].mxu0 %v6356_v57  ;;  %8725 = vmatmul.mubr.msk.f32.gmra.mrb[214].mxu1 %vm108_vm3, %v5111_v46  ;;  %v10590_v9 = vunpack.i.l.bf16 %v10589_v60  ;;  %v10591_v44 = vunpack.i.h.bf16 %v10589_v60  ;;  %v6425_v46 = vsel %vm108_vm3, %v5017_v40, %v10595_v52  ;;  %v10604_v10 = vpop.permute.xlu1 %10603 }
 0x447   :  { %7338 = vmatprep.mubr.f32.mxu0 %v6421_v23  ;;  %8727 = vmatprep.mubr.msk.f32.mxu1 %vm108_vm3, %v5112_v24  ;;  %v4888_v24 = vld [vmem:[#allocation3 + $0x219] sm:$0xff]  ;;  %v10606_v60 = vunpack.i.h.bf16 %v10604_v10 }
 0x448   :  { %v6424_v16 = vsel %vm108_vm3, %v5016_v4, %v10590_v9  ;;  %v6360_v27 = vsel %vm108_vm3, %v4887_v0, %v10591_v44  ;;  %v6361_v11 = vsel %vm108_vm3, %v4888_v24, %v10596_v59  ;;  %v5124_v9 = vld [vmem:[#allocation3 + $0x10a] sm:$0xff]  ;;  %v5020_v4 = vld [vmem:[#allocation3 + $0x258] sm:$0xff] }
 0x449   :  { %v10599_v42 = vpop.permute.xlu0 %10598  ;;  %v5128_v24 = vld [vmem:[#allocation3 + $0x13a] sm:$0xff] }
 0x44a   :  { %7339 = vmatmul.mubr.f32.gmra.mrb[198].mxu0 %v6357_v26  ;;  %8728 = vmatmul.mubr.msk.f32.gmra.mrb[216].mxu1 %vm108_vm3, %v5113_v5  ;;  %v10600_v57 = vunpack.i.l.bf16 %v10599_v42  ;;  %v10601_v43 = vunpack.i.h.bf16 %v10599_v42  ;;  %v5018_v26 = vld [vmem:[#allocation3 + $0x240] sm:$0xff]  ;;  %v10605_v5 = vunpack.i.l.bf16 %v10604_v10 }
 0x44b   :  { %v14402_v31 = vpop.f32.mrb[138].mxu1  ;;  %7343 = vmatprep.mubr.f32.mxu0 %v6422_v1  ;;  %8730 = vmatprep.mubr.msk.f32.mxu1 %vm108_vm3, %v5114_v58  ;;  %v4889_v58 = vld [vmem:[#allocation3 + $0x229] sm:$0xff] }
 0x44c   :  { %v6922_v47 = vpop.f32.mrb[139].mxu1  ;;  %v6426_v32 = vsel %vm108_vm3, %v5018_v26, %v10600_v57  ;;  %v6427_v54 = vsel %vm108_vm3, %v5019_v25, %v10605_v5  ;;  %v5126_v42 = vld [vmem:[#allocation3 + $0x122] sm:$0xff] }
 0x44d   :  { %v10609_v1 = vpop.permute.xlu0 %10608  ;;  %v6362_v47 = vsel %vm108_vm3, %v4889_v58, %v10601_v43  ;;  %v5129_v5 = vld [vmem:[#allocation3 + $0x142] sm:$0xff]  ;;  %v5130_v58 = vld [vmem:[#allocation3 + $0x152] sm:$0xff] }
 0x44e   :  { %7344 = vmatmul.mubr.f32.gmra.mrb[200].mxu0 %v6358_v56  ;;  %8731 = vmatmul.mubr.msk.f32.gmra.mrb[218].mxu1 %vm108_vm3, %v5115_v12  ;;  %v10614_v56 = vpop.permute.xlu1 %10613  ;;  %v10610_v12 = vunpack.i.l.bf16 %v10609_v1  ;;  %v10611_v44 = vunpack.i.h.bf16 %v10609_v1 }
 0x44f   :  { %v14408_v2 = vpop.f32.mrb[140].mxu1  ;;  %7348 = vmatprep.mubr.f32.mxu0 %v6423_v17  ;;  %8733 = vmatprep.mubr.msk.f32.mxu1 %vm108_vm3, %v5116_v34  ;;  %v10615_v52 = vunpack.i.l.bf16 %v10614_v56  ;;  %v10616_v40 = vunpack.i.h.bf16 %v10614_v56 }
 0x450   :  { %v6927_v41 = vpop.f32.mrb[141].mxu1 }
 0x452   :  { %7349 = vmatmul.mubr.f32.gmra.mrb[202].mxu0 %v6359_v18  ;;  %8734 = vmatmul.mubr.msk.f32.gmra.mrb[220].mxu1 %vm108_vm3, %v5117_v19  ;;  %v6363_v18 = vsel %vm108_vm3, %v4890_v21, %v10606_v60  ;;  %v5125_v19 = vld [vmem:[#allocation3 + $0x112] sm:$0xff]  ;;  %v10624_v43 = vpop.permute.xlu1 %10623 }
 0x453   :  { %v14414_v39 = vpop.f32.mrb[142].mxu1  ;;  %7353 = vmatprep.mubr.f32.mxu0 %v6424_v16  ;;  %8736 = vmatprep.mubr.msk.f32.mxu1 %vm108_vm3, %v5118_v35  ;;  %v10619_v16 = vpop.permute.xlu0 %10618  ;;  %v6428_v35 = vsel %vm108_vm3, %v5020_v4, %v10610_v12  ;;  %v10626_v25 = vunpack.i.h.bf16 %v10624_v43  ;;  %v4894_v4 = vld [vmem:[#allocation3 + $0x261] sm:$0xff] }
 0x454   :  { %v6932_v30 = vpop.f32.mrb[143].mxu1  ;;  %v10620_v10 = vunpack.i.l.bf16 %v10619_v16 }
 0x456   :  { %7354 = vmatmul.mubr.f32.gmra.mrb[204].mxu0 %v6360_v27  ;;  %8737 = vmatmul.mubr.msk.f32.gmra.mrb[222].mxu1 %vm108_vm3, %v5119_v45  ;;  %v4891_v45 = vld [vmem:[#allocation3 + $0x241] sm:$0xff] }
 0x457   :  { %v14420_v28 = vpop.f32.mrb[144].mxu1  ;;  %7358 = vmatprep.mubr.f32.mxu0 %v6425_v46  ;;  %8739 = vmatprep.mubr.msk.f32.mxu1 %vm108_vm3, %v5120_v33  ;;  %v6364_v57 = vsel %vm108_vm3, %v4891_v45, %v10611_v44  ;;  %v5127_v46 = vld [vmem:[#allocation3 + $0x12a] sm:$0xff]  ;;  %v5021_v33 = vld [vmem:[#allocation3 + $0x260] sm:$0xff]  ;;  %v10629_v60 = vpop.permute.xlu0 %10628 }
 0x458   :  { %v6937_v23 = vpop.f32.mrb[145].mxu1  ;;  %v5132_v44 = vld [vmem:[#allocation3 + $0x16a] sm:$0xff] }
 0x459   :  { %v6429_v23 = vsel %vm108_vm3, %v5021_v33, %v10615_v52  ;;  %v10631_v52 = vunpack.i.h.bf16 %v10629_v60 }
 0x45a   :  { %7359 = vmatmul.mubr.f32.gmra.mrb[206].mxu0 %v6361_v11  ;;  %8740 = vmatmul.mubr.msk.f32.gmra.mrb[224].mxu1 %vm108_vm3, %v5121_v49  ;;  %v4892_v11 = vld [vmem:[#allocation3 + $0x249] sm:$0xff]  ;;  %v10621_v49 = vunpack.i.h.bf16 %v10619_v16 }
 0x45b   :  { %7363 = vmatprep.mubr.f32.mxu0 %v6426_v32  ;;  %8742 = vmatprep.mubr.msk.f32.mxu1 %vm108_vm3, %v5122_v36  ;;  %v6365_v26 = vsel %vm108_vm3, %v4892_v11, %v10616_v40  ;;  %v5022_v32 = vld [vmem:[#allocation3 + $0x270] sm:$0xff]  ;;  %v10625_v36 = vunpack.i.l.bf16 %v10624_v43  ;;  %v10639_v33 = vpop.permute.xlu0 %10638 }
 0x45c   :  { %v6430_v1 = vsel %vm108_vm3, %v5022_v32, %v10620_v10  ;;  %v10640_v32 = vunpack.i.l.bf16 %v10639_v33 }
 0x45e   :  { %7364 = vmatmul.mubr.f32.gmra.mrb[208].mxu0 %v6362_v47  ;;  %8743 = vmatmul.mubr.msk.f32.gmra.mrb[226].mxu1 %vm108_vm3, %v5123_v3  ;;  %v4893_v3 = vld [vmem:[#allocation3 + $0x259] sm:$0xff] }
 0x45f   :  { %7368 = vmatprep.mubr.f32.mxu0 %v6427_v54  ;;  %8745 = vmatprep.mubr.msk.f32.mxu1 %vm108_vm3, %v5124_v9  ;;  %v14431_v17 = vpop.f32.mrb[146].mxu1  ;;  %v6366_v12 = vsel %vm108_vm3, %v4893_v3, %v10621_v49  ;;  %v5131_v54 = vld [vmem:[#allocation3 + $0x15a] sm:$0xff]  ;;  %v5137_v3 = vld [vmem:[#allocation3 + $0x1a2] sm:$0xff] }
 0x460   :  { %v14433_v34 = vpop.f32.mrb[128].mxu0  ;;  %v6942_v38 = vpop.f32.mrb[147].mxu1  ;;  %v5023_v9 = vld [vmem:[#allocation3 + $0x278] sm:$0xff] }
 0x461   :  { %v7167_v41 = vpop.f32.mrb[129].mxu0  ;;  %v10630_v38 = vunpack.i.l.bf16 %v10629_v60  ;;  %v6431_v21 = vsel %vm108_vm3, %v5023_v9, %v10625_v36 }
 0x462   :  { %7369 = vmatmul.mubr.f32.gmra.mrb[210].mxu0 %v6363_v18  ;;  %8746 = vmatmul.mubr.msk.f32.gmra.mrb[228].mxu1 %vm108_vm3, %v5125_v19  ;;  %v10634_v18 = vpop.permute.xlu1 %10633 }
 0x463   :  { %7373 = vmatprep.mubr.f32.mxu0 %v6428_v35  ;;  %8748 = vmatprep.mubr.msk.f32.mxu1 %vm108_vm3, %v5126_v42  ;;  %v14439_v30 = vpop.f32.mrb[148].mxu1  ;;  %v6367_v42 = vsel %vm108_vm3, %v4894_v4, %v10626_v25  ;;  %v10635_v45 = vunpack.i.l.bf16 %v10634_v18  ;;  %v10636_v43 = vunpack.i.h.bf16 %v10634_v18  ;;  %v4896_v25 = vld [vmem:[#allocation3 + $0x279] sm:$0xff]  ;;  %v5138_v18 = vld [vmem:[#allocation3 + $0x1e2] sm:$0xff] }
 0x464   :  { %v14441_v0 = vpop.f32.mrb[130].mxu0  ;;  %v6947_v59 = vpop.f32.mrb[149].mxu1  ;;  %v4897_v4 = vld [vmem:[#allocation3 + $0x289] sm:$0xff] }
 0x465   :  { %v7172_v27 = vpop.f32.mrb[131].mxu0  ;;  %v5133_v59 = vld [vmem:[#allocation3 + $0x172] sm:$0xff] }
 0x466   :  { %7374 = vmatmul.mubr.f32.gmra.mrb[212].mxu0 %v6364_v57  ;;  %8749 = vmatmul.mubr.msk.f32.gmra.mrb[230].mxu1 %vm108_vm3, %v5127_v46  ;;  %v5024_v27 = vld [vmem:[#allocation3 + $0x288] sm:$0xff] }
 0x467   :  { %7378 = vmatprep.mubr.f32.mxu0 %v6429_v23  ;;  %8751 = vmatprep.mubr.msk.f32.mxu1 %vm108_vm3, %v5128_v24  ;;  %v6432_v57 = vsel %vm108_vm3, %v5024_v27, %v10630_v38  ;;  %v5134_v46 = vld [vmem:[#allocation3 + $0x182] sm:$0xff]  ;;  %v4895_v23 = vld [vmem:[#allocation3 + $0x271] sm:$0xff]  ;;  %v5136_v24 = vld [vmem:[#allocation3 + $0x19a] sm:$0xff]  ;;  %v6369_v38 = vsel %vm108_vm3, %v4896_v25, %v10636_v43 }
 0x468   :  { %v5142_v43 = vld [vmem:[#allocation3 + $0x212] sm:$0xff] }
 0x46a   :  { %7379 = vmatmul.mubr.f32.gmra.mrb[214].mxu0 %v6365_v26  ;;  %8752 = vmatmul.mubr.msk.f32.gmra.mrb[232].mxu1 %vm108_vm3, %v5129_v5  ;;  %v6368_v26 = vsel %vm108_vm3, %v4895_v23, %v10631_v52  ;;  %v5135_v5 = vld [vmem:[#allocation3 + $0x18a] sm:$0xff] }
 0x46b   :  { %7383 = vmatprep.mubr.f32.mxu0 %v6430_v1  ;;  %8754 = vmatprep.mubr.msk.f32.mxu1 %vm108_vm3, %v5130_v58  ;;  %v6433_v1 = vsel %vm108_vm3, %v14269_v14, %v10635_v45  ;;  %v10644_v58 = vpop.permute.xlu1 %10643  ;;  %v6434_v14 = vsel %vm108_vm3, %v14281_v22, %v10640_v32  ;;  %v4898_v22 = vld [vmem:[#allocation3 + $0x291] sm:$0xff] }
 0x46c   :  { %v10646_v52 = vunpack.i.h.bf16 %v10644_v58 }
 0x46d   :  { %v14451_v47 = vpop.f32.mrb[150].mxu1  ;;  %v14453_v56 = vpop.f32.mrb[132].mxu0 }
 0x46e   :  { %v6952_v41 = vpop.f32.mrb[151].mxu1  ;;  %7384 = vmatmul.mubr.f32.gmra.mrb[216].mxu0 %v6366_v12  ;;  %8755 = vmatmul.mubr.msk.f32.gmra.mrb[234].mxu1 %vm108_vm3, %v5131_v54  ;;  %v7177_v19 = vpop.f32.mrb[133].mxu0  ;;  %v10641_v12 = vunpack.i.h.bf16 %v10639_v33  ;;  %v6371_v33 = vsel %vm108_vm3, %v4898_v22, %v10646_v52 }
 0x46f   :  { %7388 = vmatprep.mubr.f32.mxu0 %v6431_v21  ;;  %8757 = vmatprep.mubr.msk.f32.mxu1 %vm108_vm3, %v5132_v44  ;;  %v10645_v41 = vunpack.i.l.bf16 %v10644_v58  ;;  %v10649_v19 = vpop.permute.xlu0 %10648 }
 0x470   :  { %v10650_v27 = vunpack.i.l.bf16 %v10649_v19 }
 0x471   :  { %v14459_v16 = vpop.f32.mrb[152].mxu1  ;;  %v14461_v35 = vpop.f32.mrb[134].mxu0  ;;  %v6435_v45 = vsel %vm108_vm3, %v14290_v20, %v10645_v41  ;;  %v4900_v41 = vld [vmem:[#allocation3 + $0x2a9] sm:$0xff] }
 0x472   :  { %v6957_v40 = vpop.f32.mrb[153].mxu1  ;;  %7389 = vmatmul.mubr.f32.gmra.mrb[218].mxu0 %v6367_v42  ;;  %8758 = vmatmul.mubr.msk.f32.gmra.mrb[236].mxu1 %vm108_vm3, %v5133_v59  ;;  %v7182_v10 = vpop.f32.mrb[135].mxu0  ;;  %v6370_v42 = vsel %vm108_vm3, %v4897_v4, %v10641_v12  ;;  %v5139_v59 = vld [vmem:[#allocation3 + $0x1ea] sm:$0xff] }
 0x473   :  { %7393 = vmatprep.mubr.f32.mxu0 %v6432_v57  ;;  %8760 = vmatprep.mubr.msk.f32.mxu1 %vm108_vm3, %v5134_v46  ;;  %v5140_v40 = vld [vmem:[#allocation3 + $0x1fa] sm:$0xff]  ;;  %v10654_v57 = vpop.permute.xlu1 %10653  ;;  %v10651_v46 = vunpack.i.h.bf16 %v10649_v19  ;;  %v5141_v10 = vld [vmem:[#allocation3 + $0x202] sm:$0xff]  ;;  %v5144_v12 = vld [vmem:[#allocation3 + $0x22a] sm:$0xff] }
 0x474   :  { %v10655_v23 = vunpack.i.l.bf16 %v10654_v57  ;;  %v10656_v32 = vunpack.i.h.bf16 %v10654_v57  ;;  %v5145_v19 = vld [vmem:[#allocation3 + $0x232] sm:$0xff] }
 0x475   :  { %v14467_v11 = vpop.f32.mrb[154].mxu1  ;;  %v14469_v49 = vpop.f32.mrb[136].mxu0 }
 0x476   :  { %v6962_v36 = vpop.f32.mrb[155].mxu1  ;;  %7394 = vmatmul.mubr.f32.gmra.mrb[220].mxu0 %v6368_v26  ;;  %8761 = vmatmul.mubr.msk.f32.gmra.mrb[238].mxu1 %vm108_vm3, %v5135_v5  ;;  %v7187_v60 = vpop.f32.mrb[137].mxu0  ;;  %v4899_v5 = vld [vmem:[#allocation3 + $0x2a1] sm:$0xff] }
 0x477   :  { %7398 = vmatprep.mubr.f32.mxu0 %v6433_v1  ;;  %8763 = vmatprep.mubr.msk.f32.mxu1 %vm108_vm3, %v5136_v24  ;;  %v6436_v24 = vsel %vm108_vm3, %v14298_v50, %v10650_v27  ;;  %v10659_v26 = vpop.permute.xlu0 %10658  ;;  %v6372_v58 = vsel %vm108_vm3, %v4899_v5, %v10651_v46  ;;  %v5143_v60 = vld [vmem:[#allocation3 + $0x21a] sm:$0xff]  ;;  %v6437_v50 = vsel %vm108_vm3, %v14306_v51, %v10655_v23 }
 0x478   :  { %v4902_v5 = vld [vmem:[#allocation3 + $0x2c1] sm:$0xff] }
 0x479   :  { %v14476_v54 = vpop.f32.mrb[156].mxu1  ;;  %v14478_v9 = vpop.f32.mrb[138].mxu0 }
 0x47a   :  { %v6967_v21 = vpop.f32.mrb[157].mxu1  ;;  %v7192_v44 = vpop.f32.mrb[139].mxu0  ;;  %7399 = vmatmul.mubr.f32.gmra.mrb[222].mxu0 %v6369_v38  ;;  %8764 = vmatmul.mubr.msk.f32.gmra.mrb[240].mxu1 %vm108_vm3, %v5137_v3  ;;  %v10660_v3 = vunpack.i.l.bf16 %v10659_v26 }
 0x47b   :  { %7403 = vmatprep.mubr.f32.mxu0 %v6434_v14  ;;  %8766 = vmatprep.mubr.msk.f32.mxu1 %vm108_vm3, %v5138_v18  ;;  %v10664_v38 = vpop.permute.xlu1 %10663  ;;  %v10661_v21 = vunpack.i.h.bf16 %v10659_v26  ;;  %v6373_v18 = vsel %vm108_vm3, %v4900_v41, %v10656_v32  ;;  %v10669_v27 = vpop.permute.xlu0 %10668 }
 0x47c   :  { %v10665_v4 = vunpack.i.l.bf16 %v10664_v38  ;;  %v6438_v51 = vsel %vm108_vm3, %v14314_v13, %v10660_v3  ;;  %v10671_v32 = vunpack.i.h.bf16 %v10669_v27  ;;  %v5149_v3 = vld [vmem:[#allocation3 + $0x262] sm:$0xff] }
 0x47e   :  { %7404 = vmatmul.mubr.f32.gmra.mrb[224].mxu0 %v6370_v42  ;;  %8767 = vmatmul.mubr.msk.f32.gmra.mrb[242].mxu1 %vm108_vm3, %v5139_v59  ;;  %v5146_v59 = vld [vmem:[#allocation3 + $0x242] sm:$0xff]  ;;  %v6439_v13 = vsel %vm108_vm3, %v14322_v62, %v10665_v4  ;;  %v5151_v4 = vld [vmem:[#allocation3 + $0x27a] sm:$0xff] }
 0x47f   :  { %7408 = vmatprep.mubr.f32.mxu0 %v6435_v45  ;;  %8769 = vmatprep.mubr.msk.f32.mxu1 %vm108_vm3, %v5140_v40  ;;  %v4901_v45 = vld [vmem:[#allocation3 + $0x2b9] sm:$0xff]  ;;  %v10666_v40 = vunpack.i.h.bf16 %v10664_v38  ;;  %v10674_v26 = vpop.permute.xlu1 %10673  ;;  %v10679_v41 = vpop.permute.xlu0 %10678 }
 0x480   :  { %v6374_v46 = vsel %vm108_vm3, %v4901_v45, %v10661_v21  ;;  %v5150_v38 = vld [vmem:[#allocation3 + $0x272] sm:$0xff] }
 0x481   :  { %v4903_v21 = vld [vmem:[#allocation3 + $0x2d1] sm:$0xff] }
 0x482   :  { %7409 = vmatmul.mubr.f32.gmra.mrb[226].mxu0 %v6371_v33  ;;  %8770 = vmatmul.mubr.msk.f32.gmra.mrb[244].mxu1 %vm108_vm3, %v5141_v10  ;;  %v5147_v33 = vld [vmem:[#allocation3 + $0x24a] sm:$0xff]  ;;  %v10670_v10 = vunpack.i.l.bf16 %v10669_v27  ;;  %v10681_v27 = vunpack.i.h.bf16 %v10679_v41 }
 0x483   :  { %7413 = vmatprep.mubr.f32.mxu0 %v6436_v24  ;;  %8772 = vmatprep.mubr.msk.f32.mxu1 %vm108_vm3, %v5142_v43  ;;  %v5148_v43 = vld [vmem:[#allocation3 + $0x25a] sm:$0xff] }
 0x484   :  { %v6440_v62 = vsel %vm108_vm3, %v14330_v55, %v10670_v10  ;;  %v4904_v55 = vld [vmem:[#allocation3 + $0x2d9] sm:$0xff]  ;;  %v5154_v10 = vld [vmem:[#allocation3 + $0x2a2] sm:$0xff] }
 0x485   :  { %v14495_v20 = vpop.f32.mrb[158].mxu1  ;;  %v14497_v36 = vpop.f32.mrb[140].mxu0 }
 0x486   :  { %v6972_v1 = vpop.f32.mrb[159].mxu1  ;;  %v7197_v25 = vpop.f32.mrb[141].mxu0  ;;  %7414 = vmatmul.mubr.f32.gmra.mrb[228].mxu0 %v6372_v58  ;;  %8773 = vmatmul.mubr.msk.f32.gmra.mrb[246].mxu1 %vm108_vm3, %v5143_v60  ;;  %v6375_v60 = vsel %vm108_vm3, %v4902_v5, %v10666_v40  ;;  %v5153_v40 = vld [vmem:[#allocation3 + $0x292] sm:$0xff] }
 0x487   :  { %7418 = vmatprep.mubr.f32.mxu0 %v6437_v50  ;;  %8775 = vmatprep.mubr.msk.f32.mxu1 %vm108_vm3, %v5144_v12  ;;  %v10675_v25 = vunpack.i.l.bf16 %v10674_v26 }
 0x489   :  { %v14504_v44 = vpop.f32.mrb[160].mxu1  ;;  %v14506_v14 = vpop.f32.mrb[142].mxu0 }
 0x48a   :  { %v6977_v52 = vpop.f32.mrb[161].mxu1  ;;  %v7202_v42 = vpop.f32.mrb[143].mxu0  ;;  %7419 = vmatmul.mubr.f32.gmra.mrb[230].mxu0 %v6373_v18  ;;  %8776 = vmatmul.mubr.msk.f32.gmra.mrb[248].mxu1 %vm108_vm3, %v5145_v19  ;;  %v10676_v18 = vunpack.i.h.bf16 %v10674_v26  ;;  %v6376_v19 = vsel %vm108_vm3, %v4903_v21, %v10671_v32 }
 0x48b   :  { %7423 = vmatprep.mubr.f32.mxu0 %v6438_v51  ;;  %8778 = vmatprep.mubr.msk.f32.mxu1 %vm108_vm3, %v5146_v59  ;;  %v10680_v52 = vunpack.i.l.bf16 %v10679_v41  ;;  %v6441_v42 = vsel %vm108_vm3, %v14338_v37, %v10675_v25  ;;  %v5152_v51 = vld [vmem:[#allocation3 + $0x28a] sm:$0xff]  ;;  %v10684_v59 = vpop.permute.xlu1 %10683  ;;  %v5156_v25 = vld [vmem:[#allocation3 + $0x2ba] sm:$0xff] }
 0x48c   :  { %v6377_v45 = vsel %vm108_vm3, %v4904_v55, %v10676_v18 }
 0x48d   :  { %v14513_v57 = vpop.f32.mrb[162].mxu1  ;;  %v14515_v22 = vpop.f32.mrb[144].mxu0 }
 0x48e   :  { %v6982_v23 = vpop.f32.mrb[163].mxu1  ;;  %v7207_v24 = vpop.f32.mrb[145].mxu0  ;;  %7424 = vmatmul.mubr.f32.gmra.mrb[232].mxu0 %v6374_v46  ;;  %8779 = vmatmul.mubr.msk.f32.gmra.mrb[250].mxu1 %vm108_vm3, %v5147_v33  ;;  %v10685_v46 = vunpack.i.l.bf16 %v10684_v59  ;;  %v6442_v33 = vsel %vm108_vm3, %v14348_v29, %v10680_v52 }
 0x48f   :  { %7428 = vmatprep.mubr.f32.mxu0 %v6439_v13  ;;  %8781 = vmatprep.mubr.msk.f32.mxu1 %vm108_vm3, %v5148_v43  ;;  %v10689_v23 = vpop.permute.xlu0 %10688  ;;  %v4905_v13 = vld [vmem:[#allocation3 + $0x2e9] sm:$0xff]  ;;  %v10686_v43 = vunpack.i.h.bf16 %v10684_v59 }
 0x490   :  { %v6378_v32 = vsel %vm108_vm3, %v4905_v13, %v10681_v27  ;;  %v6443_v29 = vsel %vm108_vm3, %v14356_v15, %v10685_v46  ;;  %v10691_v41 = vunpack.i.h.bf16 %v10689_v23  ;;  %v4907_v27 = vld [vmem:[#allocation3 + $0x301] sm:$0xff]  ;;  %v5160_v13 = vld [vmem:[#allocation3 + $0x2ea] sm:$0xff] }
 0x491   :  { %v14522_v1 = vpop.f32.mrb[164].mxu1  ;;  %v14524_v58 = vpop.f32.mrb[146].mxu0 }
 0x492   :  { %v6987_v50 = vpop.f32.mrb[165].mxu1  ;;  %v7212_v12 = vpop.f32.mrb[147].mxu0  ;;  %7429 = vmatmul.mubr.f32.gmra.mrb[234].mxu0 %v6375_v60  ;;  %8782 = vmatmul.mubr.msk.f32.gmra.mrb[252].mxu1 %vm108_vm3, %v5149_v3  ;;  %v5155_v60 = vld [vmem:[#allocation3 + $0x2aa] sm:$0xff]  ;;  %v10690_v3 = vunpack.i.l.bf16 %v10689_v23 }
 0x493   :  { %7433 = vmatprep.mubr.f32.mxu0 %v6440_v62  ;;  %8784 = vmatprep.mubr.msk.f32.mxu1 %vm108_vm3, %v5150_v38  ;;  %v10694_v50 = vpop.permute.xlu1 %10693  ;;  %v4906_v38 = vld [vmem:[#allocation3 + $0x2f1] sm:$0xff] }
 0x494   :  { %v10695_v52 = vunpack.i.l.bf16 %v10694_v50  ;;  %v6444_v15 = vsel %vm108_vm3, %v14366_v6, %v10690_v3 }
 0x496   :  { %7434 = vmatmul.mubr.f32.gmra.mrb[236].mxu0 %v6376_v19  ;;  %8785 = vmatmul.mubr.msk.f32.gmra.mrb[254].mxu1 %vm108_vm3, %v5151_v4  ;;  %v6379_v19 = vsel %vm108_vm3, %v4906_v38, %v10686_v43  ;;  %v5157_v4 = vld [vmem:[#allocation3 + $0x2c2] sm:$0xff]  ;;  %v6445_v6 = vsel %vm108_vm3, %v14376_v63, %v10695_v52  ;;  %v5038_v38 = vld [vmem:[#allocation3 + $0x330] sm:$0xff] }
 0x497   :  { %7438 = vmatprep.mubr.f32.mxu0 %v6441_v42  ;;  %8787 = vmatprep.mubr.msk.f32.mxu1 %vm108_vm3, %v5152_v51  ;;  %v5158_v42 = vld [vmem:[#allocation3 + $0x2d2] sm:$0xff]  ;;  %v10699_v51 = vpop.permute.xlu0 %10698  ;;  %v10704_v43 = vpop.permute.xlu1 %10703 }
 0x498   :  { %v10700_v23 = vunpack.i.l.bf16 %v10699_v51 }
 0x49a   :  { %7439 = vmatmul.mubr.f32.gmra.mrb[238].mxu0 %v6377_v45  ;;  %8788 = vmatmul.mubr.msk.f32.gmra.mrb[0].mxu1 %vm108_vm3, %v5153_v40  ;;  %v10696_v45 = vunpack.i.h.bf16 %v10694_v50  ;;  %v5161_v50 = vld [vmem:[#allocation3 + $0x2f2] sm:$0xff]  ;;  %v6446_v63 = vsel %vm108_vm3, %v5038_v38, %v10700_v23 }
 0x49b   :  { %7443 = vmatprep.mubr.f32.mxu0 %v6442_v33  ;;  %8790 = vmatprep.mubr.msk.f32.mxu1 %vm108_vm3, %v5154_v10  ;;  %v6380_v33 = vsel %vm108_vm3, %v4907_v27, %v10691_v41  ;;  %v5159_v10 = vld [vmem:[#allocation3 + $0x2da] sm:$0xff]  ;;  %v10705_v41 = vunpack.i.l.bf16 %v10704_v43 }
 0x49d   :  { %v14541_v37 = vpop.f32.mrb[166].mxu1  ;;  %v14543_v24 = vpop.f32.mrb[148].mxu0 }
 0x49e   :  { %v6992_v26 = vpop.f32.mrb[167].mxu1  ;;  %v7217_v5 = vpop.f32.mrb[149].mxu0  ;;  %7444 = vmatmul.mubr.f32.gmra.mrb[240].mxu0 %v6378_v32  ;;  %8791 = vmatmul.mubr.msk.f32.gmra.mrb[2].mxu1 %vm108_vm3, %v5155_v60  ;;  %v4908_v32 = vld [vmem:[#allocation3 + $0x309] sm:$0xff]  ;;  %v10701_v60 = vunpack.i.h.bf16 %v10699_v51 }
 0x49f   :  { %7448 = vmatprep.mubr.f32.mxu0 %v6443_v29  ;;  %8793 = vmatprep.mubr.msk.f32.mxu1 %vm108_vm3, %v5156_v25  ;;  %v6381_v25 = vsel %vm108_vm3, %v4908_v32, %v10696_v45  ;;  %v5164_v45 = vld [vmem:[#allocation3 + $0x31a] sm:$0xff]  ;;  %v5166_v32 = vld [vmem:[#allocation3 + $0x332] sm:$0xff] }
 0x4a1   :  { %v14550_v12 = vpop.f32.mrb[168].mxu1  ;;  %v14552_v62 = vpop.f32.mrb[150].mxu0 }
 0x4a2   :  { %v6997_v21 = vpop.f32.mrb[169].mxu1  ;;  %v7222_v18 = vpop.f32.mrb[151].mxu0  ;;  %7449 = vmatmul.mubr.f32.gmra.mrb[242].mxu0 %v6379_v19  ;;  %8794 = vmatmul.mubr.msk.f32.gmra.mrb[4].mxu1 %vm108_vm3, %v5157_v4  ;;  %v4909_v19 = vld [vmem:[#allocation3 + $0x319] sm:$0xff]  ;;  %v10706_v4 = vunpack.i.h.bf16 %v10704_v43 }
 0x4a3   :  { %7453 = vmatprep.mubr.f32.mxu0 %v6444_v15  ;;  %8796 = vmatprep.mubr.msk.f32.mxu1 %vm108_vm3, %v5158_v42  ;;  %v5162_v21 = vld [vmem:[#allocation3 + $0x302] sm:$0xff]  ;;  %v10709_v18 = vpop.permute.xlu0 %10708  ;;  %v6382_v52 = vsel %vm108_vm3, %v4909_v19, %v10701_v60  ;;  %v5163_v15 = vld [vmem:[#allocation3 + $0x30a] sm:$0xff]  ;;  %v5039_v42 = vld [vmem:[#allocation3 + $0x338] sm:$0xff] }
 0x4a4   :  { %v10710_v51 = vunpack.i.l.bf16 %v10709_v18  ;;  %v6447_v27 = vsel %vm108_vm3, %v5039_v42, %v10705_v41  ;;  %v5041_v60 = vld [vmem:[#allocation3 + $0x350] sm:$0xff]  ;;  %v4912_v42 = vld [vmem:[#allocation3 + $0x339] sm:$0xff] }
 0x4a5   :  { %v14559_v59 = vpop.f32.mrb[170].mxu1  ;;  %v14561_v55 = vpop.f32.mrb[152].mxu0 }
 0x4a6   :  { %v7002_v40 = vpop.f32.mrb[171].mxu1  ;;  %v7227_v46 = vpop.f32.mrb[153].mxu0  ;;  %7454 = vmatmul.mubr.f32.gmra.mrb[244].mxu0 %v6380_v33  ;;  %8797 = vmatmul.mubr.msk.f32.gmra.mrb[6].mxu1 %vm108_vm3, %v5159_v10  ;;  %v4910_v33 = vld [vmem:[#allocation3 + $0x321] sm:$0xff]  ;;  %v10711_v10 = vunpack.i.h.bf16 %v10709_v18 }
 0x4a7   :  { %7458 = vmatprep.mubr.f32.mxu0 %v6445_v6  ;;  %8799 = vmatprep.mubr.msk.f32.mxu1 %vm108_vm3, %v5160_v13  ;;  %v10714_v40 = vpop.permute.xlu1 %10713  ;;  %v5040_v46 = vld [vmem:[#allocation3 + $0x348] sm:$0xff]  ;;  %v6383_v23 = vsel %vm108_vm3, %v4910_v33, %v10706_v4  ;;  %v5167_v18 = vld [vmem:[#allocation3 + $0x33a] sm:$0xff]  ;;  %v5169_v4 = vld [vmem:[#allocation3 + $0x352] sm:$0xff] }
 0x4a8   :  { %v5165_v6 = vld [vmem:[#allocation3 + $0x322] sm:$0xff]  ;;  %v10715_v13 = vunpack.i.l.bf16 %v10714_v40  ;;  %v6448_v43 = vsel %vm108_vm3, %v5040_v46, %v10710_v51  ;;  %v10716_v38 = vunpack.i.h.bf16 %v10714_v40 }
 0x4a9   :  { %v14568_v26 = vpop.f32.mrb[172].mxu1  ;;  %v14570_v5 = vpop.f32.mrb[154].mxu0 }
 0x4aa   :  { %v7007_v3 = vpop.f32.mrb[173].mxu1  ;;  %v7232_v29 = vpop.f32.mrb[155].mxu0  ;;  %7459 = vmatmul.mubr.f32.gmra.mrb[246].mxu0 %v6381_v25  ;;  %8800 = vmatmul.mubr.msk.f32.gmra.mrb[8].mxu1 %vm108_vm3, %v5161_v50  ;;  %v4911_v25 = vld [vmem:[#allocation3 + $0x331] sm:$0xff]  ;;  %v6449_v19 = vsel %vm108_vm3, %v5041_v60, %v10715_v13 }
 0x4ab   :  { %7463 = vmatprep.mubr.f32.mxu0 %v6446_v63  ;;  %8802 = vmatprep.mubr.msk.f32.mxu1 %vm108_vm3, %v5162_v21  ;;  %v5168_v50 = vld [vmem:[#allocation3 + $0x34a] sm:$0xff]  ;;  %v6384_v21 = vsel %vm108_vm3, %v4911_v25, %v10711_v10 }
 0x4ae   :  { %7464 = vmatmul.mubr.f32.gmra.mrb[248].mxu0 %v6382_v52  ;;  %8803 = vmatmul.mubr.msk.f32.gmra.mrb[10].mxu1 %vm108_vm3, %v5163_v15 }
 0x4af   :  { %7468 = vmatprep.mubr.f32.mxu0 %v6447_v27  ;;  %8805 = vmatprep.mubr.msk.f32.mxu1 %vm108_vm3, %v5164_v45  ;;  %v6385_v45 = vsel %vm108_vm3, %v4912_v42, %v10716_v38 }
 0x4b2   :  { %7469 = vmatmul.mubr.f32.gmra.mrb[250].mxu0 %v6383_v23  ;;  %8806 = vmatmul.mubr.msk.f32.gmra.mrb[12].mxu1 %vm108_vm3, %v5165_v6 }
 0x4b3   :  { %7473 = vmatprep.mubr.f32.mxu0 %v6448_v43  ;;  %8808 = vmatprep.mubr.msk.f32.mxu1 %vm108_vm3, %v5166_v32 }
 0x4b5   :  { %v14584_v3 = vpop.f32.mrb[174].mxu1  ;;  %v14586_v29 = vpop.f32.mrb[156].mxu0 }
 0x4b6   :  { %v7012_v41 = vpop.f32.mrb[175].mxu1  ;;  %v7237_v63 = vpop.f32.mrb[157].mxu0  ;;  %7474 = vmatmul.mubr.f32.gmra.mrb[252].mxu0 %v6384_v21  ;;  %8809 = vmatmul.mubr.msk.f32.gmra.mrb[14].mxu1 %vm108_vm3, %v5167_v18 }
 0x4b7   :  { %7478 = vmatprep.mubr.f32.mxu0 %v6449_v19  ;;  %8811 = vmatprep.mubr.msk.f32.mxu1 %vm108_vm3, %v5168_v50 }
 0x4b9   :  { %v14592_v52 = vpop.f32.mrb[176].mxu1  ;;  %v14594_v15 = vpop.f32.mrb[158].mxu0 }
 0x4ba   :  { %v7017_v51 = vpop.f32.mrb[177].mxu1  ;;  %v7242_v27 = vpop.f32.mrb[159].mxu0  ;;  %7479 = vmatmul.mubr.f32.gmra.mrb[254].mxu0 %v6385_v45  ;;  %8812 = vmatmul.mubr.msk.f32.gmra.mrb[16].mxu1 %vm108_vm3, %v5169_v4 }
 0x4bd   :  { %v14598_v40 = vpop.f32.mrb[178].mxu1  ;;  %v14600_v46 = vpop.f32.mrb[160].mxu0 }
 0x4be   :  { %v7022_v33 = vpop.f32.mrb[179].mxu1  ;;  %v7247_v10 = vpop.f32.mrb[161].mxu0 }
 0x4c1   :  { %v14602_v23 = vpop.f32.mrb[180].mxu1  ;;  %v14604_v6 = vpop.f32.mrb[162].mxu0 }
 0x4c2   :  { %15022 = vst [vmem:[#allocation7_spill] sm:$0xff] %v14602_v23  ;;  %v7027_v13 = vpop.f32.mrb[181].mxu1  ;;  %v7252_v43 = vpop.f32.mrb[163].mxu0 }
 0x4cd   :  { %v14606_v32 = vpop.f32.mrb[182].mxu1  ;;  %v14608_v60 = vpop.f32.mrb[164].mxu0 }
 0x4ce   :  { %15023 = vst [vmem:[#allocation9_spill] sm:$0xff] %v14606_v32  ;;  %v7032_v25 = vpop.f32.mrb[183].mxu1  ;;  %v7257_v50 = vpop.f32.mrb[165].mxu0 }
 0x4d1   :  { %v14610_v38 = vpop.f32.mrb[184].mxu1  ;;  %v14612_v41 = vpop.f32.mrb[166].mxu0 }
 0x4d2   :  { %15024 = vst [vmem:[#allocation8_spill] sm:$0xff] %v14610_v38  ;;  %v7037_v63 = vpop.f32.mrb[185].mxu1  ;;  %v7262_v21 = vpop.f32.mrb[167].mxu0 }
 0x4d5   :  { %v14614_v18 = vpop.f32.mrb[186].mxu1  ;;  %v14616_v19 = vpop.f32.mrb[168].mxu0 }
 0x4d6   :  { %15025 = vst [vmem:[#allocation11_spill] sm:$0xff] %v14614_v18  ;;  %v7042_v4 = vpop.f32.mrb[187].mxu1  ;;  %v7267_v42 = vpop.f32.mrb[169].mxu0 }
 0x4d9   :  { %v14618_v51 = vpop.f32.mrb[188].mxu1  ;;  %v14620_v27 = vpop.f32.mrb[170].mxu0 }
 0x4da   :  { %15026 = vst [vmem:[#allocation10_spill] sm:$0xff] %v14618_v51  ;;  %v7047_v45 = vpop.f32.mrb[189].mxu1  ;;  %v7272_v33 = vpop.f32.mrb[171].mxu0 }
 0x4e5   :  { %v14622_v10 = vpop.f32.mrb[190].mxu1  ;;  %v14624_v13 = vpop.f32.mrb[172].mxu0 }
 0x4e6   :  { %15027 = vst [vmem:[#allocation13_spill] sm:$0xff] %v14622_v10  ;;  %v7052_v43 = vpop.f32.mrb[191].mxu1  ;;  %v7277_v25 = vpop.f32.mrb[173].mxu0 }
 0x4e9   :  { %v14626_v50 = vpop.f32.mrb[192].mxu1  ;;  %v7280_v63 = vpop.f32.mrb[174].mxu0 }
 0x4ea   :  { %15028 = vst [vmem:[#allocation12_spill] sm:$0xff] %v14626_v50  ;;  %v14629_v21 = vadd.f32 %v7280_v63, %v14343_v53  ;;  %v7057_v4 = vpop.f32.mrb[193].mxu1  ;;  %v7282_v42 = vpop.f32.mrb[175].mxu0 }
 0x4ed   :  { %v14631_v18 = vpop.f32.mrb[194].mxu1  ;;  %v7285_v51 = vpop.f32.mrb[176].mxu0 }
 0x4ee   :  { %15029 = vst [vmem:[#allocation15_spill] sm:$0xff] %v14631_v18  ;;  %v14634_v45 = vadd.f32 %v7285_v51, %v14361_v8  ;;  %v7062_v33 = vpop.f32.mrb[195].mxu1  ;;  %v7287_v10 = vpop.f32.mrb[177].mxu0 }
 0x4f4   :  { %v14636_v38 = vpop.f32.mrb[196].mxu1  ;;  %v7290_v43 = vpop.f32.mrb[178].mxu0 }
 0x4f5   :  { %15030 = vst [vmem:[#allocation14_spill] sm:$0xff] %v14636_v38  ;;  %v14639_v25 = vadd.f32 %v7290_v43, %v14371_v48  ;;  %v7067_v50 = vpop.f32.mrb[197].mxu1  ;;  %v7292_v32 = vpop.f32.mrb[179].mxu0 }
 0x4f9   :  { %v14641_v53 = vpop.f32.mrb[198].mxu1  ;;  %v7295_v63 = vpop.f32.mrb[180].mxu0 }
 0x4fa   :  { %15031 = vst [vmem:[#allocation17_spill] sm:$0xff] %v14641_v53  ;;  %v14644_v4 = vadd.f32 %v7295_v63, %v14387_v61  ;;  %v7072_v42 = vpop.f32.mrb[199].mxu1  ;;  %v7297_v18 = vpop.f32.mrb[181].mxu0 }
 0x4fd   :  { %v14646_v8 = vpop.f32.mrb[200].mxu1  ;;  %v7300_v51 = vpop.f32.mrb[182].mxu0 }
 0x4fe   :  { %15032 = vst [vmem:[#allocation16_spill] sm:$0xff] %v14646_v8  ;;  %v14649_v10 = vadd.f32 %v7300_v51, %v14393_v7  ;;  %v7077_v33 = vpop.f32.mrb[201].mxu1  ;;  %v7302_v38 = vpop.f32.mrb[183].mxu0 }
 0x501   :  { %v14651_v48 = vpop.f32.mrb[202].mxu1  ;;  %v7305_v50 = vpop.f32.mrb[184].mxu0 }
 0x502   :  { %15033 = vst [vmem:[#allocation19_spill] sm:$0xff] %v14651_v48  ;;  %v14654_v32 = vadd.f32 %v7305_v50, %v14402_v31  ;;  %v7082_v43 = vpop.f32.mrb[203].mxu1  ;;  %v7307_v53 = vpop.f32.mrb[185].mxu0 }
 0x505   :  { %v14656_v61 = vpop.f32.mrb[204].mxu1  ;;  %v7310_v63 = vpop.f32.mrb[186].mxu0 }
 0x506   :  { %15034 = vst [vmem:[#allocation18_spill] sm:$0xff] %v14656_v61  ;;  %v14659_v18 = vadd.f32 %v7310_v63, %v14408_v2  ;;  %v7087_v42 = vpop.f32.mrb[205].mxu1  ;;  %v7312_v8 = vpop.f32.mrb[187].mxu0 }
 0x507   :  { %v14674_v8 = vld [vmem:[%s14959_s5] ss:$0 sm:$0xff]  ;;  %s10749_s5 = smov [#allocation4]  }
 0x509   :  { %v14661_v7 = vpop.f32.mrb[206].mxu1  ;;  %v7315_v51 = vpop.f32.mrb[188].mxu0 }
 0x50a   :  { %15035 = vst [vmem:[#allocation21_spill] sm:$0xff] %v14661_v7  ;;  %v14664_v38 = vadd.f32 %v7315_v51, %v14414_v39  ;;  %v7092_v33 = vpop.f32.mrb[207].mxu1  ;;  %v7317_v48 = vpop.f32.mrb[189].mxu0 }
 0x50d   :  { %v14666_v31 = vpop.f32.mrb[208].mxu1  ;;  %v7320_v50 = vpop.f32.mrb[190].mxu0 }
 0x50e   :  { %15036 = vst [vmem:[#allocation20_spill] sm:$0xff] %v14666_v31  ;;  %v14669_v53 = vadd.f32 %v7320_v50, %v14420_v28  ;;  %v7097_v43 = vpop.f32.mrb[209].mxu1  ;;  %v7322_v61 = vpop.f32.mrb[191].mxu0  ;;  %v14683_v28 = vld [vmem:[%s14960_s6] ss:$0 sm:$0xff]  ;;  %s8080_s6 = sshll.u32 %s10749_s5, 4  ;;  %s8081_s6 = int_to_ptr.vmem [resolvable:$true] %s8080_s6 }
 0x50f   :  { %s10720_s0 = scalar_lea.vmem %s8081_s6, 8192  ;;  %p10725_p1 = scmp.lt.s32.totalorder %s8081_s6, %s8081_s6 }
 0x510   :  { %p10721_p0 = scmp.ne.s32.totalorder %s8081_s6, %s10720_s0  ;;  %p10726_p2 = scmp.lt.s32.totalorder %s10720_s0, %s10720_s0 }
 0x511   :  { %v7325_v2 = vpop.f32.mrb[192].mxu0  ;;  %v8720_v63 = vpop.f32.mrb[210].mxu1 }
 0x512   :  { %v14677_v39 = vadd.f32 %v7325_v2, %v14431_v17  ;;  %v7556_v48 = vadd.f32 %v8720_v63, %v14441_v0  ;;  %v7327_v42 = vpop.f32.mrb[193].mxu0  ;;  %v7550_v51 = vpop.f32.mrb[211].mxu1  ;;  %p10727_p3 = por %p10726_p2, %p10725_p1 }
 0x513   :  { %v7551_v61 = vadd.f32 %v7550_v51, %v14433_v34 }
 0x514   :  { %v7877_v33 = vmul.f32 %v14674_v8, %v7556_v48  ;;  %p10728_p4 = pnand %p10727_p3, %p10721_p0 }
 0x515   :  { %v7876_v50 = vmul.f32 %v14674_v8, %v7551_v61  ;;  %v7330_v43 = vpop.f32.mrb[194].mxu0  ;;  %v8723_v31 = vpop.f32.mrb[212].mxu1 }
 0x516   :  { %v7948_v17 = vadd.f32 %v14683_v28, %v7877_v33  ;;  %v14690_v2 = vadd.f32 %v7330_v43, %v14439_v30  ;;  %v7566_v0 = vadd.f32 %v8723_v31, %v14461_v35  ;;  %v7332_v63 = vpop.f32.mrb[195].mxu0  ;;  %v7560_v42 = vpop.f32.mrb[213].mxu1 }
 0x517   :  { %v7947_v7 = vadd.f32 %v14683_v28, %v7876_v50  ;;  %v7561_v23 = vadd.f32 %v7560_v42, %v14453_v56 }
 0x518   :  { %8012 = vst [vmem:[#allocation4 + $0x8] sm:$0xff] %v7948_v17  ;;  %v7879_v34 = vmul.f32 %v14674_v8, %v7566_v0 }
 0x519   :  { %8011 = vst [vmem:[#allocation4] sm:$0xff] %v7947_v7  ;;  %v7878_v48 = vmul.f32 %v14674_v8, %v7561_v23  ;;  %v7335_v51 = vpop.f32.mrb[196].mxu0  ;;  %v8726_v61 = vpop.f32.mrb[214].mxu1 }
 0x51a   :  { %v7950_v33 = vadd.f32 %v14683_v28, %v7879_v34  ;;  %v14699_v30 = vadd.f32 %v7335_v51, %v14451_v47  ;;  %v7576_v35 = vadd.f32 %v8726_v61, %v14478_v9  ;;  %v7337_v31 = vpop.f32.mrb[197].mxu0  ;;  %v7570_v43 = vpop.f32.mrb[215].mxu1 }
 0x51b   :  { %v7949_v50 = vadd.f32 %v14683_v28, %v7878_v48  ;;  %v7571_v56 = vadd.f32 %v7570_v43, %v14469_v49 }
 0x51c   :  { %8014 = vst [vmem:[#allocation4 + $0x18] sm:$0xff] %v7950_v33  ;;  %v7881_v7 = vmul.f32 %v14674_v8, %v7576_v35 }
 0x51d   :  { %8013 = vst [vmem:[#allocation4 + $0x10] sm:$0xff] %v7949_v50  ;;  %v7880_v23 = vmul.f32 %v14674_v8, %v7571_v56  ;;  %v7340_v17 = vpop.f32.mrb[198].mxu0  ;;  %v8729_v0 = vpop.f32.mrb[216].mxu1 }
 0x51e   :  { %v7952_v63 = vadd.f32 %v14683_v28, %v7881_v7  ;;  %v14708_v47 = vadd.f32 %v7340_v17, %v14459_v16  ;;  %v7586_v9 = vadd.f32 %v8729_v0, %v14506_v14  ;;  %v7342_v42 = vpop.f32.mrb[199].mxu0  ;;  %v7580_v34 = vpop.f32.mrb[217].mxu1 }
 0x51f   :  { %v7951_v48 = vadd.f32 %v14683_v28, %v7880_v23  ;;  %v7581_v49 = vadd.f32 %v7580_v34, %v14497_v36 }
 0x520   :  { %8016 = vst [vmem:[#allocation4 + $0x28] sm:$0xff] %v7952_v63  ;;  %v7883_v51 = vmul.f32 %v14674_v8, %v7586_v9 }
 0x521   :  { %8015 = vst [vmem:[#allocation4 + $0x20] sm:$0xff] %v7951_v48  ;;  %v7882_v61 = vmul.f32 %v14674_v8, %v7581_v49  ;;  %v7345_v33 = vpop.f32.mrb[200].mxu0  ;;  %v8732_v35 = vpop.f32.mrb[218].mxu1 }
 0x522   :  { %v7954_v31 = vadd.f32 %v14683_v28, %v7883_v51  ;;  %v14717_v16 = vadd.f32 %v7345_v33, %v14467_v11  ;;  %v7596_v14 = vadd.f32 %v8732_v35, %v14524_v58  ;;  %v7347_v43 = vpop.f32.mrb[201].mxu0  ;;  %v7590_v50 = vpop.f32.mrb[219].mxu1 }
 0x523   :  { %v7953_v56 = vadd.f32 %v14683_v28, %v7882_v61  ;;  %v7591_v36 = vadd.f32 %v7590_v50, %v14515_v22 }
 0x524   :  { %8018 = vst [vmem:[#allocation4 + $0x38] sm:$0xff] %v7954_v31  ;;  %v7885_v7 = vmul.f32 %v14674_v8, %v7596_v14 }
 0x525   :  { %8017 = vst [vmem:[#allocation4 + $0x30] sm:$0xff] %v7953_v56  ;;  %v7884_v23 = vmul.f32 %v14674_v8, %v7591_v36  ;;  %v7350_v17 = vpop.f32.mrb[202].mxu0  ;;  %v8735_v0 = vpop.f32.mrb[220].mxu1 }
 0x526   :  { %v7956_v63 = vadd.f32 %v14683_v28, %v7885_v7  ;;  %v14726_v11 = vadd.f32 %v7350_v17, %v14476_v54  ;;  %v7606_v58 = vadd.f32 %v8735_v0, %v14552_v62  ;;  %v7352_v9 = vpop.f32.mrb[203].mxu0  ;;  %v7600_v42 = vpop.f32.mrb[221].mxu1 }
 0x527   :  { %v7955_v34 = vadd.f32 %v14683_v28, %v7884_v23  ;;  %v7601_v22 = vadd.f32 %v7600_v42, %v14543_v24 }
 0x528   :  { %8020 = vst [vmem:[#allocation4 + $0x48] sm:$0xff] %v7956_v63  ;;  %v7887_v48 = vmul.f32 %v14674_v8, %v7606_v58 }
 0x529   :  { %8019 = vst [vmem:[#allocation4 + $0x40] sm:$0xff] %v7955_v34  ;;  %v7886_v49 = vmul.f32 %v14674_v8, %v7601_v22  ;;  %v7355_v51 = vpop.f32.mrb[204].mxu0  ;;  %v8738_v61 = vpop.f32.mrb[222].mxu1 }
 0x52a   :  { %v7958_v33 = vadd.f32 %v14683_v28, %v7887_v48  ;;  %v14735_v54 = vadd.f32 %v7355_v51, %v14495_v20  ;;  %v7616_v62 = vadd.f32 %v8738_v61, %v14570_v5  ;;  %v7357_v35 = vpop.f32.mrb[205].mxu0  ;;  %v7610_v31 = vpop.f32.mrb[223].mxu1 }
 0x52b   :  { %v7957_v14 = vadd.f32 %v14683_v28, %v7886_v49  ;;  %v7611_v24 = vadd.f32 %v7610_v31, %v14561_v55 }
 0x52c   :  { %8022 = vst [vmem:[#allocation4 + $0x58] sm:$0xff] %v7958_v33  ;;  %v7889_v43 = vmul.f32 %v14674_v8, %v7616_v62 }
 0x52d   :  { %8021 = vst [vmem:[#allocation4 + $0x50] sm:$0xff] %v7957_v14  ;;  %v7888_v50 = vmul.f32 %v14674_v8, %v7611_v24  ;;  %v7360_v56 = vpop.f32.mrb[206].mxu0  ;;  %v8741_v36 = vpop.f32.mrb[224].mxu1 }
 0x52e   :  { %v7960_v7 = vadd.f32 %v14683_v28, %v7889_v43  ;;  %v14744_v20 = vadd.f32 %v7360_v56, %v14504_v44  ;;  %v7626_v5 = vadd.f32 %v8741_v36, %v14594_v15  ;;  %v7362_v23 = vpop.f32.mrb[207].mxu0  ;;  %v7620_v17 = vpop.f32.mrb[225].mxu1 }
 0x52f   :  { %v7959_v0 = vadd.f32 %v14683_v28, %v7888_v50  ;;  %v7621_v55 = vadd.f32 %v7620_v17, %v14586_v29 }
 0x530   :  { %8024 = vst [vmem:[#allocation4 + $0x68] sm:$0xff] %v7960_v7  ;;  %v7891_v63 = vmul.f32 %v14674_v8, %v7626_v5 }
 0x531   :  { %8023 = vst [vmem:[#allocation4 + $0x60] sm:$0xff] %v7959_v0  ;;  %v7890_v58 = vmul.f32 %v14674_v8, %v7621_v55  ;;  %v7365_v9 = vpop.f32.mrb[208].mxu0  ;;  %v8744_v42 = vpop.f32.mrb[226].mxu1 }
 0x532   :  { %v7962_v34 = vadd.f32 %v14683_v28, %v7891_v63  ;;  %v14753_v44 = vadd.f32 %v7365_v9, %v14513_v57  ;;  %v7636_v15 = vadd.f32 %v8744_v42, %v14604_v6  ;;  %v7367_v22 = vpop.f32.mrb[209].mxu0  ;;  %v7630_v48 = vpop.f32.mrb[227].mxu1 }
 0x533   :  { %v7961_v49 = vadd.f32 %v14683_v28, %v7890_v58  ;;  %v7631_v29 = vadd.f32 %v7630_v48, %v14600_v46 }
 0x534   :  { %8026 = vst [vmem:[#allocation4 + $0x78] sm:$0xff] %v7962_v34  ;;  %v7893_v51 = vmul.f32 %v14674_v8, %v7636_v15 }
 0x535   :  { %8025 = vst [vmem:[#allocation4 + $0x70] sm:$0xff] %v7961_v49  ;;  %v7892_v61 = vmul.f32 %v14674_v8, %v7631_v29  ;;  %v7370_v33 = vpop.f32.mrb[210].mxu0  ;;  %v8747_v62 = vpop.f32.mrb[228].mxu1 }
 0x536   :  { %v7964_v35 = vadd.f32 %v14683_v28, %v7893_v51  ;;  %v14762_v57 = vadd.f32 %v7370_v33, %v14522_v1  ;;  %v7646_v6 = vadd.f32 %v8747_v62, %v14612_v41  ;;  %v7372_v31 = vpop.f32.mrb[211].mxu0  ;;  %v7640_v14 = vpop.f32.mrb[229].mxu1 }
 0x537   :  { %v7963_v24 = vadd.f32 %v14683_v28, %v7892_v61  ;;  %v7641_v46 = vadd.f32 %v7640_v14, %v14608_v60 }
 0x538   :  { %8028 = vst [vmem:[#allocation4 + $0x88] sm:$0xff] %v7964_v35  ;;  %v7895_v43 = vmul.f32 %v14674_v8, %v7646_v6 }
 0x539   :  { %8027 = vst [vmem:[#allocation4 + $0x80] sm:$0xff] %v7963_v24  ;;  %v7894_v50 = vmul.f32 %v14674_v8, %v7641_v46  ;;  %v7375_v56 = vpop.f32.mrb[212].mxu0  ;;  %v8750_v36 = vpop.f32.mrb[230].mxu1 }
 0x53a   :  { %v7966_v7 = vadd.f32 %v14683_v28, %v7895_v43  ;;  %v14771_v1 = vadd.f32 %v7375_v56, %v14541_v37  ;;  %v7656_v41 = vadd.f32 %v8750_v36, %v14620_v27  ;;  %v7377_v5 = vpop.f32.mrb[213].mxu0  ;;  %v7650_v23 = vpop.f32.mrb[231].mxu1 }
 0x53b   :  { %v7965_v17 = vadd.f32 %v14683_v28, %v7894_v50  ;;  %v7651_v60 = vadd.f32 %v7650_v23, %v14616_v19 }
 0x53c   :  { %8030 = vst [vmem:[#allocation4 + $0x98] sm:$0xff] %v7966_v7  ;;  %v7897_v0 = vmul.f32 %v14674_v8, %v7656_v41 }
 0x53d   :  { %8029 = vst [vmem:[#allocation4 + $0x90] sm:$0xff] %v7965_v17  ;;  %v7896_v55 = vmul.f32 %v14674_v8, %v7651_v60  ;;  %v7380_v63 = vpop.f32.mrb[214].mxu0  ;;  %v8753_v58 = vpop.f32.mrb[232].mxu1 }
 0x53e   :  { %v7968_v9 = vadd.f32 %v14683_v28, %v7897_v0  ;;  %v14780_v37 = vadd.f32 %v7380_v63, %v14550_v12  ;;  %v7666_v27 = vadd.f32 %v8753_v58, %v14629_v21  ;;  %v7382_v42 = vpop.f32.mrb[215].mxu0  ;;  %v7660_v34 = vpop.f32.mrb[233].mxu1 }
 0x53f   :  { %v7967_v15 = vadd.f32 %v14683_v28, %v7896_v55  ;;  %v7661_v19 = vadd.f32 %v7660_v34, %v14624_v13 }
 0x540   :  { %8032 = vst [vmem:[#allocation4 + $0xa8] sm:$0xff] %v7968_v9  ;;  %v7899_v22 = vmul.f32 %v14674_v8, %v7666_v27 }
 0x541   :  { %8031 = vst [vmem:[#allocation4 + $0xa0] sm:$0xff] %v7967_v15  ;;  %v7898_v48 = vmul.f32 %v14674_v8, %v7661_v19  ;;  %v7385_v49 = vpop.f32.mrb[216].mxu0  ;;  %v8756_v29 = vpop.f32.mrb[234].mxu1 }
 0x542   :  { %v7970_v51 = vadd.f32 %v14683_v28, %v7899_v22  ;;  %v14789_v12 = vadd.f32 %v7385_v49, %v14559_v59  ;;  %v7676_v21 = vadd.f32 %v8756_v29, %v14639_v25  ;;  %v7387_v61 = vpop.f32.mrb[217].mxu0  ;;  %v7670_v33 = vpop.f32.mrb[235].mxu1 }
 0x543   :  { %v7969_v62 = vadd.f32 %v14683_v28, %v7898_v48  ;;  %v7671_v13 = vadd.f32 %v7670_v33, %v14634_v45 }
 0x544   :  { %8034 = vst [vmem:[#allocation4 + $0xb8] sm:$0xff] %v7970_v51  ;;  %v7901_v35 = vmul.f32 %v14674_v8, %v7676_v21 }
 0x545   :  { %8033 = vst [vmem:[#allocation4 + $0xb0] sm:$0xff] %v7969_v62  ;;  %v7900_v6 = vmul.f32 %v14674_v8, %v7671_v13  ;;  %v7390_v31 = vpop.f32.mrb[218].mxu0  ;;  %v8759_v14 = vpop.f32.mrb[236].mxu1 }
 0x546   :  { %v7972_v24 = vadd.f32 %v14683_v28, %v7901_v35  ;;  %v14798_v59 = vadd.f32 %v7390_v31, %v14568_v26  ;;  %v7686_v25 = vadd.f32 %v8759_v14, %v14649_v10  ;;  %v7392_v46 = vpop.f32.mrb[219].mxu0  ;;  %v7680_v43 = vpop.f32.mrb[237].mxu1 }
 0x547   :  { %v7971_v50 = vadd.f32 %v14683_v28, %v7900_v6  ;;  %v7681_v45 = vadd.f32 %v7680_v43, %v14644_v4 }
 0x548   :  { %8036 = vst [vmem:[#allocation4 + $0xc8] sm:$0xff] %v7972_v24  ;;  %v7903_v56 = vmul.f32 %v14674_v8, %v7686_v25 }
 0x549   :  { %8035 = vst [vmem:[#allocation4 + $0xc0] sm:$0xff] %v7971_v50  ;;  %v7902_v36 = vmul.f32 %v14674_v8, %v7681_v45  ;;  %v7395_v7 = vpop.f32.mrb[220].mxu0  ;;  %v8762_v41 = vpop.f32.mrb[238].mxu1 }
 0x54a   :  { %v7974_v5 = vadd.f32 %v14683_v28, %v7903_v56  ;;  %v14807_v26 = vadd.f32 %v7395_v7, %v14584_v3  ;;  %v7696_v10 = vadd.f32 %v8762_v41, %v14659_v18  ;;  %v7397_v23 = vpop.f32.mrb[221].mxu0  ;;  %v7690_v17 = vpop.f32.mrb[239].mxu1  ;;  %v15038_v56 = vld [vmem:[#allocation9_spill] sm:$0xff] }
 0x54b   :  { %v7973_v60 = vadd.f32 %v14683_v28, %v7902_v36  ;;  %v7691_v4 = vadd.f32 %v7690_v17, %v14654_v32 }
 0x54c   :  { %8038 = vst [vmem:[#allocation4 + $0xd8] sm:$0xff] %v7974_v5  ;;  %v7905_v0 = vmul.f32 %v14674_v8, %v7696_v10 }
 0x54d   :  { %8037 = vst [vmem:[#allocation4 + $0xd0] sm:$0xff] %v7973_v60  ;;  %v7904_v55 = vmul.f32 %v14674_v8, %v7691_v4  ;;  %v7400_v63 = vpop.f32.mrb[222].mxu0  ;;  %v8765_v58 = vpop.f32.mrb[240].mxu1 }
 0x54e   :  { %v7976_v9 = vadd.f32 %v14683_v28, %v7905_v0  ;;  %v14816_v3 = vadd.f32 %v7400_v63, %v14592_v52  ;;  %v7706_v18 = vadd.f32 %v8765_v58, %v14669_v53  ;;  %v7402_v27 = vpop.f32.mrb[223].mxu0  ;;  %v7700_v42 = vpop.f32.mrb[241].mxu1  ;;  %v15039_v0 = vld [vmem:[#allocation8_spill] sm:$0xff] }
 0x54f   :  { %v7975_v34 = vadd.f32 %v14683_v28, %v7904_v55  ;;  %v7701_v32 = vadd.f32 %v7700_v42, %v14664_v38 }
 0x550   :  { %8040 = vst [vmem:[#allocation4 + $0xe8] sm:$0xff] %v7976_v9  ;;  %v7907_v15 = vmul.f32 %v14674_v8, %v7706_v18 }
 0x551   :  { %8039 = vst [vmem:[#allocation4 + $0xe0] sm:$0xff] %v7975_v34  ;;  %v7906_v19 = vmul.f32 %v14674_v8, %v7701_v32  ;;  %v7405_v22 = vpop.f32.mrb[224].mxu0  ;;  %v8768_v48 = vpop.f32.mrb[242].mxu1 }
 0x552   :  { %v7978_v49 = vadd.f32 %v14683_v28, %v7907_v15  ;;  %v14825_v52 = vadd.f32 %v7405_v22, %v14598_v40  ;;  %v7716_v53 = vadd.f32 %v8768_v48, %v14690_v2  ;;  %v7407_v29 = vpop.f32.mrb[225].mxu0  ;;  %v7710_v51 = vpop.f32.mrb[243].mxu1  ;;  %v15037_v40 = vld [vmem:[#allocation7_spill] sm:$0xff] }
 0x553   :  { %v7977_v21 = vadd.f32 %v14683_v28, %v7906_v19  ;;  %v7711_v38 = vadd.f32 %v7710_v51, %v14677_v39  ;;  %v15040_v15 = vld [vmem:[#allocation11_spill] sm:$0xff] }
 0x554   :  { %8042 = vst [vmem:[#allocation4 + $0xf8] sm:$0xff] %v7978_v49  ;;  %v7909_v61 = vmul.f32 %v14674_v8, %v7716_v53 }
 0x555   :  { %8041 = vst [vmem:[#allocation4 + $0xf0] sm:$0xff] %v7977_v21  ;;  %v7908_v33 = vmul.f32 %v14674_v8, %v7711_v38  ;;  %v7410_v62 = vpop.f32.mrb[226].mxu0  ;;  %v8771_v13 = vpop.f32.mrb[244].mxu1 }
 0x556   :  { %v7980_v35 = vadd.f32 %v14683_v28, %v7909_v61  ;;  %v14834_v6 = vadd.f32 %v7410_v62, %v15037_v40  ;;  %v7726_v2 = vadd.f32 %v8771_v13, %v14708_v47  ;;  %v7412_v31 = vpop.f32.mrb[227].mxu0  ;;  %v7720_v14 = vpop.f32.mrb[245].mxu1  ;;  %v15041_v61 = vld [vmem:[#allocation10_spill] sm:$0xff] }
 0x557   :  { %v7979_v24 = vadd.f32 %v14683_v28, %v7908_v33  ;;  %v7721_v39 = vadd.f32 %v7720_v14, %v14699_v30 }
 0x558   :  { %8044 = vst [vmem:[#allocation4 + $0x108] sm:$0xff] %v7980_v35  ;;  %v7911_v25 = vmul.f32 %v14674_v8, %v7726_v2 }
 0x559   :  { %8043 = vst [vmem:[#allocation4 + $0x100] sm:$0xff] %v7979_v24  ;;  %v7910_v46 = vmul.f32 %v14674_v8, %v7721_v39  ;;  %v7415_v43 = vpop.f32.mrb[228].mxu0  ;;  %v8774_v50 = vpop.f32.mrb[246].mxu1  ;;  %v15042_v39 = vld [vmem:[#allocation13_spill] sm:$0xff] }
 0x55a   :  { %v7982_v45 = vadd.f32 %v14683_v28, %v7911_v25  ;;  %v14843_v36 = vadd.f32 %v7415_v43, %v15038_v56  ;;  %v7736_v47 = vadd.f32 %v8774_v50, %v14726_v11  ;;  %v7417_v7 = vpop.f32.mrb[229].mxu0  ;;  %v7730_v41 = vpop.f32.mrb[247].mxu1 }
 0x55b   :  { %v7981_v5 = vadd.f32 %v14683_v28, %v7910_v46  ;;  %v7731_v30 = vadd.f32 %v7730_v41, %v14717_v16 }
 0x55c   :  { %8046 = vst [vmem:[#allocation4 + $0x118] sm:$0xff] %v7982_v45  ;;  %v7913_v10 = vmul.f32 %v14674_v8, %v7736_v47 }
 0x55d   :  { %8045 = vst [vmem:[#allocation4 + $0x110] sm:$0xff] %v7981_v5  ;;  %v7912_v23 = vmul.f32 %v14674_v8, %v7731_v30  ;;  %v7420_v17 = vpop.f32.mrb[230].mxu0  ;;  %v8777_v60 = vpop.f32.mrb[248].mxu1  ;;  %v15043_v5 = vld [vmem:[#allocation12_spill] sm:$0xff] }
 0x55e   :  { %v7984_v4 = vadd.f32 %v14683_v28, %v7913_v10  ;;  %v14852_v55 = vadd.f32 %v7420_v17, %v15039_v0  ;;  %v7746_v11 = vadd.f32 %v8777_v60, %v14744_v20  ;;  %v7422_v63 = vpop.f32.mrb[231].mxu0  ;;  %v7740_v58 = vpop.f32.mrb[249].mxu1 }
 0x55f   :  { %v7983_v9 = vadd.f32 %v14683_v28, %v7912_v23  ;;  %v7741_v16 = vadd.f32 %v7740_v58, %v14735_v54  ;;  %v15044_v58 = vld [vmem:[#allocation15_spill] sm:$0xff] }
 0x560   :  { %8048 = vst [vmem:[#allocation4 + $0x128] sm:$0xff] %v7984_v4  ;;  %v7915_v18 = vmul.f32 %v14674_v8, %v7746_v11 }
 0x561   :  { %8047 = vst [vmem:[#allocation4 + $0x120] sm:$0xff] %v7983_v9  ;;  %v7914_v27 = vmul.f32 %v14674_v8, %v7741_v16  ;;  %v7425_v42 = vpop.f32.mrb[232].mxu0  ;;  %v8780_v34 = vpop.f32.mrb[250].mxu1 }
 0x562   :  { %v7986_v32 = vadd.f32 %v14683_v28, %v7915_v18  ;;  %v14861_v19 = vadd.f32 %v7425_v42, %v15040_v15  ;;  %v7756_v20 = vadd.f32 %v8780_v34, %v14762_v57  ;;  %v7427_v22 = vpop.f32.mrb[233].mxu0  ;;  %v7750_v48 = vpop.f32.mrb[251].mxu1 }
 0x563   :  { %v7985_v49 = vadd.f32 %v14683_v28, %v7914_v27  ;;  %v7751_v54 = vadd.f32 %v7750_v48, %v14753_v44  ;;  %v15045_v22 = vld [vmem:[#allocation14_spill] sm:$0xff] }
 0x564   :  { %8050 = vst [vmem:[#allocation4 + $0x138] sm:$0xff] %v7986_v32  ;;  %v7917_v53 = vmul.f32 %v14674_v8, %v7756_v20 }
 0x565   :  { %8049 = vst [vmem:[#allocation4 + $0x130] sm:$0xff] %v7985_v49  ;;  %v7916_v29 = vmul.f32 %v14674_v8, %v7751_v54  ;;  %v7430_v51 = vpop.f32.mrb[234].mxu0  ;;  %v8783_v21 = vpop.f32.mrb[252].mxu1 }
 0x566   :  { %v7988_v38 = vadd.f32 %v14683_v28, %v7917_v53  ;;  %v14870_v33 = vadd.f32 %v7430_v51, %v15041_v61  ;;  %v7766_v57 = vadd.f32 %v8783_v21, %v14780_v37  ;;  %v7432_v62 = vpop.f32.mrb[235].mxu0  ;;  %v7760_v13 = vpop.f32.mrb[253].mxu1 }
 0x567   :  { %v7987_v35 = vadd.f32 %v14683_v28, %v7916_v29  ;;  %v7761_v44 = vadd.f32 %v7760_v13, %v14771_v1 }
 0x568   :  { %8052 = vst [vmem:[#allocation4 + $0x148] sm:$0xff] %v7988_v38  ;;  %v7919_v40 = vmul.f32 %v14674_v8, %v7766_v57  ;;  %v15046_v57 = vld [vmem:[#allocation17_spill] sm:$0xff] }
 0x569   :  { %8051 = vst [vmem:[#allocation4 + $0x140] sm:$0xff] %v7987_v35  ;;  %v7918_v2 = vmul.f32 %v14674_v8, %v7761_v44  ;;  %v7435_v31 = vpop.f32.mrb[236].mxu0  ;;  %v8786_v14 = vpop.f32.mrb[254].mxu1 }
 0x56a   :  { %v7990_v24 = vadd.f32 %v14683_v28, %v7919_v40  ;;  %v14879_v25 = vadd.f32 %v7435_v31, %v15042_v39  ;;  %v7776_v37 = vadd.f32 %v8786_v14, %v14798_v59  ;;  %v7437_v46 = vpop.f32.mrb[237].mxu0  ;;  %v7770_v43 = vpop.f32.mrb[255].mxu1  ;;  %v15047_v39 = vld [vmem:[#allocation16_spill] sm:$0xff] }
 0x56b   :  { %v7989_v50 = vadd.f32 %v14683_v28, %v7918_v2  ;;  %v7771_v1 = vadd.f32 %v7770_v43, %v14789_v12 }
 0x56c   :  { %8054 = vst [vmem:[#allocation4 + $0x158] sm:$0xff] %v7990_v24  ;;  %v7921_v45 = vmul.f32 %v14674_v8, %v7776_v37 }
 0x56d   :  { %8053 = vst [vmem:[#allocation4 + $0x150] sm:$0xff] %v7989_v50  ;;  %v7920_v56 = vmul.f32 %v14674_v8, %v7771_v1  ;;  %v7440_v47 = vpop.f32.mrb[238].mxu0  ;;  %v8789_v7 = vpop.f32.mrb[0].mxu1 }
 0x56e   :  { %v7992_v41 = vadd.f32 %v14683_v28, %v7921_v45  ;;  %v7441_v30 = vadd.f32 %v7440_v47, %v15043_v5  ;;  %v7786_v59 = vadd.f32 %v8789_v7, %v14816_v3  ;;  %v7442_v10 = vpop.f32.mrb[239].mxu0  ;;  %v7780_v23 = vpop.f32.mrb[1].mxu1 }
 0x56f   :  { %v7991_v17 = vadd.f32 %v14683_v28, %v7920_v56  ;;  %v7781_v12 = vadd.f32 %v7780_v23, %v14807_v26 }
 0x570   :  { %8056 = vst [vmem:[#allocation4 + $0x168] sm:$0xff] %v7992_v41  ;;  %v7923_v60 = vmul.f32 %v14674_v8, %v7786_v59  ;;  %v15048_v41 = vld [vmem:[#allocation19_spill] sm:$0xff] }
 0x571   :  { %8055 = vst [vmem:[#allocation4 + $0x160] sm:$0xff] %v7991_v17  ;;  %v7922_v4 = vmul.f32 %v14674_v8, %v7781_v12  ;;  %v7445_v0 = vpop.f32.mrb[240].mxu0  ;;  %v8792_v11 = vpop.f32.mrb[2].mxu1 }
 0x572   :  { %v7994_v63 = vadd.f32 %v14683_v28, %v7923_v60  ;;  %v7446_v9 = vadd.f32 %v7445_v0, %v15044_v58  ;;  %v7796_v3 = vadd.f32 %v8792_v11, %v14834_v6  ;;  %v7447_v16 = vpop.f32.mrb[241].mxu0  ;;  %v7790_v18 = vpop.f32.mrb[3].mxu1  ;;  %v15049_v11 = vld [vmem:[#allocation18_spill] sm:$0xff] }
 0x573   :  { %v7993_v27 = vadd.f32 %v14683_v28, %v7922_v4  ;;  %v7791_v26 = vadd.f32 %v7790_v18, %v14825_v52 }
 0x574   :  { %8058 = vst [vmem:[#allocation4 + $0x178] sm:$0xff] %v7994_v63  ;;  %v7925_v42 = vmul.f32 %v14674_v8, %v7796_v3 }
 0x575   :  { %8057 = vst [vmem:[#allocation4 + $0x170] sm:$0xff] %v7993_v27  ;;  %v7924_v34 = vmul.f32 %v14674_v8, %v7791_v26  ;;  %v7450_v32 = vpop.f32.mrb[242].mxu0  ;;  %v8795_v15 = vpop.f32.mrb[4].mxu1 }
 0x576   :  { %v7996_v20 = vadd.f32 %v14683_v28, %v7925_v42  ;;  %v7451_v48 = vadd.f32 %v7450_v32, %v15045_v22  ;;  %v7806_v6 = vadd.f32 %v8795_v15, %v14852_v55  ;;  %v7452_v49 = vpop.f32.mrb[243].mxu0  ;;  %v7800_v54 = vpop.f32.mrb[5].mxu1  ;;  %v15050_v15 = vld [vmem:[#allocation21_spill] sm:$0xff] }
 0x577   :  { %v7995_v53 = vadd.f32 %v14683_v28, %v7924_v34  ;;  %v7801_v52 = vadd.f32 %v7800_v54, %v14843_v36 }
 0x578   :  { %8060 = vst [vmem:[#allocation4 + $0x188] sm:$0xff] %v7996_v20  ;;  %v7927_v29 = vmul.f32 %v14674_v8, %v7806_v6 }
 0x579   :  { %8059 = vst [vmem:[#allocation4 + $0x180] sm:$0xff] %v7995_v53  ;;  %v7926_v51 = vmul.f32 %v14674_v8, %v7801_v52  ;;  %v7455_v21 = vpop.f32.mrb[244].mxu0  ;;  %v8798_v38 = vpop.f32.mrb[6].mxu1 }
 0x57a   :  { %v7998_v61 = vadd.f32 %v14683_v28, %v7927_v29  ;;  %v7456_v62 = vadd.f32 %v7455_v21, %v15046_v57  ;;  %v7816_v55 = vadd.f32 %v8798_v38, %v14870_v33  ;;  %v7457_v13 = vpop.f32.mrb[245].mxu0  ;;  %v7810_v35 = vpop.f32.mrb[7].mxu1  ;;  %v15051_v38 = vld [vmem:[#allocation20_spill] sm:$0xff] }
 0x57b   :  { %v7997_v44 = vadd.f32 %v14683_v28, %v7926_v51  ;;  %v7811_v36 = vadd.f32 %v7810_v35, %v14861_v19 }
 0x57c   :  { %8062 = vst [vmem:[#allocation4 + $0x198] sm:$0xff] %v7998_v61  ;;  %v7929_v40 = vmul.f32 %v14674_v8, %v7816_v55 }
 0x57d   :  { %8061 = vst [vmem:[#allocation4 + $0x190] sm:$0xff] %v7997_v44  ;;  %v7928_v2 = vmul.f32 %v14674_v8, %v7811_v36  ;;  %v7460_v31 = vpop.f32.mrb[246].mxu0  ;;  %v8801_v14 = vpop.f32.mrb[8].mxu1 }
 0x57e   :  { %v8000_v24 = vadd.f32 %v14683_v28, %v7929_v40  ;;  %v7461_v37 = vadd.f32 %v7460_v31, %v15047_v39  ;;  %v7826_v46 = vadd.f32 %v8801_v14, %v7441_v30  ;;  %v7462_v33 = vpop.f32.mrb[247].mxu0  ;;  %v7820_v43 = vpop.f32.mrb[9].mxu1 }
 0x57f   :  { %v7999_v50 = vadd.f32 %v14683_v28, %v7928_v2  ;;  %v7821_v1 = vadd.f32 %v7820_v43, %v14879_v25 }
 0x580   :  { %8064 = vst [vmem:[#allocation4 + $0x1a8] sm:$0xff] %v8000_v24  ;;  %v7931_v19 = vmul.f32 %v14674_v8, %v7826_v46 }
 0x581   :  { %8063 = vst [vmem:[#allocation4 + $0x1a0] sm:$0xff] %v7999_v50  ;;  %v7930_v45 = vmul.f32 %v14674_v8, %v7821_v1  ;;  %v7465_v56 = vpop.f32.mrb[248].mxu0  ;;  %v8804_v47 = vpop.f32.mrb[10].mxu1 }
 0x582   :  { %v8002_v7 = vadd.f32 %v14683_v28, %v7931_v19  ;;  %v7466_v5 = vadd.f32 %v7465_v56, %v15048_v41  ;;  %v7836_v59 = vadd.f32 %v8804_v47, %v7451_v48  ;;  %v7467_v30 = vpop.f32.mrb[249].mxu0  ;;  %v7830_v10 = vpop.f32.mrb[11].mxu1 }
 0x583   :  { %v8001_v23 = vadd.f32 %v14683_v28, %v7930_v45  ;;  %v7831_v17 = vadd.f32 %v7830_v10, %v7446_v9 }
 0x584   :  { %8066 = vst [vmem:[#allocation4 + $0x1b8] sm:$0xff] %v8002_v7  ;;  %v7933_v25 = vmul.f32 %v14674_v8, %v7836_v59 }
 0x585   :  { %8065 = vst [vmem:[#allocation4 + $0x1b0] sm:$0xff] %v8001_v23  ;;  %v7932_v12 = vmul.f32 %v14674_v8, %v7831_v17  ;;  %v7470_v60 = vpop.f32.mrb[250].mxu0  ;;  %v8807_v4 = vpop.f32.mrb[12].mxu1 }
 0x586   :  { %v8004_v0 = vadd.f32 %v14683_v28, %v7933_v25  ;;  %v7471_v63 = vadd.f32 %v7470_v60, %v15049_v11  ;;  %v7846_v58 = vadd.f32 %v8807_v4, %v7461_v37  ;;  %v7472_v3 = vpop.f32.mrb[251].mxu0  ;;  %v7840_v16 = vpop.f32.mrb[13].mxu1 }
 0x587   :  { %v8003_v18 = vadd.f32 %v14683_v28, %v7932_v12  ;;  %v7841_v27 = vadd.f32 %v7840_v16, %v7456_v62 }
 0x588   :  { %8068 = vst [vmem:[#allocation4 + $0x1c8] sm:$0xff] %v8004_v0  ;;  %v7935_v9 = vmul.f32 %v14674_v8, %v7846_v58 }
 0x589   :  { %8067 = vst [vmem:[#allocation4 + $0x1c0] sm:$0xff] %v8003_v18  ;;  %v7934_v26 = vmul.f32 %v14674_v8, %v7841_v27  ;;  %v7475_v42 = vpop.f32.mrb[252].mxu0  ;;  %v8810_v34 = vpop.f32.mrb[14].mxu1 }
 0x58a   :  { %v8006_v32 = vadd.f32 %v14683_v28, %v7935_v9  ;;  %v7476_v20 = vadd.f32 %v7475_v42, %v15050_v15  ;;  %v7856_v22 = vadd.f32 %v8810_v34, %v7471_v63  ;;  %v7477_v48 = vpop.f32.mrb[253].mxu0  ;;  %v7850_v6 = vpop.f32.mrb[15].mxu1 }
 0x58b   :  { %v8005_v49 = vadd.f32 %v14683_v28, %v7934_v26  ;;  %v7851_v54 = vadd.f32 %v7850_v6, %v7466_v5 }
 0x58c   :  { %8070 = vst [vmem:[#allocation4 + $0x1d8] sm:$0xff] %v8006_v32  ;;  %v7937_v53 = vmul.f32 %v14674_v8, %v7856_v22 }
 0x58d   :  { %8069 = vst [vmem:[#allocation4 + $0x1d0] sm:$0xff] %v8005_v49  ;;  %v7936_v52 = vmul.f32 %v14674_v8, %v7851_v54  ;;  %v7480_v29 = vpop.f32.mrb[254].mxu0  ;;  %v8813_v51 = vpop.f32.mrb[16].mxu1 }
 0x58e   :  { %v8008_v21 = vadd.f32 %v14683_v28, %v7937_v53  ;;  %v7481_v61 = vadd.f32 %v7480_v29, %v15051_v38  ;;  %v7482_v57 = vpop.f32.mrb[255].mxu0  ;;  %v7860_v62 = vpop.f32.mrb[17].mxu1 }
 0x58f   :  { %v8007_v55 = vadd.f32 %v14683_v28, %v7936_v52  ;;  %v7861_v13 = vadd.f32 %v7860_v62, %v7476_v20 }
 0x590   :  { %8072 = vst [vmem:[#allocation4 + $0x1e8] sm:$0xff] %v8008_v21  ;;  %v7866_v35 = vadd.f32 %v8813_v51, %v7481_v61 }
 0x591   :  { %8071 = vst [vmem:[#allocation4 + $0x1e0] sm:$0xff] %v8007_v55  ;;  %v7938_v44 = vmul.f32 %v14674_v8, %v7861_v13 }
 0x592   :  { %v7939_v36 = vmul.f32 %v14674_v8, %v7866_v35 }
 0x593   :  { %v8009_v40 = vadd.f32 %v14683_v28, %v7938_v44 }
 0x594   :  { %v8010_v2 = vadd.f32 %v14683_v28, %v7939_v36 }
 0x595   :  { %8073 = vst [vmem:[#allocation4 + $0x1f0] sm:$0xff] %v8009_v40 }
 0x596   :  { %8074 = vst [vmem:[#allocation4 + $0x1f8] sm:$0xff] %v8010_v2 }
 0x597   :  { %10731 = shalt.err (!%p10728_p4)
}
 0x598   :  { %s10732_s17 = scalar_lea.hbm %s14961_s7, 8192 }
 0x599   :  { %p10733_p5 = scmp.ne.s32.totalorder %s14961_s7, %s10732_s17  ;;  %p10736_p6 = scmp.lt.u32.totalorder %s10732_s17, %s14961_s7 }
 0x59b   :  { %p10738_p7 = pnand %p10736_p6, %p10733_p5 }
 0x59d   :  { %10741 = shalt.err (!%p10738_p7)
}
 0x59e   :  { %s10750_s22 = smov 128   ;;  %s10751_s23 = smov 8  }
 0x59f   :  { %8086 = dma.vmem_to_hbm [thread:$0]  %s8081_s6, 8192, %s14961_s7, [#allocation5], %s10750_s22, %s10750_s22, %s10751_s23  }
 0x5a0   :  { %10742 = dma.done.wait [#allocation5], 8192  }
 0x5a1   :  { %10743 = vsyncadd [#allocation5], 4294959104 }
 0x5a2   :  { %8090 = vsyncpa [#allocation5], 1 }

</bundles_post_ra>
